<compile_context>
chip_gen: v6e
topology: v6e:2x2x1
jax: 0.10.0
libtpu: 0.0.40
codegen_flags: <defaults>
</compile_context>

<pallas_src>
import functools
import math

import jax
import jax.numpy as jnp
from jax.experimental import pallas as pl
from jax.experimental.pallas import tpu as pltpu


# ----------------------------------------------------------------------------
# Fused ConvBlock4 kernel: 3x (3x3 conv -> scale/shift -> ReLU), all in VMEM
# ----------------------------------------------------------------------------
def _conv_block4_kernel(x_ref, w1_ref, s1_ref, b1_ref,
                        w2_ref, s2_ref, b2_ref,
                        w3_ref, s3_ref, b3_ref,
                        o_ref, pad_ref, *, H, W, cin, cout):
    """One batch element per grid step.

    x_ref  : (1, H+2, W+2, cin)  f32   spatially zero-padded input
    w*_ref : (9, c_in, cout)     bf16  per-tap weight matrices
    s*/b*  : (1, cout)           f32   folded BN scale / shift
    o_ref  : (1, H, W, cout)     f32   output
    pad_ref: (H+2, W+2, cout)    f32   VMEM scratch for padded intermediates
    """

    def conv3x3_bn_relu(src, c_in, w_ref, s_ref, b_ref):
        # src: (H+2, W+2, c_in) f32 value (zero padding included).
        acc = jnp.zeros((H * W, cout), jnp.float32)
        for dh in range(3):
            for dw in range(3):
                tap = src[dh:dh + H, dw:dw + W, :]              # (H, W, c_in)
                tap2d = tap.reshape(H * W, c_in).astype(jnp.bfloat16)
                wk = w_ref[dh * 3 + dw]                         # (c_in, cout) bf16
                acc = acc + jnp.dot(tap2d, wk,
                                    preferred_element_type=jnp.float32)
        y = acc * s_ref[...] + b_ref[...]                       # f32 epilogue
        y = jnp.maximum(y, 0.0)
        return y.reshape(H, W, cout)

    # ---- layer 1 (reads the pre-padded input block) ----
    y1 = conv3x3_bn_relu(x_ref[0], cin, w1_ref, s1_ref, b1_ref)

    # ---- layer 2 (intermediate stays in VMEM scratch, zero border = padding) ----
    pad_ref[...] = jnp.zeros_like(pad_ref)
    pad_ref[1:H + 1, 1:W + 1, :] = y1
    y2 = conv3x3_bn_relu(pad_ref[...], cout, w2_ref, s2_ref, b2_ref)

    # ---- layer 3 ----
    pad_ref[1:H + 1, 1:W + 1, :] = y2
    y3 = conv3x3_bn_relu(pad_ref[...], cout, w3_ref, s3_ref, b3_ref)

    o_ref[0] = y3.astype(o_ref.dtype)


def conv_block4_forward(params, x_nchw):
    """ConvBlock4 (block_type='A') forward.  x_nchw: (N, Cin, H, W) f32."""
    x = jnp.transpose(x_nchw, (0, 2, 3, 1))                     # NCHW -> NHWC
    N, H, W, cin = x.shape
    cout = params["w1"].shape[-1]

    # Spatial zero padding done once on the (tiny) input; everything else stays
    # in VMEM inside the kernel.
    x_pad = jnp.pad(x, ((0, 0), (1, 1), (1, 1), (0, 0)))

    def const_spec(shape):
        # constant block index -> single-buffer it (VMEM headroom on v7x)
        return pl.BlockSpec(shape, lambda n: (0,) * len(shape),
                            pipeline_mode=pl.Buffered(1))

    kernel = functools.partial(_conv_block4_kernel,
                               H=H, W=W, cin=cin, cout=cout)

    out = pl.pallas_call(
        kernel,
        out_shape=jax.ShapeDtypeStruct((N, H, W, cout), jnp.float32),
        grid=(N,),
        in_specs=[
            pl.BlockSpec((1, H + 2, W + 2, cin), lambda n: (n, 0, 0, 0)),
            const_spec((9, cin, cout)), const_spec((1, cout)), const_spec((1, cout)),
            const_spec((9, cout, cout)), const_spec((1, cout)), const_spec((1, cout)),
            const_spec((9, cout, cout)), const_spec((1, cout)), const_spec((1, cout)),
        ],
        out_specs=pl.BlockSpec((1, H, W, cout), lambda n: (n, 0, 0, 0)),
        scratch_shapes=[pltpu.VMEM((H + 2, W + 2, cout), jnp.float32)],
        compiler_params=pltpu.CompilerParams(
            dimension_semantics=("parallel",),
        ),
    )(x_pad,
      params["w1"], params["s1"], params["b1"],
      params["w2"], params["s2"], params["b2"],
      params["w3"], params["s3"], params["b3"])

    return jnp.transpose(out, (0, 3, 1, 2))                     # NHWC -> NCHW


# ----------------------------------------------------------------------------
# Parameter init: weights packed once into kernel-ready form, BN (eval-mode)
# folded with the conv bias into per-channel scale/shift.
# ----------------------------------------------------------------------------
def init_convblock4_params(key, i_ch, o_ch):
    params = {}
    chans = [(i_ch, o_ch), (o_ch, o_ch), (o_ch, o_ch)]
    keys = jax.random.split(key, len(chans))
    eps = 1e-5
    for idx, (k, (ci, co)) in enumerate(zip(keys, chans), start=1):
        k1, k2, k3, k4, k5, k6 = jax.random.split(k, 6)
        fan_in = 9 * ci
        w = jax.random.normal(k1, (3, 3, ci, co), jnp.float32) / math.sqrt(fan_in)
        bias = 0.05 * jax.random.normal(k2, (co,), jnp.float32)
        gamma = 1.0 + 0.1 * jax.random.normal(k3, (co,), jnp.float32)
        beta = 0.1 * jax.random.normal(k4, (co,), jnp.float32)
        running_mean = 0.05 * jax.random.normal(k5, (co,), jnp.float32)
        running_var = 1.0 + 0.1 * jax.random.uniform(k6, (co,), jnp.float32)

        scale = gamma / jnp.sqrt(running_var + eps)
        shift = (bias - running_mean) * scale + beta

        params[f"w{idx}"] = w.reshape(9, ci, co).astype(jnp.bfloat16)  # MXU form
        params[f"s{idx}"] = scale.reshape(1, co).astype(jnp.float32)
        params[f"b{idx}"] = shift.reshape(1, co).astype(jnp.float32)
    return params


# ----------------------------------------------------------------------------
# Pure-JAX reference (same bf16-rounded weights) for a correctness check
# ----------------------------------------------------------------------------
def reference_forward(params, x_nchw):
    x = jnp.transpose(x_nchw, (0, 2, 3, 1))
    for idx in (1, 2, 3):
        w9 = params[f"w{idx}"].astype(jnp.float32)
        ci, co = w9.shape[1], w9.shape[2]
        w = w9.reshape(3, 3, ci, co)
        y = jax.lax.conv_general_dilated(
            x, w, window_strides=(1, 1), padding=((1, 1), (1, 1)),
            dimension_numbers=("NHWC", "HWIO", "NHWC"))
        y = (y * params[f"s{idx}"].reshape(1, 1, 1, co)
             + params[f"b{idx}"].reshape(1, 1, 1, co))
        x = jnp.maximum(y, 0.0)
    return jnp.transpose(x, (0, 3, 1, 2))


if __name__ == "__main__":
    key = jax.random.PRNGKey(0)
    pkey, xkey = jax.random.split(key)

    N, i_ch, o_ch, H, W = 2, 4, 32, 16, 16
    params = init_convblock4_params(pkey, i_ch, o_ch)
    x = jax.random.normal(xkey, (N, i_ch, H, W), jnp.float32)   # NCHW like PyTorch

    fwd = jax.jit(conv_block4_forward)
    y = fwd(params, x)
    jax.block_until_ready(y)

    assert y.shape == (N, o_ch, H, W), y.shape
    assert y.dtype == jnp.float32
    assert bool(jnp.all(jnp.isfinite(y)))

    # Loose tolerance: kernel casts activation taps to bf16 for the MXU.
    y_ref = jax.jit(reference_forward)(params, x)
    max_err = float(jnp.max(jnp.abs(y - y_ref)))
    assert max_err < 1e-1, f"max abs diff vs reference: {max_err}"

    print("KERNEL_OK")
</pallas_src>

<mosaic_0001>
module attributes {stable_mosaic.version = 11 : i64} {
  func.func @_conv_block4_kernel(%arg0: i32, %arg1: memref<1x18x18x4xf32, #tpu.memory_space<vmem>>, %arg2: memref<9x4x32xbf16, #tpu.memory_space<vmem>>, %arg3: memref<1x32xf32, #tpu.memory_space<vmem>>, %arg4: memref<1x32xf32, #tpu.memory_space<vmem>>, %arg5: memref<9x32x32xbf16, #tpu.memory_space<vmem>>, %arg6: memref<1x32xf32, #tpu.memory_space<vmem>>, %arg7: memref<1x32xf32, #tpu.memory_space<vmem>>, %arg8: memref<9x32x32xbf16, #tpu.memory_space<vmem>>, %arg9: memref<1x32xf32, #tpu.memory_space<vmem>>, %arg10: memref<1x32xf32, #tpu.memory_space<vmem>>, %arg11: memref<1x16x16x32xf32, #tpu.memory_space<vmem>>, %arg12: memref<18x18x32xf32, #tpu.memory_space<vmem>>) attributes {dimension_semantics = [#tpu.dimension_semantics<parallel>], iteration_bounds = array<i64: 2>, scalar_prefetch = 0 : i64, scratch_operands = 1 : i64, tpu.core_type = #tpu.core_type<tc>, window_params = [{transform_indices = @transform_0, window_bounds = array<i64: 1, 18, 18, 4>}, {pipeline_mode = #tpu.pipeline_mode<synchronous>, transform_indices = @transform_1, window_bounds = array<i64: 9, 4, 32>}, {pipeline_mode = #tpu.pipeline_mode<synchronous>, transform_indices = @transform_2, window_bounds = array<i64: 1, 32>}, {pipeline_mode = #tpu.pipeline_mode<synchronous>, transform_indices = @transform_3, window_bounds = array<i64: 1, 32>}, {pipeline_mode = #tpu.pipeline_mode<synchronous>, transform_indices = @transform_4, window_bounds = array<i64: 9, 32, 32>}, {pipeline_mode = #tpu.pipeline_mode<synchronous>, transform_indices = @transform_5, window_bounds = array<i64: 1, 32>}, {pipeline_mode = #tpu.pipeline_mode<synchronous>, transform_indices = @transform_6, window_bounds = array<i64: 1, 32>}, {pipeline_mode = #tpu.pipeline_mode<synchronous>, transform_indices = @transform_7, window_bounds = array<i64: 9, 32, 32>}, {pipeline_mode = #tpu.pipeline_mode<synchronous>, transform_indices = @transform_8, window_bounds = array<i64: 1, 32>}, {pipeline_mode = #tpu.pipeline_mode<synchronous>, transform_indices = @transform_9, window_bounds = array<i64: 1, 32>}, {transform_indices = @transform_10, window_bounds = array<i64: 1, 16, 16, 32>}]} {
    %c0 = arith.constant 0 : index
    %c0_0 = arith.constant 0 : index
    %c0_1 = arith.constant 0 : index
    %c0_2 = arith.constant 0 : index
    %0 = vector.load %arg1[%c0, %c0_0, %c0_1, %c0_2] : memref<1x18x18x4xf32, #tpu.memory_space<vmem>>, vector<1x18x18x4xf32>
    %1 = vector.shape_cast %0 : vector<1x18x18x4xf32> to vector<18x18x4xf32>
    %cst = arith.constant 0.000000e+00 : f32
    %2 = vector.broadcast %cst : f32 to vector<256x32xf32>
    %3 = vector.extract_strided_slice %1 {offsets = [0, 0, 0], sizes = [16, 16, 4], strides = [1, 1, 1]} : vector<18x18x4xf32> to vector<16x16x4xf32>
    %4 = vector.shape_cast %3 : vector<16x16x4xf32> to vector<256x4xf32>
    %5 = arith.truncf %4 : vector<256x4xf32> to vector<256x4xbf16>
    %c0_3 = arith.constant 0 : index
    %c0_4 = arith.constant 0 : index
    %c0_5 = arith.constant 0 : index
    %6 = vector.load %arg2[%c0_3, %c0_4, %c0_5] : memref<9x4x32xbf16, #tpu.memory_space<vmem>>, vector<1x4x32xbf16>
    %7 = vector.shape_cast %6 : vector<1x4x32xbf16> to vector<4x32xbf16>
    %cst_6 = arith.constant dense<0.000000e+00> : vector<256x32xf32>
    %8 = tpu.matmul %5, %7, %cst_6 {dimension_numbers = #tpu.dot_dimension_numbers<[1], [0], [0], [1], [0, 0, 1, 1], [], []>} : vector<256x4xbf16>, vector<4x32xbf16>, vector<256x32xf32> -> vector<256x32xf32>
    %9 = arith.addf %2, %8 : vector<256x32xf32>
    %10 = vector.extract_strided_slice %1 {offsets = [0, 1, 0], sizes = [16, 16, 4], strides = [1, 1, 1]} : vector<18x18x4xf32> to vector<16x16x4xf32>
    %11 = vector.shape_cast %10 : vector<16x16x4xf32> to vector<256x4xf32>
    %12 = arith.truncf %11 : vector<256x4xf32> to vector<256x4xbf16>
    %c1 = arith.constant 1 : index
    %c0_7 = arith.constant 0 : index
    %c0_8 = arith.constant 0 : index
    %13 = vector.load %arg2[%c1, %c0_7, %c0_8] : memref<9x4x32xbf16, #tpu.memory_space<vmem>>, vector<1x4x32xbf16>
    %14 = vector.shape_cast %13 : vector<1x4x32xbf16> to vector<4x32xbf16>
    %cst_9 = arith.constant dense<0.000000e+00> : vector<256x32xf32>
    %15 = tpu.matmul %12, %14, %cst_9 {dimension_numbers = #tpu.dot_dimension_numbers<[1], [0], [0], [1], [0, 0, 1, 1], [], []>} : vector<256x4xbf16>, vector<4x32xbf16>, vector<256x32xf32> -> vector<256x32xf32>
    %16 = arith.addf %9, %15 : vector<256x32xf32>
    %17 = vector.extract_strided_slice %1 {offsets = [0, 2, 0], sizes = [16, 16, 4], strides = [1, 1, 1]} : vector<18x18x4xf32> to vector<16x16x4xf32>
    %18 = vector.shape_cast %17 : vector<16x16x4xf32> to vector<256x4xf32>
    %19 = arith.truncf %18 : vector<256x4xf32> to vector<256x4xbf16>
    %c2 = arith.constant 2 : index
    %c0_10 = arith.constant 0 : index
    %c0_11 = arith.constant 0 : index
    %20 = vector.load %arg2[%c2, %c0_10, %c0_11] : memref<9x4x32xbf16, #tpu.memory_space<vmem>>, vector<1x4x32xbf16>
    %21 = vector.shape_cast %20 : vector<1x4x32xbf16> to vector<4x32xbf16>
    %cst_12 = arith.constant dense<0.000000e+00> : vector<256x32xf32>
    %22 = tpu.matmul %19, %21, %cst_12 {dimension_numbers = #tpu.dot_dimension_numbers<[1], [0], [0], [1], [0, 0, 1, 1], [], []>} : vector<256x4xbf16>, vector<4x32xbf16>, vector<256x32xf32> -> vector<256x32xf32>
    %23 = arith.addf %16, %22 : vector<256x32xf32>
    %24 = vector.extract_strided_slice %1 {offsets = [1, 0, 0], sizes = [16, 16, 4], strides = [1, 1, 1]} : vector<18x18x4xf32> to vector<16x16x4xf32>
    %25 = vector.shape_cast %24 : vector<16x16x4xf32> to vector<256x4xf32>
    %26 = arith.truncf %25 : vector<256x4xf32> to vector<256x4xbf16>
    %c3 = arith.constant 3 : index
    %c0_13 = arith.constant 0 : index
    %c0_14 = arith.constant 0 : index
    %27 = vector.load %arg2[%c3, %c0_13, %c0_14] : memref<9x4x32xbf16, #tpu.memory_space<vmem>>, vector<1x4x32xbf16>
    %28 = vector.shape_cast %27 : vector<1x4x32xbf16> to vector<4x32xbf16>
    %cst_15 = arith.constant dense<0.000000e+00> : vector<256x32xf32>
    %29 = tpu.matmul %26, %28, %cst_15 {dimension_numbers = #tpu.dot_dimension_numbers<[1], [0], [0], [1], [0, 0, 1, 1], [], []>} : vector<256x4xbf16>, vector<4x32xbf16>, vector<256x32xf32> -> vector<256x32xf32>
    %30 = arith.addf %23, %29 : vector<256x32xf32>
    %31 = vector.extract_strided_slice %1 {offsets = [1, 1, 0], sizes = [16, 16, 4], strides = [1, 1, 1]} : vector<18x18x4xf32> to vector<16x16x4xf32>
    %32 = vector.shape_cast %31 : vector<16x16x4xf32> to vector<256x4xf32>
    %33 = arith.truncf %32 : vector<256x4xf32> to vector<256x4xbf16>
    %c4 = arith.constant 4 : index
    %c0_16 = arith.constant 0 : index
    %c0_17 = arith.constant 0 : index
    %34 = vector.load %arg2[%c4, %c0_16, %c0_17] : memref<9x4x32xbf16, #tpu.memory_space<vmem>>, vector<1x4x32xbf16>
    %35 = vector.shape_cast %34 : vector<1x4x32xbf16> to vector<4x32xbf16>
    %cst_18 = arith.constant dense<0.000000e+00> : vector<256x32xf32>
    %36 = tpu.matmul %33, %35, %cst_18 {dimension_numbers = #tpu.dot_dimension_numbers<[1], [0], [0], [1], [0, 0, 1, 1], [], []>} : vector<256x4xbf16>, vector<4x32xbf16>, vector<256x32xf32> -> vector<256x32xf32>
    %37 = arith.addf %30, %36 : vector<256x32xf32>
    %38 = vector.extract_strided_slice %1 {offsets = [1, 2, 0], sizes = [16, 16, 4], strides = [1, 1, 1]} : vector<18x18x4xf32> to vector<16x16x4xf32>
    %39 = vector.shape_cast %38 : vector<16x16x4xf32> to vector<256x4xf32>
    %40 = arith.truncf %39 : vector<256x4xf32> to vector<256x4xbf16>
    %c5 = arith.constant 5 : index
    %c0_19 = arith.constant 0 : index
    %c0_20 = arith.constant 0 : index
    %41 = vector.load %arg2[%c5, %c0_19, %c0_20] : memref<9x4x32xbf16, #tpu.memory_space<vmem>>, vector<1x4x32xbf16>
    %42 = vector.shape_cast %41 : vector<1x4x32xbf16> to vector<4x32xbf16>
    %cst_21 = arith.constant dense<0.000000e+00> : vector<256x32xf32>
    %43 = tpu.matmul %40, %42, %cst_21 {dimension_numbers = #tpu.dot_dimension_numbers<[1], [0], [0], [1], [0, 0, 1, 1], [], []>} : vector<256x4xbf16>, vector<4x32xbf16>, vector<256x32xf32> -> vector<256x32xf32>
    %44 = arith.addf %37, %43 : vector<256x32xf32>
    %45 = vector.extract_strided_slice %1 {offsets = [2, 0, 0], sizes = [16, 16, 4], strides = [1, 1, 1]} : vector<18x18x4xf32> to vector<16x16x4xf32>
    %46 = vector.shape_cast %45 : vector<16x16x4xf32> to vector<256x4xf32>
    %47 = arith.truncf %46 : vector<256x4xf32> to vector<256x4xbf16>
    %c6 = arith.constant 6 : index
    %c0_22 = arith.constant 0 : index
    %c0_23 = arith.constant 0 : index
    %48 = vector.load %arg2[%c6, %c0_22, %c0_23] : memref<9x4x32xbf16, #tpu.memory_space<vmem>>, vector<1x4x32xbf16>
    %49 = vector.shape_cast %48 : vector<1x4x32xbf16> to vector<4x32xbf16>
    %cst_24 = arith.constant dense<0.000000e+00> : vector<256x32xf32>
    %50 = tpu.matmul %47, %49, %cst_24 {dimension_numbers = #tpu.dot_dimension_numbers<[1], [0], [0], [1], [0, 0, 1, 1], [], []>} : vector<256x4xbf16>, vector<4x32xbf16>, vector<256x32xf32> -> vector<256x32xf32>
    %51 = arith.addf %44, %50 : vector<256x32xf32>
    %52 = vector.extract_strided_slice %1 {offsets = [2, 1, 0], sizes = [16, 16, 4], strides = [1, 1, 1]} : vector<18x18x4xf32> to vector<16x16x4xf32>
    %53 = vector.shape_cast %52 : vector<16x16x4xf32> to vector<256x4xf32>
    %54 = arith.truncf %53 : vector<256x4xf32> to vector<256x4xbf16>
    %c7 = arith.constant 7 : index
    %c0_25 = arith.constant 0 : index
    %c0_26 = arith.constant 0 : index
    %55 = vector.load %arg2[%c7, %c0_25, %c0_26] : memref<9x4x32xbf16, #tpu.memory_space<vmem>>, vector<1x4x32xbf16>
    %56 = vector.shape_cast %55 : vector<1x4x32xbf16> to vector<4x32xbf16>
    %cst_27 = arith.constant dense<0.000000e+00> : vector<256x32xf32>
    %57 = tpu.matmul %54, %56, %cst_27 {dimension_numbers = #tpu.dot_dimension_numbers<[1], [0], [0], [1], [0, 0, 1, 1], [], []>} : vector<256x4xbf16>, vector<4x32xbf16>, vector<256x32xf32> -> vector<256x32xf32>
    %58 = arith.addf %51, %57 : vector<256x32xf32>
    %59 = vector.extract_strided_slice %1 {offsets = [2, 2, 0], sizes = [16, 16, 4], strides = [1, 1, 1]} : vector<18x18x4xf32> to vector<16x16x4xf32>
    %60 = vector.shape_cast %59 : vector<16x16x4xf32> to vector<256x4xf32>
    %61 = arith.truncf %60 : vector<256x4xf32> to vector<256x4xbf16>
    %c8 = arith.constant 8 : index
    %c0_28 = arith.constant 0 : index
    %c0_29 = arith.constant 0 : index
    %62 = vector.load %arg2[%c8, %c0_28, %c0_29] : memref<9x4x32xbf16, #tpu.memory_space<vmem>>, vector<1x4x32xbf16>
    %63 = vector.shape_cast %62 : vector<1x4x32xbf16> to vector<4x32xbf16>
    %cst_30 = arith.constant dense<0.000000e+00> : vector<256x32xf32>
    %64 = tpu.matmul %61, %63, %cst_30 {dimension_numbers = #tpu.dot_dimension_numbers<[1], [0], [0], [1], [0, 0, 1, 1], [], []>} : vector<256x4xbf16>, vector<4x32xbf16>, vector<256x32xf32> -> vector<256x32xf32>
    %65 = arith.addf %58, %64 : vector<256x32xf32>
    %c0_31 = arith.constant 0 : index
    %c0_32 = arith.constant 0 : index
    %66 = vector.load %arg3[%c0_31, %c0_32] : memref<1x32xf32, #tpu.memory_space<vmem>>, vector<1x32xf32>
    %67 = vector.broadcast %66 : vector<1x32xf32> to vector<256x32xf32>
    %68 = arith.mulf %65, %67 : vector<256x32xf32>
    %c0_33 = arith.constant 0 : index
    %c0_34 = arith.constant 0 : index
    %69 = vector.load %arg4[%c0_33, %c0_34] : memref<1x32xf32, #tpu.memory_space<vmem>>, vector<1x32xf32>
    %70 = vector.broadcast %69 : vector<1x32xf32> to vector<256x32xf32>
    %71 = arith.addf %68, %70 : vector<256x32xf32>
    %cst_35 = arith.constant 0.000000e+00 : f32
    %72 = vector.broadcast %cst_35 : f32 to vector<256x32xf32>
    %73 = arith.maximumf %71, %72 : vector<256x32xf32>
    %74 = vector.shape_cast %73 : vector<256x32xf32> to vector<16x16x32xf32>
    %cst_36 = arith.constant 0.000000e+00 : f32
    %75 = vector.broadcast %cst_36 : f32 to vector<18x18x32xf32>
    %c0_37 = arith.constant 0 : index
    %c0_38 = arith.constant 0 : index
    %c0_39 = arith.constant 0 : index
    %76 = vector.load %arg12[%c0_37, %c0_38, %c0_39] : memref<18x18x32xf32, #tpu.memory_space<vmem>>, vector<18x18x32xf32>
    tpu.vector_store %arg12[%c0_37, %c0_38, %c0_39], %75 {strides = array<i32>} : memref<18x18x32xf32, #tpu.memory_space<vmem>>, vector<18x18x32xf32>,
    %c1_40 = arith.constant 1 : index
    %c1_41 = arith.constant 1 : index
    %c0_42 = arith.constant 0 : index
    %77 = vector.load %arg12[%c1_40, %c1_41, %c0_42] : memref<18x18x32xf32, #tpu.memory_space<vmem>>, vector<16x16x32xf32>
    tpu.vector_store %arg12[%c1_40, %c1_41, %c0_42], %74 {strides = array<i32>} : memref<18x18x32xf32, #tpu.memory_space<vmem>>, vector<16x16x32xf32>,
    %c0_43 = arith.constant 0 : index
    %c0_44 = arith.constant 0 : index
    %c0_45 = arith.constant 0 : index
    %78 = vector.load %arg12[%c0_43, %c0_44, %c0_45] : memref<18x18x32xf32, #tpu.memory_space<vmem>>, vector<18x18x32xf32>
    %cst_46 = arith.constant 0.000000e+00 : f32
    %79 = vector.broadcast %cst_46 : f32 to vector<256x32xf32>
    %80 = vector.extract_strided_slice %78 {offsets = [0, 0, 0], sizes = [16, 16, 32], strides = [1, 1, 1]} : vector<18x18x32xf32> to vector<16x16x32xf32>
    %81 = vector.shape_cast %80 : vector<16x16x32xf32> to vector<256x32xf32>
    %82 = arith.truncf %81 : vector<256x32xf32> to vector<256x32xbf16>
    %c0_47 = arith.constant 0 : index
    %c0_48 = arith.constant 0 : index
    %c0_49 = arith.constant 0 : index
    %83 = vector.load %arg5[%c0_47, %c0_48, %c0_49] : memref<9x32x32xbf16, #tpu.memory_space<vmem>>, vector<1x32x32xbf16>
    %84 = vector.shape_cast %83 : vector<1x32x32xbf16> to vector<32x32xbf16>
    %cst_50 = arith.constant dense<0.000000e+00> : vector<256x32xf32>
    %85 = tpu.matmul %82, %84, %cst_50 {dimension_numbers = #tpu.dot_dimension_numbers<[1], [0], [0], [1], [0, 0, 1, 1], [], []>} : vector<256x32xbf16>, vector<32x32xbf16>, vector<256x32xf32> -> vector<256x32xf32>
    %86 = arith.addf %79, %85 : vector<256x32xf32>
    %87 = vector.extract_strided_slice %78 {offsets = [0, 1, 0], sizes = [16, 16, 32], strides = [1, 1, 1]} : vector<18x18x32xf32> to vector<16x16x32xf32>
    %88 = vector.shape_cast %87 : vector<16x16x32xf32> to vector<256x32xf32>
    %89 = arith.truncf %88 : vector<256x32xf32> to vector<256x32xbf16>
    %c1_51 = arith.constant 1 : index
    %c0_52 = arith.constant 0 : index
    %c0_53 = arith.constant 0 : index
    %90 = vector.load %arg5[%c1_51, %c0_52, %c0_53] : memref<9x32x32xbf16, #tpu.memory_space<vmem>>, vector<1x32x32xbf16>
    %91 = vector.shape_cast %90 : vector<1x32x32xbf16> to vector<32x32xbf16>
    %cst_54 = arith.constant dense<0.000000e+00> : vector<256x32xf32>
    %92 = tpu.matmul %89, %91, %cst_54 {dimension_numbers = #tpu.dot_dimension_numbers<[1], [0], [0], [1], [0, 0, 1, 1], [], []>} : vector<256x32xbf16>, vector<32x32xbf16>, vector<256x32xf32> -> vector<256x32xf32>
    %93 = arith.addf %86, %92 : vector<256x32xf32>
    %94 = vector.extract_strided_slice %78 {offsets = [0, 2, 0], sizes = [16, 16, 32], strides = [1, 1, 1]} : vector<18x18x32xf32> to vector<16x16x32xf32>
    %95 = vector.shape_cast %94 : vector<16x16x32xf32> to vector<256x32xf32>
    %96 = arith.truncf %95 : vector<256x32xf32> to vector<256x32xbf16>
    %c2_55 = arith.constant 2 : index
    %c0_56 = arith.constant 0 : index
    %c0_57 = arith.constant 0 : index
    %97 = vector.load %arg5[%c2_55, %c0_56, %c0_57] : memref<9x32x32xbf16, #tpu.memory_space<vmem>>, vector<1x32x32xbf16>
    %98 = vector.shape_cast %97 : vector<1x32x32xbf16> to vector<32x32xbf16>
    %cst_58 = arith.constant dense<0.000000e+00> : vector<256x32xf32>
    %99 = tpu.matmul %96, %98, %cst_58 {dimension_numbers = #tpu.dot_dimension_numbers<[1], [0], [0], [1], [0, 0, 1, 1], [], []>} : vector<256x32xbf16>, vector<32x32xbf16>, vector<256x32xf32> -> vector<256x32xf32>
    %100 = arith.addf %93, %99 : vector<256x32xf32>
    %101 = vector.extract_strided_slice %78 {offsets = [1, 0, 0], sizes = [16, 16, 32], strides = [1, 1, 1]} : vector<18x18x32xf32> to vector<16x16x32xf32>
    %102 = vector.shape_cast %101 : vector<16x16x32xf32> to vector<256x32xf32>
    %103 = arith.truncf %102 : vector<256x32xf32> to vector<256x32xbf16>
    %c3_59 = arith.constant 3 : index
    %c0_60 = arith.constant 0 : index
    %c0_61 = arith.constant 0 : index
    %104 = vector.load %arg5[%c3_59, %c0_60, %c0_61] : memref<9x32x32xbf16, #tpu.memory_space<vmem>>, vector<1x32x32xbf16>
    %105 = vector.shape_cast %104 : vector<1x32x32xbf16> to vector<32x32xbf16>
    %cst_62 = arith.constant dense<0.000000e+00> : vector<256x32xf32>
    %106 = tpu.matmul %103, %105, %cst_62 {dimension_numbers = #tpu.dot_dimension_numbers<[1], [0], [0], [1], [0, 0, 1, 1], [], []>} : vector<256x32xbf16>, vector<32x32xbf16>, vector<256x32xf32> -> vector<256x32xf32>
    %107 = arith.addf %100, %106 : vector<256x32xf32>
    %108 = vector.extract_strided_slice %78 {offsets = [1, 1, 0], sizes = [16, 16, 32], strides = [1, 1, 1]} : vector<18x18x32xf32> to vector<16x16x32xf32>
    %109 = vector.shape_cast %108 : vector<16x16x32xf32> to vector<256x32xf32>
    %110 = arith.truncf %109 : vector<256x32xf32> to vector<256x32xbf16>
    %c4_63 = arith.constant 4 : index
    %c0_64 = arith.constant 0 : index
    %c0_65 = arith.constant 0 : index
    %111 = vector.load %arg5[%c4_63, %c0_64, %c0_65] : memref<9x32x32xbf16, #tpu.memory_space<vmem>>, vector<1x32x32xbf16>
    %112 = vector.shape_cast %111 : vector<1x32x32xbf16> to vector<32x32xbf16>
    %cst_66 = arith.constant dense<0.000000e+00> : vector<256x32xf32>
    %113 = tpu.matmul %110, %112, %cst_66 {dimension_numbers = #tpu.dot_dimension_numbers<[1], [0], [0], [1], [0, 0, 1, 1], [], []>} : vector<256x32xbf16>, vector<32x32xbf16>, vector<256x32xf32> -> vector<256x32xf32>
    %114 = arith.addf %107, %113 : vector<256x32xf32>
    %115 = vector.extract_strided_slice %78 {offsets = [1, 2, 0], sizes = [16, 16, 32], strides = [1, 1, 1]} : vector<18x18x32xf32> to vector<16x16x32xf32>
    %116 = vector.shape_cast %115 : vector<16x16x32xf32> to vector<256x32xf32>
    %117 = arith.truncf %116 : vector<256x32xf32> to vector<256x32xbf16>
    %c5_67 = arith.constant 5 : index
    %c0_68 = arith.constant 0 : index
    %c0_69 = arith.constant 0 : index
    %118 = vector.load %arg5[%c5_67, %c0_68, %c0_69] : memref<9x32x32xbf16, #tpu.memory_space<vmem>>, vector<1x32x32xbf16>
    %119 = vector.shape_cast %118 : vector<1x32x32xbf16> to vector<32x32xbf16>
    %cst_70 = arith.constant dense<0.000000e+00> : vector<256x32xf32>
    %120 = tpu.matmul %117, %119, %cst_70 {dimension_numbers = #tpu.dot_dimension_numbers<[1], [0], [0], [1], [0, 0, 1, 1], [], []>} : vector<256x32xbf16>, vector<32x32xbf16>, vector<256x32xf32> -> vector<256x32xf32>
    %121 = arith.addf %114, %120 : vector<256x32xf32>
    %122 = vector.extract_strided_slice %78 {offsets = [2, 0, 0], sizes = [16, 16, 32], strides = [1, 1, 1]} : vector<18x18x32xf32> to vector<16x16x32xf32>
    %123 = vector.shape_cast %122 : vector<16x16x32xf32> to vector<256x32xf32>
    %124 = arith.truncf %123 : vector<256x32xf32> to vector<256x32xbf16>
    %c6_71 = arith.constant 6 : index
    %c0_72 = arith.constant 0 : index
    %c0_73 = arith.constant 0 : index
    %125 = vector.load %arg5[%c6_71, %c0_72, %c0_73] : memref<9x32x32xbf16, #tpu.memory_space<vmem>>, vector<1x32x32xbf16>
    %126 = vector.shape_cast %125 : vector<1x32x32xbf16> to vector<32x32xbf16>
    %cst_74 = arith.constant dense<0.000000e+00> : vector<256x32xf32>
    %127 = tpu.matmul %124, %126, %cst_74 {dimension_numbers = #tpu.dot_dimension_numbers<[1], [0], [0], [1], [0, 0, 1, 1], [], []>} : vector<256x32xbf16>, vector<32x32xbf16>, vector<256x32xf32> -> vector<256x32xf32>
    %128 = arith.addf %121, %127 : vector<256x32xf32>
    %129 = vector.extract_strided_slice %78 {offsets = [2, 1, 0], sizes = [16, 16, 32], strides = [1, 1, 1]} : vector<18x18x32xf32> to vector<16x16x32xf32>
    %130 = vector.shape_cast %129 : vector<16x16x32xf32> to vector<256x32xf32>
    %131 = arith.truncf %130 : vector<256x32xf32> to vector<256x32xbf16>
    %c7_75 = arith.constant 7 : index
    %c0_76 = arith.constant 0 : index
    %c0_77 = arith.constant 0 : index
    %132 = vector.load %arg5[%c7_75, %c0_76, %c0_77] : memref<9x32x32xbf16, #tpu.memory_space<vmem>>, vector<1x32x32xbf16>
    %133 = vector.shape_cast %132 : vector<1x32x32xbf16> to vector<32x32xbf16>
    %cst_78 = arith.constant dense<0.000000e+00> : vector<256x32xf32>
    %134 = tpu.matmul %131, %133, %cst_78 {dimension_numbers = #tpu.dot_dimension_numbers<[1], [0], [0], [1], [0, 0, 1, 1], [], []>} : vector<256x32xbf16>, vector<32x32xbf16>, vector<256x32xf32> -> vector<256x32xf32>
    %135 = arith.addf %128, %134 : vector<256x32xf32>
    %136 = vector.extract_strided_slice %78 {offsets = [2, 2, 0], sizes = [16, 16, 32], strides = [1, 1, 1]} : vector<18x18x32xf32> to vector<16x16x32xf32>
    %137 = vector.shape_cast %136 : vector<16x16x32xf32> to vector<256x32xf32>
    %138 = arith.truncf %137 : vector<256x32xf32> to vector<256x32xbf16>
    %c8_79 = arith.constant 8 : index
    %c0_80 = arith.constant 0 : index
    %c0_81 = arith.constant 0 : index
    %139 = vector.load %arg5[%c8_79, %c0_80, %c0_81] : memref<9x32x32xbf16, #tpu.memory_space<vmem>>, vector<1x32x32xbf16>
    %140 = vector.shape_cast %139 : vector<1x32x32xbf16> to vector<32x32xbf16>
    %cst_82 = arith.constant dense<0.000000e+00> : vector<256x32xf32>
    %141 = tpu.matmul %138, %140, %cst_82 {dimension_numbers = #tpu.dot_dimension_numbers<[1], [0], [0], [1], [0, 0, 1, 1], [], []>} : vector<256x32xbf16>, vector<32x32xbf16>, vector<256x32xf32> -> vector<256x32xf32>
    %142 = arith.addf %135, %141 : vector<256x32xf32>
    %c0_83 = arith.constant 0 : index
    %c0_84 = arith.constant 0 : index
    %143 = vector.load %arg6[%c0_83, %c0_84] : memref<1x32xf32, #tpu.memory_space<vmem>>, vector<1x32xf32>
    %144 = vector.broadcast %143 : vector<1x32xf32> to vector<256x32xf32>
    %145 = arith.mulf %142, %144 : vector<256x32xf32>
    %c0_85 = arith.constant 0 : index
    %c0_86 = arith.constant 0 : index
    %146 = vector.load %arg7[%c0_85, %c0_86] : memref<1x32xf32, #tpu.memory_space<vmem>>, vector<1x32xf32>
    %147 = vector.broadcast %146 : vector<1x32xf32> to vector<256x32xf32>
    %148 = arith.addf %145, %147 : vector<256x32xf32>
    %cst_87 = arith.constant 0.000000e+00 : f32
    %149 = vector.broadcast %cst_87 : f32 to vector<256x32xf32>
    %150 = arith.maximumf %148, %149 : vector<256x32xf32>
    %151 = vector.shape_cast %150 : vector<256x32xf32> to vector<16x16x32xf32>
    %c1_88 = arith.constant 1 : index
    %c1_89 = arith.constant 1 : index
    %c0_90 = arith.constant 0 : index
    %152 = vector.load %arg12[%c1_88, %c1_89, %c0_90] : memref<18x18x32xf32, #tpu.memory_space<vmem>>, vector<16x16x32xf32>
    tpu.vector_store %arg12[%c1_88, %c1_89, %c0_90], %151 {strides = array<i32>} : memref<18x18x32xf32, #tpu.memory_space<vmem>>, vector<16x16x32xf32>,
    %c0_91 = arith.constant 0 : index
    %c0_92 = arith.constant 0 : index
    %c0_93 = arith.constant 0 : index
    %153 = vector.load %arg12[%c0_91, %c0_92, %c0_93] : memref<18x18x32xf32, #tpu.memory_space<vmem>>, vector<18x18x32xf32>
    %cst_94 = arith.constant 0.000000e+00 : f32
    %154 = vector.broadcast %cst_94 : f32 to vector<256x32xf32>
    %155 = vector.extract_strided_slice %153 {offsets = [0, 0, 0], sizes = [16, 16, 32], strides = [1, 1, 1]} : vector<18x18x32xf32> to vector<16x16x32xf32>
    %156 = vector.shape_cast %155 : vector<16x16x32xf32> to vector<256x32xf32>
    %157 = arith.truncf %156 : vector<256x32xf32> to vector<256x32xbf16>
    %c0_95 = arith.constant 0 : index
    %c0_96 = arith.constant 0 : index
    %c0_97 = arith.constant 0 : index
    %158 = vector.load %arg8[%c0_95, %c0_96, %c0_97] : memref<9x32x32xbf16, #tpu.memory_space<vmem>>, vector<1x32x32xbf16>
    %159 = vector.shape_cast %158 : vector<1x32x32xbf16> to vector<32x32xbf16>
    %cst_98 = arith.constant dense<0.000000e+00> : vector<256x32xf32>
    %160 = tpu.matmul %157, %159, %cst_98 {dimension_numbers = #tpu.dot_dimension_numbers<[1], [0], [0], [1], [0, 0, 1, 1], [], []>} : vector<256x32xbf16>, vector<32x32xbf16>, vector<256x32xf32> -> vector<256x32xf32>
    %161 = arith.addf %154, %160 : vector<256x32xf32>
    %162 = vector.extract_strided_slice %153 {offsets = [0, 1, 0], sizes = [16, 16, 32], strides = [1, 1, 1]} : vector<18x18x32xf32> to vector<16x16x32xf32>
    %163 = vector.shape_cast %162 : vector<16x16x32xf32> to vector<256x32xf32>
    %164 = arith.truncf %163 : vector<256x32xf32> to vector<256x32xbf16>
    %c1_99 = arith.constant 1 : index
    %c0_100 = arith.constant 0 : index
    %c0_101 = arith.constant 0 : index
    %165 = vector.load %arg8[%c1_99, %c0_100, %c0_101] : memref<9x32x32xbf16, #tpu.memory_space<vmem>>, vector<1x32x32xbf16>
    %166 = vector.shape_cast %165 : vector<1x32x32xbf16> to vector<32x32xbf16>
    %cst_102 = arith.constant dense<0.000000e+00> : vector<256x32xf32>
    %167 = tpu.matmul %164, %166, %cst_102 {dimension_numbers = #tpu.dot_dimension_numbers<[1], [0], [0], [1], [0, 0, 1, 1], [], []>} : vector<256x32xbf16>, vector<32x32xbf16>, vector<256x32xf32> -> vector<256x32xf32>
    %168 = arith.addf %161, %167 : vector<256x32xf32>
    %169 = vector.extract_strided_slice %153 {offsets = [0, 2, 0], sizes = [16, 16, 32], strides = [1, 1, 1]} : vector<18x18x32xf32> to vector<16x16x32xf32>
    %170 = vector.shape_cast %169 : vector<16x16x32xf32> to vector<256x32xf32>
    %171 = arith.truncf %170 : vector<256x32xf32> to vector<256x32xbf16>
    %c2_103 = arith.constant 2 : index
    %c0_104 = arith.constant 0 : index
    %c0_105 = arith.constant 0 : index
    %172 = vector.load %arg8[%c2_103, %c0_104, %c0_105] : memref<9x32x32xbf16, #tpu.memory_space<vmem>>, vector<1x32x32xbf16>
    %173 = vector.shape_cast %172 : vector<1x32x32xbf16> to vector<32x32xbf16>
    %cst_106 = arith.constant dense<0.000000e+00> : vector<256x32xf32>
    %174 = tpu.matmul %171, %173, %cst_106 {dimension_numbers = #tpu.dot_dimension_numbers<[1], [0], [0], [1], [0, 0, 1, 1], [], []>} : vector<256x32xbf16>, vector<32x32xbf16>, vector<256x32xf32> -> vector<256x32xf32>
    %175 = arith.addf %168, %174 : vector<256x32xf32>
    %176 = vector.extract_strided_slice %153 {offsets = [1, 0, 0], sizes = [16, 16, 32], strides = [1, 1, 1]} : vector<18x18x32xf32> to vector<16x16x32xf32>
    %177 = vector.shape_cast %176 : vector<16x16x32xf32> to vector<256x32xf32>
    %178 = arith.truncf %177 : vector<256x32xf32> to vector<256x32xbf16>
    %c3_107 = arith.constant 3 : index
    %c0_108 = arith.constant 0 : index
    %c0_109 = arith.constant 0 : index
    %179 = vector.load %arg8[%c3_107, %c0_108, %c0_109] : memref<9x32x32xbf16, #tpu.memory_space<vmem>>, vector<1x32x32xbf16>
    %180 = vector.shape_cast %179 : vector<1x32x32xbf16> to vector<32x32xbf16>
    %cst_110 = arith.constant dense<0.000000e+00> : vector<256x32xf32>
    %181 = tpu.matmul %178, %180, %cst_110 {dimension_numbers = #tpu.dot_dimension_numbers<[1], [0], [0], [1], [0, 0, 1, 1], [], []>} : vector<256x32xbf16>, vector<32x32xbf16>, vector<256x32xf32> -> vector<256x32xf32>
    %182 = arith.addf %175, %181 : vector<256x32xf32>
    %183 = vector.extract_strided_slice %153 {offsets = [1, 1, 0], sizes = [16, 16, 32], strides = [1, 1, 1]} : vector<18x18x32xf32> to vector<16x16x32xf32>
    %184 = vector.shape_cast %183 : vector<16x16x32xf32> to vector<256x32xf32>
    %185 = arith.truncf %184 : vector<256x32xf32> to vector<256x32xbf16>
    %c4_111 = arith.constant 4 : index
    %c0_112 = arith.constant 0 : index
    %c0_113 = arith.constant 0 : index
    %186 = vector.load %arg8[%c4_111, %c0_112, %c0_113] : memref<9x32x32xbf16, #tpu.memory_space<vmem>>, vector<1x32x32xbf16>
    %187 = vector.shape_cast %186 : vector<1x32x32xbf16> to vector<32x32xbf16>
    %cst_114 = arith.constant dense<0.000000e+00> : vector<256x32xf32>
    %188 = tpu.matmul %185, %187, %cst_114 {dimension_numbers = #tpu.dot_dimension_numbers<[1], [0], [0], [1], [0, 0, 1, 1], [], []>} : vector<256x32xbf16>, vector<32x32xbf16>, vector<256x32xf32> -> vector<256x32xf32>
    %189 = arith.addf %182, %188 : vector<256x32xf32>
    %190 = vector.extract_strided_slice %153 {offsets = [1, 2, 0], sizes = [16, 16, 32], strides = [1, 1, 1]} : vector<18x18x32xf32> to vector<16x16x32xf32>
    %191 = vector.shape_cast %190 : vector<16x16x32xf32> to vector<256x32xf32>
    %192 = arith.truncf %191 : vector<256x32xf32> to vector<256x32xbf16>
    %c5_115 = arith.constant 5 : index
    %c0_116 = arith.constant 0 : index
    %c0_117 = arith.constant 0 : index
    %193 = vector.load %arg8[%c5_115, %c0_116, %c0_117] : memref<9x32x32xbf16, #tpu.memory_space<vmem>>, vector<1x32x32xbf16>
    %194 = vector.shape_cast %193 : vector<1x32x32xbf16> to vector<32x32xbf16>
    %cst_118 = arith.constant dense<0.000000e+00> : vector<256x32xf32>
    %195 = tpu.matmul %192, %194, %cst_118 {dimension_numbers = #tpu.dot_dimension_numbers<[1], [0], [0], [1], [0, 0, 1, 1], [], []>} : vector<256x32xbf16>, vector<32x32xbf16>, vector<256x32xf32> -> vector<256x32xf32>
    %196 = arith.addf %189, %195 : vector<256x32xf32>
    %197 = vector.extract_strided_slice %153 {offsets = [2, 0, 0], sizes = [16, 16, 32], strides = [1, 1, 1]} : vector<18x18x32xf32> to vector<16x16x32xf32>
    %198 = vector.shape_cast %197 : vector<16x16x32xf32> to vector<256x32xf32>
    %199 = arith.truncf %198 : vector<256x32xf32> to vector<256x32xbf16>
    %c6_119 = arith.constant 6 : index
    %c0_120 = arith.constant 0 : index
    %c0_121 = arith.constant 0 : index
    %200 = vector.load %arg8[%c6_119, %c0_120, %c0_121] : memref<9x32x32xbf16, #tpu.memory_space<vmem>>, vector<1x32x32xbf16>
    %201 = vector.shape_cast %200 : vector<1x32x32xbf16> to vector<32x32xbf16>
    %cst_122 = arith.constant dense<0.000000e+00> : vector<256x32xf32>
    %202 = tpu.matmul %199, %201, %cst_122 {dimension_numbers = #tpu.dot_dimension_numbers<[1], [0], [0], [1], [0, 0, 1, 1], [], []>} : vector<256x32xbf16>, vector<32x32xbf16>, vector<256x32xf32> -> vector<256x32xf32>
    %203 = arith.addf %196, %202 : vector<256x32xf32>
    %204 = vector.extract_strided_slice %153 {offsets = [2, 1, 0], sizes = [16, 16, 32], strides = [1, 1, 1]} : vector<18x18x32xf32> to vector<16x16x32xf32>
    %205 = vector.shape_cast %204 : vector<16x16x32xf32> to vector<256x32xf32>
    %206 = arith.truncf %205 : vector<256x32xf32> to vector<256x32xbf16>
    %c7_123 = arith.constant 7 : index
    %c0_124 = arith.constant 0 : index
    %c0_125 = arith.constant 0 : index
    %207 = vector.load %arg8[%c7_123, %c0_124, %c0_125] : memref<9x32x32xbf16, #tpu.memory_space<vmem>>, vector<1x32x32xbf16>
    %208 = vector.shape_cast %207 : vector<1x32x32xbf16> to vector<32x32xbf16>
    %cst_126 = arith.constant dense<0.000000e+00> : vector<256x32xf32>
    %209 = tpu.matmul %206, %208, %cst_126 {dimension_numbers = #tpu.dot_dimension_numbers<[1], [0], [0], [1], [0, 0, 1, 1], [], []>} : vector<256x32xbf16>, vector<32x32xbf16>, vector<256x32xf32> -> vector<256x32xf32>
    %210 = arith.addf %203, %209 : vector<256x32xf32>
    %211 = vector.extract_strided_slice %153 {offsets = [2, 2, 0], sizes = [16, 16, 32], strides = [1, 1, 1]} : vector<18x18x32xf32> to vector<16x16x32xf32>
    %212 = vector.shape_cast %211 : vector<16x16x32xf32> to vector<256x32xf32>
    %213 = arith.truncf %212 : vector<256x32xf32> to vector<256x32xbf16>
    %c8_127 = arith.constant 8 : index
    %c0_128 = arith.constant 0 : index
    %c0_129 = arith.constant 0 : index
    %214 = vector.load %arg8[%c8_127, %c0_128, %c0_129] : memref<9x32x32xbf16, #tpu.memory_space<vmem>>, vector<1x32x32xbf16>
    %215 = vector.shape_cast %214 : vector<1x32x32xbf16> to vector<32x32xbf16>
    %cst_130 = arith.constant dense<0.000000e+00> : vector<256x32xf32>
    %216 = tpu.matmul %213, %215, %cst_130 {dimension_numbers = #tpu.dot_dimension_numbers<[1], [0], [0], [1], [0, 0, 1, 1], [], []>} : vector<256x32xbf16>, vector<32x32xbf16>, vector<256x32xf32> -> vector<256x32xf32>
    %217 = arith.addf %210, %216 : vector<256x32xf32>
    %c0_131 = arith.constant 0 : index
    %c0_132 = arith.constant 0 : index
    %218 = vector.load %arg9[%c0_131, %c0_132] : memref<1x32xf32, #tpu.memory_space<vmem>>, vector<1x32xf32>
    %219 = vector.broadcast %218 : vector<1x32xf32> to vector<256x32xf32>
    %220 = arith.mulf %217, %219 : vector<256x32xf32>
    %c0_133 = arith.constant 0 : index
    %c0_134 = arith.constant 0 : index
    %221 = vector.load %arg10[%c0_133, %c0_134] : memref<1x32xf32, #tpu.memory_space<vmem>>, vector<1x32xf32>
    %222 = vector.broadcast %221 : vector<1x32xf32> to vector<256x32xf32>
    %223 = arith.addf %220, %222 : vector<256x32xf32>
    %cst_135 = arith.constant 0.000000e+00 : f32
    %224 = vector.broadcast %cst_135 : f32 to vector<256x32xf32>
    %225 = arith.maximumf %223, %224 : vector<256x32xf32>
    %226 = vector.shape_cast %225 : vector<256x32xf32> to vector<16x16x32xf32>
    %c0_136 = arith.constant 0 : index
    %c0_137 = arith.constant 0 : index
    %c0_138 = arith.constant 0 : index
    %c0_139 = arith.constant 0 : index
    %227 = vector.load %arg11[%c0_136, %c0_137, %c0_138, %c0_139] : memref<1x16x16x32xf32, #tpu.memory_space<vmem>>, vector<1x16x16x32xf32>
    %228 = vector.shape_cast %227 : vector<1x16x16x32xf32> to vector<16x16x32xf32>
    %229 = vector.shape_cast %226 : vector<16x16x32xf32> to vector<1x16x16x32xf32>
    tpu.vector_store %arg11[%c0_136, %c0_137, %c0_138, %c0_139], %229 {strides = array<i32>} : memref<1x16x16x32xf32, #tpu.memory_space<vmem>>, vector<1x16x16x32xf32>,
    return
  }
  func.func @transform_0(%arg0: i32) -> (i32, i32, i32, i32) {
    %c0_i32 = arith.constant 0 : i32
    %c0_i32_0 = arith.constant 0 : i32
    %c0_i32_1 = arith.constant 0 : i32
    %c0_i32_2 = arith.constant 0 : i32
    return %arg0, %c0_i32, %c0_i32_0, %c0_i32_1 : i32, i32, i32, i32
  }
  func.func @transform_1(%arg0: i32) -> (i32, i32, i32) {
    %c0_i32 = arith.constant 0 : i32
    %c0_i32_0 = arith.constant 0 : i32
    %c0_i32_1 = arith.constant 0 : i32
    %c0_i32_2 = arith.constant 0 : i32
    return %c0_i32, %c0_i32_0, %c0_i32_1 : i32, i32, i32
  }
  func.func @transform_2(%arg0: i32) -> (i32, i32) {
    %c0_i32 = arith.constant 0 : i32
    %c0_i32_0 = arith.constant 0 : i32
    %c0_i32_1 = arith.constant 0 : i32
    return %c0_i32, %c0_i32_0 : i32, i32
  }
  func.func @transform_3(%arg0: i32) -> (i32, i32) {
    %c0_i32 = arith.constant 0 : i32
    %c0_i32_0 = arith.constant 0 : i32
    %c0_i32_1 = arith.constant 0 : i32
    return %c0_i32, %c0_i32_0 : i32, i32
  }
  func.func @transform_4(%arg0: i32) -> (i32, i32, i32) {
    %c0_i32 = arith.constant 0 : i32
    %c0_i32_0 = arith.constant 0 : i32
    %c0_i32_1 = arith.constant 0 : i32
    %c0_i32_2 = arith.constant 0 : i32
    return %c0_i32, %c0_i32_0, %c0_i32_1 : i32, i32, i32
  }
  func.func @transform_5(%arg0: i32) -> (i32, i32) {
    %c0_i32 = arith.constant 0 : i32
    %c0_i32_0 = arith.constant 0 : i32
    %c0_i32_1 = arith.constant 0 : i32
    return %c0_i32, %c0_i32_0 : i32, i32
  }
  func.func @transform_6(%arg0: i32) -> (i32, i32) {
    %c0_i32 = arith.constant 0 : i32
    %c0_i32_0 = arith.constant 0 : i32
    %c0_i32_1 = arith.constant 0 : i32
    return %c0_i32, %c0_i32_0 : i32, i32
  }
  func.func @transform_7(%arg0: i32) -> (i32, i32, i32) {
    %c0_i32 = arith.constant 0 : i32
    %c0_i32_0 = arith.constant 0 : i32
    %c0_i32_1 = arith.constant 0 : i32
    %c0_i32_2 = arith.constant 0 : i32
    return %c0_i32, %c0_i32_0, %c0_i32_1 : i32, i32, i32
  }
  func.func @transform_8(%arg0: i32) -> (i32, i32) {
    %c0_i32 = arith.constant 0 : i32
    %c0_i32_0 = arith.constant 0 : i32
    %c0_i32_1 = arith.constant 0 : i32
    return %c0_i32, %c0_i32_0 : i32, i32
  }
  func.func @transform_9(%arg0: i32) -> (i32, i32) {
    %c0_i32 = arith.constant 0 : i32
    %c0_i32_0 = arith.constant 0 : i32
    %c0_i32_1 = arith.constant 0 : i32
    return %c0_i32, %c0_i32_0 : i32, i32
  }
  func.func @transform_10(%arg0: i32) -> (i32, i32, i32, i32) {
    %c0_i32 = arith.constant 0 : i32
    %c0_i32_0 = arith.constant 0 : i32
    %c0_i32_1 = arith.constant 0 : i32
    %c0_i32_2 = arith.constant 0 : i32
    return %arg0, %c0_i32, %c0_i32_0, %c0_i32_1 : i32, i32, i32, i32
  }
}

</mosaic_0001>

<bundles_post_ra>
// kernel: conv_block4_forward.1
= control target key start
LH: loop header
LB: loop body
LE: loop exit
PB: predicated region body
PF: predicated region fallthrough
CT: control target
= control target key end

     0   :  { %15 = vsyncpa [#allocation4], 0  ;;  %s15124_s0 = inlined_call_operand.vmem [shape: f32[2,18,18,4], index: 0, kind: input, shape index: {}]   ;;  %s15125_s1 = inlined_call_operand.vmem [shape: bf16[9,4,32], index: 1, kind: input, shape index: {}]   ;;  %s15126_s2 = inlined_call_operand.vmem [shape: f32[1,32], index: 2, kind: input, shape index: {}]   ;;  %s15127_s3 = inlined_call_operand.vmem [shape: f32[1,32], index: 3, kind: input, shape index: {}]   ;;  %s15128_s4 = inlined_call_operand.vmem [shape: bf16[9,32,32], index: 4, kind: input, shape index: {}]   ;;  %s15129_s5 = inlined_call_operand.vmem [shape: f32[1,32], index: 5, kind: input, shape index: {}]   ;;  %s15130_s6 = inlined_call_operand.vmem [shape: f32[1,32], index: 6, kind: input, shape index: {}]   ;;  %s15131_s7 = inlined_call_operand.vmem [shape: bf16[9,32,32], index: 7, kind: input, shape index: {}]   ;;  %s15132_s8 = inlined_call_operand.vmem [shape: f32[1,32], index: 8, kind: input, shape index: {}]   ;;  %s15133_s9 = inlined_call_operand.vmem [shape: f32[1,32], index: 9, kind: input, shape index: {}]   ;;  %s15134_s10 = inlined_call_operand.hbm [shape: f32[2,16,16,32], index: 10, kind: output, shape index: {}]  }
   0x1   :  { %17 = vsyncpa [#allocation4 + $0x1], 0  ;;  %s10218_s13 = smov 0   ;;  %s10220_s14 = smov 0  }
   0x2   :  { %s10222_s15 = smov 0   ;;  %s10224_s16 = smov 0  }
   0x3 LB: > { %s10239_s17 = sadd.s32 4294967295, %s10157_s16   ;;  %s8017_s18 = sadd.s32 4294967294, %s10157_s16   ;;  %s10157_s16 = sphi %s10224_s16, %s15840_s16   ;;  %s10153_s15 = sphi %s10222_s15, %s15839_s15   ;;  %s10149_s14 = sphi %s10220_s14, %s15838_s14   ;;  %s10145_s13 = sphi %s10218_s13, %s15837_s13  }
   0x4   : > { %s10243_s19 = sadd.s32 1, %s10157_s16   ;;  %s245_s20 = sadd.s32 1, %s10153_s15 }
   0x5   : > { %s242_s21 = ssub.s32 %s10157_s16, %s10243_s19  ;;  %p255_p0 = scmp.ne.s32.totalorder %s10153_s15, %s10149_s14 }
   0x6   : > { %p243_p1 = scmp.eq.s32.totalorder %s242_s21, 0  ;;  %p256_p2 = scmp.eq.s32.totalorder %s10239_s17, 1 }
   0x7   : > { %p261_p3 = scmp.ne.s32.totalorder %s10149_s14, %s10145_s13  ;;  %p262_p4 = scmp.eq.s32.totalorder %s8017_s18, 1 }
   0x8   : > { %s10254_s22 = scalar_select %p243_p1, %s10153_s15, %s245_s20  }
   0x9   : > { %p10256_p5 = por %p256_p2, %p255_p0  ;;  %p10260_p6 = por %p262_p4, %p261_p3 }
   0xa   : > { %p8020_p7 = scmp.ge.s32.totalorder %s10157_s16, 1  ;;  %p315_p8 = scmp.lt.s32.totalorder %s10157_s16, 3 }
   0xc   : > { %p316_p9 = pnand %p8020_p7, %p315_p8 }
   0xe   : > { %319 = sbr.rel (%p316_p9) target bundleno = 1507 (0x5e3), region = 60 }
  0x13   : > { %v8023_v0 = vld [vmem:[%s15125_s1 + $0x2] sm:$0x3]  ;;  %vm658_vm0 = vcmask 1041408   ;;  %p353_p10 = scmp.lt.s32.totalorder %s10239_s17, 1  ;;  %v429_v2 = vld [vmem:[%s15125_s1] sm:$0x3] }
  0x14   : > { %10009 = vmatprep.subr.msk.bf16.mxu1 %vm658_vm0, %v8023_v0  ;;  %10008 = vmatprep.subr.msk.bf16.mxu0 %vm658_vm0, %v8023_v0  ;;  %v660_v1 = vsel %vm658_vm0, %v8023_v0, 0  ;;  %v8056_v3 = vld [vmem:[%s15125_s1 + $0x4] sm:$0x3]  ;;  %vm478_vm1 = vcmask 1046528   ;;  %vm609_vm2 = vcmask 31744   ;;  %v10311_v15 = vsel %vm658_vm0, %v429_v2, 0 }
  0x15   : > { %10007 = vmatpush3.bf16.msra.mxu1 %v660_v1  ;;  %9053 = vmatpush3.bf16.msra.mxu0 %v660_v1  ;;  %s354_s11 = scalar_select %p353_p10, %s10239_s17, 1  ;;  %v1215_v22 = vsel %vm658_vm0, %v8056_v3, 0  ;;  %v10386_v54 = vld [vmem:[%s15125_s1 + $0x8] sm:$0x3]  ;;  %vm1035_vm3 = vcmask 1045504   ;;  %vm2766_vm4 = vcmask 261120  }
  0x16   : > { %10010 = vmatprep.subr.msk.bf16.mxu1 %vm658_vm0, %v429_v2  ;;  %10011 = vmatprep.subr.msk.bf16.mxu0 %vm658_vm0, %v8056_v3  ;;  %vm2769_vm5 = vcmask 254976   ;;  %s350_s29 = sand.u32 1, %s10149_s14   ;;  %s8574_s26 = sshll.u32 %s10239_s17, 12 }
  0x17   : > { %s10018_s12 = smul.u32 432, %s354_s11  ;;  %s8021_s20 = sshll.u32 %s350_s29, 8 }
  0x18   : > { %s14844_s25 = scalar_lea.vmem [#allocation3], %s8021_s20  ;;  %s15074_s30 = scalar_lea.hbm %s15134_s10, %s8574_s26 }
  0x19   : > { %s10285_s21 = scalar_lea.vmem %s15124_s0, %s10018_s12  ;;  %s7955_s27 = sshll.u32 %s14844_s25, 4  ;;  %s15076_s27 = int_to_ptr.vmem [resolvable:$true] %s7955_s27 }
  0x1a   : > { %v10288_v4 = vld [vmem:[%s10285_s21] sm:$0xff]  ;;  %v10291_v5 = vld [vmem:[%s10285_s21 + $0x8] sm:$0xff]  ;;  %v10294_v6 = vld [vmem:[%s10285_s21 + $0x10] sm:$0x3]  ;;  %s15084_s17 = scalar_lea.sflag [#allocation4], %s350_s29  ;;  %s10097_s11 = scalar_lea.vmem %s15076_s27, 4096 }
  0x1b   : > { %v479_v7 = vrot.slane %v10288_v4, 1  ;;  %v480_v8 = vrot.slane %v10291_v5, 1  ;;  %v482_v9 = vrot.slane %v10294_v6, 1  ;;  %v10300_v10 = vld [vmem:[%s10285_s21 + $0xc0] sm:$0xff]  ;;  %v10303_v11 = vld [vmem:[%s10285_s21 + $0xc8] sm:$0xff]  ;;  %v10317_v19 = vld [vmem:[%s10285_s21 + $0x18] sm:$0xff]  ;;  %p10098_p11 = scmp.ne.s32.totalorder %s15076_s27, %s10097_s11 }
  0x1c   : > { %v10306_v12 = vld [vmem:[%s10285_s21 + $0xd0] sm:$0x3]  ;;  %v519_v13 = vrot.slane %v10300_v10, 1  ;;  %v520_v14 = vrot.slane %v10303_v11, 1  ;;  %v10320_v20 = vld [vmem:[%s10285_s21 + $0x20] sm:$0xff]  ;;  %v484_v25 = vrot.slane %v10317_v19, 1 }
  0x1d   : > { %v481_v16 = vsel %vm478_vm1, %v479_v7, %v480_v8  ;;  %v483_v17 = vsel %vm478_vm1, %v480_v8, %v482_v9  ;;  %v522_v18 = vrot.slane %v10306_v12, 1  ;;  %v10323_v21 = vld [vmem:[%s10285_s21 + $0x28] sm:$0x3]  ;;  %v485_v26 = vrot.slane %v10320_v20, 1  ;;  %v10330_v27 = vld [vmem:[%s10285_s21 + $0xd8] sm:$0xff]  ;;  %v10333_v28 = vld [vmem:[%s10285_s21 + $0xe0] sm:$0xff]  ;;  %p10099_p12 = pnand %p10098_p11, %p10256_p5 }
  0x1e   : > { %v591_v23 = vpack.c.bf16 %v483_v17, %v481_v16  ;;  %v521_v24 = vsel %vm478_vm1, %v519_v13, %v520_v14  ;;  %v10336_v29 = vld [vmem:[%s10285_s21 + $0xe8] sm:$0x3]  ;;  %v487_v33 = vrot.slane %v10323_v21, 1  ;;  %v10343_v34 = vld [vmem:[%s10285_s21 + $0x30] sm:$0xff]  ;;  %v10346_v35 = vld [vmem:[%s10285_s21 + $0x38] sm:$0xff]  ;;  %v524_v40 = vrot.slane %v10330_v27, 1 }
  0x1f   : > { %15251 = vst [vmem:[#allocation6_spill] sm:$0xff] %v10336_v29  ;;  %v523_v32 = vsel %vm478_vm1, %v520_v14, %v522_v18  ;;  %v10349_v36 = vld [vmem:[%s10285_s21 + $0xf0] sm:$0xff]  ;;  %v486_v39 = vsel %vm478_vm1, %v484_v25, %v485_v26  ;;  %v10358_v41 = vld [vmem:[%s10285_s21 + $0x40] sm:$0x3]  ;;  %v10361_v42 = vld [vmem:[%s10285_s21 + $0xf8] sm:$0xff]  ;;  %v525_v44 = vrot.slane %v10333_v28, 1  ;;  %p10100_p13 = pneg %p10099_p12 }
  0x20   : > { %9054 = vmatprep.mubr.msk.bf16.mxu0 %vm609_vm2, %v591_v23  ;;  %v10353_v38 = vpack.c.bf16 %v523_v32, %v521_v24  ;;  %v488_v43 = vsel %vm478_vm1, %v485_v26, %v487_v33  ;;  %v527_v45 = vrot.slane %v10336_v29, 1  ;;  %v489_v46 = vrot.slane %v10343_v34, 1  ;;  %v10368_v47 = vld [vmem:[%s10285_s21 + $0x100] sm:$0x3]  ;;  %v10371_v48 = vld [vmem:[%s10285_s21 + $0x48] sm:$0xff]  ;;  %v10381_v53 = vld [vmem:[%s10285_s21 + $0x50] sm:$0xff] }
  0x21   : > { %15253 = vst [vmem:[#allocation8_spill] sm:$0xff] %v10368_v47  ;;  %v10375_v49 = vpack.c.bf16 %v488_v43, %v486_v39  ;;  %v490_v50 = vrot.slane %v10346_v35, 1  ;;  %v492_v51 = vrot.slane %v10358_v41, 1  ;;  %v529_v52 = vrot.slane %v10349_v36, 1  ;;  %v10393_v59 = vld [vmem:[%s10285_s21 + $0x58] sm:$0x3] }
  0x22   : > { %15252 = vst [vmem:[#allocation7_spill] sm:$0xff] %v10353_v38  ;;  %9070 = vmatprep.mubr.msk.bf16.mxu1 %vm609_vm2, %v10353_v38  ;;  %v526_v55 = vsel %vm478_vm1, %v524_v40, %v525_v44  ;;  %v528_v56 = vsel %vm478_vm1, %v525_v44, %v527_v45  ;;  %v530_v57 = vrot.slane %v10361_v42, 1  ;;  %v532_v58 = vrot.slane %v10368_v47, 1  ;;  %v10396_v60 = vld [vmem:[%s10285_s21 + $0x108] sm:$0xff]  ;;  %v10399_v61 = vld [vmem:[%s10285_s21 + $0x110] sm:$0xff]  ;;  %v10412_v3 = vld [vmem:[%s10285_s21 + $0x60] sm:$0xff] }
  0x23   : > { %15254 = vst [vmem:[#allocation9_spill] sm:$0xff] %v10375_v49  ;;  %9055 = vmatmul.mubr.msk.bf16.vlgmr.msra.gmra.mxu0 %vm609_vm2, %v10375_v49  ;;  %v10403_v62 = vpack.c.bf16 %v528_v56, %v526_v55  ;;  %v491_v63 = vsel %vm478_vm1, %v489_v46, %v490_v50  ;;  %v493_v0 = vsel %vm478_vm1, %v490_v50, %v492_v51  ;;  %v494_v1 = vrot.slane %v10371_v48, 1  ;;  %v10409_v2 = vld [vmem:[%s10285_s21 + $0x118] sm:$0x3]  ;;  %v10415_v7 = vld [vmem:[%s10285_s21 + $0x68] sm:$0xff]  ;;  %v10426_v17 = vld [vmem:[%s10285_s21 + $0x120] sm:$0xff] }
  0x24   : > { %15256 = vst [vmem:[#allocation11_spill] sm:$0xff] %v10409_v2  ;;  %9121 = vmatpush3.bf16.msra.mxu0 %v1215_v22  ;;  %v10417_v8 = vpack.c.bf16 %v493_v0, %v491_v63  ;;  %v531_v9 = vsel %vm478_vm1, %v529_v52, %v530_v57  ;;  %v533_v13 = vsel %vm478_vm1, %v530_v57, %v532_v58  ;;  %v495_v14 = vrot.slane %v10381_v53, 1  ;;  %v10423_v16 = vld [vmem:[%s10285_s21 + $0x70] sm:$0x3]  ;;  %v10431_v18 = vld [vmem:[%s15125_s1 + $0x6] sm:$0x3] }
  0x25   : > { %15255 = vst [vmem:[#allocation10_spill] sm:$0xff] %v10403_v62  ;;  %9071 = vmatmul.mubr.msk.bf16.vlgmr.msra.gmra.mxu1 %vm609_vm2, %v10403_v62  ;;  %v10435_v22 = vpack.c.bf16 %v533_v13, %v531_v9  ;;  %v497_v23 = vrot.slane %v10393_v59, 1  ;;  %v534_v24 = vrot.slane %v10396_v60, 1  ;;  %v535_v25 = vrot.slane %v10399_v61, 1  ;;  %v10441_v26 = vld [vmem:[%s10285_s21 + $0x128] sm:$0xff]  ;;  %10013 = vmatprep.subr.msk.bf16.mxu0 %vm658_vm0, %v10386_v54  ;;  %v10456_v44 = vld [vmem:[%s10285_s21 + $0x78] sm:$0xff] }
  0x26   : > { %15257 = vst [vmem:[#allocation12_spill] sm:$0xff] %v10417_v8  ;;  %9087 = vmatpush3.bf16.msra.mxu1 %v10311_v15  ;;  %9058 = vmatprep.mubr.msk.bf16.mxu0 %vm609_vm2, %v10417_v8  ;;  %v496_v32 = vsel %vm478_vm1, %v494_v1, %v495_v14  ;;  %v537_v33 = vrot.slane %v10409_v2, 1  ;;  %v499_v39 = vrot.slane %v10412_v3, 1  ;;  %v500_v40 = vrot.slane %v10415_v7, 1  ;;  %v10453_v43 = vld [vmem:[%s10285_s21 + $0x130] sm:$0x3] }
  0x27   : > { %15258 = vst [vmem:[#allocation13_spill] sm:$0xff] %v10435_v22  ;;  %15259 = vst [vmem:[#allocation14_spill] sm:$0xff] %v10453_v43  ;;  %9074 = vmatprep.mubr.msk.bf16.mxu1 %vm609_vm2, %v10435_v22  ;;  %v498_v15 = vsel %vm478_vm1, %v495_v14, %v497_v23  ;;  %v536_v45 = vsel %vm478_vm1, %v534_v24, %v535_v25  ;;  %v502_v46 = vrot.slane %v10423_v16, 1  ;;  %v539_v50 = vrot.slane %v10426_v17, 1  ;;  %v10465_v51 = vld [vmem:[%s10285_s21 + $0x80] sm:$0xff]  ;;  %v10478_v63 = vld [vmem:[%s10285_s21 + $0x138] sm:$0xff] }
  0x28   : > { %v10468_v52 = vld [vmem:[%s10285_s21 + $0x88] sm:$0x3]  ;;  %10012 = vmatprep.subr.msk.bf16.mxu1 %vm658_vm0, %v10431_v18  ;;  %v10472_v55 = vpack.c.bf16 %v498_v15, %v496_v32  ;;  %v538_v56 = vsel %vm478_vm1, %v535_v25, %v537_v33  ;;  %v501_v57 = vsel %vm478_vm1, %v499_v39, %v500_v40  ;;  %v540_v58 = vrot.slane %v10441_v26, 1  ;;  %v10481_v0 = vld [vmem:[%s10285_s21 + $0x140] sm:$0xff]  ;;  %v10492_v24 = vld [vmem:[%s10285_s21 + $0x90] sm:$0xff]  ;;  %s10160_s12 = smov [#allocation3]  }
  0x29   : > { %v10484_v1 = vld [vmem:[%s10285_s21 + $0x148] sm:$0x3]  ;;  %v10486_v9 = vpack.c.bf16 %v538_v56, %v536_v45  ;;  %v503_v13 = vsel %vm478_vm1, %v500_v40, %v502_v46  ;;  %v542_v14 = vrot.slane %v10453_v43, 1  ;;  %v504_v23 = vrot.slane %v10456_v44, 1  ;;  %v10495_v25 = vld [vmem:[%s10285_s21 + $0x98] sm:$0xff]  ;;  %v10506_v45 = vld [vmem:[%s10285_s21 + $0x150] sm:$0xff] }
  0x2a   : > { %15260 = vst [vmem:[#allocation15_spill] sm:$0xff] %v10472_v55  ;;  %15261 = vst [vmem:[#allocation16_spill] sm:$0xff] %v10484_v1  ;;  %v10498_v32 = vld [vmem:[%s10285_s21 + $0xa0] sm:$0x3]  ;;  %v10500_v33 = vpack.c.bf16 %v503_v13, %v501_v57  ;;  %v541_v39 = vsel %vm478_vm1, %v539_v50, %v540_v58  ;;  %v505_v15 = vrot.slane %v10465_v51, 1  ;;  %v507_v40 = vrot.slane %v10468_v52, 1 }
  0x2b   : > { %15262 = vst [vmem:[#allocation17_spill] sm:$0xff] %v10486_v9  ;;  %v10509_v46 = vld [vmem:[%s10285_s21 + $0x158] sm:$0xff]  ;;  %v10512_v56 = vld [vmem:[%s10285_s21 + $0x160] sm:$0x3]  ;;  %9059 = vmatmul.mubr.msk.bf16.gmra.mxu0 %vm609_vm2, %v10472_v55  ;;  %v543_v57 = vsel %vm478_vm1, %v540_v58, %v542_v14  ;;  %v544_v50 = vrot.slane %v10478_v63, 1  ;;  %v545_v13 = vrot.slane %v10481_v0, 1 }
  0x2c   : > { %15263 = vst [vmem:[#allocation18_spill] sm:$0xff] %v10500_v33  ;;  %15264 = vst [vmem:[#allocation19_spill] sm:$0xff] %v10512_v56  ;;  %v547_v37 = vrot.slane %v10484_v1, 1  ;;  %v10521_v30 = vld [vmem:[%s10285_s21 + $0xa8] sm:$0xff]  ;;  %v10524_v31 = vld [vmem:[%s10285_s21 + $0xb8] sm:$0x3]  ;;  %9062 = vmatprep.mubr.msk.bf16.mxu0 %vm609_vm2, %v10500_v33  ;;  %v10528_v22 = vpack.c.bf16 %v543_v57, %v541_v39  ;;  %v506_v62 = vsel %vm478_vm1, %v504_v23, %v505_v15 }
  0x2d   : > { %v508_v58 = vsel %vm478_vm1, %v505_v15, %v507_v40  ;;  %v509_v14 = vrot.slane %v10492_v24, 1  ;;  %v10534_v38 = vld [vmem:[%s10285_s21 + $0xb0] sm:$0xff]  ;;  %9075 = vmatmul.mubr.msk.bf16.gmra.mxu1 %vm609_vm2, %v10486_v9  ;;  %v546_v55 = vsel %vm478_vm1, %v544_v50, %v545_v13  ;;  %v510_v8 = vrot.slane %v10495_v25, 1  ;;  %v10541_v49 = vld [vmem:[%s10285_s21 + $0x168] sm:$0xff]  ;;  %v10558_v43 = vld [vmem:[%s10285_s21 + $0x178] sm:$0x3] }
  0x2e   : > { %15265 = vst [vmem:[#allocation20_spill] sm:$0xff] %v10528_v22  ;;  %9078 = vmatprep.mubr.msk.bf16.mxu1 %vm609_vm2, %v10528_v22  ;;  %v548_v23 = vsel %vm478_vm1, %v545_v13, %v547_v37  ;;  %v512_v39 = vrot.slane %v10498_v32, 1  ;;  %v549_v15 = vrot.slane %v10506_v45, 1  ;;  %v550_v40 = vrot.slane %v10509_v46, 1  ;;  %v10550_v57 = vld [vmem:[%s10285_s21 + $0x170] sm:$0xff]  ;;  %s10101_s18 = sshll.u32 %s10160_s12, 4  ;;  %s10102_s18 = int_to_ptr.vmem [resolvable:$false] %s10101_s18 }
  0x2f   : > { %v10552_v9 = vpack.c.bf16 %v508_v58, %v506_v62  ;;  %v511_v50 = vsel %vm478_vm1, %v509_v14, %v510_v8  ;;  %v552_v33 = vrot.slane %v10512_v56, 1  ;;  %v514_v1 = vrot.slane %v10521_v30, 1  ;;  %s10103_s20 = scalar_lea.vmem %s10102_s18, 8192  ;;  %p10104_p0 = scmp.lt.s32.totalorder %s15076_s27, %s10102_s18 }
  0x30   : > { %v513_v37 = vsel %vm478_vm1, %v510_v8, %v512_v39  ;;  %v551_v13 = vsel %vm478_vm1, %v549_v15, %v550_v40  ;;  %v515_v22 = vrot.slane %v10534_v38, 1  ;;  %v517_v2 = vrot.slane %v10524_v31, 1  ;;  %p10105_p1 = scmp.lt.s32.totalorder %s10103_s20, %s10097_s11 }
  0x31   : > { %v10564_v47 = vpack.c.bf16 %v548_v23, %v546_v55  ;;  %v10566_v62 = vpack.c.bf16 %v513_v37, %v511_v50  ;;  %v553_v58 = vsel %vm478_vm1, %v550_v40, %v552_v33  ;;  %v554_v14 = vrot.slane %v10541_v49, 1 }
  0x32   : > { %v10570_v56 = vpack.c.bf16 %v553_v58, %v551_v13  ;;  %v555_v29 = vrot.slane %v10550_v57, 1  ;;  %v557_v8 = vrot.slane %v10558_v43, 1  ;;  %v516_v55 = vsel %vm478_vm1, %v514_v1, %v515_v22  ;;  %p10106_p2 = por %p10105_p1, %p10104_p0 }
  0x33   : > { %15266 = vst [vmem:[#allocation21_spill] sm:$0xff] %v10564_v47  ;;  %9063 = vmatmul.mubr.msk.bf16.gmra.mxu0 %vm609_vm2, %v10552_v9  ;;  %v518_v23 = vsel %vm478_vm1, %v515_v22, %v517_v2  ;;  %v15267_v33 = vrot.slane %v10291_v5, 2  ;;  %v15268_v39 = vrot.slane %v10288_v4, 2  ;;  %v15269_v40 = vrot.slane %v10294_v6, 2 }
  0x34   : > { %9066 = vmatprep.mubr.msk.bf16.mxu0 %vm609_vm2, %v10566_v62  ;;  %v556_v2 = vsel %vm478_vm1, %v554_v14, %v555_v29  ;;  %v558_v22 = vsel %vm478_vm1, %v555_v29, %v557_v8  ;;  %v1041_v1 = vrot.slane %v10317_v19, 2  ;;  %v1042_v13 = vrot.slane %v10320_v20, 2  ;;  %p10107_p3 = pnand %p10106_p2, %p10100_p13 }
  0x35   : > { %9079 = vmatmul.mubr.msk.bf16.gmra.mxu1 %vm609_vm2, %v10564_v47  ;;  %v1038_v15 = vsel %vm1035_vm3, %v15268_v39, %v15267_v33  ;;  %v15270_v50 = vmov %v15267_v33  ;;  %v10598_v58 = vpack.c.bf16 %v518_v23, %v516_v55  ;;  %v1044_v33 = vrot.slane %v10323_v21, 2 }
  0x36   : > { %v1040_v37 = vsel %vm1035_vm3, %v15270_v50, %v15269_v40  ;;  %9082 = vmatprep.mubr.msk.bf16.mxu1 %vm609_vm2, %v10570_v56  ;;  %v1046_v39 = vrot.slane %v10343_v34, 2  ;;  %v10602_v47 = vpack.c.bf16 %v558_v22, %v556_v2  ;;  %v1047_v40 = vrot.slane %v10346_v35, 2 }
  0x37   : > { %v1148_v6 = vpack.c.bf16 %v1040_v37, %v1038_v15  ;;  %v1049_v50 = vrot.slane %v10358_v41, 2  ;;  %v413_v29 = vpack.c.bf16 %v10291_v5, %v10288_v4  ;;  %v1043_v14 = vsel %vm1035_vm3, %v1041_v1, %v1042_v13 }
  0x38   : > { %v1045_v21 = vsel %vm1035_vm3, %v1042_v13, %v1044_v33  ;;  %v1048_v8 = vsel %vm1035_vm3, %v1046_v39, %v1047_v40  ;;  %v1629_v4 = vsel %vm658_vm0, %v10386_v54, 0  ;;  %v1051_v41 = vrot.slane %v10371_v48, 2  ;;  %v10653_v39 = vld [vmem:[%s15125_s1 + $0xc] sm:$0x3] }
  0x39   : > { %v1050_v55 = vsel %vm1035_vm3, %v1047_v40, %v1049_v50  ;;  %v10620_v5 = vpack.c.bf16 %v1045_v21, %v1043_v14  ;;  %v1052_v23 = vrot.slane %v10381_v53, 2  ;;  %v10626_v15 = vpack.c.bf16 %v10303_v11, %v10300_v10 }
  0x3a   : > { %v10628_v37 = vpack.c.bf16 %v1050_v55, %v1048_v8  ;;  %v1054_v2 = vrot.slane %v10393_v59, 2  ;;  %v1056_v22 = vrot.slane %v10412_v3, 2  ;;  %v10634_v1 = vpack.c.bf16 %v10333_v28, %v10330_v27 }
  0x3b   : > { %9067 = vmatmul.mubr.msk.bf16.gmra.mxu0 %vm609_vm2, %v10598_v58  ;;  %v10638_v54 = vpack.c.bf16 %v10320_v20, %v10317_v19  ;;  %v1057_v13 = vrot.slane %v10415_v7, 2  ;;  %v1059_v33 = vrot.slane %v10423_v16, 2  ;;  %v10648_v59 = vpack.c.bf16 %v10346_v35, %v10343_v34  ;;  %v10670_v16 = vld [vmem:[%s15125_s1 + $0xa] sm:$0x3] }
  0x3c   : > { %9122 = vmatprep.mubr.msk.bf16.mxu0 %vm609_vm2, %v1148_v6  ;;  %v10644_v6 = vpack.c.bf16 %v10361_v42, %v10349_v36  ;;  %v1417_v19 = vsel %vm658_vm0, %v10431_v18, 0  ;;  %v1053_v20 = vsel %vm1035_vm3, %v1051_v41, %v1052_v23  ;;  %v1055_v34 = vsel %vm1035_vm3, %v1052_v23, %v1054_v2 }
  0x3d   : > { %9083 = vmatmul.mubr.msk.bf16.gmra.mxu1 %vm609_vm2, %v10602_v47  ;;  %v10665_v35 = vpack.c.bf16 %v10399_v61, %v10396_v60  ;;  %v1058_v18 = vsel %vm1035_vm3, %v1056_v22, %v1057_v13  ;;  %v1060_v40 = vsel %vm1035_vm3, %v1057_v13, %v1059_v33  ;;  %v10678_v50 = vpack.c.bf16 %v10441_v26, %v10426_v17 }
  0x3e   : > { %9088 = vmatprep.mubr.msk.bf16.mxu1 %vm609_vm2, %v413_v29  ;;  %v1061_v29 = vrot.slane %v10456_v44, 2  ;;  %v1062_v14 = vrot.slane %v10465_v51, 2  ;;  %v10686_v21 = vpack.c.bf16 %v1055_v34, %v1053_v20  ;;  %v10690_v8 = vpack.c.bf16 %v10481_v0, %v10478_v63 }
  0x3f   : > { %v10694_v55 = vpack.c.bf16 %v1060_v40, %v1058_v18  ;;  %v1066_v41 = vrot.slane %v10492_v24, 2  ;;  %v10700_v23 = vpack.c.bf16 %v10381_v53, %v10371_v48  ;;  %v1067_v2 = vrot.slane %v10495_v25, 2 }
  0x40   : > { %v1069_v22 = vrot.slane %v10498_v32, 2  ;;  %v10706_v13 = vpack.c.bf16 %v10509_v46, %v10506_v45  ;;  %v10710_v33 = vpack.c.bf16 %v10415_v7, %v10412_v3  ;;  %v1063_v48 = vsel %vm1035_vm3, %v1061_v29, %v1062_v14 }
  0x41   : > { %v1068_v3 = vsel %vm1035_vm3, %v1066_v41, %v1067_v2  ;;  %v1072_v20 = vrot.slane %v10534_v38, 2  ;;  %v1074_v34 = vrot.slane %v10524_v31, 2  ;;  %v1079_v40 = vrot.slane %v10306_v12, 2 }
  0x42   : > { %v1070_v7 = vsel %vm1035_vm3, %v1067_v2, %v1069_v22  ;;  %v10738_v29 = vpack.c.bf16 %v10465_v51, %v10456_v44  ;;  %v10744_v41 = vpack.c.bf16 %v10495_v25, %v10492_v24  ;;  %v1081_v24 = vrot.slane %v10330_v27, 2  ;;  %v15271_v2 = vld [vmem:[#allocation6_spill] sm:$0xff] }
  0x43   : > { %9123 = vmatmul.mubr.msk.bf16.vlgmr.msra.gmra.mxu0 %vm609_vm2, %v10620_v5  ;;  %v10733_v18 = vpack.c.bf16 %v1070_v7, %v1068_v3  ;;  %v1075_v31 = vsel %vm1035_vm3, %v1072_v20, %v1074_v34  ;;  %v1082_v25 = vrot.slane %v10333_v28, 2  ;;  %v1084_v22 = vrot.slane %v15271_v2, 2  ;;  %v15272_v7 = vld [vmem:[#allocation8_spill] sm:$0xff] }
  0x44   : > { %9189 = vmatpush3.bf16.msra.mxu0 %v1629_v4  ;;  %9126 = vmatprep.mubr.msk.bf16.mxu0 %vm609_vm2, %v10628_v37  ;;  %v1064_v4 = vrot.slane %v10468_v52, 2  ;;  %v10714_v52 = vpack.c.bf16 %v10550_v57, %v10541_v49  ;;  %v1087_v3 = vrot.slane %v10361_v42, 2  ;;  %v1092_v34 = vrot.slane %v10399_v61, 2 }
  0x45   : > { %9089 = vmatmul.mubr.msk.bf16.vlgmr.msra.gmra.mxu1 %vm609_vm2, %v10638_v54  ;;  %10015 = vmatprep.subr.msk.bf16.mxu0 %vm658_vm0, %v10653_v39  ;;  %v1083_v27 = vsel %vm1035_vm3, %v1081_v24, %v1082_v25  ;;  %v1085_v28 = vsel %vm1035_vm3, %v1082_v25, %v1084_v22  ;;  %v1101_v25 = vrot.slane %v10478_v63, 2  ;;  %v1102_v2 = vrot.slane %v10481_v0, 2  ;;  %v15275_v22 = vld [vmem:[#allocation16_spill] sm:$0xff] }
  0x46   : > { %9155 = vmatpush3.bf16.msra.mxu1 %v1417_v19  ;;  %9092 = vmatprep.mubr.msk.bf16.mxu1 %vm609_vm2, %v10648_v59  ;;  %v1065_v53 = vsel %vm1035_vm3, %v1062_v14, %v1064_v4  ;;  %v1071_v19 = vrot.slane %v10521_v30, 2  ;;  %v1076_v14 = vrot.slane %v10300_v10, 2  ;;  %v1077_v4 = vrot.slane %v10303_v11, 2 }
  0x47   : > { %10014 = vmatprep.subr.msk.bf16.mxu1 %vm658_vm0, %v10670_v16  ;;  %v10728_v32 = vpack.c.bf16 %v1065_v53, %v1063_v48  ;;  %v10767_v48 = vpack.c.bf16 %v10534_v38, %v10521_v30  ;;  %v1086_v53 = vrot.slane %v10349_v36, 2  ;;  %v10784_v38 = vpack.c.bf16 %v1085_v28, %v1083_v27 }
  0x48   : > { %v1073_v12 = vsel %vm1035_vm3, %v1071_v19, %v1072_v20  ;;  %v1078_v10 = vsel %vm1035_vm3, %v1076_v14, %v1077_v4  ;;  %v1080_v11 = vsel %vm1035_vm3, %v1077_v4, %v1079_v40  ;;  %v1089_v19 = vrot.slane %v15272_v7, 2  ;;  %v15273_v40 = vld [vmem:[#allocation11_spill] sm:$0xff] }
  0x49   : > { %v10758_v44 = vpack.c.bf16 %v1075_v31, %v1073_v12  ;;  %v10760_v51 = vpack.c.bf16 %v1080_v11, %v1078_v10  ;;  %v1088_v30 = vsel %vm1035_vm3, %v1086_v53, %v1087_v3  ;;  %v1091_v20 = vrot.slane %v10396_v60, 2  ;;  %v15274_v31 = vld [vmem:[#allocation14_spill] sm:$0xff] }
  0x4a   : > { %v1090_v36 = vsel %vm1035_vm3, %v1087_v3, %v1089_v19  ;;  %v1094_v14 = vrot.slane %v15273_v40, 2  ;;  %v1096_v4 = vrot.slane %v10426_v17, 2  ;;  %v1097_v12 = vrot.slane %v10441_v26, 2  ;;  %v15276_v19 = vld [vmem:[#allocation19_spill] sm:$0xff] }
  0x4b   : > { %9127 = vmatmul.mubr.msk.bf16.gmra.mxu0 %vm609_vm2, %v10686_v21  ;;  %v10786_v42 = vpack.c.bf16 %v1090_v36, %v1088_v30  ;;  %v1099_v10 = vrot.slane %v15274_v31, 2  ;;  %v1093_v11 = vsel %vm1035_vm3, %v1091_v20, %v1092_v34  ;;  %v1104_v53 = vrot.slane %v15275_v22, 2  ;;  %v409_v31 = vld [vmem:[%s10285_s21 + $0x190] sm:$0x3]  ;;  %v15278_v22 = vld [vmem:[#allocation12_spill] sm:$0xff] }
  0x4c   : > { %9130 = vmatprep.mubr.msk.bf16.mxu0 %vm609_vm2, %v10694_v55  ;;  %v1095_v60 = vsel %vm1035_vm3, %v1092_v34, %v1094_v14  ;;  %v1098_v61 = vsel %vm1035_vm3, %v1096_v4, %v1097_v12  ;;  %v1106_v3 = vrot.slane %v10506_v45, 2  ;;  %v1107_v7 = vrot.slane %v10509_v46, 2  ;;  %v407_v4 = vld [vmem:[%s10285_s21 + $0x180] sm:$0xff] }
  0x4d   : > { %9093 = vmatmul.mubr.msk.bf16.gmra.mxu1 %vm609_vm2, %v10700_v23  ;;  %v1100_v17 = vsel %vm1035_vm3, %v1097_v12, %v1099_v10  ;;  %v10806_v26 = vpack.c.bf16 %v1095_v60, %v1093_v11  ;;  %v1109_v27 = vrot.slane %v15276_v19, 2  ;;  %v1103_v28 = vsel %vm1035_vm3, %v1101_v25, %v1102_v2  ;;  %v408_v12 = vld [vmem:[%s10285_s21 + $0x188] sm:$0xff] }
  0x4e   : > { %9096 = vmatprep.mubr.msk.bf16.mxu1 %vm609_vm2, %v10710_v33  ;;  %v10808_v24 = vpack.c.bf16 %v1100_v17, %v1098_v61  ;;  %v1105_v63 = vsel %vm1035_vm3, %v1102_v2, %v1104_v53  ;;  %v1108_v0 = vsel %vm1035_vm3, %v1106_v3, %v1107_v7  ;;  %v1111_v36 = vrot.slane %v10541_v49, 2  ;;  %v15277_v17 = vld [vmem:[#allocation9_spill] sm:$0xff]  ;;  %v8158_v2 = vld [vmem:[%s15125_s1 + $0x10] sm:$0x3]  ;;  %v15279_v3 = vld [vmem:[#allocation15_spill] sm:$0xff] }
  0x4f   : > { %v1110_v45 = vsel %vm1035_vm3, %v1107_v7, %v1109_v27  ;;  %v10828_v46 = vpack.c.bf16 %v1105_v63, %v1103_v28  ;;  %v1112_v20 = vrot.slane %v10550_v57, 2  ;;  %v1114_v34 = vrot.slane %v10558_v43, 2  ;;  %v15282_v7 = vld [vmem:[#allocation10_spill] sm:$0xff]  ;;  %v15283_v19 = vld [vmem:[#allocation13_spill] sm:$0xff]  ;;  %v15285_v28 = vld [vmem:[#allocation20_spill] sm:$0xff] }
  0x50   : > { %v10830_v30 = vpack.c.bf16 %v1110_v45, %v1108_v0  ;;  %v1824_v49 = vrot.slane %v407_v4, 2  ;;  %v1825_v43 = vrot.slane %v408_v12, 2  ;;  %v1827_v10 = vrot.slane %v409_v31, 2  ;;  %v15284_v27 = vld [vmem:[#allocation17_spill] sm:$0xff] }
  0x51   : > { %v1113_v40 = vsel %vm1035_vm3, %v1111_v36, %v1112_v20  ;;  %v1115_v14 = vsel %vm1035_vm3, %v1112_v20, %v1114_v34  ;;  %v2040_v25 = vsel %vm658_vm0, %v10653_v39, 0  ;;  %v1838_v53 = vsel %vm658_vm0, %v10670_v16, 0  ;;  %v15280_v39 = vld [vmem:[#allocation18_spill] sm:$0xff]  ;;  %v15281_v16 = vld [vmem:[#allocation7_spill] sm:$0xff]  ;;  %v15286_v63 = vld [vmem:[#allocation21_spill] sm:$0xff] }
  0x52   : > { %v10847_v57 = vpack.c.bf16 %v1115_v14, %v1113_v40  ;;  %v1826_v11 = vsel %vm1035_vm3, %v1824_v49, %v1825_v43  ;;  %v1828_v60 = vsel %vm1035_vm3, %v1825_v43, %v1827_v10  ;;  %v1615_v0 = vrot.slane %v407_v4, 1  ;;  %v11021_v10 = vld [vmem:[%s10285_s21 + $0x198] sm:$0xff] }
  0x53   : > { %9131 = vmatmul.mubr.msk.bf16.gmra.mxu0 %vm609_vm2, %v10728_v32  ;;  %v10854_v61 = vpack.c.bf16 %v1828_v60, %v1826_v11  ;;  %v1616_v45 = vrot.slane %v408_v12, 1  ;;  %v1618_v36 = vrot.slane %v409_v31, 1  ;;  %v1410_v14 = vpack.c.bf16 %v408_v12, %v407_v4  ;;  %v11024_v11 = vld [vmem:[%s10285_s21 + $0x1a0] sm:$0xff] }
  0x54   : > { %9134 = vmatprep.mubr.msk.bf16.mxu0 %vm609_vm2, %v10733_v18  ;;  %v2461_v49 = vsel %vm658_vm0, %v8158_v2, 0 }
  0x55   : > { %9097 = vmatmul.mubr.msk.bf16.gmra.mxu1 %vm609_vm2, %v10738_v29  ;;  %v1617_v20 = vsel %vm478_vm1, %v1615_v0, %v1616_v45  ;;  %v1619_v34 = vsel %vm478_vm1, %v1616_v45, %v1618_v36 }
  0x56   : > { %9100 = vmatprep.mubr.msk.bf16.mxu1 %vm609_vm2, %v10744_v41  ;;  %v10932_v40 = vpack.c.bf16 %v1619_v34, %v1617_v20 }
  0x58   : > { %15287 = vst [vmem:[#allocation6_spill] sm:$0xff] %v10932_v40 }
  0x5b   : > { %9135 = vmatmul.mubr.msk.bf16.gmra.mxu0 %vm609_vm2, %v10758_v44 }
  0x5c   : > { %9138 = vmatprep.mubr.msk.bf16.mxu0 %vm609_vm2, %v10760_v51 }
  0x5d   : > { %9101 = vmatmul.mubr.msk.bf16.gmra.mxu1 %vm609_vm2, %v10767_v48 }
  0x5e   : > { %9104 = vmatprep.mubr.msk.bf16.mxu1 %vm609_vm2, %v10626_v15 }
  0x63   : > { %9139 = vmatmul.mubr.msk.bf16.gmra.mxu0 %vm609_vm2, %v10784_v38 }
  0x64   : > { %9142 = vmatprep.mubr.msk.bf16.mxu0 %vm609_vm2, %v10786_v42 }
  0x65   : > { %9105 = vmatmul.mubr.msk.bf16.gmra.mxu1 %vm609_vm2, %v10634_v1 }
  0x66   : > { %9108 = vmatprep.mubr.msk.bf16.mxu1 %vm609_vm2, %v10644_v6 }
  0x6b   : > { %9143 = vmatmul.mubr.msk.bf16.gmra.mxu0 %vm609_vm2, %v10806_v26 }
  0x6c   : > { %9146 = vmatprep.mubr.msk.bf16.mxu0 %vm609_vm2, %v10808_v24 }
  0x6d   : > { %9109 = vmatmul.mubr.msk.bf16.gmra.mxu1 %vm609_vm2, %v10665_v35 }
  0x6e   : > { %9112 = vmatprep.mubr.msk.bf16.mxu1 %vm609_vm2, %v10678_v50 }
  0x73   : > { %9147 = vmatmul.mubr.msk.bf16.gmra.mxu0 %vm609_vm2, %v10828_v46 }
  0x74   : > { %9150 = vmatprep.mubr.msk.bf16.mxu0 %vm609_vm2, %v10830_v30 }
  0x75   : > { %9113 = vmatmul.mubr.msk.bf16.gmra.mxu1 %vm609_vm2, %v10690_v8 }
  0x76   : > { %9116 = vmatprep.mubr.msk.bf16.mxu1 %vm609_vm2, %v10706_v13 }
  0x7b   : > { %9151 = vmatmul.mubr.msk.bf16.gmra.mxu0 %vm609_vm2, %v10847_v57 }
  0x7c   : > { %9190 = vmatprep.mubr.msk.bf16.mxu0 %vm609_vm2, %v15277_v17 }
  0x7d   : > { %9117 = vmatmul.mubr.msk.bf16.gmra.mxu1 %vm609_vm2, %v10714_v52 }
  0x7e   : > { %9156 = vmatprep.mubr.msk.bf16.mxu1 %vm609_vm2, %v10638_v54  ;;  %v8141_v54 = vld [vmem:[%s15125_s1 + $0xe] sm:$0x3] }
  0x7f   : > { %v2252_v43 = vsel %vm658_vm0, %v8141_v54, 0 }
  0x83   : > { %9191 = vmatmul.mubr.msk.bf16.vlgmr.msra.gmra.mxu0 %vm609_vm2, %v15278_v22 }
  0x84   : > { %9257 = vmatpush3.bf16.msra.mxu0 %v2040_v25  ;;  %9194 = vmatprep.mubr.msk.bf16.mxu0 %vm609_vm2, %v15279_v3 }
  0x85   : > { %9157 = vmatmul.mubr.msk.bf16.vlgmr.msra.gmra.mxu1 %vm609_vm2, %v10648_v59  ;;  %10017 = vmatprep.subr.msk.bf16.mxu0 %vm658_vm0, %v8158_v2 }
  0x86   : > { %9223 = vmatpush3.bf16.msra.mxu1 %v1838_v53  ;;  %9160 = vmatprep.mubr.msk.bf16.mxu1 %vm609_vm2, %v10700_v23 }
  0x87   : > { %10016 = vmatprep.subr.msk.bf16.mxu1 %vm658_vm0, %v8141_v54 }
  0x8b   : > { %9195 = vmatmul.mubr.msk.bf16.gmra.mxu0 %vm609_vm2, %v15280_v39 }
  0x8c   : > { %9198 = vmatprep.mubr.msk.bf16.mxu0 %vm609_vm2, %v10552_v9 }
  0x8d   : > { %9161 = vmatmul.mubr.msk.bf16.gmra.mxu1 %vm609_vm2, %v10710_v33 }
  0x8e   : > { %9164 = vmatprep.mubr.msk.bf16.mxu1 %vm609_vm2, %v10738_v29 }
  0x93   : > { %9199 = vmatmul.mubr.msk.bf16.gmra.mxu0 %vm609_vm2, %v10566_v62 }
  0x94   : > { %9202 = vmatprep.mubr.msk.bf16.mxu0 %vm609_vm2, %v10598_v58 }
  0x95   : > { %9165 = vmatmul.mubr.msk.bf16.gmra.mxu1 %vm609_vm2, %v10744_v41 }
  0x96   : > { %9168 = vmatprep.mubr.msk.bf16.mxu1 %vm609_vm2, %v10767_v48 }
  0x9b   : > { %9203 = vmatmul.mubr.msk.bf16.gmra.mxu0 %vm609_vm2, %v15281_v16 }
  0x9c   : > { %9206 = vmatprep.mubr.msk.bf16.mxu0 %vm609_vm2, %v15282_v7 }
  0x9d   : > { %9169 = vmatmul.mubr.msk.bf16.gmra.mxu1 %vm609_vm2, %v10626_v15 }
  0x9e   : > { %9172 = vmatprep.mubr.msk.bf16.mxu1 %vm609_vm2, %v10634_v1 }
  0xa3   : > { %9207 = vmatmul.mubr.msk.bf16.gmra.mxu0 %vm609_vm2, %v15283_v19 }
  0xa4   : > { %9210 = vmatprep.mubr.msk.bf16.mxu0 %vm609_vm2, %v15284_v27 }
  0xa5   : > { %9173 = vmatmul.mubr.msk.bf16.gmra.mxu1 %vm609_vm2, %v10644_v6 }
  0xa6   : > { %9176 = vmatprep.mubr.msk.bf16.mxu1 %vm609_vm2, %v10665_v35 }
  0xab   : > { %9211 = vmatmul.mubr.msk.bf16.gmra.mxu0 %vm609_vm2, %v15285_v28 }
  0xac   : > { %9214 = vmatprep.mubr.msk.bf16.mxu0 %vm609_vm2, %v15286_v63 }
  0xad   : > { %9177 = vmatmul.mubr.msk.bf16.gmra.mxu1 %vm609_vm2, %v10678_v50 }
  0xae   : > { %9180 = vmatprep.mubr.msk.bf16.mxu1 %vm609_vm2, %v10690_v8 }
  0xb3   : > { %9215 = vmatmul.mubr.msk.bf16.gmra.mxu0 %vm609_vm2, %v10570_v56 }
  0xb4   : > { %9218 = vmatprep.mubr.msk.bf16.mxu0 %vm609_vm2, %v10602_v47 }
  0xb5   : > { %9181 = vmatmul.mubr.msk.bf16.gmra.mxu1 %vm609_vm2, %v10706_v13 }
  0xb6   : > { %9184 = vmatprep.mubr.msk.bf16.mxu1 %vm609_vm2, %v10714_v52 }
  0xbb   : > { %9219 = vmatmul.mubr.msk.bf16.gmra.mxu0 %vm609_vm2, %v10932_v40 }
  0xbc   : > { %9258 = vmatprep.mubr.msk.bf16.mxu0 %vm609_vm2, %v10648_v59 }
  0xbd   : > { %9185 = vmatmul.mubr.msk.bf16.gmra.mxu1 %vm609_vm2, %v1410_v14 }
  0xbe   : > { %9224 = vmatprep.mubr.msk.bf16.mxu1 %vm609_vm2, %v10620_v5 }
  0xc3   : > { %9259 = vmatmul.mubr.msk.bf16.vlgmr.msra.gmra.mxu0 %vm609_vm2, %v10700_v23 }
  0xc4   : > { %9325 = vmatpush3.bf16.msra.mxu0 %v2461_v49  ;;  %9262 = vmatprep.mubr.msk.bf16.mxu0 %vm609_vm2, %v10710_v33 }
  0xc5   : > { %9225 = vmatmul.mubr.msk.bf16.vlgmr.msra.gmra.mxu1 %vm609_vm2, %v10628_v37 }
  0xc6   : > { %9291 = vmatpush3.bf16.msra.mxu1 %v2252_v43  ;;  %9228 = vmatprep.mubr.msk.bf16.mxu1 %vm609_vm2, %v10686_v21 }
  0xcb   : > { %9263 = vmatmul.mubr.msk.bf16.gmra.mxu0 %vm609_vm2, %v10738_v29 }
  0xcc   : > { %9266 = vmatprep.mubr.msk.bf16.mxu0 %vm609_vm2, %v10744_v41 }
  0xcd   : > { %9229 = vmatmul.mubr.msk.bf16.gmra.mxu1 %vm609_vm2, %v10694_v55 }
  0xce   : > { %9232 = vmatprep.mubr.msk.bf16.mxu1 %vm609_vm2, %v10728_v32 }
  0xd3   : > { %9267 = vmatmul.mubr.msk.bf16.gmra.mxu0 %vm609_vm2, %v10767_v48 }
  0xd4   : > { %9270 = vmatprep.mubr.msk.bf16.mxu0 %vm609_vm2, %v10626_v15 }
  0xd5   : > { %9233 = vmatmul.mubr.msk.bf16.gmra.mxu1 %vm609_vm2, %v10733_v18 }
  0xd6   : > { %9236 = vmatprep.mubr.msk.bf16.mxu1 %vm609_vm2, %v10758_v44 }
  0xdb   : > { %9271 = vmatmul.mubr.msk.bf16.gmra.mxu0 %vm609_vm2, %v10634_v1 }
  0xdc   : > { %9274 = vmatprep.mubr.msk.bf16.mxu0 %vm609_vm2, %v10644_v6 }
  0xdd   : > { %9237 = vmatmul.mubr.msk.bf16.gmra.mxu1 %vm609_vm2, %v10760_v51 }
  0xde   : > { %9240 = vmatprep.mubr.msk.bf16.mxu1 %vm609_vm2, %v10784_v38 }
  0xe3   : > { %v9056_v5 = vpop.f32.mrf.mxu0  ;;  %9275 = vmatmul.mubr.msk.bf16.gmra.mxu0 %vm609_vm2, %v10665_v35 }
  0xe4   : > { %9278 = vmatprep.mubr.msk.bf16.mxu0 %vm609_vm2, %v10678_v50 }
  0xe5   : > { %v10979_v15 = vpop.f32.mrf.mxu1  ;;  %9241 = vmatmul.mubr.msk.bf16.gmra.mxu1 %vm609_vm2, %v10786_v42  ;;  %v696_v1 = vpop.f32.mrf.mxu0 }
  0xe6   : > { %9244 = vmatprep.mubr.msk.bf16.mxu1 %vm609_vm2, %v10806_v26 }
  0xe7   : > { %v10985_v6 = vpop.f32.mrf.mxu1  ;;  %v9057_v59 = vpop.f32.mrf.mxu0 }
  0xe9   : > { %v10987_v23 = vpop.f32.mrf.mxu1  ;;  %v699_v33 = vpop.f32.mrf.mxu0 }
  0xeb   : > { %v10989_v29 = vpop.f32.mrf.mxu1  ;;  %v10991_v35 = vpop.f32.mrf.mxu0  ;;  %9279 = vmatmul.mubr.msk.bf16.gmra.mxu0 %vm609_vm2, %v10690_v8 }
  0xec   : > { %15288 = vst [vmem:[#allocation8_spill] sm:$0xff] %v10989_v29  ;;  %9282 = vmatprep.mubr.msk.bf16.mxu0 %vm609_vm2, %v10706_v13 }
  0xed   : > { %v10997_v50 = vpop.f32.mrf.mxu1  ;;  %9245 = vmatmul.mubr.msk.bf16.gmra.mxu1 %vm609_vm2, %v10808_v24  ;;  %v11001_v41 = vpop.f32.mrf.mxu0 }
  0xee   : > { %9248 = vmatprep.mubr.msk.bf16.mxu1 %vm609_vm2, %v10828_v46 }
  0xef   : > { %v11005_v48 = vpop.f32.mrf.mxu1  ;;  %v11007_v4 = vpop.f32.mrf.mxu0 }
  0xf1   : > { %v11009_v12 = vpop.f32.mrf.mxu1  ;;  %v11011_v8 = vpop.f32.mrf.mxu0 }
  0xf3   : > { %v11013_v31 = vpop.f32.mrf.mxu1  ;;  %v11015_v13 = vpop.f32.mrf.mxu0  ;;  %9283 = vmatmul.mubr.msk.bf16.gmra.mxu0 %vm609_vm2, %v10714_v52  ;;  %v2033_v52 = vpack.c.bf16 %v11024_v11, %v11021_v10 }
  0xf4   : > { %15289 = vst [vmem:[#allocation11_spill] sm:$0xff] %v11013_v31  ;;  %9286 = vmatprep.mubr.msk.bf16.mxu0 %vm609_vm2, %v1410_v14 }
  0xf5   : > { %v11026_v60 = vpop.f32.mrf.mxu1  ;;  %9249 = vmatmul.mubr.msk.bf16.gmra.mxu1 %vm609_vm2, %v10830_v30  ;;  %v11030_v17 = vpop.f32.mrf.mxu0 }
  0xf6   : > { %9252 = vmatprep.mubr.msk.bf16.mxu1 %vm609_vm2, %v10847_v57 }
  0xf7   : > { %v11034_v25 = vpop.f32.mrf.mxu1  ;;  %v11036_v2 = vpop.f32.mrf.mxu0 }
  0xf8   : > { %15290 = vst [vmem:[#allocation14_spill] sm:$0xff] %v11034_v25 }
  0xf9   : > { %v11040_v53 = vpop.f32.mrf.mxu1  ;;  %v11042_v54 = vpop.f32.mrf.mxu0 }
  0xfa   : > { %15291 = vst [vmem:[#allocation16_spill] sm:$0xff] %v11040_v53 }
  0xfb   : > { %v11044_v0 = vpop.f32.mrf.mxu1  ;;  %v11046_v45 = vpop.f32.mrf.mxu0  ;;  %9287 = vmatmul.mubr.msk.bf16.gmra.mxu0 %vm609_vm2, %v2033_v52 }
  0xfc   : > { %15292 = vst [vmem:[#allocation19_spill] sm:$0xff] %v11044_v0  ;;  %9326 = vmatprep.mubr.msk.bf16.mxu0 %vm609_vm2, %v10628_v37 }
  0xfd   : > { %v11051_v36 = vpop.f32.mrf.mxu1  ;;  %9253 = vmatmul.mubr.msk.bf16.gmra.mxu1 %vm609_vm2, %v10854_v61  ;;  %v11055_v20 = vpop.f32.mrf.mxu0 }
  0xfe   : > { %15293 = vst [vmem:[#allocation9_spill] sm:$0xff] %v11051_v36  ;;  %9292 = vmatprep.mubr.msk.bf16.mxu1 %vm609_vm2, %v15278_v22 }
  0xff   : > { %v11059_v34 = vpop.f32.mrf.mxu1  ;;  %v11061_v14 = vpop.f32.mrf.mxu0 }
 0x100   : > { %15294 = vst [vmem:[#allocation12_spill] sm:$0xff] %v11059_v34 }
 0x101   : > { %v11063_v49 = vpop.f32.mrf.mxu1  ;;  %v11065_v43 = vpop.f32.mrf.mxu0 }
 0x102   : > { %15295 = vst [vmem:[#allocation15_spill] sm:$0xff] %v11063_v49 }
 0x103   : > { %v11067_v52 = vpop.f32.mrf.mxu1  ;;  %v9124_v37 = vpop.f32.mrf.mxu0  ;;  %9327 = vmatmul.mubr.msk.bf16.vlgmr.msra.gmra.mxu0 %vm609_vm2, %v10686_v21 }
 0x104   : > { %15296 = vst [vmem:[#allocation18_spill] sm:$0xff] %v11067_v52  ;;  %9330 = vmatprep.mubr.msk.bf16.mxu0 %vm609_vm2, %v10694_v55 }
 0x105   : > { %v9090_v0 = vpop.f32.mrf.mxu1  ;;  %9293 = vmatmul.mubr.msk.bf16.vlgmr.msra.gmra.mxu1 %vm609_vm2, %v15279_v3  ;;  %v1251_v22 = vpop.f32.mrf.mxu0 }
 0x106   : > { %v917_v31 = vadd.f32 %v9090_v0, %v9056_v5  ;;  %9296 = vmatprep.mubr.msk.bf16.mxu1 %vm609_vm2, %v15280_v39 }
 0x107   : > { %v908_v29 = vpop.f32.mrf.mxu1  ;;  %v9125_v49 = vpop.f32.mrf.mxu0 }
 0x108   : > { %v11077_v34 = vadd.f32 %v9124_v37, %v917_v31  ;;  %v909_v52 = vadd.f32 %v908_v29, %v696_v1 }
 0x109   : > { %v9091_v36 = vpop.f32.mrf.mxu1  ;;  %v1254_v53 = vpop.f32.mrf.mxu0 }
 0x10a   : > { %v11079_v21 = vadd.f32 %v1251_v22, %v909_v52  ;;  %v920_v25 = vadd.f32 %v9091_v36, %v9057_v59 }
 0x10b   : > { %v911_v55 = vpop.f32.mrf.mxu1  ;;  %v9128_v40 = vpop.f32.mrf.mxu0  ;;  %9331 = vmatmul.mubr.msk.bf16.gmra.mxu0 %vm609_vm2, %v10728_v32 }
 0x10c   : > { %v11083_v3 = vadd.f32 %v9125_v49, %v920_v25  ;;  %v912_v5 = vadd.f32 %v911_v55, %v699_v33  ;;  %9334 = vmatprep.mubr.msk.bf16.mxu0 %vm609_vm2, %v10733_v18 }
 0x10d   : > { %v9094_v39 = vpop.f32.mrf.mxu1  ;;  %9297 = vmatmul.mubr.msk.bf16.gmra.mxu1 %vm609_vm2, %v10552_v9  ;;  %v1267_v1 = vpop.f32.mrf.mxu0 }
 0x10e   : > { %v11089_v29 = vadd.f32 %v1254_v53, %v912_v5  ;;  %v933_v59 = vadd.f32 %v9094_v39, %v10991_v35  ;;  %9300 = vmatprep.mubr.msk.bf16.mxu1 %vm609_vm2, %v10566_v62 }
 0x10f   : > { %v924_v31 = vpop.f32.mrf.mxu1  ;;  %v9129_v32 = vpop.f32.mrf.mxu0 }
 0x110   : > { %v11094_v25 = vadd.f32 %v9128_v40, %v933_v59  ;;  %v925_v33 = vadd.f32 %v924_v31, %v11001_v41 }
 0x111   : > { %v9095_v0 = vpop.f32.mrf.mxu1  ;;  %v1270_v18 = vpop.f32.mrf.mxu0 }
 0x112   : > { %v11097_v36 = vadd.f32 %v1267_v1, %v925_v33  ;;  %v936_v9 = vadd.f32 %v9095_v0, %v11007_v4 }
 0x113   : > { %v927_v49 = vpop.f32.mrf.mxu1  ;;  %v9132_v53 = vpop.f32.mrf.mxu0  ;;  %9335 = vmatmul.mubr.msk.bf16.gmra.mxu0 %vm609_vm2, %v10758_v44 }
 0x114   : > { %v11102_v35 = vadd.f32 %v9129_v32, %v936_v9  ;;  %v928_v62 = vadd.f32 %v927_v49, %v11011_v8  ;;  %9338 = vmatprep.mubr.msk.bf16.mxu0 %vm609_vm2, %v10760_v51 }
 0x115   : > { %v9098_v40 = vpop.f32.mrf.mxu1  ;;  %9301 = vmatmul.mubr.msk.bf16.gmra.mxu1 %vm609_vm2, %v10598_v58  ;;  %v1283_v41 = vpop.f32.mrf.mxu0 }
 0x116   : > { %v11109_v52 = vadd.f32 %v1270_v18, %v928_v62  ;;  %v949_v4 = vadd.f32 %v9098_v40, %v11015_v13  ;;  %9304 = vmatprep.mubr.msk.bf16.mxu1 %vm609_vm2, %v15281_v16 }
 0x117   : > { %v940_v44 = vpop.f32.mrf.mxu1  ;;  %v9133_v37 = vpop.f32.mrf.mxu0 }
 0x118   : > { %v11114_v22 = vadd.f32 %v9132_v53, %v949_v4  ;;  %v941_v8 = vadd.f32 %v940_v44, %v11030_v17 }
 0x119   : > { %v9099_v55 = vpop.f32.mrf.mxu1  ;;  %v1286_v51 = vpop.f32.mrf.mxu0 }
 0x11a   : > { %v11117_v5 = vadd.f32 %v1283_v41, %v941_v8  ;;  %v952_v58 = vadd.f32 %v9099_v55, %v11036_v2 }
 0x11b   : > { %v943_v39 = vpop.f32.mrf.mxu1  ;;  %v9136_v1 = vpop.f32.mrf.mxu0  ;;  %9339 = vmatmul.mubr.msk.bf16.gmra.mxu0 %vm609_vm2, %v10784_v38 }
 0x11c   : > { %v11122_v13 = vadd.f32 %v9133_v37, %v952_v58  ;;  %v944_v16 = vadd.f32 %v943_v39, %v11042_v54  ;;  %9342 = vmatprep.mubr.msk.bf16.mxu0 %vm609_vm2, %v10786_v42 }
 0x11d   : > { %v9102_v59 = vpop.f32.mrf.mxu1  ;;  %9305 = vmatmul.mubr.msk.bf16.gmra.mxu1 %vm609_vm2, %v15282_v7  ;;  %v1299_v17 = vpop.f32.mrf.mxu0 }
 0x11e   : > { %v11129_v31 = vadd.f32 %v1286_v51, %v944_v16  ;;  %v965_v2 = vadd.f32 %v9102_v59, %v11046_v45  ;;  %9308 = vmatprep.mubr.msk.bf16.mxu1 %vm609_vm2, %v15283_v19  ;;  %v412_v51 = vld [vmem:[%s10285_s21 + $0x1a8] sm:$0x3] }
 0x11f   : > { %v956_v38 = vpop.f32.mrf.mxu1  ;;  %v9137_v32 = vpop.f32.mrf.mxu0  ;;  %v2450_v59 = vrot.slane %v412_v51, 2 }
 0x120   : > { %v11134_v33 = vadd.f32 %v9136_v1, %v965_v2  ;;  %v957_v54 = vadd.f32 %v956_v38, %v11055_v20  ;;  %v10061_v20 = vld [vmem:[%s15128_s4 + $0x18] sm:$0xff]   ;;  %v2448_v1 = vrot.slane %v11024_v11, 2 }
 0x121   : > { %v9103_v0 = vpop.f32.mrf.mxu1  ;;  %v1302_v42 = vpop.f32.mrf.mxu0  ;;  %9358 = vmatprep.subr.bf16.mxu1 %v10061_v20 }
 0x122   : > { %v11137_v18 = vadd.f32 %v1299_v17, %v957_v54  ;;  %v968_v7 = vadd.f32 %v9103_v0, %v11061_v14  ;;  %9359 = vmatpush3.bf16.msra.mxu1 %v10061_v20 }
 0x123   : > { %v959_v9 = vpop.f32.mrf.mxu1  ;;  %v9140_v49 = vpop.f32.mrf.mxu0  ;;  %9343 = vmatmul.mubr.msk.bf16.gmra.mxu0 %vm609_vm2, %v10806_v26 }
 0x124   : > { %v11142_v45 = vadd.f32 %v9137_v32, %v968_v7  ;;  %v960_v19 = vadd.f32 %v959_v9, %v11065_v43  ;;  %9346 = vmatprep.mubr.msk.bf16.mxu0 %vm609_vm2, %v10808_v24  ;;  %v2241_v32 = vrot.slane %v412_v51, 1  ;;  %v15297_v9 = vld [vmem:[#allocation6_spill] sm:$0xff] }
 0x125   : > { %v9106_v53 = vpop.f32.mrf.mxu1  ;;  %9309 = vmatmul.mubr.msk.bf16.gmra.mxu1 %vm609_vm2, %v15284_v27  ;;  %v1315_v14 = vpop.f32.mrf.mxu0 }
 0x126   : > { %v11152_v62 = vadd.f32 %v1302_v42, %v960_v19  ;;  %v981_v26 = vadd.f32 %v9106_v53, %v10979_v15  ;;  %9312 = vmatprep.mubr.msk.bf16.mxu1 %vm609_vm2, %v15285_v28 }
 0x127   : > { %v972_v43 = vpop.f32.mrf.mxu1  ;;  %v9141_v40 = vpop.f32.mrf.mxu0 }
 0x128   : > { %v11157_v24 = vadd.f32 %v9140_v49, %v981_v26  ;;  %v973_v41 = vadd.f32 %v972_v43, %v10985_v6 }
 0x129   : > { %v9107_v4 = vpop.f32.mrf.mxu1  ;;  %v11160_v44 = vpop.f32.mrf.mxu0 }
 0x12a   : > { %v11162_v27 = vadd.f32 %v1315_v14, %v973_v41  ;;  %v984_v37 = vadd.f32 %v9107_v4, %v10987_v23  ;;  %v2447_v23 = vrot.slane %v11021_v10, 2  ;;  %v15298_v14 = vld [vmem:[#allocation14_spill] sm:$0xff] }
 0x12b   : > { %v11165_v15 = vpop.f32.mrf.mxu1  ;;  %v9144_v8 = vpop.f32.mrf.mxu0  ;;  %9347 = vmatmul.mubr.msk.bf16.gmra.mxu0 %vm609_vm2, %v10828_v46 }
 0x12c   : > { %v11169_v28 = vadd.f32 %v9141_v40, %v984_v37  ;;  %9350 = vmatprep.mubr.msk.bf16.mxu0 %vm609_vm2, %v10830_v30 }
 0x12d   : > { %v9110_v55 = vpop.f32.mrf.mxu1  ;;  %9313 = vmatmul.mubr.msk.bf16.gmra.mxu1 %vm609_vm2, %v15286_v63  ;;  %v1331_v6 = vpop.f32.mrf.mxu0  ;;  %v2238_v63 = vrot.slane %v11021_v10, 1  ;;  %v2449_v10 = vsel %vm1035_vm3, %v2447_v23, %v2448_v1 }
 0x12e   : > { %v997_v58 = vadd.f32 %v9110_v55, %v10997_v50  ;;  %9316 = vmatprep.mubr.msk.bf16.mxu1 %vm609_vm2, %v10570_v56  ;;  %v2239_v50 = vrot.slane %v11024_v11, 1  ;;  %v2451_v11 = vsel %vm1035_vm3, %v2448_v1, %v2450_v59 }
 0x12f   : > { %v988_v39 = vpop.f32.mrf.mxu1  ;;  %v9145_v46 = vpop.f32.mrf.mxu0  ;;  %v2454_v20 = vpack.c.bf16 %v2451_v11, %v2449_v10 }
 0x130   : > { %v11181_v16 = vadd.f32 %v9144_v8, %v997_v58  ;;  %v989_v30 = vadd.f32 %v988_v39, %v11005_v48  ;;  %v2242_v49 = vsel %vm478_vm1, %v2239_v50, %v2241_v32  ;;  %v15300_v58 = vld [vmem:[#allocation9_spill] sm:$0xff] }
 0x131   : > { %v9111_v17 = vpop.f32.mrf.mxu1  ;;  %v11185_v2 = vpop.f32.mrf.mxu0 }
 0x132   : > { %v11188_v38 = vadd.f32 %v1331_v6, %v989_v30  ;;  %v1000_v56 = vadd.f32 %v9111_v17, %v11009_v12  ;;  %v15301_v30 = vld [vmem:[#allocation12_spill] sm:$0xff] }
 0x133   : > { %v11191_v54 = vpop.f32.mrf.mxu1  ;;  %v9148_v0 = vpop.f32.mrf.mxu0  ;;  %9351 = vmatmul.mubr.msk.bf16.gmra.mxu0 %vm609_vm2, %v10847_v57  ;;  %v2240_v57 = vsel %vm478_vm1, %v2238_v63, %v2239_v50 }
 0x134   : > { %v11195_v48 = vadd.f32 %v9145_v46, %v1000_v56  ;;  %9354 = vmatprep.mubr.msk.bf16.mxu0 %vm609_vm2, %v10854_v61  ;;  %v15302_v56 = vld [vmem:[#allocation15_spill] sm:$0xff] }
 0x135   : > { %v9114_v42 = vpop.f32.mrf.mxu1  ;;  %9317 = vmatmul.mubr.msk.bf16.gmra.mxu1 %vm609_vm2, %v10602_v47  ;;  %v1347_v12 = vpop.f32.mrf.mxu0  ;;  %v2245_v47 = vpack.c.bf16 %v2242_v49, %v2240_v57 }
 0x136   : > { %v1013_v7 = vadd.f32 %v9114_v42, %v11026_v60  ;;  %9320 = vmatprep.mubr.msk.bf16.mxu1 %vm609_vm2, %v15297_v9  ;;  %v15299_v60 = vld [vmem:[#allocation16_spill] sm:$0xff]  ;;  %v10062_v42 = vld [vmem:[%s15128_s4 + $0x10] sm:$0xff]  }
 0x137   : > { %v1004_v19 = vpop.f32.mrf.mxu1  ;;  %v9149_v61 = vpop.f32.mrf.mxu0  ;;  %9360 = vmatprep.subr.bf16.mxu1 %v10062_v42 }
 0x138   : > { %v11208_v53 = vadd.f32 %v9148_v0, %v1013_v7  ;;  %v1005_v26 = vadd.f32 %v1004_v19, %v15298_v14  ;;  %9361 = vmatpush3.bf16.msra.mxu1 %v10062_v42 }
 0x139   : > { %v9115_v43 = vpop.f32.mrf.mxu1  ;;  %v11211_v40 = vpop.f32.mrf.mxu0 }
 0x13a   : > { %v11213_v41 = vadd.f32 %v1347_v12, %v1005_v26  ;;  %v1016_v4 = vadd.f32 %v9115_v43, %v15299_v60 }
 0x13b   : > { %v11216_v37 = vpop.f32.mrf.mxu1  ;;  %v9152_v8 = vpop.f32.mrf.mxu0  ;;  %9355 = vmatmul.mubr.msk.bf16.gmra.mxu0 %vm609_vm2, %v2454_v20 }
 0x13c   : > { %v11219_v55 = vadd.f32 %v9149_v61, %v1016_v4 }
 0x13d   : > { %v9118_v6 = vpop.f32.mrf.mxu1  ;;  %9321 = vmatmul.mubr.msk.bf16.gmra.mxu1 %vm609_vm2, %v2245_v47  ;;  %v1363_v51 = vpop.f32.mrf.mxu0 }
 0x13e   : > { %v1029_v23 = vadd.f32 %v9118_v6, %v15300_v58 }
 0x13f   : > { %v1020_v39 = vpop.f32.mrf.mxu1  ;;  %v9153_v46 = vpop.f32.mrf.mxu0 }
 0x140   : > { %v11223_v1 = vadd.f32 %v9152_v8, %v1029_v23  ;;  %v1021_v59 = vadd.f32 %v1020_v39, %v15301_v30 }
 0x141   : > { %v9119_v63 = vpop.f32.mrf.mxu1  ;;  %v11226_v17 = vpop.f32.mrf.mxu0 }
 0x142   : > { %v11228_v50 = vadd.f32 %v1363_v51, %v1021_v59  ;;  %v1032_v32 = vadd.f32 %v9119_v63, %v15302_v56 }
 0x143   : > { %v11231_v0 = vpop.f32.mrf.mxu1  ;;  %v9192_v10 = vpop.f32.mrf.mxu0 }
 0x144   : > { %v11233_v11 = vadd.f32 %v9153_v46, %v1032_v32 }
 0x145   : > { %v9158_v12 = vpop.f32.mrf.mxu1  ;;  %v1665_v7 = vpop.f32.mrf.mxu0 }
 0x146   : > { %v1582_v9 = vadd.f32 %v9158_v12, %v11077_v34  ;;  %v10063_v12 = vld [vmem:[%s15128_s4 + $0x8] sm:$0xff]  }
 0x147   : > { %v1453_v57 = vpop.f32.mrf.mxu1  ;;  %v9193_v49 = vpop.f32.mrf.mxu0  ;;  %9394 = vmatprep.subr.bf16.mxu0 %v10063_v12 }
 0x148   : > { %v11239_v19 = vadd.f32 %v9192_v10, %v1582_v9  ;;  %v1580_v61 = vadd.f32 %v1453_v57, %v11079_v21  ;;  %v10159_v21 = vmov 0.0   ;;  %9395 = vmatpush3.bf16.msra.mxu0 %v10063_v12 }
 0x149   : > { %v9159_v20 = vpop.f32.mrf.mxu1  ;;  %v11242_v14 = vpop.f32.mrf.mxu0  ;;  %2774 = vst.msk [vmem:[#allocation2 + $0x30] sm:$0xff] %vm2766_vm4, %v10159_v21  ;;  %2775 = vst.msk [vmem:[#allocation2 + $0x38] sm:$0xff] %vm2766_vm4, %v10159_v21 }
 0x14a   : > { %v11244_v26 = vadd.f32 %v1665_v7, %v1580_v61  ;;  %v1583_v43 = vadd.f32 %v9159_v20, %v11083_v3  ;;  %2767 = vst.msk [vmem:[#allocation2] sm:$0xff] %vm2766_vm4, %v10159_v21  ;;  %2768 = vst.msk [vmem:[#allocation2 + $0x8] sm:$0xff] %vm2766_vm4, %v10159_v21 }
 0x14b   : > { %v11247_v47 = vpop.f32.mrf.mxu1  ;;  %v9196_v60 = vpop.f32.mrf.mxu0  ;;  %2771 = vst.msk [vmem:[#allocation2 + $0x18] sm:$0xff] %vm2766_vm4, %v10159_v21  ;;  %2772 = vst.msk [vmem:[#allocation2 + $0x20] sm:$0xff] %vm2766_vm4, %v10159_v21 }
 0x14c   : > { %v11249_v4 = vadd.f32 %v9193_v49, %v1583_v43  ;;  %2777 = vst.msk [vmem:[#allocation2 + $0x48] sm:$0xff] %vm2766_vm4, %v10159_v21  ;;  %2778 = vst.msk [vmem:[#allocation2 + $0x50] sm:$0xff] %vm2766_vm4, %v10159_v21 }
 0x14d   : > { %v9162_v34 = vpop.f32.mrf.mxu1  ;;  %v1681_v8 = vpop.f32.mrf.mxu0  ;;  %2780 = vst.msk [vmem:[#allocation2 + $0x60] sm:$0xff] %vm2766_vm4, %v10159_v21  ;;  %2781 = vst.msk [vmem:[#allocation2 + $0x68] sm:$0xff] %vm2766_vm4, %v10159_v21 }
 0x14e   : > { %v1586_v6 = vadd.f32 %v9162_v34, %v11094_v25  ;;  %2783 = vst.msk [vmem:[#allocation2 + $0x78] sm:$0xff] %vm2766_vm4, %v10159_v21  ;;  %2784 = vst.msk [vmem:[#allocation2 + $0x80] sm:$0xff] %vm2766_vm4, %v10159_v21 }
 0x14f   : > { %v1469_v51 = vpop.f32.mrf.mxu1  ;;  %v11252_v58 = vpop.f32.mrf.mxu0  ;;  %2786 = vst.msk [vmem:[#allocation2 + $0x90] sm:$0xff] %vm2766_vm4, %v10159_v21  ;;  %2787 = vst.msk [vmem:[#allocation2 + $0x98] sm:$0xff] %vm2766_vm4, %v10159_v21 }
 0x150   : > { %2789 = vst.msk [vmem:[#allocation2 + $0xa8] sm:$0xff] %vm2766_vm4, %v10159_v21  ;;  %2790 = vst.msk [vmem:[#allocation2 + $0xb0] sm:$0xff] %vm2766_vm4, %v10159_v21  ;;  %v11326_v3 = vadd.f32 %v9196_v60, %v1586_v6  ;;  %v1584_v25 = vadd.f32 %v1469_v51, %v11097_v36  ;;  %v10064_v60 = vld [vmem:[%s15128_s4] sm:$0xff]  }
 0x151   : > { %2792 = vst.msk [vmem:[#allocation2 + $0xc0] sm:$0xff] %vm2766_vm4, %v10159_v21  ;;  %2793 = vst.msk [vmem:[#allocation2 + $0xc8] sm:$0xff] %vm2766_vm4, %v10159_v21  ;;  %v9163_v23 = vpop.f32.mrf.mxu1  ;;  %v11329_v39 = vpop.f32.mrf.mxu0  ;;  %9396 = vmatprep.subr.bf16.mxu0 %v10064_v60  ;;  %v11394_v6 = vld [vmem:[#allocation2] sm:$0xff]  ;;  %v11396_v51 = vld [vmem:[#allocation2 + $0x8] sm:$0xff] }
 0x152   : > { %2795 = vst.msk [vmem:[#allocation2 + $0xd8] sm:$0xff] %vm2766_vm4, %v10159_v21  ;;  %2796 = vst.msk [vmem:[#allocation2 + $0xe0] sm:$0xff] %vm2766_vm4, %v10159_v21  ;;  %v11331_v46 = vadd.f32 %v1681_v8, %v1584_v25  ;;  %v1587_v30 = vadd.f32 %v9163_v23, %v11102_v35  ;;  %9397 = vmatpush3.bf16.msra.mxu0 %v10064_v60  ;;  %v2977_v25 = vrot.slane %v11394_v6, 1 }
 0x153   : > { %2798 = vst.msk [vmem:[#allocation2 + $0xf0] sm:$0xff] %vm2766_vm4, %v10159_v21  ;;  %2799 = vst.msk [vmem:[#allocation2 + $0xf8] sm:$0xff] %vm2766_vm4, %v10159_v21  ;;  %v11334_v59 = vpop.f32.mrf.mxu1  ;;  %v9200_v63 = vpop.f32.mrf.mxu0 }
 0x154   : > { %2801 = vst.msk [vmem:[#allocation2 + $0x108] sm:$0xff] %vm2766_vm4, %v10159_v21  ;;  %2802 = vst.msk [vmem:[#allocation2 + $0x110] sm:$0xff] %vm2766_vm4, %v10159_v21  ;;  %v11373_v36 = vadd.f32 %v11252_v58, %v1587_v30 }
 0x155   : > { %2804 = vst.msk [vmem:[#allocation2 + $0x120] sm:$0xff] %vm2766_vm4, %v10159_v21  ;;  %2805 = vst.msk [vmem:[#allocation2 + $0x128] sm:$0xff] %vm2766_vm4, %v10159_v21  ;;  %v9166_v35 = vpop.f32.mrf.mxu1  ;;  %v1697_v56 = vpop.f32.mrf.mxu0 }
 0x156   : > { %2807 = vst.msk [vmem:[#allocation2 + $0x138] sm:$0xff] %vm2766_vm4, %v10159_v21  ;;  %2808 = vst.msk [vmem:[#allocation2 + $0x140] sm:$0xff] %vm2766_vm4, %v10159_v21  ;;  %v1590_v32 = vadd.f32 %v9166_v35, %v11114_v22 }
 0x157   : > { %2810 = vst.msk [vmem:[#allocation2 + $0x150] sm:$0xff] %vm2766_vm4, %v10159_v21  ;;  %2811 = vst.msk [vmem:[#allocation2 + $0x158] sm:$0xff] %vm2766_vm4, %v10159_v21  ;;  %v1485_v10 = vpop.f32.mrf.mxu1  ;;  %v9201_v42 = vpop.f32.mrf.mxu0 }
 0x158   : > { %2813 = vst.msk [vmem:[#allocation2 + $0x168] sm:$0xff] %vm2766_vm4, %v10159_v21  ;;  %2814 = vst.msk [vmem:[#allocation2 + $0x170] sm:$0xff] %vm2766_vm4, %v10159_v21  ;;  %v11379_v7 = vadd.f32 %v9200_v63, %v1590_v32  ;;  %v1588_v9 = vadd.f32 %v1485_v10, %v11117_v5  ;;  %v2978_v63 = vrot.slane %v11396_v51, 1 }
 0x159   : > { %2816 = vst.msk [vmem:[#allocation2 + $0x180] sm:$0xff] %vm2766_vm4, %v10159_v21  ;;  %2817 = vst.msk [vmem:[#allocation2 + $0x188] sm:$0xff] %vm2766_vm4, %v10159_v21  ;;  %v9167_v57 = vpop.f32.mrf.mxu1  ;;  %v11382_v49 = vpop.f32.mrf.mxu0 }
 0x15a   : > { %2819 = vst.msk [vmem:[#allocation2 + $0x198] sm:$0xff] %vm2766_vm4, %v10159_v21  ;;  %2820 = vst.msk [vmem:[#allocation2 + $0x1a0] sm:$0xff] %vm2766_vm4, %v10159_v21  ;;  %v11384_v61 = vadd.f32 %v1697_v56, %v1588_v9  ;;  %v1591_v20 = vadd.f32 %v9167_v57, %v11122_v13 }
 0x15b   : > { %2776 = vst.msk [vmem:[#allocation2 + $0x40] sm:$0x3] %vm2769_vm5, %v10159_v21  ;;  %2770 = vst.msk [vmem:[#allocation2 + $0x10] sm:$0x3] %vm2769_vm5, %v10159_v21  ;;  %v11387_v22 = vpop.f32.mrf.mxu1  ;;  %v9204_v43 = vpop.f32.mrf.mxu0 }
 0x15c   : > { %2773 = vst.msk [vmem:[#allocation2 + $0x28] sm:$0x3] %vm2769_vm5, %v10159_v21  ;;  %2779 = vst.msk [vmem:[#allocation2 + $0x58] sm:$0x3] %vm2769_vm5, %v10159_v21  ;;  %v11392_v34 = vadd.f32 %v9201_v42, %v1591_v20  ;;  %v2979_v42 = vsel %vm478_vm1, %v2977_v25, %v2978_v63 }
 0x15d   : > { %2782 = vst.msk [vmem:[#allocation2 + $0x70] sm:$0x3] %vm2769_vm5, %v10159_v21  ;;  %2785 = vst.msk [vmem:[#allocation2 + $0x88] sm:$0x3] %vm2769_vm5, %v10159_v21  ;;  %v9170_v8 = vpop.f32.mrf.mxu1  ;;  %v1713_v5 = vpop.f32.mrf.mxu0 }
 0x15e   : > { %2788 = vst.msk [vmem:[#allocation2 + $0xa0] sm:$0x3] %vm2769_vm5, %v10159_v21  ;;  %2791 = vst.msk [vmem:[#allocation2 + $0xb8] sm:$0x3] %vm2769_vm5, %v10159_v21  ;;  %v1594_v13 = vadd.f32 %v9170_v8, %v11134_v33 }
 0x15f   : > { %2794 = vst.msk [vmem:[#allocation2 + $0xd0] sm:$0x3] %vm2769_vm5, %v10159_v21  ;;  %2797 = vst.msk [vmem:[#allocation2 + $0xe8] sm:$0x3] %vm2769_vm5, %v10159_v21  ;;  %v1501_v23 = vpop.f32.mrf.mxu1  ;;  %v9205_v30 = vpop.f32.mrf.mxu0 }
 0x160   : > { %2800 = vst.msk [vmem:[#allocation2 + $0x100] sm:$0x3] %vm2769_vm5, %v10159_v21  ;;  %2803 = vst.msk [vmem:[#allocation2 + $0x118] sm:$0x3] %vm2769_vm5, %v10159_v21  ;;  %v11406_v56 = vadd.f32 %v9204_v43, %v1594_v13  ;;  %v1592_v32 = vadd.f32 %v1501_v23, %v11137_v18 }
 0x161   : > { %2806 = vst.msk [vmem:[#allocation2 + $0x130] sm:$0x3] %vm2769_vm5, %v10159_v21  ;;  %2809 = vst.msk [vmem:[#allocation2 + $0x148] sm:$0x3] %vm2769_vm5, %v10159_v21  ;;  %v9171_v10 = vpop.f32.mrf.mxu1  ;;  %v11410_v33 = vpop.f32.mrf.mxu0 }
 0x162   : > { %2812 = vst.msk [vmem:[#allocation2 + $0x160] sm:$0x3] %vm2769_vm5, %v10159_v21  ;;  %2815 = vst.msk [vmem:[#allocation2 + $0x178] sm:$0x3] %vm2769_vm5, %v10159_v21  ;;  %v11398_v58 = vld [vmem:[#allocation2 + $0x10] sm:$0x3]  ;;  %v11414_v9 = vadd.f32 %v1713_v5, %v1592_v32  ;;  %v1595_v57 = vadd.f32 %v9171_v10, %v11142_v45 }
 0x163   : > { %2818 = vst.msk [vmem:[#allocation2 + $0x190] sm:$0x3] %vm2769_vm5, %v10159_v21  ;;  %2821 = vst.msk [vmem:[#allocation2 + $0x1a8] sm:$0x3] %vm2769_vm5, %v10159_v21  ;;  %v2909_v21 = vpack.c.bf16 %v11396_v51, %v11394_v6  ;;  %v2980_v35 = vrot.slane %v11398_v58, 1  ;;  %v11417_v60 = vpop.f32.mrf.mxu1  ;;  %v9208_v43 = vpop.f32.mrf.mxu0 }
 0x164   : > { %15303 = vst [vmem:[#allocation7_spill] sm:$0xff] %v11392_v34  ;;  %15304 = vst [vmem:[#allocation10_spill] sm:$0xff] %v11406_v56  ;;  %v11419_v8 = vadd.f32 %v9205_v30, %v1595_v57  ;;  %v11438_v57 = vld [vmem:[%s15128_s4 + $0x28] sm:$0xff]  }
 0x165   : > { %9398 = vmatprep.mubr.msk.bf16.mxu0 %vm2766_vm4, %v2909_v21  ;;  %v2981_v12 = vsel %vm478_vm1, %v2978_v63, %v2980_v35  ;;  %15305 = vst [vmem:[#allocation13_spill] sm:$0xff] %v11414_v9  ;;  %v9174_v18 = vpop.f32.mrf.mxu1  ;;  %v1729_v13 = vpop.f32.mrf.mxu0  ;;  %15310 = vst [vmem:[#allocation14_spill] sm:$0xff] %v11438_v57  ;;  %9430 = vmatprep.subr.bf16.mxu1 %v11438_v57 }
 0x166   : > { %v3089_v20 = vpack.c.bf16 %v2981_v12, %v2979_v42  ;;  %15306 = vst [vmem:[#allocation17_spill] sm:$0xff] %v11419_v8  ;;  %v1598_v21 = vadd.f32 %v9174_v18, %v11157_v24 }
 0x167   : > { %v1517_v23 = vpop.f32.mrf.mxu1  ;;  %v9209_v25 = vpop.f32.mrf.mxu0 }
 0x168   : > { %9362 = vmatprep.mubr.msk.bf16.mxu1 %vm2766_vm4, %v3089_v20  ;;  %v11423_v56 = vadd.f32 %v9208_v43, %v1598_v21  ;;  %v1596_v5 = vadd.f32 %v1517_v23, %v11162_v27 }
 0x169   : > { %v9175_v63 = vpop.f32.mrf.mxu1  ;;  %v11426_v45 = vpop.f32.mrf.mxu0 }
 0x16a   : > { %15307 = vst [vmem:[#allocation20_spill] sm:$0xff] %v11423_v56  ;;  %v11428_v35 = vadd.f32 %v1729_v13, %v1596_v5  ;;  %v1599_v30 = vadd.f32 %v9175_v63, %v11169_v28 }
 0x16b   : > { %v11431_v32 = vpop.f32.mrf.mxu1  ;;  %v9212_v10 = vpop.f32.mrf.mxu0 }
 0x16c   : > { %15308 = vst [vmem:[#allocation21_spill] sm:$0xff] %v11428_v35  ;;  %v11433_v42 = vadd.f32 %v9209_v25, %v1599_v30 }
 0x16d   : > { %v9178_v12 = vpop.f32.mrf.mxu1  ;;  %v1745_v24 = vpop.f32.mrf.mxu0 }
 0x16e   : > { %15309 = vst [vmem:[#allocation6_spill] sm:$0xff] %v11433_v42  ;;  %v1602_v27 = vadd.f32 %v9178_v12, %v11181_v16 }
 0x16f   : > { %v1533_v20 = vpop.f32.mrf.mxu1  ;;  %v9213_v43 = vpop.f32.mrf.mxu0 }
 0x170   : > { %v11442_v18 = vadd.f32 %v9212_v10, %v1602_v27  ;;  %v1600_v28 = vadd.f32 %v1533_v20, %v11188_v38 }
 0x171   : > { %v9179_v13 = vpop.f32.mrf.mxu1  ;;  %v11445_v21 = vpop.f32.mrf.mxu0 }
 0x172   : > { %15311 = vst [vmem:[#allocation16_spill] sm:$0xff] %v11442_v18  ;;  %v11447_v23 = vadd.f32 %v1745_v24, %v1600_v28  ;;  %v1603_v25 = vadd.f32 %v9179_v13, %v11195_v48 }
 0x173   : > { %v11450_v5 = vpop.f32.mrf.mxu1  ;;  %v9216_v63 = vpop.f32.mrf.mxu0 }
 0x174   : > { %15312 = vst [vmem:[#allocation9_spill] sm:$0xff] %v11447_v23  ;;  %v11452_v30 = vadd.f32 %v9213_v43, %v1603_v25 }
 0x175   : > { %v9182_v16 = vpop.f32.mrf.mxu1  ;;  %v1761_v12 = vpop.f32.mrf.mxu0 }
 0x176   : > { %15313 = vst [vmem:[#allocation12_spill] sm:$0xff] %v11452_v30  ;;  %v1606_v57 = vadd.f32 %v9182_v16, %v11208_v53 }
 0x177   : > { %v1549_v10 = vpop.f32.mrf.mxu1  ;;  %v9217_v27 = vpop.f32.mrf.mxu0 }
 0x178   : > { %v11455_v18 = vadd.f32 %v9216_v63, %v1606_v57  ;;  %v1604_v38 = vadd.f32 %v1549_v10, %v11213_v41 }
 0x179   : > { %v9183_v20 = vpop.f32.mrf.mxu1  ;;  %v11458_v24 = vpop.f32.mrf.mxu0 }
 0x17a   : > { %15314 = vst [vmem:[#allocation15_spill] sm:$0xff] %v11455_v18  ;;  %v11460_v28 = vadd.f32 %v1761_v12, %v1604_v38  ;;  %v1607_v48 = vadd.f32 %v9183_v20, %v11219_v55 }
 0x17b   : > { %v11463_v13 = vpop.f32.mrf.mxu1  ;;  %v9220_v43 = vpop.f32.mrf.mxu0 }
 0x17c   : > { %15315 = vst [vmem:[#allocation22_spill] sm:$0xff] %v11460_v28  ;;  %v11465_v25 = vadd.f32 %v9217_v27, %v1607_v48 }
 0x17d   : > { %v9186_v30 = vpop.f32.mrf.mxu1  ;;  %v1777_v53 = vpop.f32.mrf.mxu0 }
 0x17e   : > { %15316 = vst [vmem:[#allocation23_spill] sm:$0xff] %v11465_v25  ;;  %v1610_v16 = vadd.f32 %v9186_v30, %v11223_v1 }
 0x17f   : > { %v1565_v57 = vpop.f32.mrf.mxu1  ;;  %v9221_v63 = vpop.f32.mrf.mxu0 }
 0x180   : > { %v11468_v18 = vadd.f32 %v9220_v43, %v1610_v16  ;;  %v1608_v41 = vadd.f32 %v1565_v57, %v11228_v50 }
 0x181   : > { %v9187_v10 = vpop.f32.mrf.mxu1  ;;  %v11471_v12 = vpop.f32.mrf.mxu0 }
 0x182   : > { %15317 = vst [vmem:[#allocation24_spill] sm:$0xff] %v11468_v18  ;;  %v11473_v38 = vadd.f32 %v1777_v53, %v1608_v41  ;;  %v1611_v55 = vadd.f32 %v9187_v10, %v11233_v11 }
 0x183   : > { %v11476_v20 = vpop.f32.mrf.mxu1  ;;  %v11478_v27 = vpop.f32.mrf.mxu0 }
 0x184   : > { %15318 = vst [vmem:[#allocation25_spill] sm:$0xff] %v11473_v38  ;;  %v11480_v48 = vadd.f32 %v9221_v63, %v1611_v55 }
 0x185   : > { %v11482_v1 = vpop.f32.mrf.mxu1  ;;  %v11484_v30 = vpop.f32.mrf.mxu0 }
 0x186   : > { %15319 = vst [vmem:[#allocation26_spill] sm:$0xff] %v11480_v48 }
 0x187   : > { %v11486_v43 = vpop.f32.mrf.mxu1  ;;  %v11488_v50 = vpop.f32.mrf.mxu0 }
 0x189   : > { %v11490_v16 = vpop.f32.mrf.mxu1  ;;  %v11492_v53 = vpop.f32.mrf.mxu0 }
 0x18b   : > { %v11494_v57 = vpop.f32.mrf.mxu1  ;;  %v11496_v11 = vpop.f32.mrf.mxu0 }
 0x18c   : > { %15320 = vst [vmem:[#allocation27_spill] sm:$0xff] %v11496_v11 }
 0x18d   : > { %v11498_v41 = vpop.f32.mrf.mxu1  ;;  %v11500_v63 = vpop.f32.mrf.mxu0 }
 0x18e   : > { %15321 = vst [vmem:[#allocation28_spill] sm:$0xff] %v11500_v63  ;;  %v3553_v63 = vrot.slane %v11396_v51, 2 }
 0x18f   : > { %v11502_v10 = vpop.f32.mrf.mxu1  ;;  %v11504_v55 = vpop.f32.mrf.mxu0 }
 0x190   : > { %15322 = vst [vmem:[#allocation29_spill] sm:$0xff] %v11504_v55 }
 0x191   : > { %v11506_v48 = vpop.f32.mrf.mxu1  ;;  %v11508_v38 = vpop.f32.mrf.mxu0 }
 0x192   : > { %15323 = vst [vmem:[#allocation30_spill] sm:$0xff] %v11508_v38  ;;  %v11529_v38 = vld [vmem:[%s15128_s4 + $0x38] sm:$0xff]  }
 0x193   : > { %v11510_v18 = vpop.f32.mrf.mxu1  ;;  %v11512_v25 = vpop.f32.mrf.mxu0  ;;  %15329 = vst [vmem:[#allocation36_spill] sm:$0xff] %v11529_v38  ;;  %9466 = vmatprep.subr.bf16.mxu0 %v11529_v38  ;;  %v3555_v38 = vrot.slane %v11398_v58, 2 }
 0x194   : > { %15324 = vst [vmem:[#allocation31_spill] sm:$0xff] %v11512_v25 }
 0x195   : > { %v11514_v28 = vpop.f32.mrf.mxu1  ;;  %v11516_v23 = vpop.f32.mrf.mxu0 }
 0x196   : > { %15325 = vst [vmem:[#allocation32_spill] sm:$0xff] %v11516_v23 }
 0x197   : > { %v11518_v42 = vpop.f32.mrf.mxu1  ;;  %v11520_v35 = vpop.f32.mrf.mxu0 }
 0x198   : > { %15326 = vst [vmem:[#allocation33_spill] sm:$0xff] %v11520_v35  ;;  %v3552_v35 = vrot.slane %v11394_v6, 2  ;;  %v11559_v6 = vsel %vm1035_vm3, %v3553_v63, %v3555_v38 }
 0x199   : > { %v11522_v56 = vpop.f32.mrf.mxu1  ;;  %v11524_v8 = vpop.f32.mrf.mxu0  ;;  %15340 = vst [vmem:[#allocation47_spill] sm:$0xff] %v11559_v6 }
 0x19a   : > { %15327 = vst [vmem:[#allocation34_spill] sm:$0xff] %v11522_v56  ;;  %15328 = vst [vmem:[#allocation35_spill] sm:$0xff] %v11524_v8 }
 0x19b   : > { %v11531_v9 = vpop.f32.mrf.mxu1  ;;  %v11533_v25 = vpop.f32.mrf.mxu0 }
 0x19c   : > { %15330 = vst [vmem:[#allocation37_spill] sm:$0xff] %v11533_v25  ;;  %v11551_v25 = vsel %vm1035_vm3, %v3552_v35, %v3553_v63 }
 0x19d   : > { %v11536_v23 = vpop.f32.mrf.mxu1  ;;  %v11538_v55 = vpop.f32.mrf.mxu0  ;;  %15337 = vst [vmem:[#allocation44_spill] sm:$0xff] %v11551_v25 }
 0x19e   : > { %15331 = vst [vmem:[#allocation38_spill] sm:$0xff] %v11536_v23  ;;  %15332 = vst [vmem:[#allocation39_spill] sm:$0xff] %v11538_v55 }
 0x19f   : > { %v11542_v8 = vpop.f32.mrf.mxu1  ;;  %v11544_v11 = vpop.f32.mrf.mxu0 }
 0x1a0   : > { %15333 = vst [vmem:[#allocation40_spill] sm:$0xff] %v11542_v8  ;;  %15334 = vst [vmem:[#allocation41_spill] sm:$0xff] %v11544_v11 }
 0x1a1   : > { %v11546_v56 = vpop.f32.mrf.mxu1  ;;  %v11548_v34 = vpop.f32.mrf.mxu0 }
 0x1a2   : > { %15335 = vst [vmem:[#allocation42_spill] sm:$0xff] %v11546_v56  ;;  %15336 = vst [vmem:[#allocation43_spill] sm:$0xff] %v11548_v34 }
 0x1a3   : > { %v11554_v23 = vpop.f32.mrf.mxu1  ;;  %v11556_v55 = vpop.f32.mrf.mxu0 }
 0x1a4   : > { %15338 = vst [vmem:[#allocation45_spill] sm:$0xff] %v11554_v23  ;;  %15339 = vst [vmem:[#allocation46_spill] sm:$0xff] %v11556_v55 }
 0x1a5   : > { %v11561_v51 = vpop.f32.mrf.mxu1  ;;  %v11563_v8 = vpop.f32.mrf.mxu0 }
 0x1a6   : > { %15341 = vst [vmem:[#allocation48_spill] sm:$0xff] %v11561_v51  ;;  %15342 = vst [vmem:[#allocation49_spill] sm:$0xff] %v11563_v8 }
 0x1a7   : > { %v11567_v34 = vpop.f32.mrf.mxu1  ;;  %v11569_v35 = vpop.f32.mrf.mxu0 }
 0x1a8   : > { %15343 = vst [vmem:[#allocation50_spill] sm:$0xff] %v11567_v34  ;;  %15344 = vst [vmem:[#allocation51_spill] sm:$0xff] %v11569_v35 }
 0x1a9   : > { %v11571_v56 = vpop.f32.mrf.mxu1  ;;  %v11573_v58 = vpop.f32.mrf.mxu0 }
 0x1aa   : > { %15345 = vst [vmem:[#allocation52_spill] sm:$0xff] %v11571_v56  ;;  %15346 = vst [vmem:[#allocation53_spill] sm:$0xff] %v11573_v58  ;;  %v15361_v56 = vld [vmem:[#allocation19_spill] sm:$0xff] }
 0x1ab   : > { %v11575_v23 = vpop.f32.mrf.mxu1  ;;  %v11577_v55 = vpop.f32.mrf.mxu0 }
 0x1ac   : > { %15347 = vst [vmem:[#allocation54_spill] sm:$0xff] %v11575_v23  ;;  %15348 = vst [vmem:[#allocation55_spill] sm:$0xff] %v11577_v55  ;;  %v15359_v55 = vld [vmem:[#allocation8_spill] sm:$0xff] }
 0x1ad   : > { %v11579_v38 = vpop.f32.mrf.mxu1  ;;  %v11581_v63 = vpop.f32.mrf.mxu0 }
 0x1ae   : > { %15349 = vst [vmem:[#allocation56_spill] sm:$0xff] %v11579_v38  ;;  %15350 = vst [vmem:[#allocation57_spill] sm:$0xff] %v11581_v63  ;;  %v976_v38 = vadd.f32 %v11165_v15, %v15359_v55  ;;  %v15360_v63 = vld [vmem:[#allocation11_spill] sm:$0xff] }
 0x1af   : > { %v11583_v8 = vpop.f32.mrf.mxu1  ;;  %v11585_v51 = vpop.f32.mrf.mxu0 }
 0x1b0   : > { %15351 = vst [vmem:[#allocation58_spill] sm:$0xff] %v11583_v8  ;;  %15352 = vst [vmem:[#allocation59_spill] sm:$0xff] %v11585_v51  ;;  %v992_v8 = vadd.f32 %v11191_v54, %v15360_v63  ;;  %v1008_v51 = vadd.f32 %v11216_v37, %v15361_v56  ;;  %v1395_v15 = vadd.f32 %v11160_v44, %v976_v38 }
 0x1b1   : > { %v11587_v11 = vpop.f32.mrf.mxu1  ;;  %v11589_v25 = vpop.f32.mrf.mxu0 }
 0x1b2   : > { %15353 = vst [vmem:[#allocation60_spill] sm:$0xff] %v11587_v11  ;;  %15354 = vst [vmem:[#allocation61_spill] sm:$0xff] %v11589_v25  ;;  %v15362_v11 = vld [vmem:[#allocation18_spill] sm:$0xff]  ;;  %v1399_v54 = vadd.f32 %v11185_v2, %v992_v8  ;;  %v1403_v37 = vadd.f32 %v11211_v40, %v1008_v51  ;;  %v1597_v44 = vadd.f32 %v11431_v32, %v1395_v15  ;;  %v15366_v51 = vld [vmem:[#allocation28_spill] sm:$0xff] }
 0x1b3   : > { %v11591_v6 = vpop.f32.mrf.mxu1  ;;  %v11593_v35 = vpop.f32.mrf.mxu0  ;;  %v1024_v25 = vadd.f32 %v11231_v0, %v15362_v11  ;;  %v1585_v0 = vadd.f32 %v11334_v59, %v11109_v52  ;;  %v1589_v11 = vadd.f32 %v11387_v22, %v11129_v31  ;;  %v2003_v22 = vadd.f32 %v11482_v1, %v11239_v19  ;;  %v15372_v15 = vld [vmem:[#allocation17_spill] sm:$0xff] }
 0x1b4   : > { %15355 = vst [vmem:[#allocation62_spill] sm:$0xff] %v11591_v6  ;;  %15356 = vst [vmem:[#allocation63_spill] sm:$0xff] %v11593_v35  ;;  %v1581_v35 = vadd.f32 %v11247_v47, %v11089_v29  ;;  %v1593_v47 = vadd.f32 %v11417_v60, %v11152_v62  ;;  %v1601_v40 = vadd.f32 %v11450_v5, %v1399_v54  ;;  %v15373_v54 = vld [vmem:[#allocation42_spill] sm:$0xff] }
 0x1b5   : > { %v11595_v58 = vpop.f32.mrf.mxu1  ;;  %v11597_v23 = vpop.f32.mrf.mxu0  ;;  %v1407_v56 = vadd.f32 %v11226_v17, %v1024_v25  ;;  %v1605_v17 = vadd.f32 %v11463_v13, %v1403_v37  ;;  %v2001_v62 = vadd.f32 %v11486_v43, %v11244_v26  ;;  %v1797_v60 = vadd.f32 %v11329_v39, %v1585_v0 }
 0x1b6   : > { %15357 = vst [vmem:[#allocation64_spill] sm:$0xff] %v11595_v58  ;;  %15358 = vst [vmem:[#allocation65_spill] sm:$0xff] %v11597_v23  ;;  %v1793_v2 = vadd.f32 %v11242_v14, %v1581_v35  ;;  %v1801_v14 = vadd.f32 %v11382_v49, %v1589_v11  ;;  %v2004_v8 = vadd.f32 %v11490_v16, %v11249_v4  ;;  %v15364_v16 = vld [vmem:[#allocation34_spill] sm:$0xff] }
 0x1b7   : > { %v11607_v34 = vpop.f32.mrf.mxu1  ;;  %v11609_v6 = vpop.f32.mrf.mxu0  ;;  %v1609_v52 = vadd.f32 %v11476_v20, %v1407_v56  ;;  %v1805_v25 = vadd.f32 %v11410_v33, %v1593_v47  ;;  %v1809_v19 = vadd.f32 %v11426_v45, %v1597_v44  ;;  %v2007_v26 = vadd.f32 %v11498_v41, %v11326_v3  ;;  %v15374_v56 = vld [vmem:[#allocation45_spill] sm:$0xff]  ;;  %v15375_v44 = vld [vmem:[#allocation30_spill] sm:$0xff] }
 0x1b8   : > { %v2002_v32 = vadd.f32 %v11494_v57, %v1793_v2  ;;  %v2005_v39 = vadd.f32 %v11502_v10, %v11331_v46  ;;  %v11660_v49 = vadd.f32 %v11445_v21, %v1601_v40  ;;  %v11663_v4 = vadd.f32 %v11458_v24, %v1605_v17  ;;  %v15365_v10 = vld [vmem:[#allocation27_spill] sm:$0xff]  ;;  %v15377_v17 = vld [vmem:[#allocation20_spill] sm:$0xff] }
 0x1b9   : > { %v11613_v23 = vpop.f32.mrf.mxu1  ;;  %v11615_v58 = vpop.f32.mrf.mxu0  ;;  %v11666_v20 = vadd.f32 %v11471_v12, %v1609_v52  ;;  %v2008_v33 = vadd.f32 %v11506_v48, %v11373_v36  ;;  %v2205_v3 = vadd.f32 %v11478_v27, %v2003_v22  ;;  %v2203_v46 = vadd.f32 %v11484_v30, %v2001_v62  ;;  %v15363_v48 = vld [vmem:[#allocation7_spill] sm:$0xff]  ;;  %v15378_v52 = vld [vmem:[#allocation48_spill] sm:$0xff] }
 0x1ba   : > { %v2006_v21 = vadd.f32 %v11510_v18, %v1797_v60  ;;  %v2011_v24 = vadd.f32 %v11514_v28, %v11379_v7  ;;  %v2206_v43 = vadd.f32 %v11488_v50, %v2004_v8  ;;  %v2204_v12 = vadd.f32 %v11492_v53, %v2002_v32  ;;  %v15367_v28 = vld [vmem:[#allocation10_spill] sm:$0xff]  ;;  %v15369_v53 = vld [vmem:[#allocation29_spill] sm:$0xff]  ;;  %v15379_v60 = vld [vmem:[#allocation32_spill] sm:$0xff] }
 0x1bb   : > { %v11625_v55 = vpop.f32.mrf.mxu1  ;;  %v11627_v29 = vpop.f32.mrf.mxu0  ;;  %v2009_v36 = vadd.f32 %v11518_v42, %v11384_v61  ;;  %v2012_v57 = vadd.f32 %v15364_v16, %v15363_v48  ;;  %v2209_v30 = vadd.f32 %v15365_v10, %v2007_v26  ;;  %v11689_v18 = vadd.f32 %v15366_v51, %v2005_v39  ;;  %v15368_v50 = vld [vmem:[#allocation38_spill] sm:$0xff]  ;;  %v15370_v61 = vld [vmem:[#allocation13_spill] sm:$0xff]  ;;  %v15371_v42 = vld [vmem:[#allocation40_spill] sm:$0xff] }
 0x1bc   : > { %v2010_v7 = vadd.f32 %v11531_v9, %v1801_v14  ;;  %v2015_v35 = vadd.f32 %v15368_v50, %v15367_v28  ;;  %v11695_v38 = vadd.f32 %v15369_v53, %v2008_v33  ;;  %v2013_v63 = vadd.f32 %v15371_v42, %v15370_v61  ;;  %v15376_v9 = vld [vmem:[#allocation31_spill] sm:$0xff]  ;;  %v15380_v8 = vld [vmem:[#allocation33_spill] sm:$0xff]  ;;  %v15383_v33 = vld [vmem:[#allocation6_spill] sm:$0xff] }
 0x1bd   : > { %v11636_v59 = vpop.f32.mrf.mxu1  ;;  %v11638_v31 = vpop.f32.mrf.mxu0  ;;  %v2016_v37 = vadd.f32 %v15373_v54, %v15372_v15  ;;  %v2014_v0 = vadd.f32 %v15374_v56, %v1805_v25  ;;  %v11703_v2 = vadd.f32 %v15375_v44, %v2006_v21  ;;  %v11706_v40 = vadd.f32 %v15376_v9, %v2011_v24  ;;  %v15381_v26 = vld [vmem:[#allocation21_spill] sm:$0xff]  ;;  %v15382_v25 = vld [vmem:[#allocation50_spill] sm:$0xff]  ;;  %v15384_v48 = vld [vmem:[#allocation52_spill] sm:$0xff] }
 0x1be   : > { %v2019_v22 = vadd.f32 %v15378_v52, %v15377_v17  ;;  %v11711_v14 = vadd.f32 %v15379_v60, %v2009_v36  ;;  %v11714_v32 = vadd.f32 %v15380_v8, %v2012_v57  ;;  %v2017_v39 = vadd.f32 %v15382_v25, %v15381_v26  ;;  %v11723_v24 = vld [vmem:[%s15126_s2] ss:$0 sm:$0xff]  ;;  %v15386_v36 = vld [vmem:[#allocation37_spill] sm:$0xff]  ;;  %v15387_v53 = vld [vmem:[#allocation39_spill] sm:$0xff] }
 0x1bf   : > { %v11649_v5 = vpop.f32.mrf.mxu1  ;;  %v11651_v13 = vpop.f32.mrf.mxu0  ;;  %v2020_v21 = vadd.f32 %v15384_v48, %v15383_v33  ;;  %v11729_v28 = vadd.f32 %v15386_v36, %v2015_v35  ;;  %v11732_v61 = vadd.f32 %v15387_v53, %v2013_v63  ;;  %v15388_v42 = vld [vmem:[#allocation41_spill] sm:$0xff]  ;;  %v15389_v54 = vld [vmem:[#allocation43_spill] sm:$0xff]  ;;  %v15395_v8 = vld [vmem:[#allocation56_spill] sm:$0xff] }
 0x1c0   : > { %v11735_v15 = vadd.f32 %v15388_v42, %v2016_v37  ;;  %v11738_v56 = vadd.f32 %v15389_v54, %v2014_v0  ;;  %v15392_v52 = vld [vmem:[#allocation49_spill] sm:$0xff]  ;;  %v15393_v0 = vld [vmem:[#allocation51_spill] sm:$0xff]  ;;  %v15397_v33 = vld [vmem:[#allocation58_spill] sm:$0xff] }
 0x1c1   : > { %v11670_v1 = vpop.f32.mrf.mxu1  ;;  %v11672_v45 = vpop.f32.mrf.mxu0  ;;  %v11754_v60 = vadd.f32 %v15393_v0, %v2020_v21  ;;  %v15396_v25 = vld [vmem:[#allocation9_spill] sm:$0xff]  ;;  %v15400_v21 = vld [vmem:[#allocation60_spill] sm:$0xff]  ;;  %v15401_v42 = vld [vmem:[#allocation62_spill] sm:$0xff] }
 0x1c2   : > { %v2021_v48 = vadd.f32 %v15397_v33, %v15396_v25  ;;  %v2022_v54 = vadd.f32 %v15401_v42, %v11660_v49  ;;  %v15406_v25 = vld [vmem:[#allocation22_spill] sm:$0xff] }
 0x1c3   : > { %v11685_v41 = vpop.f32.mrf.mxu1  ;;  %v9328_v27 = vpop.f32.mrf.mxu0  ;;  %v2025_v49 = vadd.f32 %v11607_v34, %v15406_v25 }
 0x1c5   : > { %v9294_v11 = vpop.f32.mrf.mxu1  ;;  %v2497_v47 = vpop.f32.mrf.mxu0 }
 0x1c6   : > { %v2417_v62 = vadd.f32 %v9294_v11, %v2205_v3  ;;  %v15385_v3 = vld [vmem:[#allocation35_spill] sm:$0xff]  ;;  %v15390_v11 = vld [vmem:[#allocation54_spill] sm:$0xff] }
 0x1c7   : > { %v2288_v16 = vpop.f32.mrf.mxu1  ;;  %v9329_v10 = vpop.f32.mrf.mxu0  ;;  %v11726_v51 = vadd.f32 %v15385_v3, %v2010_v7  ;;  %v2018_v44 = vadd.f32 %v15390_v11, %v1809_v19  ;;  %v11744_v7 = vld [vmem:[%s15127_s3] ss:$0 sm:$0xff]  ;;  %v15402_v11 = vld [vmem:[#allocation15_spill] sm:$0xff] }
 0x1c8   : > { %v2626_v57 = vadd.f32 %v9328_v27, %v2417_v62  ;;  %v2415_v50 = vadd.f32 %v2288_v16, %v2203_v46  ;;  %v15391_v27 = vld [vmem:[#allocation46_spill] sm:$0xff]  ;;  %v11751_v62 = vadd.f32 %v15392_v52, %v2017_v39  ;;  %v15394_v19 = vld [vmem:[#allocation16_spill] sm:$0xff] }
 0x1c9   : > { %v9295_v35 = vpop.f32.mrf.mxu1  ;;  %v2500_v9 = vpop.f32.mrf.mxu0  ;;  %v11747_v46 = vadd.f32 %v15391_v27, %v2019_v22  ;;  %v2023_v26 = vadd.f32 %v15395_v8, %v15394_v19 }
 0x1ca   : > { %v2665_v63 = vmul.f32 %v11723_v24, %v2626_v57  ;;  %v2624_v17 = vadd.f32 %v2497_v47, %v2415_v50  ;;  %v2418_v37 = vadd.f32 %v9295_v35, %v2206_v43  ;;  %v15398_v57 = vld [vmem:[#allocation53_spill] sm:$0xff]  ;;  %v15399_v50 = vld [vmem:[#allocation12_spill] sm:$0xff] }
 0x1cb   : > { %v2291_v16 = vpop.f32.mrf.mxu1  ;;  %v9332_v3 = vpop.f32.mrf.mxu0  ;;  %v11763_v39 = vadd.f32 %v15398_v57, %v2018_v44  ;;  %v2024_v53 = vadd.f32 %v15400_v21, %v15399_v50  ;;  %v15403_v35 = vld [vmem:[#allocation64_spill] sm:$0xff]  ;;  %v15409_v21 = vld [vmem:[#allocation63_spill] sm:$0xff] }
 0x1cc   : > { %v2704_v22 = vadd.f32 %v11744_v7, %v2665_v63  ;;  %v2663_v36 = vmul.f32 %v11723_v24, %v2624_v17  ;;  %v2627_v47 = vadd.f32 %v9329_v10, %v2418_v37  ;;  %v2416_v43 = vadd.f32 %v2291_v16, %v2204_v12  ;;  %v15404_v17 = vld [vmem:[#allocation55_spill] sm:$0xff]  ;;  %v15405_v37 = vld [vmem:[#allocation57_spill] sm:$0xff] }
 0x1cd   : > { %v2027_v27 = vadd.f32 %v15403_v35, %v15402_v11  ;;  %v9298_v52 = vpop.f32.mrf.mxu1  ;;  %v2513_v0 = vpop.f32.mrf.mxu0  ;;  %v11774_v44 = vadd.f32 %v15404_v17, %v2023_v26  ;;  %v11777_v8 = vadd.f32 %v15405_v37, %v2021_v48  ;;  %v15407_v26 = vld [vmem:[#allocation59_spill] sm:$0xff]  ;;  %v15408_v48 = vld [vmem:[#allocation61_spill] sm:$0xff] }
 0x1ce   : > { %v2736_v19 = vmax.f32 %v2704_v22, 0.0  ;;  %v2702_v63 = vadd.f32 %v11744_v7, %v2663_v36  ;;  %v2666_v10 = vmul.f32 %v11723_v24, %v2627_v47  ;;  %v2625_v12 = vadd.f32 %v2500_v9, %v2416_v43 }
 0x1cf   : > { %v2421_v33 = vadd.f32 %v9298_v52, %v2209_v30  ;;  %v2304_v16 = vpop.f32.mrf.mxu1  ;;  %v9333_v57 = vpop.f32.mrf.mxu0  ;;  %v11786_v43 = vadd.f32 %v15407_v26, %v2024_v53  ;;  %v11789_v50 = vadd.f32 %v15408_v48, %v2022_v54  ;;  %v11792_v34 = vadd.f32 %v15409_v21, %v2027_v27 }
 0x1d0   : > { %2825 = vst.msk [vmem:[#allocation2 + $0x31] sm:$0xff] %vm2766_vm4, %v2736_v19  ;;  %v2734_v22 = vmax.f32 %v2702_v63, 0.0  ;;  %v2705_v36 = vadd.f32 %v11744_v7, %v2666_v10  ;;  %v2664_v47 = vmul.f32 %v11723_v24, %v2625_v12  ;;  %v2419_v9 = vadd.f32 %v2304_v16, %v11689_v18  ;;  %v15410_v63 = vld [vmem:[#allocation65_spill] sm:$0xff]  ;;  %v15411_v10 = vld [vmem:[#allocation23_spill] sm:$0xff] }
 0x1d1   : > { %v2630_v30 = vadd.f32 %v9332_v3, %v2421_v33  ;;  %v9299_v42 = vpop.f32.mrf.mxu1  ;;  %v2516_v11 = vpop.f32.mrf.mxu0  ;;  %v11798_v53 = vadd.f32 %v15410_v63, %v2025_v49  ;;  %v2028_v54 = vadd.f32 %v11613_v23, %v15411_v10  ;;  %v2026_v27 = vadd.f32 %v11625_v55, %v11663_v4  ;;  %v15412_v49 = vld [vmem:[#allocation24_spill] sm:$0xff]  ;;  %v15413_v16 = vld [vmem:[#allocation25_spill] sm:$0xff] }
 0x1d2   : > { %2823 = vst.msk [vmem:[#allocation2 + $0x19] sm:$0xff] %vm2766_vm4, %v2734_v22  ;;  %v2737_v35 = vmax.f32 %v2705_v36, 0.0  ;;  %v2703_v52 = vadd.f32 %v11744_v7, %v2664_v47  ;;  %v2628_v19 = vadd.f32 %v2513_v0, %v2419_v9  ;;  %v2422_v18 = vadd.f32 %v9299_v42, %v11695_v38  ;;  %v15414_v22 = vld [vmem:[#allocation26_spill] sm:$0xff] }
 0x1d3   : > { %v2669_v3 = vmul.f32 %v11723_v24, %v2630_v30  ;;  %v2307_v12 = vpop.f32.mrf.mxu1  ;;  %v9336_v17 = vpop.f32.mrf.mxu0  ;;  %v2031_v33 = vadd.f32 %v11636_v59, %v15412_v49  ;;  %v2029_v23 = vadd.f32 %v11649_v5, %v15413_v16  ;;  %v2032_v55 = vadd.f32 %v11670_v1, %v15414_v22 }
 0x1d4   : > { %2826 = vst.msk [vmem:[#allocation2 + $0x39] sm:$0xff] %vm2766_vm4, %v2737_v35  ;;  %v2735_v37 = vmax.f32 %v2703_v52, 0.0  ;;  %v2667_v0 = vmul.f32 %v11723_v24, %v2628_v19  ;;  %v2631_v25 = vadd.f32 %v9333_v57, %v2422_v18  ;;  %v2420_v38 = vadd.f32 %v2307_v12, %v11703_v2 }
 0x1d5   : > { %v2708_v4 = vadd.f32 %v11744_v7, %v2669_v3  ;;  %v9302_v36 = vpop.f32.mrf.mxu1  ;;  %v2529_v47 = vpop.f32.mrf.mxu0  ;;  %v11820_v59 = vadd.f32 %v11609_v6, %v2028_v54  ;;  %v11823_v5 = vadd.f32 %v11615_v58, %v2026_v27  ;;  %v2030_v1 = vadd.f32 %v11685_v41, %v11666_v20 }
 0x1d6   : > { %2824 = vst.msk [vmem:[#allocation2 + $0x21] sm:$0xff] %vm2766_vm4, %v2735_v37  ;;  %v2706_v9 = vadd.f32 %v11744_v7, %v2667_v0  ;;  %v2670_v57 = vmul.f32 %v11723_v24, %v2631_v25  ;;  %v2629_v2 = vadd.f32 %v2516_v11, %v2420_v38  ;;  %v2425_v26 = vadd.f32 %v9302_v36, %v11706_v40 }
 0x1d7   : > { %v2740_v48 = vmax.f32 %v2708_v4, 0.0  ;;  %v2320_v21 = vpop.f32.mrf.mxu1  ;;  %v9337_v30 = vpop.f32.mrf.mxu0  ;;  %v11829_v19 = vld [vmem:[#allocation2 + $0x30] sm:$0xff]  ;;  %v11832_v6 = vadd.f32 %v11627_v29, %v2031_v33  ;;  %v11835_v58 = vadd.f32 %v11638_v31, %v2029_v23  ;;  %v11838_v40 = vadd.f32 %v11651_v13, %v2032_v55 }
 0x1d8   : > { %v2738_v42 = vmax.f32 %v2706_v9, 0.0  ;;  %v2709_v35 = vadd.f32 %v11744_v7, %v2670_v57  ;;  %v2668_v52 = vmul.f32 %v11723_v24, %v2629_v2  ;;  %v2634_v11 = vadd.f32 %v9336_v17, %v2425_v26 }
 0x1d9   : > { %2829 = vst.msk [vmem:[#allocation2 + $0x61] sm:$0xff] %vm2766_vm4, %v2740_v48  ;;  %v2423_v20 = vadd.f32 %v2320_v21, %v11711_v14  ;;  %v9303_v41 = vpop.f32.mrf.mxu1  ;;  %v2532_v18 = vpop.f32.mrf.mxu0  ;;  %v11842_v63 = vld [vmem:[#allocation2 + $0x18] sm:$0xff]  ;;  %v11849_v13 = vadd.f32 %v11672_v45, %v2030_v1  ;;  %v2987_v0 = vrot.slane %v11829_v19, 1 }
 0x1da   : > { %2827 = vst.msk [vmem:[#allocation2 + $0x49] sm:$0xff] %vm2766_vm4, %v2738_v42  ;;  %v2741_v10 = vmax.f32 %v2709_v35, 0.0  ;;  %v2707_v29 = vadd.f32 %v11744_v7, %v2668_v52  ;;  %v2673_v54 = vmul.f32 %v11723_v24, %v2634_v11  ;;  %v2426_v31 = vadd.f32 %v9303_v41, %v11714_v32  ;;  %v10068_v42 = vld [vmem:[%s15128_s4 + $0x30] sm:$0xff]  }
 0x1db   : > { %v2632_v27 = vadd.f32 %v2529_v47, %v2423_v20  ;;  %v2323_v3 = vpop.f32.mrf.mxu1  ;;  %v9340_v12 = vpop.f32.mrf.mxu0  ;;  %v11851_v14 = vld [vmem:[#allocation2 + $0x38] sm:$0xff]  ;;  %v2982_v17 = vrot.slane %v11842_v63, 1  ;;  %v11854_v37 = vld [vmem:[#allocation2 + $0x40] sm:$0x3] }
 0x1dc   : > { %2830 = vst.msk [vmem:[#allocation2 + $0x69] sm:$0xff] %vm2766_vm4, %v2741_v10  ;;  %v2739_v25 = vmax.f32 %v2707_v29, 0.0  ;;  %v2712_v38 = vadd.f32 %v11744_v7, %v2673_v54  ;;  %v2635_v32 = vadd.f32 %v9337_v30, %v2426_v31  ;;  %v2424_v45 = vadd.f32 %v2323_v3, %v11726_v51 }
 0x1dd   : > { %v2671_v49 = vmul.f32 %v11723_v24, %v2632_v27  ;;  %v9306_v33 = vpop.f32.mrf.mxu1  ;;  %v2545_v16 = vpop.f32.mrf.mxu0  ;;  %v11861_v23 = vld [vmem:[#allocation2 + $0x20] sm:$0xff]  ;;  %v11865_v22 = vpack.c.bf16 %v11851_v14, %v11829_v19  ;;  %v11867_v55 = vld [vmem:[#allocation2 + $0x28] sm:$0x3]  ;;  %v2988_v4 = vrot.slane %v11851_v14, 1  ;;  %v2990_v36 = vrot.slane %v11854_v37, 1 }
 0x1de   : > { %2828 = vst.msk [vmem:[#allocation2 + $0x51] sm:$0xff] %vm2766_vm4, %v2739_v25  ;;  %v2744_v47 = vmax.f32 %v2712_v38, 0.0  ;;  %v2674_v51 = vmul.f32 %v11723_v24, %v2635_v32  ;;  %v2633_v9 = vadd.f32 %v2532_v18, %v2424_v45  ;;  %v2429_v57 = vadd.f32 %v9306_v33, %v11729_v28  ;;  %v15415_v38 = vld [vmem:[#allocation36_spill] sm:$0xff] }
 0x1df   : > { %v2710_v2 = vadd.f32 %v11744_v7, %v2671_v49  ;;  %v2336_v26 = vpop.f32.mrf.mxu1  ;;  %v11877_v1 = vpack.c.bf16 %v11861_v23, %v11842_v63  ;;  %v9341_v48 = vpop.f32.mrf.mxu0  ;;  %v2983_v21 = vrot.slane %v11861_v23, 1  ;;  %v2985_v30 = vrot.slane %v11867_v55, 1 }
 0x1e0   : > { %2833 = vst.msk [vmem:[#allocation2 + $0x91] sm:$0xff] %vm2766_vm4, %v2744_v47  ;;  %v2713_v28 = vadd.f32 %v11744_v7, %v2674_v51  ;;  %v2672_v35 = vmul.f32 %v11723_v24, %v2633_v9  ;;  %v2638_v52 = vadd.f32 %v9340_v12, %v2429_v57  ;;  %v2427_v11 = vadd.f32 %v2336_v26, %v11732_v61  ;;  %v11899_v25 = vld [vmem:[#allocation2 + $0x60] sm:$0xff] }
 0x1e1   : > { %v2742_v20 = vmax.f32 %v2710_v2, 0.0  ;;  %9399 = vmatmul.mubr.msk.bf16.vlgmr.msra.gmra.mxu0 %vm2766_vm4, %v11877_v1  ;;  %v9307_v41 = vpop.f32.mrf.mxu1  ;;  %v2548_v18 = vpop.f32.mrf.mxu0  ;;  %v2984_v10 = vsel %vm478_vm1, %v2982_v17, %v2983_v21  ;;  %v2986_v29 = vsel %vm478_vm1, %v2983_v21, %v2985_v30  ;;  %v2989_v54 = vsel %vm478_vm1, %v2987_v0, %v2988_v4  ;;  %v11893_v31 = vld [vmem:[#allocation2 + $0x48] sm:$0xff]  ;;  %v10066_v47 = vld [vmem:[%s15128_s4 + $0x20] sm:$0xff]  }
 0x1e2   : > { %v2745_v27 = vmax.f32 %v2713_v28, 0.0  ;;  %v2711_v3 = vadd.f32 %v11744_v7, %v2672_v35  ;;  %v2677_v12 = vmul.f32 %v11723_v24, %v2638_v52  ;;  %v2636_v61 = vadd.f32 %v2545_v16, %v2427_v11  ;;  %9402 = vmatprep.mubr.msk.bf16.mxu0 %vm2766_vm4, %v11865_v22  ;;  %9467 = vmatpush3.bf16.msra.mxu0 %v15415_v38 }
 0x1e3   : > { %2831 = vst.msk [vmem:[#allocation2 + $0x79] sm:$0xff] %vm2766_vm4, %v2742_v20  ;;  %v2430_v17 = vadd.f32 %v9307_v41, %v11735_v15  ;;  %v2339_v0 = vpop.f32.mrf.mxu1  ;;  %v11904_v32 = vpack.c.bf16 %v2986_v29, %v2984_v10  ;;  %v2991_v45 = vsel %vm478_vm1, %v2988_v4, %v2990_v36  ;;  %v9344_v49 = vpop.f32.mrf.mxu0  ;;  %v11907_v33 = vld [vmem:[#allocation2 + $0x68] sm:$0xff]  ;;  %v2992_v16 = vrot.slane %v11893_v31, 1  ;;  %9468 = vmatprep.subr.bf16.mxu0 %v10068_v42  ;;  %v11920_v4 = vld [vmem:[%s15128_s4 + $0x58] sm:$0xff]   ;;  %v15418_v20 = vld [vmem:[#allocation14_spill] sm:$0xff] }
 0x1e4   : > { %2834 = vst.msk [vmem:[#allocation2 + $0x99] sm:$0xff] %vm2766_vm4, %v2745_v27  ;;  %v2743_v51 = vmax.f32 %v2711_v3, 0.0  ;;  %v2716_v15 = vadd.f32 %v11744_v7, %v2677_v12  ;;  %v2675_v9 = vmul.f32 %v11723_v24, %v2636_v61  ;;  %v2428_v57 = vadd.f32 %v2339_v0, %v11738_v56  ;;  %v11951_v38 = vld [vmem:[#allocation2 + $0x70] sm:$0x3] }
 0x1e5   : > { %15416 = vst [vmem:[#allocation8_spill] sm:$0xff] %v11904_v32  ;;  %v2639_v36 = vadd.f32 %v9341_v48, %v2430_v17  ;;  %9363 = vmatmul.mubr.msk.bf16.vlgmr.msra.gmra.mxu1 %vm2766_vm4, %v11904_v32  ;;  %v11924_v2 = vpack.c.bf16 %v2991_v45, %v2989_v54  ;;  %v9310_v26 = vpop.f32.mrf.mxu1  ;;  %v2561_v21 = vpop.f32.mrf.mxu0  ;;  %v11926_v30 = vld [vmem:[#allocation2 + $0x50] sm:$0xff]  ;;  %v11930_v28 = vpack.c.bf16 %v11907_v33, %v11899_v25  ;;  %v11932_v56 = vld [vmem:[#allocation2 + $0x58] sm:$0x3]  ;;  %v2997_v35 = vrot.slane %v11899_v25, 1  ;;  %v11956_v17 = vld [vmem:[%s15128_s4 + $0x48] sm:$0xff]  }
 0x1e6   : > { %2832 = vst.msk [vmem:[#allocation2 + $0x81] sm:$0xff] %vm2766_vm4, %v2743_v51  ;;  %v2748_v48 = vmax.f32 %v2716_v15, 0.0  ;;  %v2714_v52 = vadd.f32 %v11744_v7, %v2675_v9  ;;  %v2637_v11 = vadd.f32 %v2548_v18, %v2428_v57  ;;  %9431 = vmatpush3.bf16.msra.mxu1 %v15418_v20  ;;  %v2433_v41 = vadd.f32 %v9310_v26, %v11747_v46 }
 0x1e7   : > { %15417 = vst [vmem:[#allocation11_spill] sm:$0xff] %v11924_v2  ;;  %9469 = vmatpush3.bf16.msra.mxu0 %v10068_v42  ;;  %v2678_v10 = vmul.f32 %v11723_v24, %v2639_v36  ;;  %9366 = vmatprep.mubr.msk.bf16.mxu1 %vm2766_vm4, %v11924_v2  ;;  %v2352_v29 = vpop.f32.mrf.mxu1  ;;  %v11944_v54 = vpack.c.bf16 %v11926_v30, %v11893_v31  ;;  %v9345_v27 = vpop.f32.mrf.mxu0  ;;  %v2993_v3 = vrot.slane %v11926_v30, 1  ;;  %v2995_v18 = vrot.slane %v11932_v56, 1 }
 0x1e8   : > { %9432 = vmatprep.subr.bf16.mxu1 %v10066_v47  ;;  %2837 = vst.msk [vmem:[#allocation2 + $0xc1] sm:$0xff] %vm2766_vm4, %v2748_v48  ;;  %v2746_v46 = vmax.f32 %v2714_v52, 0.0  ;;  %v2676_v42 = vmul.f32 %v11723_v24, %v2637_v11  ;;  %v2642_v12 = vadd.f32 %v9344_v49, %v2433_v41  ;;  %v2431_v61 = vadd.f32 %v2352_v29, %v11751_v62 }
 0x1e9   : > { %9538 = vmatprep.subr.bf16.mxu0 %v11920_v4  ;;  %v2717_v0 = vadd.f32 %v11744_v7, %v2678_v10  ;;  %9403 = vmatmul.mubr.msk.bf16.gmra.mxu0 %vm2766_vm4, %v11944_v54  ;;  %v9311_v45 = vpop.f32.mrf.mxu1  ;;  %v2564_v51 = vpop.f32.mrf.mxu0  ;;  %v2994_v49 = vsel %vm478_vm1, %v2992_v16, %v2993_v3  ;;  %v2996_v62 = vsel %vm478_vm1, %v2993_v3, %v2995_v18  ;;  %v2998_v15 = vrot.slane %v11907_v33, 1 }
 0x1ea   : > { %2835 = vst.msk [vmem:[#allocation2 + $0xa9] sm:$0xff] %vm2766_vm4, %v2746_v46  ;;  %v2715_v9 = vadd.f32 %v11744_v7, %v2676_v42  ;;  %v2681_v57 = vmul.f32 %v11723_v24, %v2642_v12  ;;  %v2640_v36 = vadd.f32 %v2561_v21, %v2431_v61  ;;  %v2434_v26 = vadd.f32 %v9311_v45, %v11754_v60  ;;  %v11971_v48 = vld [vmem:[#allocation2 + $0x78] sm:$0xff]  ;;  %v11981_v46 = vld [vmem:[#allocation2 + $0x90] sm:$0xff] }
 0x1eb   : > { %9406 = vmatprep.mubr.msk.bf16.mxu0 %vm2766_vm4, %v11930_v28  ;;  %v2749_v52 = vmax.f32 %v2717_v0, 0.0  ;;  %v2355_v16 = vpop.f32.mrf.mxu1  ;;  %v11973_v11 = vpack.c.bf16 %v2996_v62, %v2994_v49  ;;  %v2999_v20 = vsel %vm478_vm1, %v2997_v35, %v2998_v15  ;;  %v3000_v41 = vrot.slane %v11951_v38, 1  ;;  %v9348_v10 = vpop.f32.mrf.mxu0  ;;  %v11977_v29 = vld [vmem:[#allocation2 + $0x98] sm:$0xff]  ;;  %9433 = vmatpush3.bf16.msra.mxu1 %v10066_v47 }
 0x1ec   : > { %v2747_v21 = vmax.f32 %v2715_v9, 0.0  ;;  %v2720_v60 = vadd.f32 %v11744_v7, %v2681_v57  ;;  %v2679_v3 = vmul.f32 %v11723_v24, %v2640_v36  ;;  %v2643_v18 = vadd.f32 %v9345_v27, %v2434_v26  ;;  %9502 = vmatprep.subr.bf16.mxu1 %v11956_v17 }
 0x1ed   : > { %15419 = vst [vmem:[#allocation19_spill] sm:$0xff] %v11973_v11  ;;  %2838 = vst.msk [vmem:[#allocation2 + $0xc9] sm:$0xff] %vm2766_vm4, %v2749_v52  ;;  %v2432_v35 = vadd.f32 %v2355_v16, %v11763_v39  ;;  %9367 = vmatmul.mubr.msk.bf16.gmra.mxu1 %vm2766_vm4, %v11973_v11  ;;  %v3001_v42 = vsel %vm478_vm1, %v2998_v15, %v3000_v41  ;;  %v9314_v47 = vpop.f32.mrf.mxu1  ;;  %v2577_v12 = vpop.f32.mrf.mxu0  ;;  %v11989_v61 = vld [vmem:[#allocation2 + $0x80] sm:$0xff]  ;;  %v11993_v27 = vpack.c.bf16 %v11977_v29, %v11981_v46  ;;  %v11995_v0 = vld [vmem:[#allocation2 + $0x88] sm:$0x3] }
 0x1ee   : > { %v3002_v45 = vrot.slane %v11971_v48, 1  ;;  %2836 = vst.msk [vmem:[#allocation2 + $0xb1] sm:$0xff] %vm2766_vm4, %v2747_v21  ;;  %v2752_v39 = vmax.f32 %v2720_v60, 0.0  ;;  %v2718_v49 = vadd.f32 %v11744_v7, %v2679_v3  ;;  %v2682_v62 = vmul.f32 %v11723_v24, %v2643_v18 }
 0x1ef   : > { %v12001_v15 = vpack.c.bf16 %v3001_v42, %v2999_v20  ;;  %v2641_v9 = vadd.f32 %v2564_v51, %v2432_v35  ;;  %v2437_v57 = vadd.f32 %v9314_v47, %v11774_v44  ;;  %v2368_v36 = vpop.f32.mrf.mxu1  ;;  %v12006_v26 = vpack.c.bf16 %v11989_v61, %v11971_v48  ;;  %v9349_v52 = vpop.f32.mrf.mxu0  ;;  %v12019_v42 = vld [vmem:[#allocation2 + $0xa0] sm:$0x3] }
 0x1f0   : > { %v3003_v16 = vrot.slane %v11989_v61, 1  ;;  %2841 = vst.msk [vmem:[#allocation2 + $0xf1] sm:$0xff] %vm2766_vm4, %v2752_v39  ;;  %v2750_v41 = vmax.f32 %v2718_v49, 0.0  ;;  %v2721_v21 = vadd.f32 %v11744_v7, %v2682_v62  ;;  %v2435_v51 = vadd.f32 %v2368_v36, %v11777_v8 }
 0x1f1   : > { %15420 = vst [vmem:[#allocation18_spill] sm:$0xff] %v12001_v15  ;;  %9370 = vmatprep.mubr.msk.bf16.mxu1 %vm2766_vm4, %v12001_v15  ;;  %v3005_v44 = vrot.slane %v11995_v0, 1  ;;  %v2680_v20 = vmul.f32 %v11723_v24, %v2641_v9  ;;  %v2646_v60 = vadd.f32 %v9348_v10, %v2437_v57  ;;  %9407 = vmatmul.mubr.msk.bf16.gmra.mxu0 %vm2766_vm4, %v12006_v26  ;;  %v9315_v3 = vpop.f32.mrf.mxu1  ;;  %v2580_v18 = vpop.f32.mrf.mxu0  ;;  %v3007_v47 = vrot.slane %v11981_v46, 1 }
 0x1f2   : > { %v3004_v35 = vsel %vm478_vm1, %v3002_v45, %v3003_v16  ;;  %2839 = vst.msk [vmem:[#allocation2 + $0xd9] sm:$0xff] %vm2766_vm4, %v2750_v41  ;;  %v2753_v39 = vmax.f32 %v2721_v21, 0.0  ;;  %v2644_v8 = vadd.f32 %v2577_v12, %v2435_v51  ;;  %v2438_v49 = vadd.f32 %v9315_v3, %v11786_v43  ;;  %9410 = vmatprep.mubr.msk.bf16.mxu0 %vm2766_vm4, %v11993_v27 }
 0x1f3   : > { %v3006_v10 = vsel %vm478_vm1, %v3003_v16, %v3005_v44  ;;  %v2719_v62 = vadd.f32 %v11744_v7, %v2680_v20  ;;  %v2685_v9 = vmul.f32 %v11723_v24, %v2646_v60  ;;  %v2371_v45 = vpop.f32.mrf.mxu1  ;;  %v3008_v36 = vrot.slane %v11977_v29, 1  ;;  %v9352_v15 = vpop.f32.mrf.mxu0  ;;  %v12036_v16 = vld [vmem:[#allocation2 + $0xc0] sm:$0xff] }
 0x1f4   : > { %v12029_v57 = vpack.c.bf16 %v3006_v10, %v3004_v35  ;;  %2842 = vst.msk [vmem:[#allocation2 + $0xf9] sm:$0xff] %vm2766_vm4, %v2753_v39  ;;  %v2683_v12 = vmul.f32 %v11723_v24, %v2644_v8  ;;  %v2647_v43 = vadd.f32 %v9349_v52, %v2438_v49  ;;  %v2436_v41 = vadd.f32 %v2371_v45, %v11789_v50  ;;  %v12038_v51 = vld [vmem:[#allocation2 + $0xc8] sm:$0xff] }
 0x1f5   : > { %v3010_v21 = vrot.slane %v12019_v42, 1  ;;  %v2751_v44 = vmax.f32 %v2719_v62, 0.0  ;;  %v2724_v20 = vadd.f32 %v11744_v7, %v2685_v9  ;;  %v3009_v60 = vsel %vm478_vm1, %v3007_v47, %v3008_v36  ;;  %v9318_v3 = vpop.f32.mrf.mxu1  ;;  %v2593_v35 = vpop.f32.mrf.mxu0  ;;  %v12044_v39 = vld [vmem:[#allocation2 + $0xb0] sm:$0xff]  ;;  %v12053_v62 = vld [vmem:[#allocation2 + $0xa8] sm:$0xff]  ;;  %v12055_v9 = vld [vmem:[#allocation2 + $0xb8] sm:$0x3] }
 0x1f6   : > { %15421 = vst [vmem:[#allocation7_spill] sm:$0xff] %v12029_v57  ;;  %9371 = vmatmul.mubr.msk.bf16.gmra.mxu1 %vm2766_vm4, %v12029_v57  ;;  %v12048_v50 = vpack.c.bf16 %v12038_v51, %v12036_v16  ;;  %v2722_v52 = vadd.f32 %v11744_v7, %v2683_v12  ;;  %v2686_v8 = vmul.f32 %v11723_v24, %v2647_v43 }
 0x1f7   : > { %v2645_v49 = vadd.f32 %v2580_v18, %v2436_v41  ;;  %v3011_v10 = vsel %vm478_vm1, %v3008_v36, %v3010_v21  ;;  %2840 = vst.msk [vmem:[#allocation2 + $0xe1] sm:$0xff] %vm2766_vm4, %v2751_v44  ;;  %v2756_v47 = vmax.f32 %v2724_v20, 0.0  ;;  %v2441_v57 = vadd.f32 %v9318_v3, %v11792_v34  ;;  %v2384_v11 = vpop.f32.mrf.mxu1  ;;  %v9353_v43 = vpop.f32.mrf.mxu0 }
 0x1f8   : > { %v12058_v45 = vpack.c.bf16 %v3011_v10, %v3009_v60  ;;  %v12063_v12 = vpack.c.bf16 %v12044_v39, %v12053_v62  ;;  %v2754_v18 = vmax.f32 %v2722_v52, 0.0  ;;  %v2725_v36 = vadd.f32 %v11744_v7, %v2686_v8 }
 0x1f9   : > { %v2684_v41 = vmul.f32 %v11723_v24, %v2645_v49  ;;  %v2439_v21 = vadd.f32 %v2384_v11, %v11798_v53  ;;  %2845 = vst.msk [vmem:[#allocation2 + $0x121] sm:$0xff] %vm2766_vm4, %v2756_v47  ;;  %v2650_v44 = vadd.f32 %v9352_v15, %v2441_v57  ;;  %v9319_v34 = vpop.f32.mrf.mxu1  ;;  %v2596_v20 = vpop.f32.mrf.mxu0  ;;  %v3012_v60 = vrot.slane %v12053_v62, 1  ;;  %v12081_v15 = vld [vmem:[#allocation2 + $0xd0] sm:$0x3] }
 0x1fa   : > { %15422 = vst [vmem:[#allocation34_spill] sm:$0xff] %v12058_v45  ;;  %9374 = vmatprep.mubr.msk.bf16.mxu1 %vm2766_vm4, %v12058_v45  ;;  %9411 = vmatmul.mubr.msk.bf16.gmra.mxu0 %vm2766_vm4, %v12063_v12  ;;  %v3013_v3 = vrot.slane %v12044_v39, 1  ;;  %v3015_v52 = vrot.slane %v12055_v9, 1  ;;  %2843 = vst.msk [vmem:[#allocation2 + $0x109] sm:$0xff] %vm2766_vm4, %v2754_v18  ;;  %v2757_v53 = vmax.f32 %v2725_v36, 0.0  ;;  %v2442_v49 = vadd.f32 %v9319_v34, %v11820_v59 }
 0x1fb   : > { %v2723_v11 = vadd.f32 %v11744_v7, %v2684_v41  ;;  %v2648_v8 = vadd.f32 %v2593_v35, %v2439_v21  ;;  %9414 = vmatprep.mubr.msk.bf16.mxu0 %vm2766_vm4, %v12048_v50  ;;  %v2689_v57 = vmul.f32 %v11723_v24, %v2650_v44  ;;  %v2387_v10 = vpop.f32.mrf.mxu1  ;;  %v3017_v18 = vrot.slane %v12036_v16, 1  ;;  %v9356_v36 = vpop.f32.mrf.mxu0 }
 0x1fc   : > { %v3014_v47 = vsel %vm478_vm1, %v3012_v60, %v3013_v3  ;;  %v3016_v45 = vsel %vm478_vm1, %v3013_v3, %v3015_v52  ;;  %2846 = vst.msk [vmem:[#allocation2 + $0x129] sm:$0xff] %vm2766_vm4, %v2757_v53  ;;  %v2651_v41 = vadd.f32 %v9353_v43, %v2442_v49  ;;  %v2440_v21 = vadd.f32 %v2387_v10, %v11823_v5  ;;  %v12099_v5 = vld [vmem:[#allocation2 + $0xd8] sm:$0xff] }
 0x1fd   : > { %v2755_v35 = vmax.f32 %v2723_v11, 0.0  ;;  %v2687_v59 = vmul.f32 %v11723_v24, %v2648_v8  ;;  %v2728_v34 = vadd.f32 %v11744_v7, %v2689_v57  ;;  %v12091_v2 = vpack.c.bf16 %v3016_v45, %v3014_v47  ;;  %v9322_v3 = vpop.f32.mrf.mxu1  ;;  %v2609_v52 = vpop.f32.mrf.mxu0  ;;  %15424 = vst [vmem:[#allocation28_spill] sm:$0xff] %v12099_v5  ;;  %v12103_v45 = vld [vmem:[#allocation2 + $0xf8] sm:$0xff] }
 0x1fe   : > { %v3018_v44 = vrot.slane %v12038_v51, 1  ;;  %v3020_v60 = vrot.slane %v12081_v15, 1  ;;  %v2690_v11 = vmul.f32 %v11723_v24, %v2651_v41  ;;  %v2649_v8 = vadd.f32 %v2596_v20, %v2440_v21  ;;  %v12101_v49 = vld [vmem:[#allocation2 + $0xe0] sm:$0xff] }
 0x1ff   : > { %15423 = vst [vmem:[#allocation27_spill] sm:$0xff] %v12091_v2  ;;  %2844 = vst.msk [vmem:[#allocation2 + $0x111] sm:$0xff] %vm2766_vm4, %v2755_v35  ;;  %v2726_v53 = vadd.f32 %v11744_v7, %v2687_v59  ;;  %v2445_v43 = vadd.f32 %v9322_v3, %v11832_v6  ;;  %v2760_v57 = vmax.f32 %v2728_v34, 0.0  ;;  %9375 = vmatmul.mubr.msk.bf16.gmra.mxu1 %vm2766_vm4, %v12091_v2  ;;  %v2400_v35 = vpop.f32.mrf.mxu1  ;;  %v12117_v34 = vld [vmem:[#allocation2 + $0xf0] sm:$0xff]  ;;  %v12119_v3 = vld [vmem:[#allocation2 + $0xe8] sm:$0x3] }
 0x200   : > { %v3019_v10 = vsel %vm478_vm1, %v3017_v18, %v3018_v44  ;;  %v3021_v47 = vsel %vm478_vm1, %v3018_v44, %v3020_v60  ;;  %v12111_v20 = vpack.c.bf16 %v12101_v49, %v12099_v5  ;;  %v2729_v59 = vadd.f32 %v11744_v7, %v2690_v11  ;;  %15426 = vst [vmem:[#allocation38_spill] sm:$0xff] %v12117_v34 }
 0x201   : > { %v2758_v6 = vmax.f32 %v2726_v53, 0.0  ;;  %v2688_v41 = vmul.f32 %v11723_v24, %v2649_v8  ;;  %v12115_v21 = vpack.c.bf16 %v3021_v47, %v3019_v10  ;;  %2849 = vst.msk [vmem:[#allocation2 + $0x151] sm:$0xff] %vm2766_vm4, %v2760_v57  ;;  %v2654_v18 = vadd.f32 %v9356_v36, %v2445_v43  ;;  %v9323_v60 = vpop.f32.mrf.mxu1  ;;  %v9357_v53 = vpop.f32.mrf.mxu0 }
 0x202   : > { %v2443_v44 = vadd.f32 %v2400_v35, %v11835_v58  ;;  %9415 = vmatmul.mubr.msk.bf16.gmra.mxu0 %vm2766_vm4, %v12111_v20  ;;  %v12127_v11 = vpack.c.bf16 %v12103_v45, %v12117_v34  ;;  %v3022_v8 = vrot.slane %v12099_v5, 1  ;;  %v2761_v10 = vmax.f32 %v2729_v59, 0.0 }
 0x203   : > { %15425 = vst [vmem:[#allocation10_spill] sm:$0xff] %v12115_v21  ;;  %2847 = vst.msk [vmem:[#allocation2 + $0x139] sm:$0xff] %vm2766_vm4, %v2758_v6  ;;  %v2727_v47 = vadd.f32 %v11744_v7, %v2688_v41  ;;  %9378 = vmatprep.mubr.msk.bf16.mxu1 %vm2766_vm4, %v12115_v21  ;;  %v2446_v58 = vadd.f32 %v9323_v60, %v11838_v40  ;;  %v3023_v36 = vrot.slane %v12101_v49, 1  ;;  %v2403_v35 = vpop.f32.mrf.mxu1  ;;  %v3025_v2 = vrot.slane %v12119_v3, 1  ;;  %v12140_v6 = vld [vmem:[#allocation2 + $0x100] sm:$0x3] }
 0x204   : > { %15427 = vst [vmem:[#allocation29_spill] sm:$0xff] %v12127_v11  ;;  %v2693_v43 = vmul.f32 %v11723_v24, %v2654_v18  ;;  %v2652_v57 = vadd.f32 %v2609_v52, %v2443_v44  ;;  %9418 = vmatprep.mubr.msk.bf16.mxu0 %vm2766_vm4, %v12127_v11  ;;  %v3027_v59 = vrot.slane %v12117_v34, 1  ;;  %2850 = vst.msk [vmem:[#allocation2 + $0x159] sm:$0xff] %vm2766_vm4, %v2761_v10  ;;  %v2612_v44 = vpop.f32.mrf.mxu0  ;;  %v3028_v11 = vrot.slane %v12103_v45, 1  ;;  %v12152_v34 = vld [vmem:[#allocation2 + $0x128] sm:$0xff] }
 0x205   : > { %v2759_v41 = vmax.f32 %v2727_v47, 0.0  ;;  %v2655_v21 = vadd.f32 %v9357_v53, %v2446_v58  ;;  %v2444_v40 = vadd.f32 %v2403_v35, %v11849_v13  ;;  %v3024_v60 = vsel %vm478_vm1, %v3022_v8, %v3023_v36  ;;  %v12159_v47 = vld [vmem:[#allocation2 + $0x108] sm:$0xff] }
 0x206   : > { %v2732_v52 = vadd.f32 %v11744_v7, %v2693_v43  ;;  %v2691_v18 = vmul.f32 %v11723_v24, %v2652_v57  ;;  %v3026_v32 = vsel %vm478_vm1, %v3023_v36, %v3025_v2  ;;  %v12150_v5 = vld [vmem:[#allocation2 + $0x110] sm:$0xff]  ;;  %v3030_v8 = vrot.slane %v12140_v6, 1  ;;  %v12167_v57 = vld [vmem:[#allocation2 + $0x120] sm:$0xff]  ;;  %v12169_v35 = vld [vmem:[#allocation2 + $0x118] sm:$0x3] }
 0x207   : > { %2848 = vst.msk [vmem:[#allocation2 + $0x141] sm:$0xff] %vm2766_vm4, %v2759_v41  ;;  %v2694_v53 = vmul.f32 %v11723_v24, %v2655_v21  ;;  %v2653_v13 = vadd.f32 %v2612_v44, %v2444_v40  ;;  %v12156_v10 = vpack.c.bf16 %v3026_v32, %v3024_v60  ;;  %v3029_v36 = vsel %vm478_vm1, %v3027_v59, %v3028_v11  ;;  %v12180_v40 = vld [vmem:[#allocation2 + $0x130] sm:$0x3] }
 0x208   : > { %v2764_v58 = vmax.f32 %v2732_v52, 0.0  ;;  %v2730_v2 = vadd.f32 %v11744_v7, %v2691_v18  ;;  %v12165_v43 = vpack.c.bf16 %v12150_v5, %v12159_v47  ;;  %15429 = vst [vmem:[#allocation40_spill] sm:$0xff] %v12167_v57  ;;  %v3031_v41 = vsel %vm478_vm1, %v3028_v11, %v3030_v8 }
 0x209   : > { %15428 = vst [vmem:[#allocation13_spill] sm:$0xff] %v12156_v10  ;;  %v2733_v32 = vadd.f32 %v11744_v7, %v2694_v53  ;;  %v2692_v21 = vmul.f32 %v11723_v24, %v2653_v13  ;;  %9379 = vmatmul.mubr.msk.bf16.gmra.mxu1 %vm2766_vm4, %v12156_v10  ;;  %v12178_v59 = vpack.c.bf16 %v12152_v34, %v12167_v57  ;;  %v3032_v24 = vrot.slane %v12159_v47, 1 }
 0x20a   : > { %2853 = vst.msk [vmem:[#allocation2 + $0x181] sm:$0xff] %vm2766_vm4, %v2764_v58  ;;  %v2762_v60 = vmax.f32 %v2730_v2, 0.0  ;;  %v12183_v52 = vpack.c.bf16 %v3031_v41, %v3029_v36  ;;  %9419 = vmatmul.mubr.msk.bf16.gmra.mxu0 %vm2766_vm4, %v12165_v43  ;;  %v3033_v18 = vrot.slane %v12150_v5, 1  ;;  %v3035_v53 = vrot.slane %v12169_v35, 1 }
 0x20b   : > { %v2765_v44 = vmax.f32 %v2733_v32, 0.0  ;;  %v2731_v11 = vadd.f32 %v11744_v7, %v2692_v21  ;;  %9422 = vmatprep.mubr.msk.bf16.mxu0 %vm2766_vm4, %v12178_v59  ;;  %v3037_v8 = vrot.slane %v12167_v57, 1  ;;  %v3038_v58 = vrot.slane %v12152_v34, 1  ;;  %v12202_v32 = vld [vmem:[#allocation2 + $0x138] sm:$0xff]  ;;  %v12214_v57 = vld [vmem:[#allocation2 + $0x160] sm:$0x3] }
 0x20c   : > { %15430 = vst [vmem:[#allocation17_spill] sm:$0xff] %v12183_v52  ;;  %2851 = vst.msk [vmem:[#allocation2 + $0x169] sm:$0xff] %vm2766_vm4, %v2762_v60  ;;  %9382 = vmatprep.mubr.msk.bf16.mxu1 %vm2766_vm4, %v12183_v52  ;;  %v3034_v13 = vsel %vm478_vm1, %v3032_v24, %v3033_v18  ;;  %v3040_v2 = vrot.slane %v12180_v40, 1  ;;  %v3036_v36 = vsel %vm478_vm1, %v3033_v18, %v3035_v53  ;;  %v12204_v21 = vld [vmem:[#allocation2 + $0x158] sm:$0xff] }
 0x20d   : > { %2854 = vst.msk [vmem:[#allocation2 + $0x189] sm:$0xff] %vm2766_vm4, %v2765_v44  ;;  %v2763_v7 = vmax.f32 %v2731_v11, 0.0  ;;  %15431 = vst [vmem:[#allocation42_spill] sm:$0xff] %v12202_v32  ;;  %v12206_v41 = vpack.c.bf16 %v3036_v36, %v3034_v13  ;;  %v3039_v60 = vsel %vm478_vm1, %v3037_v8, %v3038_v58  ;;  %v12225_v13 = vld [vmem:[#allocation2 + $0x150] sm:$0xff]  ;;  %v3042_v8 = vrot.slane %v12202_v32, 1 }
 0x20e   : > { %15432 = vst [vmem:[#allocation45_spill] sm:$0xff] %v12204_v21  ;;  %v3041_v24 = vsel %vm478_vm1, %v3038_v58, %v3040_v2  ;;  %v12210_v52 = vld [vmem:[#allocation2 + $0x140] sm:$0xff]  ;;  %v12212_v10 = vld [vmem:[#allocation2 + $0x148] sm:$0x3]  ;;  %15435 = vst [vmem:[#allocation20_spill] sm:$0xff] %v12214_v57  ;;  %v12232_v58 = vpack.c.bf16 %v12204_v21, %v12225_v13  ;;  %v3048_v2 = vrot.slane %v12204_v21, 1 }
 0x20f   : > { %15433 = vst [vmem:[#allocation30_spill] sm:$0xff] %v12206_v41  ;;  %15434 = vst [vmem:[#allocation31_spill] sm:$0xff] %v12212_v10  ;;  %v12219_v18 = vpack.c.bf16 %v12210_v52, %v12202_v32  ;;  %v3043_v44 = vrot.slane %v12210_v52, 1  ;;  %v3045_v11 = vrot.slane %v12212_v10, 1  ;;  %v12223_v53 = vpack.c.bf16 %v3041_v24, %v3039_v60 }
 0x210   : > { %2852 = vst.msk [vmem:[#allocation2 + $0x171] sm:$0xff] %vm2766_vm4, %v2763_v7  ;;  %v3050_v7 = vrot.slane %v12214_v57, 1  ;;  %v3047_v24 = vrot.slane %v12225_v13, 1 }
 0x211   : > { %15436 = vst [vmem:[#allocation48_spill] sm:$0xff] %v12223_v53  ;;  %9383 = vmatmul.mubr.msk.bf16.gmra.mxu1 %vm2766_vm4, %v12206_v41  ;;  %v3044_v36 = vsel %vm478_vm1, %v3042_v8, %v3043_v44  ;;  %v3046_v60 = vsel %vm478_vm1, %v3043_v44, %v3045_v11 }
 0x212   : > { %9386 = vmatprep.mubr.msk.bf16.mxu1 %vm2766_vm4, %v12223_v53  ;;  %9423 = vmatmul.mubr.msk.bf16.gmra.mxu0 %vm2766_vm4, %v12219_v18  ;;  %v12245_v41 = vpack.c.bf16 %v3046_v60, %v3044_v36  ;;  %v3049_v32 = vsel %vm478_vm1, %v3047_v24, %v3048_v2  ;;  %v3051_v57 = vsel %vm478_vm1, %v3048_v2, %v3050_v7  ;;  %v3560_v24 = vrot.slane %v11867_v55, 2 }
 0x213   : > { %9426 = vmatprep.mubr.msk.bf16.mxu0 %vm2766_vm4, %v12232_v58  ;;  %v12249_v21 = vld [vmem:[#allocation2 + $0x168] sm:$0xff]  ;;  %v12261_v36 = vpack.c.bf16 %v3051_v57, %v3049_v32  ;;  %v3558_v32 = vrot.slane %v11861_v23, 2  ;;  %v3557_v23 = vrot.slane %v11842_v63, 2  ;;  %v3562_v55 = vrot.slane %v11829_v19, 2  ;;  %v10070_v19 = vld [vmem:[%s15128_s4 + $0x40] sm:$0xff]  }
 0x214   : > { %v3052_v60 = vrot.slane %v12249_v21, 1 }
 0x215   : > { %15437 = vst [vmem:[#allocation32_spill] sm:$0xff] %v12261_v36 }
 0x217   : > { %v12251_v53 = vld [vmem:[#allocation2 + $0x170] sm:$0xff]  ;;  %v12253_v10 = vld [vmem:[#allocation2 + $0x178] sm:$0x3] }
 0x218   : > { %v12257_v44 = vpack.c.bf16 %v12251_v53, %v12249_v21  ;;  %v3053_v11 = vrot.slane %v12251_v53, 1  ;;  %v3055_v8 = vrot.slane %v12253_v10, 1 }
 0x219   : > { %9387 = vmatmul.mubr.msk.bf16.gmra.mxu1 %vm2766_vm4, %v12245_v41 }
 0x21a   : > { %9390 = vmatprep.mubr.msk.bf16.mxu1 %vm2766_vm4, %v12261_v36  ;;  %9427 = vmatmul.mubr.msk.bf16.gmra.mxu0 %vm2766_vm4, %v12257_v44  ;;  %v3054_v2 = vsel %vm478_vm1, %v3052_v60, %v3053_v11  ;;  %v3056_v7 = vsel %vm478_vm1, %v3053_v11, %v3055_v8  ;;  %v10072_v36 = vld [vmem:[%s15128_s4 + $0x50] sm:$0xff]   ;;  %v3563_v60 = vrot.slane %v11851_v14, 2  ;;  %v3565_v11 = vrot.slane %v11854_v37, 2  ;;  %v15439_v8 = vld [vmem:[#allocation44_spill] sm:$0xff] }
 0x21b   : > { %9470 = vmatprep.mubr.msk.bf16.mxu0 %vm2766_vm4, %v11877_v1  ;;  %v12274_v57 = vpack.c.bf16 %v3056_v7, %v3054_v2  ;;  %v15438_v1 = vld [vmem:[#allocation47_spill] sm:$0xff]  ;;  %v3559_v14 = vsel %vm1035_vm3, %v3557_v23, %v3558_v32  ;;  %v3561_v37 = vsel %vm1035_vm3, %v3558_v32, %v3560_v24  ;;  %v3568_v32 = vrot.slane %v11926_v30, 2 }
 0x21c   : > { %v15440_v2 = vpack.c.bf16 %v15438_v1, %v15439_v8  ;;  %v12301_v7 = vld [vmem:[%s15128_s4 + $0x78] sm:$0xff]   ;;  %v3564_v1 = vsel %vm1035_vm3, %v3562_v55, %v3563_v60  ;;  %v3566_v63 = vsel %vm1035_vm3, %v3563_v60, %v3565_v11  ;;  %v12305_v8 = vpack.c.bf16 %v3561_v37, %v3559_v14 }
 0x21d   : > { %v3570_v24 = vrot.slane %v11932_v56, 2  ;;  %v3573_v60 = vrot.slane %v11907_v33, 2  ;;  %v3575_v11 = vrot.slane %v11951_v38, 2  ;;  %v3572_v30 = vrot.slane %v11899_v25, 2  ;;  %v12329_v56 = vld [vmem:[%s15128_s4 + $0x68] sm:$0xff]  }
 0x21e   : > { %v3578_v23 = vrot.slane %v11989_v61, 2  ;;  %v3580_v55 = vrot.slane %v11995_v0, 2  ;;  %v3583_v14 = vrot.slane %v11977_v29, 2  ;;  %v3585_v37 = vrot.slane %v12019_v42, 2 }
 0x21f   : > { %v3571_v38 = vsel %vm1035_vm3, %v3568_v32, %v3570_v24  ;;  %v3590_v24 = vrot.slane %v12055_v9, 2 }
 0x220   : > { %v3581_v0 = vsel %vm1035_vm3, %v3578_v23, %v3580_v55  ;;  %v3586_v42 = vsel %vm1035_vm3, %v3583_v14, %v3585_v37  ;;  %v15442_v55 = vld [vmem:[#allocation29_spill] sm:$0xff] }
 0x221   : > { %9391 = vmatmul.mubr.msk.bf16.gmra.mxu1 %vm2766_vm4, %v12274_v57 }
 0x222   : > { %9471 = vmatmul.mubr.msk.bf16.vlgmr.msra.gmra.mxu0 %vm2766_vm4, %v11865_v22  ;;  %9434 = vmatprep.mubr.msk.bf16.mxu1 %vm2766_vm4, %v15440_v2 }
 0x223   : > { %9474 = vmatprep.mubr.msk.bf16.mxu0 %vm2766_vm4, %v11944_v54  ;;  %9539 = vmatpush3.bf16.msra.mxu0 %v11920_v4  ;;  %v12310_v4 = vpack.c.bf16 %v3566_v63, %v3564_v1  ;;  %v3577_v1 = vrot.slane %v11971_v48, 2  ;;  %v3582_v63 = vrot.slane %v11981_v46, 2  ;;  %v3588_v48 = vrot.slane %v12044_v39, 2 }
 0x224   : > { %9540 = vmatprep.subr.bf16.mxu0 %v10072_v36  ;;  %v3593_v46 = vrot.slane %v12038_v51, 2 }
 0x225   : > { %v3579_v61 = vsel %vm1035_vm3, %v3577_v1, %v3578_v23  ;;  %v3584_v29 = vsel %vm1035_vm3, %v3582_v63, %v3583_v14  ;;  %v3591_v9 = vsel %vm1035_vm3, %v3588_v48, %v3590_v24  ;;  %v15443_v14 = vld [vmem:[#allocation38_spill] sm:$0xff]  ;;  %v15444_v24 = vld [vmem:[#allocation40_spill] sm:$0xff] }
 0x226   : > { %v3602_v37 = vrot.slane %v15443_v14, 2 }
 0x227   : > { %9541 = vmatpush3.bf16.msra.mxu0 %v10072_v36  ;;  %v3567_v36 = vrot.slane %v11893_v31, 2  ;;  %v3574_v31 = vsel %vm1035_vm3, %v3572_v30, %v3573_v60 }
 0x228   : > { %9610 = vmatprep.subr.bf16.mxu0 %v12301_v7 }
 0x229   : > { %9435 = vmatmul.mubr.msk.bf16.vlgmr.msra.gmra.mxu1 %vm2766_vm4, %v12305_v8  ;;  %v3569_v33 = vsel %vm1035_vm3, %v3567_v36, %v3568_v32  ;;  %v12362_v32 = vpack.c.bf16 %v3586_v42, %v3584_v29  ;;  %v3592_v36 = vrot.slane %v12036_v16, 2  ;;  %v3603_v16 = vrot.slane %v12103_v45, 2 }
 0x22a   : > { %9503 = vmatpush3.bf16.msra.mxu1 %v11956_v17  ;;  %9438 = vmatprep.mubr.msk.bf16.mxu1 %vm2766_vm4, %v12310_v4  ;;  %v3576_v17 = vsel %vm1035_vm3, %v3573_v60, %v3575_v11  ;;  %v12337_v2 = vpack.c.bf16 %v3571_v38, %v3569_v33  ;;  %v3595_v60 = vrot.slane %v12081_v15, 2  ;;  %v3587_v11 = vrot.slane %v12053_v62, 2 }
 0x22b   : > { %9475 = vmatmul.mubr.msk.bf16.gmra.mxu0 %vm2766_vm4, %v11930_v28  ;;  %9504 = vmatprep.subr.bf16.mxu1 %v10070_v19  ;;  %v12340_v25 = vpack.c.bf16 %v3576_v17, %v3574_v31  ;;  %v3594_v51 = vsel %vm1035_vm3, %v3592_v36, %v3593_v46  ;;  %v3598_v62 = vrot.slane %v12101_v49, 2  ;;  %v3600_v38 = vrot.slane %v12119_v3, 2  ;;  %v15441_v17 = vld [vmem:[#allocation28_spill] sm:$0xff]  ;;  %v15445_v36 = vld [vmem:[#allocation31_spill] sm:$0xff] }
 0x22c   : > { %9478 = vmatprep.mubr.msk.bf16.mxu0 %vm2766_vm4, %v12006_v26  ;;  %v3589_v39 = vsel %vm1035_vm3, %v3587_v11, %v3588_v48  ;;  %v3596_v15 = vsel %vm1035_vm3, %v3593_v46, %v3595_v60  ;;  %v3605_v31 = vrot.slane %v12140_v6, 2  ;;  %v3597_v23 = vrot.slane %v15441_v17, 2 }
 0x22d   : > { %v12382_v30 = vpack.c.bf16 %v3591_v9, %v3589_v39  ;;  %v12384_v33 = vpack.c.bf16 %v3596_v15, %v3594_v51  ;;  %v3601_v3 = vsel %vm1035_vm3, %v3598_v62, %v3600_v38  ;;  %v3604_v45 = vsel %vm1035_vm3, %v3602_v37, %v3603_v16  ;;  %v15446_v9 = vld [vmem:[#allocation45_spill] sm:$0xff]  ;;  %v15447_v15 = vld [vmem:[#allocation20_spill] sm:$0xff]  ;;  %v15448_v38 = vld [vmem:[#allocation42_spill] sm:$0xff] }
 0x22e   : > { %9505 = vmatpush3.bf16.msra.mxu1 %v10070_v19  ;;  %v12360_v19 = vpack.c.bf16 %v3581_v0, %v3579_v61  ;;  %v3599_v49 = vsel %vm1035_vm3, %v3597_v23, %v3598_v62  ;;  %v3606_v6 = vsel %vm1035_vm3, %v3603_v16, %v3605_v31  ;;  %v3608_v61 = vrot.slane %v12150_v5, 2  ;;  %v12448_v37 = vld [vmem:[#allocation2 + $0x188] sm:$0xff] }
 0x22f   : > { %9574 = vmatprep.subr.bf16.mxu1 %v12329_v56  ;;  %v12404_v1 = vpack.c.bf16 %v3601_v3, %v3599_v49  ;;  %v12406_v63 = vpack.c.bf16 %v3606_v6, %v3604_v45  ;;  %v3610_v0 = vrot.slane %v12169_v35, 2  ;;  %v3613_v29 = vrot.slane %v12152_v34, 2  ;;  %v12454_v45 = vld [vmem:[#allocation2 + $0x180] sm:$0xff] }
 0x230   : > { %v3615_v42 = vrot.slane %v12180_v40, 2  ;;  %v3607_v48 = vrot.slane %v12159_v47, 2  ;;  %v3612_v46 = vrot.slane %v15444_v24, 2  ;;  %v3618_v47 = vrot.slane %v12210_v52, 2  ;;  %v15451_v24 = vld [vmem:[#allocation19_spill] sm:$0xff] }
 0x231   : > { %9439 = vmatmul.mubr.msk.bf16.gmra.mxu1 %vm2766_vm4, %v12337_v2  ;;  %v3611_v35 = vsel %vm1035_vm3, %v3608_v61, %v3610_v0  ;;  %v3620_v39 = vrot.slane %v15445_v36, 2  ;;  %v3623_v51 = vrot.slane %v15446_v9, 2  ;;  %v3625_v62 = vrot.slane %v15447_v15, 2  ;;  %v15459_v36 = vld [vmem:[#allocation30_spill] sm:$0xff]  ;;  %v15460_v9 = vld [vmem:[#allocation48_spill] sm:$0xff] }
 0x232   : > { %9442 = vmatprep.mubr.msk.bf16.mxu1 %vm2766_vm4, %v12340_v25  ;;  %v3609_v5 = vsel %vm1035_vm3, %v3607_v48, %v3608_v61  ;;  %v3614_v34 = vsel %vm1035_vm3, %v3612_v46, %v3613_v29  ;;  %v3616_v40 = vsel %vm1035_vm3, %v3613_v29, %v3615_v42  ;;  %v3617_v16 = vrot.slane %v15448_v38, 2  ;;  %v10076_v42 = vld [vmem:[%s15128_s4 + $0x70] sm:$0xff]   ;;  %v15450_v48 = vld [vmem:[#allocation11_spill] sm:$0xff] }
 0x233   : > { %9479 = vmatmul.mubr.msk.bf16.gmra.mxu0 %vm2766_vm4, %v11993_v27  ;;  %v12426_v60 = vpack.c.bf16 %v3611_v35, %v3609_v5  ;;  %v12428_v11 = vpack.c.bf16 %v3616_v40, %v3614_v34  ;;  %v3622_v31 = vrot.slane %v12225_v13, 2  ;;  %v3621_v17 = vsel %vm1035_vm3, %v3618_v47, %v3620_v39  ;;  %v15452_v46 = vld [vmem:[#allocation18_spill] sm:$0xff]  ;;  %v15455_v35 = vld [vmem:[#allocation27_spill] sm:$0xff]  ;;  %v15457_v40 = vld [vmem:[#allocation13_spill] sm:$0xff] }
 0x234   : > { %9482 = vmatprep.mubr.msk.bf16.mxu0 %vm2766_vm4, %v12063_v12  ;;  %v3619_v52 = vsel %vm1035_vm3, %v3617_v16, %v3618_v47  ;;  %v3626_v14 = vsel %vm1035_vm3, %v3623_v51, %v3625_v62  ;;  %v3628_v13 = vrot.slane %v12251_v53, 2  ;;  %v3630_v6 = vrot.slane %v12253_v10, 2  ;;  %v15454_v5 = vld [vmem:[#allocation34_spill] sm:$0xff]  ;;  %v15458_v47 = vld [vmem:[#allocation17_spill] sm:$0xff] }
 0x235   : > { %v3624_v23 = vsel %vm1035_vm3, %v3622_v31, %v3623_v51  ;;  %v12450_v49 = vpack.c.bf16 %v3621_v17, %v3619_v52  ;;  %v12462_v61 = vpack.c.bf16 %v12448_v37, %v12454_v45  ;;  %v3627_v0 = vrot.slane %v12249_v21, 2  ;;  %v15449_v21 = vld [vmem:[#allocation8_spill] sm:$0xff]  ;;  %v15456_v34 = vld [vmem:[#allocation10_spill] sm:$0xff] }
 0x236   : > { %v12452_v3 = vpack.c.bf16 %v3626_v14, %v3624_v23  ;;  %v3631_v53 = vsel %vm1035_vm3, %v3628_v13, %v3630_v6  ;;  %v2905_v39 = vld [vmem:[#allocation2 + $0x190] sm:$0x3]  ;;  %v4377_v51 = vrot.slane %v12448_v37, 2  ;;  %v4376_v62 = vrot.slane %v12454_v45, 2  ;;  %v15461_v17 = vld [vmem:[#allocation32_spill] sm:$0xff]  ;;  %v12563_v6 = vld [vmem:[#allocation2 + $0x198] sm:$0xff] }
 0x237   : > { %v3629_v10 = vsel %vm1035_vm3, %v3627_v0, %v3628_v13  ;;  %v4379_v15 = vrot.slane %v2905_v39, 2  ;;  %v4156_v31 = vrot.slane %v12448_v37, 1  ;;  %v4158_v52 = vrot.slane %v2905_v39, 1  ;;  %v12565_v0 = vld [vmem:[#allocation2 + $0x1a0] sm:$0xff] }
 0x238   : > { %v12473_v29 = vpack.c.bf16 %v3631_v53, %v3629_v10  ;;  %v4378_v38 = vsel %vm1035_vm3, %v4376_v62, %v4377_v51  ;;  %v4155_v14 = vrot.slane %v12454_v45, 1  ;;  %v5035_v10 = vrot.slane %v12563_v6, 2  ;;  %v12573_v45 = vld [vmem:[#allocation2 + $0x1a8] sm:$0x3] }
 0x239   : > { %9443 = vmatmul.mubr.msk.bf16.gmra.mxu1 %vm2766_vm4, %v12360_v19  ;;  %v4380_v16 = vsel %vm1035_vm3, %v4377_v51, %v4379_v15  ;;  %v4159_v37 = vsel %vm478_vm1, %v4156_v31, %v4158_v52  ;;  %v5036_v53 = vrot.slane %v12565_v0, 2 }
 0x23a   : > { %9446 = vmatprep.mubr.msk.bf16.mxu1 %vm2766_vm4, %v12362_v32  ;;  %v12552_v23 = vpack.c.bf16 %v4380_v16, %v4378_v38  ;;  %v4157_v13 = vsel %vm478_vm1, %v4155_v14, %v4156_v31  ;;  %v10078_v16 = vld [vmem:[%s15128_s4 + $0x80] sm:$0xff]  }
 0x23b   : > { %9483 = vmatmul.mubr.msk.bf16.gmra.mxu0 %vm2766_vm4, %v12048_v50 }
 0x23c   : > { %9486 = vmatprep.mubr.msk.bf16.mxu0 %vm2766_vm4, %v12111_v20 }
 0x241   : > { %9447 = vmatmul.mubr.msk.bf16.gmra.mxu1 %vm2766_vm4, %v12382_v30 }
 0x242   : > { %9450 = vmatprep.mubr.msk.bf16.mxu1 %vm2766_vm4, %v12384_v33 }
 0x243   : > { %9487 = vmatmul.mubr.msk.bf16.gmra.mxu0 %vm2766_vm4, %v15442_v55 }
 0x244   : > { %9490 = vmatprep.mubr.msk.bf16.mxu0 %vm2766_vm4, %v12165_v43 }
 0x249   : > { %9451 = vmatmul.mubr.msk.bf16.gmra.mxu1 %vm2766_vm4, %v12404_v1 }
 0x24a   : > { %9454 = vmatprep.mubr.msk.bf16.mxu1 %vm2766_vm4, %v12406_v63 }
 0x24b   : > { %9491 = vmatmul.mubr.msk.bf16.gmra.mxu0 %vm2766_vm4, %v12178_v59 }
 0x24c   : > { %9494 = vmatprep.mubr.msk.bf16.mxu0 %vm2766_vm4, %v12219_v18 }
 0x251   : > { %9455 = vmatmul.mubr.msk.bf16.gmra.mxu1 %vm2766_vm4, %v12426_v60 }
 0x252   : > { %9458 = vmatprep.mubr.msk.bf16.mxu1 %vm2766_vm4, %v12428_v11 }
 0x253   : > { %9495 = vmatmul.mubr.msk.bf16.gmra.mxu0 %vm2766_vm4, %v12232_v58 }
 0x254   : > { %9498 = vmatprep.mubr.msk.bf16.mxu0 %vm2766_vm4, %v12257_v44 }
 0x259   : > { %9459 = vmatmul.mubr.msk.bf16.gmra.mxu1 %vm2766_vm4, %v12450_v49 }
 0x25a   : > { %9462 = vmatprep.mubr.msk.bf16.mxu1 %vm2766_vm4, %v12452_v3 }
 0x25b   : > { %9499 = vmatmul.mubr.msk.bf16.gmra.mxu0 %vm2766_vm4, %v12462_v61 }
 0x25c   : > { %9542 = vmatprep.mubr.msk.bf16.mxu0 %vm2766_vm4, %v12305_v8  ;;  %v10074_v8 = vld [vmem:[%s15128_s4 + $0x60] sm:$0xff]  }
 0x261   : > { %9463 = vmatmul.mubr.msk.bf16.gmra.mxu1 %vm2766_vm4, %v12473_v29 }
 0x262   : > { %9506 = vmatprep.mubr.msk.bf16.mxu1 %vm2766_vm4, %v15449_v21 }
 0x263   : > { %9543 = vmatmul.mubr.msk.bf16.vlgmr.msra.gmra.mxu0 %vm2766_vm4, %v12310_v4 }
 0x264   : > { %9546 = vmatprep.mubr.msk.bf16.mxu0 %vm2766_vm4, %v12337_v2  ;;  %9611 = vmatpush3.bf16.msra.mxu0 %v12301_v7  ;;  %v12500_v7 = vld [vmem:[%s15128_s4 + $0x88] sm:$0xff]  }
 0x265   : > { %9612 = vmatprep.subr.bf16.mxu0 %v10076_v42 }
 0x268   : > { %9613 = vmatpush3.bf16.msra.mxu0 %v10076_v42  ;;  %v12569_v42 = vpack.c.bf16 %v4159_v37, %v4157_v13 }
 0x269   : > { %9507 = vmatmul.mubr.msk.bf16.vlgmr.msra.gmra.mxu1 %vm2766_vm4, %v15450_v48 }
 0x26a   : > { %9575 = vmatpush3.bf16.msra.mxu1 %v12329_v56  ;;  %9510 = vmatprep.mubr.msk.bf16.mxu1 %vm2766_vm4, %v15451_v24  ;;  %v15453_v56 = vld [vmem:[#allocation7_spill] sm:$0xff] }
 0x26b   : > { %9547 = vmatmul.mubr.msk.bf16.gmra.mxu0 %vm2766_vm4, %v12340_v25  ;;  %9576 = vmatprep.subr.bf16.mxu1 %v10074_v8 }
 0x26c   : > { %9550 = vmatprep.mubr.msk.bf16.mxu0 %vm2766_vm4, %v12360_v19 }
 0x26e   : > { %9577 = vmatpush3.bf16.msra.mxu1 %v10074_v8  ;;  %v12578_v8 = vsel %vm1035_vm3, %v5035_v10, %v5036_v53 }
 0x26f   : > { %9646 = vmatprep.subr.bf16.mxu1 %v12500_v7 }
 0x271   : > { %9511 = vmatmul.mubr.msk.bf16.gmra.mxu1 %vm2766_vm4, %v15452_v46 }
 0x272   : > { %9514 = vmatprep.mubr.msk.bf16.mxu1 %vm2766_vm4, %v15453_v56 }
 0x273   : > { %9551 = vmatmul.mubr.msk.bf16.gmra.mxu0 %vm2766_vm4, %v12362_v32 }
 0x274   : > { %9554 = vmatprep.mubr.msk.bf16.mxu0 %vm2766_vm4, %v12382_v30 }
 0x279   : > { %9515 = vmatmul.mubr.msk.bf16.gmra.mxu1 %vm2766_vm4, %v15454_v5 }
 0x27a   : > { %9518 = vmatprep.mubr.msk.bf16.mxu1 %vm2766_vm4, %v15455_v35 }
 0x27b   : > { %9555 = vmatmul.mubr.msk.bf16.gmra.mxu0 %vm2766_vm4, %v12384_v33 }
 0x27c   : > { %9558 = vmatprep.mubr.msk.bf16.mxu0 %vm2766_vm4, %v12404_v1 }
 0x281   : > { %9519 = vmatmul.mubr.msk.bf16.gmra.mxu1 %vm2766_vm4, %v15456_v34 }
 0x282   : > { %9522 = vmatprep.mubr.msk.bf16.mxu1 %vm2766_vm4, %v15457_v40 }
 0x283   : > { %9559 = vmatmul.mubr.msk.bf16.gmra.mxu0 %vm2766_vm4, %v12406_v63 }
 0x284   : > { %9562 = vmatprep.mubr.msk.bf16.mxu0 %vm2766_vm4, %v12426_v60 }
 0x289   : > { %9523 = vmatmul.mubr.msk.bf16.gmra.mxu1 %vm2766_vm4, %v15458_v47 }
 0x28a   : > { %9526 = vmatprep.mubr.msk.bf16.mxu1 %vm2766_vm4, %v15459_v36 }
 0x28b   : > { %9563 = vmatmul.mubr.msk.bf16.gmra.mxu0 %vm2766_vm4, %v12428_v11 }
 0x28c   : > { %9566 = vmatprep.mubr.msk.bf16.mxu0 %vm2766_vm4, %v12450_v49 }
 0x291   : > { %9527 = vmatmul.mubr.msk.bf16.gmra.mxu1 %vm2766_vm4, %v15460_v9 }
 0x292   : > { %9530 = vmatprep.mubr.msk.bf16.mxu1 %vm2766_vm4, %v12245_v41 }
 0x293   : > { %9567 = vmatmul.mubr.msk.bf16.gmra.mxu0 %vm2766_vm4, %v12452_v3 }
 0x294   : > { %9570 = vmatprep.mubr.msk.bf16.mxu0 %vm2766_vm4, %v12473_v29 }
 0x299   : > { %9531 = vmatmul.mubr.msk.bf16.gmra.mxu1 %vm2766_vm4, %v15461_v17 }
 0x29a   : > { %9534 = vmatprep.mubr.msk.bf16.mxu1 %vm2766_vm4, %v12274_v57 }
 0x29b   : > { %9571 = vmatmul.mubr.msk.bf16.gmra.mxu0 %vm2766_vm4, %v12552_v23 }
 0x29c   : > { %9614 = vmatprep.mubr.msk.bf16.mxu0 %vm2766_vm4, %v15450_v48  ;;  %v5038_v48 = vrot.slane %v12573_v45, 2 }
 0x29e   : > { %v12586_v51 = vsel %vm1035_vm3, %v5036_v53, %v5038_v48 }
 0x2a1   : > { %9535 = vmatmul.mubr.msk.bf16.gmra.mxu1 %vm2766_vm4, %v12569_v42  ;;  %v9400_v21 = vpop.f32.mrf.mxu0 }
 0x2a2   : > { %9578 = vmatprep.mubr.msk.bf16.mxu1 %vm2766_vm4, %v11865_v22 }
 0x2a3   : > { %9615 = vmatmul.mubr.msk.bf16.vlgmr.msra.gmra.mxu0 %vm2766_vm4, %v15451_v24  ;;  %v3425_v39 = vpop.f32.mrf.mxu0 }
 0x2a4   : > { %9618 = vmatprep.mubr.msk.bf16.mxu0 %vm2766_vm4, %v15452_v46 }
 0x2a5   : > { %v9364_v22 = vpop.f32.mrf.mxu1  ;;  %v9401_v62 = vpop.f32.mrf.mxu0 }
 0x2a6   : > { %v12590_v38 = vadd.f32 %v9400_v21, %v9364_v22 }
 0x2a7   : > { %v3204_v31 = vpop.f32.mrf.mxu1  ;;  %v3428_v24 = vpop.f32.mrf.mxu0 }
 0x2a8   : > { %v12597_v46 = vadd.f32 %v3425_v39, %v3204_v31 }
 0x2a9   : > { %9579 = vmatmul.mubr.msk.bf16.vlgmr.msra.gmra.mxu1 %vm2766_vm4, %v11944_v54  ;;  %v9365_v52 = vpop.f32.mrf.mxu1  ;;  %v9404_v14 = vpop.f32.mrf.mxu0 }
 0x2aa   : > { %9647 = vmatpush3.bf16.msra.mxu1 %v12500_v7  ;;  %9582 = vmatprep.mubr.msk.bf16.mxu1 %vm2766_vm4, %v11930_v28  ;;  %v12602_v13 = vadd.f32 %v9401_v62, %v9365_v52 }
 0x2ab   : > { %9619 = vmatmul.mubr.msk.bf16.gmra.mxu0 %vm2766_vm4, %v15453_v56  ;;  %9648 = vmatprep.subr.bf16.mxu1 %v10078_v16  ;;  %v3207_v37 = vpop.f32.mrf.mxu1  ;;  %v3441_v54 = vpop.f32.mrf.mxu0 }
 0x2ac   : > { %9622 = vmatprep.mubr.msk.bf16.mxu0 %vm2766_vm4, %v15454_v5  ;;  %v12608_v10 = vadd.f32 %v3428_v24, %v3207_v37 }
 0x2ad   : > { %v9368_v53 = vpop.f32.mrf.mxu1  ;;  %v9405_v7 = vpop.f32.mrf.mxu0 }
 0x2ae   : > { %9649 = vmatpush3.bf16.msra.mxu1 %v10078_v16  ;;  %v12610_v21 = vadd.f32 %v9404_v14, %v9368_v53 }
 0x2af   : > { %v3220_v28 = vpop.f32.mrf.mxu1  ;;  %v3444_v48 = vpop.f32.mrf.mxu0 }
 0x2b0   : > { %v12614_v39 = vadd.f32 %v3441_v54, %v3220_v28 }
 0x2b1   : > { %9583 = vmatmul.mubr.msk.bf16.gmra.mxu1 %vm2766_vm4, %v12006_v26  ;;  %v9369_v56 = vpop.f32.mrf.mxu1  ;;  %v9408_v5 = vpop.f32.mrf.mxu0 }
 0x2b2   : > { %9586 = vmatprep.mubr.msk.bf16.mxu1 %vm2766_vm4, %v11993_v27  ;;  %v12618_v22 = vadd.f32 %v9405_v7, %v9369_v56 }
 0x2b3   : > { %9623 = vmatmul.mubr.msk.bf16.gmra.mxu0 %vm2766_vm4, %v15455_v35  ;;  %v3223_v62 = vpop.f32.mrf.mxu1  ;;  %v3457_v16 = vpop.f32.mrf.mxu0 }
 0x2b4   : > { %9626 = vmatprep.mubr.msk.bf16.mxu0 %vm2766_vm4, %v15456_v34  ;;  %v12624_v31 = vadd.f32 %v3444_v48, %v3223_v62 }
 0x2b5   : > { %v9409_v24 = vpop.f32.mrf.mxu0 }
 0x2b6   : > { %v9372_v26 = vpop.f32.mrf.mxu1 }
 0x2b7   : > { %v12626_v52 = vadd.f32 %v9408_v5, %v9372_v26  ;;  %v3460_v27 = vpop.f32.mrf.mxu0 }
 0x2b8   : > { %v3236_v14 = vpop.f32.mrf.mxu1 }
 0x2b9   : > { %9587 = vmatmul.mubr.msk.bf16.gmra.mxu1 %vm2766_vm4, %v12063_v12  ;;  %v12630_v37 = vadd.f32 %v3457_v16, %v3236_v14 }
 0x2ba   : > { %9590 = vmatprep.mubr.msk.bf16.mxu1 %vm2766_vm4, %v12048_v50  ;;  %v9373_v35 = vpop.f32.mrf.mxu1  ;;  %v9412_v54 = vpop.f32.mrf.mxu0 }
 0x2bb   : > { %v12634_v34 = vadd.f32 %v9409_v24, %v9373_v35  ;;  %9627 = vmatmul.mubr.msk.bf16.gmra.mxu0 %vm2766_vm4, %v15457_v40 }
 0x2bc   : > { %v3239_v53 = vpop.f32.mrf.mxu1  ;;  %9630 = vmatprep.mubr.msk.bf16.mxu0 %vm2766_vm4, %v15458_v47  ;;  %v3473_v7 = vpop.f32.mrf.mxu0 }
 0x2bd   : > { %v12640_v28 = vadd.f32 %v3460_v27, %v3239_v53 }
 0x2be   : > { %v9413_v12 = vpop.f32.mrf.mxu0 }
 0x2bf   : > { %v9376_v48 = vpop.f32.mrf.mxu1 }
 0x2c0   : > { %v3476_v56 = vpop.f32.mrf.mxu0  ;;  %v12642_v5 = vadd.f32 %v9412_v54, %v9376_v48 }
 0x2c1   : > { %9591 = vmatmul.mubr.msk.bf16.gmra.mxu1 %vm2766_vm4, %v12111_v20  ;;  %v3252_v50 = vpop.f32.mrf.mxu1 }
 0x2c2   : > { %9594 = vmatprep.mubr.msk.bf16.mxu1 %vm2766_vm4, %v15442_v55  ;;  %v9416_v40 = vpop.f32.mrf.mxu0  ;;  %v12648_v62 = vadd.f32 %v3473_v7, %v3252_v50  ;;  %v4815_v50 = vrot.slane %v12565_v0, 1 }
 0x2c3   : > { %9631 = vmatmul.mubr.msk.bf16.gmra.mxu0 %vm2766_vm4, %v15459_v36  ;;  %v9377_v47 = vpop.f32.mrf.mxu1 }
 0x2c4   : > { %9634 = vmatprep.mubr.msk.bf16.mxu0 %vm2766_vm4, %v15460_v9  ;;  %v3489_v16 = vpop.f32.mrf.mxu0  ;;  %v12654_v26 = vadd.f32 %v9413_v12, %v9377_v47 }
 0x2c5   : > { %v3255_v24 = vpop.f32.mrf.mxu1 }
 0x2c6   : > { %v9417_v14 = vpop.f32.mrf.mxu0  ;;  %v12656_v20 = vadd.f32 %v3476_v56, %v3255_v24 }
 0x2c8   : > { %v12658_v27 = vpop.f32.mrf.mxu0 }
 0x2c9   : > { %v9380_v55 = vpop.f32.mrf.mxu1  ;;  %9595 = vmatmul.mubr.msk.bf16.gmra.mxu1 %vm2766_vm4, %v12165_v43 }
 0x2ca   : > { %v12662_v35 = vadd.f32 %v9416_v40, %v9380_v55  ;;  %9598 = vmatprep.mubr.msk.bf16.mxu1 %vm2766_vm4, %v12178_v59  ;;  %v9420_v36 = vpop.f32.mrf.mxu0  ;;  %v4814_v59 = vrot.slane %v12563_v6, 1 }
 0x2cb   : > { %v3268_v9 = vpop.f32.mrf.mxu1  ;;  %9635 = vmatmul.mubr.msk.bf16.gmra.mxu0 %vm2766_vm4, %v12245_v41  ;;  %v4817_v41 = vrot.slane %v12573_v45, 1 }
 0x2cc   : > { %v12668_v54 = vadd.f32 %v3489_v16, %v3268_v9  ;;  %9638 = vmatprep.mubr.msk.bf16.mxu0 %vm2766_vm4, %v15461_v17  ;;  %v3505_v53 = vpop.f32.mrf.mxu0 }
 0x2cd   : > { %v9381_v7 = vpop.f32.mrf.mxu1 }
 0x2ce   : > { %v12672_v12 = vadd.f32 %v9417_v14, %v9381_v7  ;;  %v9421_v43 = vpop.f32.mrf.mxu0  ;;  %v4816_v14 = vsel %vm478_vm1, %v4814_v59, %v4815_v50 }
 0x2cf   : > { %v12674_v48 = vpop.f32.mrf.mxu1 }
 0x2d0   : > { %v12676_v56 = vpop.f32.mrf.mxu0 }
 0x2d1   : > { %v9384_v40 = vpop.f32.mrf.mxu1  ;;  %9599 = vmatmul.mubr.msk.bf16.gmra.mxu1 %vm2766_vm4, %v12219_v18  ;;  %v4818_v18 = vsel %vm478_vm1, %v4815_v50, %v4817_v41 }
 0x2d2   : > { %v12683_v17 = vadd.f32 %v9420_v36, %v9384_v40  ;;  %9602 = vmatprep.mubr.msk.bf16.mxu1 %vm2766_vm4, %v12232_v58  ;;  %v9424_v47 = vpop.f32.mrf.mxu0  ;;  %v4821_v7 = vpack.c.bf16 %v4818_v18, %v4816_v14 }
 0x2d3   : > { %v3284_v16 = vpop.f32.mrf.mxu1  ;;  %9639 = vmatmul.mubr.msk.bf16.gmra.mxu0 %vm2766_vm4, %v12274_v57 }
 0x2d4   : > { %v12689_v24 = vadd.f32 %v3505_v53, %v3284_v16  ;;  %9642 = vmatprep.mubr.msk.bf16.mxu0 %vm2766_vm4, %v12569_v42  ;;  %v3521_v45 = vpop.f32.mrf.mxu0  ;;  %v4597_v16 = vpack.c.bf16 %v12565_v0, %v12563_v6 }
 0x2d5   : > { %v9385_v55 = vpop.f32.mrf.mxu1 }
 0x2d6   : > { %v12695_v36 = vadd.f32 %v9421_v43, %v9385_v55  ;;  %v9425_v9 = vpop.f32.mrf.mxu0 }
 0x2d7   : > { %v12697_v58 = vpop.f32.mrf.mxu1 }
 0x2d8   : > { %v12699_v40 = vpop.f32.mrf.mxu0 }
 0x2d9   : > { %15462 = vst [vmem:[#allocation33_spill] sm:$0xff] %v12699_v40  ;;  %v9388_v57 = vpop.f32.mrf.mxu1  ;;  %9603 = vmatmul.mubr.msk.bf16.gmra.mxu1 %vm2766_vm4, %v12257_v44 }
 0x2da   : > { %v12703_v53 = vadd.f32 %v9424_v47, %v9388_v57  ;;  %9606 = vmatprep.mubr.msk.bf16.mxu1 %vm2766_vm4, %v12462_v61  ;;  %v9428_v42 = vpop.f32.mrf.mxu0 }
 0x2db   : > { %v3300_v59 = vpop.f32.mrf.mxu1  ;;  %9643 = vmatmul.mubr.msk.bf16.gmra.mxu0 %vm2766_vm4, %v4821_v7 }
 0x2dc   : > { %v12708_v43 = vadd.f32 %v3521_v45, %v3300_v59  ;;  %v3537_v50 = vpop.f32.mrf.mxu0 }
 0x2dd   : > { %v9389_v41 = vpop.f32.mrf.mxu1 }
 0x2de   : > { %v12712_v14 = vadd.f32 %v9425_v9, %v9389_v41  ;;  %v9429_v18 = vpop.f32.mrf.mxu0 }
 0x2df   : > { %v12714_v44 = vpop.f32.mrf.mxu1 }
 0x2e0   : > { %v12716_v47 = vpop.f32.mrf.mxu0 }
 0x2e1   : > { %15463 = vst [vmem:[#allocation21_spill] sm:$0xff] %v12716_v47  ;;  %v9392_v55 = vpop.f32.mrf.mxu1  ;;  %9607 = vmatmul.mubr.msk.bf16.gmra.mxu1 %vm2766_vm4, %v4597_v16 }
 0x2e2   : > { %v12719_v61 = vadd.f32 %v9428_v42, %v9392_v55  ;;  %9650 = vmatprep.mubr.msk.bf16.mxu1 %vm2766_vm4, %v12310_v4  ;;  %v9472_v45 = vpop.f32.mrf.mxu0 }
 0x2e3   : > { %v3316_v7 = vpop.f32.mrf.mxu1 }
 0x2e4   : > { %v12723_v57 = vadd.f32 %v3537_v50, %v3316_v7  ;;  %v3993_v6 = vpop.f32.mrf.mxu0 }
 0x2e5   : > { %v9393_v0 = vpop.f32.mrf.mxu1 }
 0x2e6   : > { %v12725_v9 = vadd.f32 %v9429_v18, %v9393_v0  ;;  %v9473_v59 = vpop.f32.mrf.mxu0 }
 0x2e7   : > { %v12727_v41 = vpop.f32.mrf.mxu1 }
 0x2e8   : > { %15464 = vst [vmem:[#allocation50_spill] sm:$0xff] %v12727_v41  ;;  %v12729_v15 = vpop.f32.mrf.mxu0 }
 0x2e9   : > { %15465 = vst [vmem:[#allocation6_spill] sm:$0xff] %v12729_v15  ;;  %v9436_v47 = vpop.f32.mrf.mxu1  ;;  %9651 = vmatmul.mubr.msk.bf16.vlgmr.msra.gmra.mxu1 %vm2766_vm4, %v12337_v2 }
 0x2ea   : > { %v3908_v42 = vadd.f32 %v9436_v47, %v12590_v38  ;;  %9654 = vmatprep.mubr.msk.bf16.mxu1 %vm2766_vm4, %v12340_v25 }
 0x2eb   : > { %v3779_v4 = vpop.f32.mrf.mxu1  ;;  %v9476_v50 = vpop.f32.mrf.mxu0 }
 0x2ec   : > { %v3906_v16 = vadd.f32 %v3779_v4, %v12597_v46  ;;  %v12737_v18 = vadd.f32 %v9472_v45, %v3908_v42 }
 0x2ed   : > { %v9437_v55 = vpop.f32.mrf.mxu1  ;;  %v4009_v7 = vpop.f32.mrf.mxu0 }
 0x2ee   : > { %v3909_v0 = vadd.f32 %v9437_v55, %v12602_v13  ;;  %v12740_v15 = vadd.f32 %v3993_v6, %v3906_v16 }
 0x2ef   : > { %v3782_v41 = vpop.f32.mrf.mxu1  ;;  %v9477_v40 = vpop.f32.mrf.mxu0 }
 0x2f0   : > { %v12743_v2 = vadd.f32 %v3782_v41, %v12608_v10  ;;  %v12745_v38 = vadd.f32 %v9473_v59, %v3909_v0 }
 0x2f1   : > { %v9440_v25 = vpop.f32.mrf.mxu1  ;;  %9655 = vmatmul.mubr.msk.bf16.gmra.mxu1 %vm2766_vm4, %v12360_v19  ;;  %v12749_v46 = vpop.f32.mrf.mxu0 }
 0x2f2   : > { %v3912_v47 = vadd.f32 %v9440_v25, %v12610_v21  ;;  %9658 = vmatprep.mubr.msk.bf16.mxu1 %vm2766_vm4, %v12362_v32 }
 0x2f3   : > { %v3795_v13 = vpop.f32.mrf.mxu1  ;;  %v9480_v45 = vpop.f32.mrf.mxu0 }
 0x2f4   : > { %v3910_v6 = vadd.f32 %v3795_v13, %v12614_v39  ;;  %v12755_v42 = vadd.f32 %v9476_v50, %v3912_v47 }
 0x2f5   : > { %v9441_v10 = vpop.f32.mrf.mxu1  ;;  %v4025_v59 = vpop.f32.mrf.mxu0 }
 0x2f6   : > { %v3913_v41 = vadd.f32 %v9441_v10, %v12618_v22  ;;  %v12758_v4 = vadd.f32 %v4009_v7, %v3910_v6 }
 0x2f7   : > { %v3798_v19 = vpop.f32.mrf.mxu1  ;;  %v9481_v16 = vpop.f32.mrf.mxu0 }
 0x2f8   : > { %v12761_v55 = vadd.f32 %v3798_v19, %v12624_v31  ;;  %v12763_v21 = vadd.f32 %v9477_v40, %v3913_v41 }
 0x2f9   : > { %v9444_v32 = vpop.f32.mrf.mxu1  ;;  %9659 = vmatmul.mubr.msk.bf16.gmra.mxu1 %vm2766_vm4, %v12382_v30  ;;  %v12767_v39 = vpop.f32.mrf.mxu0 }
 0x2fa   : > { %v3916_v50 = vadd.f32 %v9444_v32, %v12626_v52  ;;  %9662 = vmatprep.mubr.msk.bf16.mxu1 %vm2766_vm4, %v12384_v33 }
 0x2fb   : > { %v3811_v22 = vpop.f32.mrf.mxu1  ;;  %v9484_v7 = vpop.f32.mrf.mxu0 }
 0x2fc   : > { %v3914_v0 = vadd.f32 %v3811_v22, %v12630_v37  ;;  %v12773_v25 = vadd.f32 %v9480_v45, %v3916_v50 }
 0x2fd   : > { %v9445_v31 = vpop.f32.mrf.mxu1  ;;  %v4041_v40 = vpop.f32.mrf.mxu0 }
 0x2fe   : > { %v3917_v47 = vadd.f32 %v9445_v31, %v12634_v34  ;;  %v12776_v13 = vadd.f32 %v4025_v59, %v3914_v0 }
 0x2ff   : > { %v3814_v30 = vpop.f32.mrf.mxu1  ;;  %v9485_v6 = vpop.f32.mrf.mxu0 }
 0x300   : > { %v12779_v10 = vadd.f32 %v3814_v30, %v12640_v28  ;;  %v12781_v52 = vadd.f32 %v9481_v16, %v3917_v47  ;;  %v10079_v28 = vld [vmem:[%s15131_s7 + $0x18] sm:$0xff]  }
 0x301   : > { %v9448_v33 = vpop.f32.mrf.mxu1  ;;  %9663 = vmatmul.mubr.msk.bf16.gmra.mxu1 %vm2766_vm4, %v12404_v1  ;;  %v12785_v37 = vpop.f32.mrf.mxu0  ;;  %9682 = vmatprep.subr.bf16.mxu0 %v10079_v28 }
 0x302   : > { %v3920_v45 = vadd.f32 %v9448_v33, %v12642_v5  ;;  %9666 = vmatprep.mubr.msk.bf16.mxu1 %vm2766_vm4, %v12406_v63  ;;  %9683 = vmatpush3.bf16.msra.mxu0 %v10079_v28 }
 0x303   : > { %v3827_v34 = vpop.f32.mrf.mxu1  ;;  %v9488_v59 = vpop.f32.mrf.mxu0 }
 0x304   : > { %v3918_v41 = vadd.f32 %v3827_v34, %v12648_v62  ;;  %v12791_v19 = vadd.f32 %v9484_v7, %v3920_v45 }
 0x305   : > { %v9449_v16 = vpop.f32.mrf.mxu1  ;;  %v4057_v32 = vpop.f32.mrf.mxu0 }
 0x306   : > { %v3921_v1 = vadd.f32 %v9449_v16, %v12654_v26  ;;  %v12797_v50 = vadd.f32 %v4041_v40, %v3918_v41 }
 0x307   : > { %v3830_v5 = vpop.f32.mrf.mxu1  ;;  %v9489_v22 = vpop.f32.mrf.mxu0 }
 0x308   : > { %v12800_v63 = vadd.f32 %v3830_v5, %v12656_v20  ;;  %v12802_v62 = vadd.f32 %v9485_v6, %v3921_v1 }
 0x309   : > { %v9452_v7 = vpop.f32.mrf.mxu1  ;;  %9667 = vmatmul.mubr.msk.bf16.gmra.mxu1 %vm2766_vm4, %v12426_v60  ;;  %v12806_v0 = vpop.f32.mrf.mxu0 }
 0x30a   : > { %v3924_v31 = vadd.f32 %v9452_v7, %v12662_v35  ;;  %9670 = vmatprep.mubr.msk.bf16.mxu1 %vm2766_vm4, %v12428_v11 }
 0x30b   : > { %v3843_v26 = vpop.f32.mrf.mxu1  ;;  %v9492_v40 = vpop.f32.mrf.mxu0 }
 0x30c   : > { %v3922_v47 = vadd.f32 %v3843_v26, %v12668_v54  ;;  %v12812_v30 = vadd.f32 %v9488_v59, %v3924_v31 }
 0x30d   : > { %v9453_v20 = vpop.f32.mrf.mxu1  ;;  %v4073_v6 = vpop.f32.mrf.mxu0 }
 0x30e   : > { %v3925_v33 = vadd.f32 %v9453_v20, %v12672_v12  ;;  %v12815_v45 = vadd.f32 %v4057_v32, %v3922_v47 }
 0x30f   : > { %v12817_v60 = vpop.f32.mrf.mxu1  ;;  %v9493_v34 = vpop.f32.mrf.mxu0 }
 0x310   : > { %v12819_v41 = vadd.f32 %v9489_v22, %v3925_v33 }
 0x311   : > { %v9456_v35 = vpop.f32.mrf.mxu1  ;;  %9671 = vmatmul.mubr.msk.bf16.gmra.mxu1 %vm2766_vm4, %v12450_v49  ;;  %v12823_v11 = vpop.f32.mrf.mxu0 }
 0x312   : > { %v3928_v54 = vadd.f32 %v9456_v35, %v12683_v17  ;;  %9674 = vmatprep.mubr.msk.bf16.mxu1 %vm2766_vm4, %v12452_v3 }
 0x313   : > { %v3859_v59 = vpop.f32.mrf.mxu1  ;;  %v9496_v12 = vpop.f32.mrf.mxu0 }
 0x314   : > { %v3926_v28 = vadd.f32 %v3859_v59, %v12689_v24  ;;  %v12829_v16 = vadd.f32 %v9492_v40, %v3928_v54 }
 0x315   : > { %v9457_v32 = vpop.f32.mrf.mxu1  ;;  %v4089_v1 = vpop.f32.mrf.mxu0 }
 0x316   : > { %v3929_v5 = vadd.f32 %v9457_v32, %v12695_v36  ;;  %v12832_v22 = vadd.f32 %v4073_v6, %v3926_v28 }
 0x317   : > { %v12834_v49 = vpop.f32.mrf.mxu1  ;;  %v9497_v7 = vpop.f32.mrf.mxu0 }
 0x318   : > { %v12836_v31 = vadd.f32 %v9493_v34, %v3929_v5 }
 0x319   : > { %v9460_v17 = vpop.f32.mrf.mxu1  ;;  %9675 = vmatmul.mubr.msk.bf16.gmra.mxu1 %vm2766_vm4, %v12473_v29  ;;  %v12840_v3 = vpop.f32.mrf.mxu0 }
 0x31a   : > { %v3932_v24 = vadd.f32 %v9460_v17, %v12703_v53  ;;  %9678 = vmatprep.mubr.msk.bf16.mxu1 %vm2766_vm4, %v12552_v23  ;;  %v15466_v23 = vpack.c.bf16 %v12586_v51, %v12578_v8 }
 0x31b   : > { %v3875_v26 = vpop.f32.mrf.mxu1  ;;  %v9500_v36 = vpop.f32.mrf.mxu0 }
 0x31c   : > { %v3930_v40 = vadd.f32 %v3875_v26, %v12708_v43  ;;  %v12846_v47 = vadd.f32 %v9496_v12, %v3932_v24 }
 0x31d   : > { %v9461_v20 = vpop.f32.mrf.mxu1  ;;  %v4105_v6 = vpop.f32.mrf.mxu0 }
 0x31e   : > { %v3933_v33 = vadd.f32 %v9461_v20, %v12712_v14  ;;  %v12849_v34 = vadd.f32 %v4089_v1, %v3930_v40  ;;  %v10080_v1 = vld [vmem:[%s15131_s7 + $0x10] sm:$0xff]  }
 0x31f   : > { %v12851_v29 = vpop.f32.mrf.mxu1  ;;  %v9501_v35 = vpop.f32.mrf.mxu0  ;;  %9684 = vmatprep.subr.bf16.mxu0 %v10080_v1 }
 0x320   : > { %v12853_v54 = vadd.f32 %v9497_v7, %v3933_v33  ;;  %9685 = vmatpush3.bf16.msra.mxu0 %v10080_v1 }
 0x321   : > { %v9464_v53 = vpop.f32.mrf.mxu1  ;;  %9679 = vmatmul.mubr.msk.bf16.gmra.mxu1 %vm2766_vm4, %v15466_v23  ;;  %v12859_v43 = vpop.f32.mrf.mxu0 }
 0x322   : > { %v3936_v59 = vadd.f32 %v9464_v53, %v12719_v61 }
 0x323   : > { %v3891_v12 = vpop.f32.mrf.mxu1  ;;  %v12862_v28 = vpop.f32.mrf.mxu0 }
 0x324   : > { %v3934_v14 = vadd.f32 %v3891_v12, %v12723_v57  ;;  %v12865_v32 = vadd.f32 %v9500_v36, %v3936_v59 }
 0x325   : > { %v9465_v5 = vpop.f32.mrf.mxu1  ;;  %v12870_v7 = vpop.f32.mrf.mxu0 }
 0x326   : > { %v3937_v8 = vadd.f32 %v9465_v5, %v12725_v9  ;;  %v12873_v51 = vadd.f32 %v4105_v6, %v3934_v14 }
 0x327   : > { %v12875_v61 = vpop.f32.mrf.mxu1  ;;  %v12877_v17 = vpop.f32.mrf.mxu0 }
 0x328   : > { %v12879_v57 = vadd.f32 %v9501_v35, %v3937_v8 }
 0x329   : > { %v9508_v24 = vpop.f32.mrf.mxu1  ;;  %v12881_v26 = vpop.f32.mrf.mxu0 }
 0x32a   : > { %v12884_v36 = vadd.f32 %v9508_v24, %v12737_v18 }
 0x32b   : > { %v4217_v40 = vpop.f32.mrf.mxu1  ;;  %v12886_v20 = vpop.f32.mrf.mxu0 }
 0x32c   : > { %v12889_v9 = vadd.f32 %v4217_v40, %v12740_v15 }
 0x32d   : > { %v9509_v6 = vpop.f32.mrf.mxu1  ;;  %v12891_v33 = vpop.f32.mrf.mxu0 }
 0x32e   : > { %v12894_v53 = vadd.f32 %v9509_v6, %v12745_v38 }
 0x32f   : > { %v12896_v35 = vpop.f32.mrf.mxu1  ;;  %v12898_v23 = vpop.f32.mrf.mxu0 }
 0x330   : > { %15467 = vst [vmem:[#allocation52_spill] sm:$0xff] %v12898_v23 }
 0x331   : > { %v9512_v59 = vpop.f32.mrf.mxu1  ;;  %v12900_v12 = vpop.f32.mrf.mxu0 }
 0x332   : > { %15468 = vst [vmem:[#allocation35_spill] sm:$0xff] %v12900_v12  ;;  %v12903_v18 = vadd.f32 %v9512_v59, %v12755_v42 }
 0x333   : > { %v4233_v14 = vpop.f32.mrf.mxu1  ;;  %v12905_v1 = vpop.f32.mrf.mxu0 }
 0x334   : > { %15469 = vst [vmem:[#allocation37_spill] sm:$0xff] %v12905_v1  ;;  %v12908_v15 = vadd.f32 %v4233_v14, %v12758_v4 }
 0x335   : > { %v9513_v5 = vpop.f32.mrf.mxu1  ;;  %v12910_v8 = vpop.f32.mrf.mxu0 }
 0x336   : > { %15470 = vst [vmem:[#allocation39_spill] sm:$0xff] %v12910_v8  ;;  %v12913_v38 = vadd.f32 %v9513_v5, %v12763_v21 }
 0x337   : > { %v12915_v24 = vpop.f32.mrf.mxu1  ;;  %v12917_v40 = vpop.f32.mrf.mxu0 }
 0x338   : > { %15471 = vst [vmem:[#allocation41_spill] sm:$0xff] %v12917_v40 }
 0x339   : > { %v9516_v6 = vpop.f32.mrf.mxu1  ;;  %v12919_v12 = vpop.f32.mrf.mxu0 }
 0x33a   : > { %15472 = vst [vmem:[#allocation43_spill] sm:$0xff] %v12919_v12  ;;  %v12922_v42 = vadd.f32 %v9516_v6, %v12773_v25 }
 0x33b   : > { %v4249_v59 = vpop.f32.mrf.mxu1  ;;  %v12924_v1 = vpop.f32.mrf.mxu0 }
 0x33c   : > { %15473 = vst [vmem:[#allocation54_spill] sm:$0xff] %v12924_v1  ;;  %v12927_v4 = vadd.f32 %v4249_v59, %v12776_v13  ;;  %v10081_v13 = vld [vmem:[%s15131_s7 + $0x8] sm:$0xff]  }
 0x33d   : > { %v9517_v14 = vpop.f32.mrf.mxu1  ;;  %v12929_v8 = vpop.f32.mrf.mxu0  ;;  %9718 = vmatprep.subr.bf16.mxu1 %v10081_v13 }
 0x33e   : > { %15474 = vst [vmem:[#allocation46_spill] sm:$0xff] %v12927_v4  ;;  %15475 = vst [vmem:[#allocation49_spill] sm:$0xff] %v12929_v8  ;;  %v12932_v21 = vadd.f32 %v9517_v14, %v12781_v52  ;;  %9719 = vmatpush3.bf16.msra.mxu1 %v10081_v13  ;;  %v12968_v13 = vld [vmem:[#allocation2] sm:$0xff] }
 0x33f   : > { %v12934_v5 = vpop.f32.mrf.mxu1  ;;  %v12936_v40 = vpop.f32.mrf.mxu0 }
 0x340   : > { %15476 = vst [vmem:[#allocation51_spill] sm:$0xff] %v12932_v21  ;;  %15477 = vst [vmem:[#allocation16_spill] sm:$0xff] %v12936_v40 }
 0x341   : > { %v9520_v12 = vpop.f32.mrf.mxu1  ;;  %v12938_v23 = vpop.f32.mrf.mxu0 }
 0x342   : > { %15478 = vst [vmem:[#allocation56_spill] sm:$0xff] %v12938_v23  ;;  %v12941_v25 = vadd.f32 %v9520_v12, %v12791_v19  ;;  %v10082_v19 = vld [vmem:[%s15131_s7] sm:$0xff]  }
 0x343   : > { %v4265_v6 = vpop.f32.mrf.mxu1  ;;  %v12946_v59 = vpop.f32.mrf.mxu0  ;;  %9720 = vmatprep.subr.bf16.mxu1 %v10082_v19 }
 0x344   : > { %15479 = vst [vmem:[#allocation9_spill] sm:$0xff] %v12941_v25  ;;  %15480 = vst [vmem:[#allocation58_spill] sm:$0xff] %v12946_v59  ;;  %v12949_v52 = vadd.f32 %v4265_v6, %v12797_v50  ;;  %9721 = vmatpush3.bf16.msra.mxu1 %v10082_v19  ;;  %v12981_v19 = vld [vmem:[#allocation2 + $0x10] sm:$0x3] }
 0x345   : > { %v9521_v14 = vpop.f32.mrf.mxu1  ;;  %v12951_v8 = vpop.f32.mrf.mxu0  ;;  %v5523_v1 = vrot.slane %v12981_v19, 1 }
 0x346   : > { %15481 = vst [vmem:[#allocation53_spill] sm:$0xff] %v12949_v52  ;;  %15482 = vst [vmem:[#allocation12_spill] sm:$0xff] %v12951_v8  ;;  %v12954_v23 = vadd.f32 %v9521_v14, %v12802_v62  ;;  %v12970_v62 = vld [vmem:[#allocation2 + $0x8] sm:$0xff] }
 0x347   : > { %v12959_v12 = vpop.f32.mrf.mxu1  ;;  %v12961_v40 = vpop.f32.mrf.mxu0  ;;  %v5521_v52 = vrot.slane %v12970_v62, 1 }
 0x348   : > { %15483 = vst [vmem:[#allocation60_spill] sm:$0xff] %v12954_v23  ;;  %15484 = vst [vmem:[#allocation62_spill] sm:$0xff] %v12961_v40  ;;  %v5452_v23 = vpack.c.bf16 %v12970_v62, %v12968_v13  ;;  %v5520_v40 = vrot.slane %v12968_v13, 1 }
 0x349   : > { %v9524_v59 = vpop.f32.mrf.mxu1  ;;  %v12963_v50 = vpop.f32.mrf.mxu0 }
 0x34a   : > { %15485 = vst [vmem:[#allocation15_spill] sm:$0xff] %v12963_v50  ;;  %v12966_v6 = vadd.f32 %v9524_v59, %v12812_v30  ;;  %v12986_v30 = vld [vmem:[%s15131_s7 + $0x28] sm:$0xff]   ;;  %9722 = vmatprep.mubr.msk.bf16.mxu1 %vm2766_vm4, %v5452_v23 }
 0x34b   : > { %v4281_v14 = vpop.f32.mrf.mxu1  ;;  %v12972_v8 = vpop.f32.mrf.mxu0  ;;  %15489 = vst [vmem:[#allocation22_spill] sm:$0xff] %v12986_v30  ;;  %9754 = vmatprep.subr.bf16.mxu0 %v12986_v30 }
 0x34c   : > { %15486 = vst [vmem:[#allocation64_spill] sm:$0xff] %v12966_v6  ;;  %15487 = vst [vmem:[#allocation55_spill] sm:$0xff] %v12972_v8  ;;  %v12979_v50 = vadd.f32 %v4281_v14, %v12815_v45  ;;  %v5522_v8 = vsel %vm478_vm1, %v5520_v40, %v5521_v52 }
 0x34d   : > { %v9525_v59 = vpop.f32.mrf.mxu1  ;;  %v12988_v6 = vpop.f32.mrf.mxu0 }
 0x34e   : > { %15488 = vst [vmem:[#allocation57_spill] sm:$0xff] %v12979_v50  ;;  %15490 = vst [vmem:[#allocation59_spill] sm:$0xff] %v12988_v6  ;;  %v12994_v25 = vadd.f32 %v9525_v59, %v12819_v41  ;;  %v5524_v50 = vsel %vm478_vm1, %v5521_v52, %v5523_v1 }
 0x34f   : > { %v12997_v45 = vpop.f32.mrf.mxu1  ;;  %v12999_v14 = vpop.f32.mrf.mxu0  ;;  %v5632_v21 = vpack.c.bf16 %v5524_v50, %v5522_v8 }
 0x350   : > { %15491 = vst [vmem:[#allocation61_spill] sm:$0xff] %v12994_v25 }
 0x351   : > { %v9528_v4 = vpop.f32.mrf.mxu1  ;;  %v13002_v6 = vpop.f32.mrf.mxu0  ;;  %9686 = vmatprep.mubr.msk.bf16.mxu0 %vm2766_vm4, %v5632_v21 }
 0x352   : > { %15492 = vst [vmem:[#allocation63_spill] sm:$0xff] %v13002_v6  ;;  %v13005_v23 = vadd.f32 %v9528_v4, %v12829_v16 }
 0x353   : > { %v4297_v40 = vpop.f32.mrf.mxu1  ;;  %v13008_v41 = vpop.f32.mrf.mxu0 }
 0x354   : > { %15493 = vst [vmem:[#allocation65_spill] sm:$0xff] %v13008_v41  ;;  %v13011_v59 = vadd.f32 %v4297_v40, %v12832_v22 }
 0x355   : > { %v9529_v30 = vpop.f32.mrf.mxu1  ;;  %v13013_v25 = vpop.f32.mrf.mxu0 }
 0x356   : > { %15494 = vst [vmem:[#allocation23_spill] sm:$0xff] %v13013_v25  ;;  %v13016_v1 = vadd.f32 %v9529_v30, %v12836_v31 }
 0x357   : > { %v13018_v8 = vpop.f32.mrf.mxu1  ;;  %v13020_v52 = vpop.f32.mrf.mxu0 }
 0x358   : > { %15495 = vst [vmem:[#allocation24_spill] sm:$0xff] %v13020_v52 }
 0x359   : > { %v9532_v16 = vpop.f32.mrf.mxu1  ;;  %v13022_v4 = vpop.f32.mrf.mxu0 }
 0x35a   : > { %15496 = vst [vmem:[#allocation25_spill] sm:$0xff] %v13022_v4  ;;  %v13025_v21 = vadd.f32 %v9532_v16, %v12846_v47 }
 0x35b   : > { %v4313_v50 = vpop.f32.mrf.mxu1  ;;  %v13027_v41 = vpop.f32.mrf.mxu0 }
 0x35c   : > { %15497 = vst [vmem:[#allocation26_spill] sm:$0xff] %v13027_v41  ;;  %v13030_v22 = vadd.f32 %v4313_v50, %v12849_v34 }
 0x35d   : > { %v9533_v40 = vpop.f32.mrf.mxu1  ;;  %v13032_v25 = vpop.f32.mrf.mxu0 }
 0x35e   : > { %15498 = vst [vmem:[#allocation36_spill] sm:$0xff] %v13032_v25  ;;  %v13035_v31 = vadd.f32 %v9533_v40, %v12853_v54 }
 0x35f   : > { %v13037_v30 = vpop.f32.mrf.mxu1  ;;  %v13039_v52 = vpop.f32.mrf.mxu0 }
 0x360   : > { %15499 = vst [vmem:[#allocation14_spill] sm:$0xff] %v13039_v52 }
 0x361   : > { %v9536_v4 = vpop.f32.mrf.mxu1  ;;  %v13041_v6 = vpop.f32.mrf.mxu0 }
 0x362   : > { %15500 = vst [vmem:[#allocation47_spill] sm:$0xff] %v13041_v6  ;;  %v13044_v47 = vadd.f32 %v9536_v4, %v12865_v32 }
 0x363   : > { %v4329_v16 = vpop.f32.mrf.mxu1  ;;  %v13046_v41 = vpop.f32.mrf.mxu0 }
 0x364   : > { %15501 = vst [vmem:[#allocation44_spill] sm:$0xff] %v13044_v47  ;;  %15502 = vst [vmem:[#allocation28_spill] sm:$0xff] %v13046_v41  ;;  %v13049_v34 = vadd.f32 %v4329_v16, %v12873_v51 }
 0x365   : > { %v9537_v50 = vpop.f32.mrf.mxu1  ;;  %v13051_v25 = vpop.f32.mrf.mxu0 }
 0x366   : > { %15503 = vst [vmem:[#allocation29_spill] sm:$0xff] %v13049_v34  ;;  %15504 = vst [vmem:[#allocation38_spill] sm:$0xff] %v13051_v25  ;;  %v13054_v54 = vadd.f32 %v9537_v50, %v12879_v57 }
 0x367   : > { %v13056_v40 = vpop.f32.mrf.mxu1  ;;  %v13058_v52 = vpop.f32.mrf.mxu0 }
 0x368   : > { %15505 = vst [vmem:[#allocation40_spill] sm:$0xff] %v13054_v54  ;;  %15506 = vst [vmem:[#allocation31_spill] sm:$0xff] %v13058_v52 }
 0x369   : > { %v13060_v6 = vpop.f32.mrf.mxu1  ;;  %v13062_v32 = vpop.f32.mrf.mxu0 }
 0x36a   : > { %15507 = vst [vmem:[#allocation45_spill] sm:$0xff] %v13062_v32 }
 0x36b   : > { %v13064_v4 = vpop.f32.mrf.mxu1  ;;  %v13066_v41 = vpop.f32.mrf.mxu0 }
 0x36c   : > { %15508 = vst [vmem:[#allocation20_spill] sm:$0xff] %v13066_v41 }
 0x36d   : > { %v13068_v51 = vpop.f32.mrf.mxu1  ;;  %v13070_v16 = vpop.f32.mrf.mxu0 }
 0x36e   : > { %15509 = vst [vmem:[#allocation42_spill] sm:$0xff] %v13068_v51  ;;  %15510 = vst [vmem:[#allocation8_spill] sm:$0xff] %v13070_v16 }
 0x36f   : > { %v13072_v25 = vpop.f32.mrf.mxu1  ;;  %v13074_v57 = vpop.f32.mrf.mxu0 }
 0x370   : > { %15511 = vst [vmem:[#allocation11_spill] sm:$0xff] %v13072_v25  ;;  %15512 = vst [vmem:[#allocation19_spill] sm:$0xff] %v13074_v57 }
 0x371   : > { %v13076_v50 = vpop.f32.mrf.mxu1  ;;  %v13078_v54 = vpop.f32.mrf.mxu0 }
 0x372   : > { %15513 = vst [vmem:[#allocation18_spill] sm:$0xff] %v13076_v50  ;;  %15514 = vst [vmem:[#allocation7_spill] sm:$0xff] %v13078_v54 }
 0x373   : > { %v13080_v52 = vpop.f32.mrf.mxu1  ;;  %v13082_v34 = vpop.f32.mrf.mxu0 }
 0x374   : > { %15515 = vst [vmem:[#allocation34_spill] sm:$0xff] %v13080_v52  ;;  %15516 = vst [vmem:[#allocation27_spill] sm:$0xff] %v13082_v34  ;;  %v13103_v34 = vld [vmem:[%s15131_s7 + $0x38] sm:$0xff]  }
 0x375   : > { %v13084_v32 = vpop.f32.mrf.mxu1  ;;  %v13086_v47 = vpop.f32.mrf.mxu0  ;;  %15525 = vst [vmem:[#allocation68_spill] sm:$0xff] %v13103_v34  ;;  %9790 = vmatprep.subr.bf16.mxu1 %v13103_v34  ;;  %v6098_v34 = vrot.slane %v12981_v19, 2 }
 0x376   : > { %15517 = vst [vmem:[#allocation10_spill] sm:$0xff] %v13084_v32  ;;  %15518 = vst [vmem:[#allocation13_spill] sm:$0xff] %v13086_v47 }
 0x377   : > { %v13088_v41 = vpop.f32.mrf.mxu1  ;;  %v13090_v51 = vpop.f32.mrf.mxu0 }
 0x378   : > { %15519 = vst [vmem:[#allocation17_spill] sm:$0xff] %v13088_v41  ;;  %15520 = vst [vmem:[#allocation30_spill] sm:$0xff] %v13090_v51 }
 0x379   : > { %v13092_v16 = vpop.f32.mrf.mxu1  ;;  %v13094_v25 = vpop.f32.mrf.mxu0 }
 0x37a   : > { %15521 = vst [vmem:[#allocation48_spill] sm:$0xff] %v13092_v16  ;;  %15522 = vst [vmem:[#allocation32_spill] sm:$0xff] %v13094_v25  ;;  %v6095_v25 = vrot.slane %v12968_v13, 2 }
 0x37b   : > { %v13096_v57 = vpop.f32.mrf.mxu1  ;;  %v13098_v50 = vpop.f32.mrf.mxu0 }
 0x37c   : > { %15523 = vst [vmem:[#allocation66_spill] sm:$0xff] %v13096_v57  ;;  %15524 = vst [vmem:[#allocation67_spill] sm:$0xff] %v13098_v50  ;;  %v6096_v57 = vrot.slane %v12970_v62, 2 }
 0x37d   : > { %v13105_v54 = vpop.f32.mrf.mxu1  ;;  %v13107_v47 = vpop.f32.mrf.mxu0 }
 0x37e   : > { %15526 = vst [vmem:[#allocation69_spill] sm:$0xff] %v13107_v47  ;;  %v13125_v47 = vsel %vm1035_vm3, %v6095_v25, %v6096_v57  ;;  %v13133_v13 = vsel %vm1035_vm3, %v6096_v57, %v6098_v34 }
 0x37f   : > { %v13110_v51 = vpop.f32.mrf.mxu1  ;;  %v13112_v16 = vpop.f32.mrf.mxu0  ;;  %15533 = vst [vmem:[#allocation76_spill] sm:$0xff] %v13125_v47  ;;  %15536 = vst [vmem:[#allocation79_spill] sm:$0xff] %v13133_v13  ;;  %v3509_v47 = vadd.f32 %v12676_v56, %v12697_v58  ;;  %v15546_v13 = vld [vmem:[#allocation33_spill] sm:$0xff]  ;;  %v4125_v58 = vadd.f32 %v12749_v46, %v12761_v55 }
 0x380   : > { %15527 = vst [vmem:[#allocation70_spill] sm:$0xff] %v13110_v51  ;;  %15528 = vst [vmem:[#allocation71_spill] sm:$0xff] %v13112_v16 }
 0x381   : > { %v13116_v50 = vpop.f32.mrf.mxu1  ;;  %v13118_v41 = vpop.f32.mrf.mxu0 }
 0x382   : > { %15529 = vst [vmem:[#allocation72_spill] sm:$0xff] %v13116_v50  ;;  %15530 = vst [vmem:[#allocation73_spill] sm:$0xff] %v13118_v41  ;;  %v3493_v41 = vadd.f32 %v12658_v27, %v12674_v48  ;;  %v15549_v27 = vld [vmem:[#allocation6_spill] sm:$0xff] }
 0x383   : > { %v13120_v32 = vpop.f32.mrf.mxu1  ;;  %v13122_v52 = vpop.f32.mrf.mxu0  ;;  %v4121_v48 = vadd.f32 %v15549_v27, %v12743_v2  ;;  %v4133_v2 = vadd.f32 %v12785_v37, %v12800_v63  ;;  %v4568_v63 = vadd.f32 %v12877_v17, %v12894_v53  ;;  %v15561_v27 = vld [vmem:[#allocation49_spill] sm:$0xff] }
 0x384   : > { %15531 = vst [vmem:[#allocation74_spill] sm:$0xff] %v13120_v32  ;;  %15532 = vst [vmem:[#allocation75_spill] sm:$0xff] %v13122_v52 }
 0x385   : > { %v13128_v51 = vpop.f32.mrf.mxu1  ;;  %v13130_v16 = vpop.f32.mrf.mxu0  ;;  %v4357_v37 = vadd.f32 %v12959_v12, %v4133_v2  ;;  %v15566_v2 = vld [vmem:[#allocation58_spill] sm:$0xff] }
 0x386   : > { %15534 = vst [vmem:[#allocation77_spill] sm:$0xff] %v13128_v51  ;;  %15535 = vst [vmem:[#allocation78_spill] sm:$0xff] %v13130_v16 }
 0x387   : > { %v13135_v62 = vpop.f32.mrf.mxu1  ;;  %v13139_v32 = vpop.f32.mrf.mxu0 }
 0x388   : > { %15537 = vst [vmem:[#allocation80_spill] sm:$0xff] %v13139_v32  ;;  %v3525_v32 = vadd.f32 %v15546_v13, %v12714_v44  ;;  %v4345_v13 = vadd.f32 %v12896_v35, %v4121_v48 }
 0x389   : > { %v13141_v52 = vpop.f32.mrf.mxu1  ;;  %v13145_v50 = vpop.f32.mrf.mxu0 }
 0x38a   : > { %15538 = vst [vmem:[#allocation81_spill] sm:$0xff] %v13141_v52  ;;  %15540 = vst [vmem:[#allocation83_spill] sm:$0xff] %v13145_v50 }
 0x38b   : > { %v13143_v25 = vpop.f32.mrf.mxu1  ;;  %v13151_v16 = vpop.f32.mrf.mxu0 }
 0x38c   : > { %15539 = vst [vmem:[#allocation82_spill] sm:$0xff] %v13143_v25  ;;  %15543 = vst [vmem:[#allocation86_spill] sm:$0xff] %v13151_v16  ;;  %v15548_v25 = vld [vmem:[#allocation21_spill] sm:$0xff]  ;;  %v3923_v16 = vadd.f32 %v12817_v60, %v3493_v41  ;;  %v4349_v60 = vadd.f32 %v12915_v24, %v4125_v58  ;;  %v4567_v24 = vadd.f32 %v12862_v28, %v12884_v36 }
 0x38d   : > { %v13147_v19 = vpop.f32.mrf.mxu1  ;;  %v13163_v50 = vpop.f32.mrf.mxu0  ;;  %v4569_v28 = vadd.f32 %v12891_v33, %v12908_v15  ;;  %v15557_v15 = vld [vmem:[#allocation43_spill] sm:$0xff] }
 0x38e   : > { %15541 = vst [vmem:[#allocation84_spill] sm:$0xff] %v13147_v19  ;;  %v15547_v19 = vld [vmem:[#allocation50_spill] sm:$0xff] }
 0x38f   : > { %v13149_v51 = vpop.f32.mrf.mxu1 }
 0x390   : > { %15542 = vst [vmem:[#allocation85_spill] sm:$0xff] %v13149_v51  ;;  %v3541_v51 = vadd.f32 %v15548_v25, %v15547_v19  ;;  %v13180_v25 = vpop.f32.mrf.mxu0  ;;  %v15559_v19 = vld [vmem:[#allocation54_spill] sm:$0xff] }
 0x391   : > { %v13153_v34 = vpop.f32.mrf.mxu1 }
 0x392   : > { %15544 = vst [vmem:[#allocation87_spill] sm:$0xff] %v13153_v34  ;;  %v3931_v34 = vadd.f32 %v12851_v29, %v3525_v32  ;;  %v3935_v56 = vadd.f32 %v12875_v61, %v3541_v51  ;;  %v4137_v61 = vadd.f32 %v12806_v0, %v3923_v16  ;;  %v4566_v0 = vadd.f32 %v12881_v26, %v4345_v13  ;;  %v15552_v26 = vld [vmem:[#allocation37_spill] sm:$0xff]  ;;  %v15555_v32 = vld [vmem:[#allocation51_spill] sm:$0xff]  ;;  %v15564_v13 = vld [vmem:[#allocation56_spill] sm:$0xff] }
 0x393   : > { %v13155_v57 = vpop.f32.mrf.mxu1  ;;  %v4575_v53 = vadd.f32 %v15552_v26, %v12922_v42  ;;  %v15563_v42 = vld [vmem:[#allocation16_spill] sm:$0xff] }
 0x394   : > { %15545 = vst [vmem:[#allocation88_spill] sm:$0xff] %v13155_v57  ;;  %v3927_v57 = vadd.f32 %v12834_v49, %v3509_v47  ;;  %v4129_v49 = vadd.f32 %v12767_v39, %v12779_v10  ;;  %v4145_v55 = vadd.f32 %v12840_v3, %v3931_v34  ;;  %v4149_v41 = vadd.f32 %v12859_v43, %v3935_v56  ;;  %v13206_v3 = vpop.f32.mrf.mxu0  ;;  %v15562_v56 = vld [vmem:[#allocation60_spill] sm:$0xff] }
 0x395   : > { %v13167_v52 = vpop.f32.mrf.mxu1  ;;  %v4565_v39 = vadd.f32 %v12870_v7, %v12889_v9  ;;  %v4361_v43 = vadd.f32 %v12997_v45, %v4137_v61  ;;  %v15550_v7 = vld [vmem:[#allocation52_spill] sm:$0xff]  ;;  %v15551_v9 = vld [vmem:[#allocation35_spill] sm:$0xff]  ;;  %v15556_v45 = vld [vmem:[#allocation41_spill] sm:$0xff]  ;;  %v4580_v58 = vadd.f32 %v15563_v42, %v15562_v56 }
 0x396   : > { %v4141_v46 = vadd.f32 %v12823_v11, %v3927_v57  ;;  %v4353_v35 = vadd.f32 %v12934_v5, %v4129_v49  ;;  %v4571_v11 = vadd.f32 %v12886_v20, %v12903_v18  ;;  %v4572_v36 = vadd.f32 %v15550_v7, %v12913_v38  ;;  %v15553_v20 = vld [vmem:[#allocation46_spill] sm:$0xff]  ;;  %v15554_v18 = vld [vmem:[#allocation39_spill] sm:$0xff]  ;;  %v15558_v38 = vld [vmem:[#allocation9_spill] sm:$0xff] }
 0x397   : > { %v13177_v44 = vpop.f32.mrf.mxu1  ;;  %v4570_v5 = vadd.f32 %v15551_v9, %v4349_v60  ;;  %v4573_v47 = vadd.f32 %v15554_v18, %v15553_v20  ;;  %v4576_v51 = vadd.f32 %v15556_v45, %v15555_v32  ;;  %v4369_v33 = vadd.f32 %v13037_v30, %v4145_v55  ;;  %v15560_v57 = vld [vmem:[#allocation53_spill] sm:$0xff]  ;;  %v15565_v49 = vld [vmem:[#allocation64_spill] sm:$0xff]  ;;  %v15571_v9 = vld [vmem:[#allocation62_spill] sm:$0xff] }
 0x398   : > { %v4365_v17 = vadd.f32 %v13018_v8, %v4141_v46  ;;  %v4574_v16 = vadd.f32 %v15557_v15, %v4353_v35  ;;  %v4579_v34 = vadd.f32 %v15559_v19, %v15558_v38  ;;  %v4577_v48 = vadd.f32 %v15561_v27, %v15560_v57  ;;  %v15567_v46 = vld [vmem:[#allocation57_spill] sm:$0xff]  ;;  %v15568_v30 = vld [vmem:[#allocation12_spill] sm:$0xff]  ;;  %v13238_v35 = vpop.f32.mrf.mxu0  ;;  %v15572_v20 = vld [vmem:[#allocation15_spill] sm:$0xff] }
 0x399   : > { %v13185_v29 = vpop.f32.mrf.mxu1  ;;  %v4578_v60 = vadd.f32 %v15564_v13, %v4357_v37  ;;  %v4583_v61 = vadd.f32 %v15566_v2, %v15565_v49  ;;  %v4581_v55 = vadd.f32 %v15568_v30, %v15567_v46  ;;  %15569 = vst [vmem:[#allocation33_spill] sm:$0xff] %v13238_v35  ;;  %v15570_v7 = vld [vmem:[#allocation61_spill] sm:$0xff]  ;;  %v13243_v18 = vadd.f32 %v15572_v20, %v4361_v43  ;;  %v15573_v32 = vld [vmem:[#allocation55_spill] sm:$0xff]  ;;  %v15578_v49 = vld [vmem:[#allocation24_spill] sm:$0xff] }
 0x39a   : > { %v4584_v26 = vadd.f32 %v15571_v9, %v15570_v7  ;;  %v13247_v45 = vadd.f32 %v15573_v32, %v13005_v23  ;;  %v15574_v37 = vld [vmem:[#allocation59_spill] sm:$0xff]  ;;  %v4373_v19 = vadd.f32 %v13056_v40, %v4149_v41  ;;  %v4781_v57 = vadd.f32 %v13060_v6, %v4567_v24  ;;  %v15576_v23 = vld [vmem:[#allocation65_spill] sm:$0xff]  ;;  %v15580_v24 = vld [vmem:[#allocation42_spill] sm:$0xff]  ;;  %v13283_v2 = vpop.f32.mrf.mxu0 }
 0x39b   : > { %v13198_v10 = vpop.f32.mrf.mxu1  ;;  %v13251_v15 = vadd.f32 %v15574_v37, %v13011_v59  ;;  %v13259_v27 = vadd.f32 %v12999_v14, %v13016_v1  ;;  %v15575_v43 = vld [vmem:[#allocation63_spill] sm:$0xff]  ;;  %v13266_v42 = vadd.f32 %v15576_v23, %v13025_v21  ;;  %v13274_v40 = vadd.f32 %v15578_v49, %v13035_v31  ;;  %v15579_v6 = vld [vmem:[#allocation25_spill] sm:$0xff]  ;;  %15581 = vst [vmem:[#allocation50_spill] sm:$0xff] %v13283_v2  ;;  %v15582_v21 = vld [vmem:[#allocation44_spill] sm:$0xff] }
 0x39c   : > { %v13262_v56 = vadd.f32 %v15575_v43, %v4365_v17  ;;  %v15577_v59 = vld [vmem:[#allocation23_spill] sm:$0xff]  ;;  %v13277_v41 = vadd.f32 %v15579_v6, %v4369_v33  ;;  %v4779_v1 = vadd.f32 %v13064_v4, %v4565_v39  ;;  %v4782_v17 = vadd.f32 %v15580_v24, %v4568_v63  ;;  %v15583_v46 = vld [vmem:[#allocation26_spill] sm:$0xff]  ;;  %v15585_v7 = vld [vmem:[#allocation36_spill] sm:$0xff] }
 0x39d   : > { %v13214_v12 = vpop.f32.mrf.mxu1  ;;  %v13270_v13 = vadd.f32 %v15577_v59, %v13030_v22  ;;  %v13287_v30 = vadd.f32 %v15583_v46, %v15582_v21  ;;  %v15584_v22 = vld [vmem:[#allocation29_spill] sm:$0xff]  ;;  %v15586_v31 = vld [vmem:[#allocation11_spill] sm:$0xff]  ;;  %v15587_v33 = vld [vmem:[#allocation18_spill] sm:$0xff] }
 0x39e   : > { %v13291_v9 = vadd.f32 %v15585_v7, %v15584_v22  ;;  %v4780_v20 = vadd.f32 %v15586_v31, %v4566_v0  ;;  %v4785_v32 = vadd.f32 %v15587_v33, %v4571_v11  ;;  %v15588_v37 = vld [vmem:[#allocation34_spill] sm:$0xff]  ;;  %v15589_v23 = vld [vmem:[#allocation40_spill] sm:$0xff]  ;;  %v15592_v6 = vld [vmem:[#allocation17_spill] sm:$0xff] }
 0x39f   : > { %v13229_v8 = vpop.f32.mrf.mxu1  ;;  %v4783_v43 = vadd.f32 %v15588_v37, %v4569_v28  ;;  %v15590_v4 = vld [vmem:[#allocation14_spill] sm:$0xff]  ;;  %v4784_v24 = vadd.f32 %v15592_v6, %v4570_v5  ;;  %v15593_v21 = vld [vmem:[#allocation47_spill] sm:$0xff]  ;;  %v15594_v22 = vld [vmem:[#allocation28_spill] sm:$0xff]  ;;  %v4790_v28 = vadd.f32 %v13105_v54, %v4576_v51  ;;  %v13316_v5 = vpop.f32.mrf.mxu0 }
 0x3a0   : > { %v13298_v39 = vadd.f32 %v15590_v4, %v15589_v23  ;;  %v15591_v59 = vld [vmem:[#allocation10_spill] sm:$0xff]  ;;  %v13305_v46 = vadd.f32 %v15593_v21, %v4373_v19  ;;  %v5005_v7 = vadd.f32 %v15594_v22, %v4781_v57  ;;  %v15595_v0 = vld [vmem:[#allocation48_spill] sm:$0xff]  ;;  %v15601_v21 = vld [vmem:[#allocation31_spill] sm:$0xff] }
 0x3a1   : > { %v13253_v38 = vpop.f32.mrf.mxu1  ;;  %v4786_v49 = vadd.f32 %v15591_v59, %v4572_v36  ;;  %v4789_v31 = vadd.f32 %v15595_v0, %v4575_v53  ;;  %v15596_v11 = vld [vmem:[#allocation66_spill] sm:$0xff]  ;;  %v15598_v2 = vld [vmem:[#allocation72_spill] sm:$0xff]  ;;  %v5006_v57 = vadd.f32 %v15601_v21, %v4782_v17  ;;  %v15602_v22 = vld [vmem:[#allocation77_spill] sm:$0xff] }
 0x3a2   : > { %v4787_v33 = vadd.f32 %v15596_v11, %v4573_v47  ;;  %v15597_v37 = vld [vmem:[#allocation70_spill] sm:$0xff]  ;;  %v4793_v35 = vadd.f32 %v15598_v2, %v4579_v34  ;;  %v4794_v53 = vadd.f32 %v15602_v22, %v4580_v58  ;;  %v13324_v54 = vld [vmem:[%s15129_s5] ss:$0 sm:$0xff]  ;;  %v15603_v47 = vld [vmem:[#allocation45_spill] sm:$0xff]  ;;  %v4792_v11 = vadd.f32 %v13135_v62, %v4578_v60 }
 0x3a3   : > { %v13279_v14 = vpop.f32.mrf.mxu1  ;;  %v4788_v23 = vadd.f32 %v15597_v37, %v4574_v16  ;;  %v15599_v36 = vld [vmem:[#allocation74_spill] sm:$0xff]  ;;  %v5004_v51 = vadd.f32 %v15603_v47, %v4780_v20  ;;  %v15604_v16 = vld [vmem:[#allocation20_spill] sm:$0xff]  ;;  %v15607_v17 = vld [vmem:[#allocation7_spill] sm:$0xff] }
 0x3a4   : > { %v4791_v59 = vadd.f32 %v15599_v36, %v4577_v48  ;;  %v15600_v19 = vld [vmem:[#allocation38_spill] sm:$0xff]  ;;  %v5009_v34 = vadd.f32 %v15604_v16, %v4785_v32  ;;  %v15605_v2 = vld [vmem:[#allocation8_spill] sm:$0xff]  ;;  %v13334_v58 = vadd.f32 %v15607_v17, %v4784_v24  ;;  %v15608_v20 = vld [vmem:[#allocation27_spill] sm:$0xff]  ;;  %v13353_v24 = vpop.f32.mrf.mxu0 }
 0x3a5   : > { %v13300_v63 = vpop.f32.mrf.mxu1  ;;  %v5003_v6 = vadd.f32 %v15600_v19, %v4779_v1  ;;  %v5007_v48 = vadd.f32 %v15605_v2, %v4783_v43  ;;  %v15606_v1 = vld [vmem:[#allocation19_spill] sm:$0xff]  ;;  %v13339_v19 = vld [vmem:[%s15130_s6] ss:$0 sm:$0xff]  ;;  %v13342_v22 = vadd.f32 %v15608_v20, %v4789_v31  ;;  %v15609_v32 = vld [vmem:[#allocation13_spill] sm:$0xff] }
 0x3a6   : > { %v13331_v36 = vadd.f32 %v15606_v1, %v4786_v49  ;;  %v13345_v43 = vadd.f32 %v15609_v32, %v4787_v33  ;;  %v15610_v62 = vld [vmem:[#allocation30_spill] sm:$0xff]  ;;  %v15612_v49 = vld [vmem:[#allocation32_spill] sm:$0xff]  ;;  %v15614_v16 = vld [vmem:[#allocation67_spill] sm:$0xff] }
 0x3a7   : > { %v13312_v4 = vpop.f32.mrf.mxu1  ;;  %v13348_v60 = vadd.f32 %v15610_v62, %v4790_v28  ;;  %v13357_v2 = vadd.f32 %v15614_v16, %v4793_v35  ;;  %v15615_v1 = vld [vmem:[#allocation69_spill] sm:$0xff]  ;;  %v15617_v20 = vld [vmem:[#allocation82_spill] sm:$0xff]  ;;  %v15618_v28 = vld [vmem:[#allocation84_spill] sm:$0xff] }
 0x3a8   : > { %v13360_v31 = vadd.f32 %v15615_v1, %v4791_v59  ;;  %v15616_v17 = vld [vmem:[#allocation81_spill] sm:$0xff]  ;;  %v4795_v32 = vadd.f32 %v15617_v20, %v4581_v55  ;;  %v4798_v62 = vadd.f32 %v15618_v28, %v4584_v26  ;;  %v15622_v55 = vld [vmem:[#allocation87_spill] sm:$0xff]  ;;  %v15623_v1 = vld [vmem:[#allocation88_spill] sm:$0xff] }
 0x3a9   : > { %v9652_v0 = vpop.f32.mrf.mxu1  ;;  %15611 = vst [vmem:[#allocation21_spill] sm:$0xff] %v13348_v60  ;;  %v4797_v33 = vadd.f32 %v15616_v17, %v4583_v61  ;;  %v15621_v61 = vld [vmem:[#allocation85_spill] sm:$0xff]  ;;  %v4801_v26 = vadd.f32 %v15622_v55, %v13247_v45  ;;  %v4802_v17 = vadd.f32 %v13167_v52, %v13259_v27  ;;  %v15624_v28 = vld [vmem:[#allocation75_spill] sm:$0xff]  ;;  %v15625_v45 = vld [vmem:[#allocation78_spill] sm:$0xff] }
 0x3aa   : > { %v5226_v37 = vadd.f32 %v9652_v0, %v5005_v7  ;;  %v13351_v7 = vadd.f32 %v15612_v49, %v4788_v23  ;;  %v15619_v23 = vld [vmem:[#allocation71_spill] sm:$0xff]  ;;  %v4796_v16 = vadd.f32 %v15621_v61, %v13243_v18 }
 0x3ab   : > { %v5097_v21 = vpop.f32.mrf.mxu1  ;;  %v13366_v49 = vadd.f32 %v15619_v23, %v4794_v53  ;;  %v4799_v53 = vadd.f32 %v15623_v1, %v13251_v15  ;;  %v13388_v23 = vadd.f32 %v15624_v28, %v4797_v33  ;;  %v15626_v15 = vld [vmem:[#allocation80_spill] sm:$0xff]  ;;  %v15628_v33 = vld [vmem:[#allocation86_spill] sm:$0xff] }
 0x3ac   : > { %15613 = vst [vmem:[#allocation6_spill] sm:$0xff] %v13351_v7  ;;  %v5265_v0 = vmul.f32 %v13324_v54, %v5226_v37  ;;  %v5224_v47 = vadd.f32 %v5097_v21, %v5003_v6  ;;  %v13368_v7 = vpop.f32.mrf.mxu0  ;;  %v15620_v21 = vld [vmem:[#allocation73_spill] sm:$0xff]  ;;  %v13394_v61 = vadd.f32 %v15626_v15, %v4798_v62  ;;  %v13403_v55 = vadd.f32 %v15628_v33, %v4801_v26 }
 0x3ad   : > { %v9653_v60 = vpop.f32.mrf.mxu1  ;;  %v13373_v59 = vadd.f32 %v15620_v21, %v4792_v11  ;;  %v13391_v21 = vadd.f32 %v15625_v45, %v4795_v32  ;;  %v13406_v32 = vadd.f32 %v13163_v50, %v4799_v53  ;;  %v13409_v62 = vadd.f32 %v13180_v25, %v4802_v17 }
 0x3ae   : > { %v5304_v6 = vadd.f32 %v13339_v19, %v5265_v0  ;;  %v5263_v35 = vmul.f32 %v13324_v54, %v5224_v47  ;;  %v5227_v37 = vadd.f32 %v9653_v60, %v5006_v57  ;;  %v4800_v60 = vadd.f32 %v13177_v44, %v13262_v56  ;;  %v4988_v52 = vpop.f32.mrf.mxu0  ;;  %v15627_v56 = vld [vmem:[#allocation83_spill] sm:$0xff] }
 0x3af   : > { %v5100_v20 = vpop.f32.mrf.mxu1  ;;  %v4803_v26 = vadd.f32 %v13198_v10, %v13270_v13  ;;  %v4806_v50 = vadd.f32 %v13214_v12, %v13274_v40  ;;  %v4804_v10 = vadd.f32 %v13229_v8, %v13277_v41  ;;  %v4809_v12 = vadd.f32 %v13253_v38, %v13287_v30  ;;  %v15629_v41 = vld [vmem:[#allocation33_spill] sm:$0xff] }
 0x3b0   : > { %v5336_v0 = vmax.f32 %v5304_v6, 0.0  ;;  %v5302_v47 = vadd.f32 %v13339_v19, %v5263_v35  ;;  %v5266_v57 = vmul.f32 %v13324_v54, %v5227_v37  ;;  %v5225_v11 = vadd.f32 %v5100_v20, %v5004_v51  ;;  %v9645_v17 = vpop.f32.mrf.mxu0 }
 0x3b1   : > { %v9656_v18 = vpop.f32.mrf.mxu1  ;;  %v13400_v37 = vadd.f32 %v15627_v56, %v4796_v16  ;;  %v4805_v16 = vadd.f32 %v13185_v29, %v13266_v42  ;;  %v13421_v25 = vadd.f32 %v13206_v3, %v4800_v60  ;;  %v4807_v3 = vadd.f32 %v13279_v14, %v13291_v9  ;;  %v15630_v14 = vld [vmem:[#allocation50_spill] sm:$0xff] }
 0x3b2   : > { %5368 = vst.msk [vmem:[#allocation2 + $0x31] sm:$0xff] %vm2766_vm4, %v5336_v0  ;;  %v5334_v27 = vmax.f32 %v5302_v47, 0.0  ;;  %v5305_v6 = vadd.f32 %v13339_v19, %v5266_v57  ;;  %v5264_v51 = vmul.f32 %v13324_v54, %v5225_v11  ;;  %v5230_v35 = vadd.f32 %v9656_v18, %v5009_v34 }
 0x3b3   : > { %v5113_v44 = vpop.f32.mrf.mxu1  ;;  %v4810_v42 = vadd.f32 %v13300_v63, %v13298_v39  ;;  %v4808_v8 = vadd.f32 %v13312_v4, %v13305_v46  ;;  %v13442_v30 = vadd.f32 %v15629_v41, %v4805_v16  ;;  %v13445_v9 = vadd.f32 %v15630_v14, %v4803_v26  ;;  %v4991_v63 = vpop.f32.mrf.mxu0  ;;  %v15631_v26 = vld [vmem:[#allocation21_spill] sm:$0xff]  ;;  %v10086_v41 = vld [vmem:[%s15131_s7 + $0x30] sm:$0xff]  }
 0x3b4   : > { %5366 = vst.msk [vmem:[#allocation2 + $0x19] sm:$0xff] %vm2766_vm4, %v5334_v27  ;;  %v5337_v1 = vmax.f32 %v5305_v6, 0.0  ;;  %v5303_v20 = vadd.f32 %v13339_v19, %v5264_v51  ;;  %v5269_v34 = vmul.f32 %v13324_v54, %v5230_v35  ;;  %v5228_v0 = vadd.f32 %v5113_v44, %v5007_v48 }
 0x3b5   : > { %v9657_v53 = vpop.f32.mrf.mxu1  ;;  %v13448_v39 = vadd.f32 %v13316_v5, %v4806_v50  ;;  %v13457_v45 = vadd.f32 %v13368_v7, %v4809_v12  ;;  %v13459_v15 = vadd.f32 %v4988_v52, %v4807_v3  ;;  %v13461_v27 = vadd.f32 %v9645_v17, %v4810_v42 }
 0x3b6   : > { %5369 = vst.msk [vmem:[#allocation2 + $0x39] sm:$0xff] %vm2766_vm4, %v5337_v1  ;;  %v5335_v47 = vmax.f32 %v5303_v20, 0.0  ;;  %v5308_v57 = vadd.f32 %v13339_v19, %v5269_v34  ;;  %v5267_v48 = vmul.f32 %v13324_v54, %v5228_v0  ;;  %v5231_v29 = vadd.f32 %v9657_v53, %v13331_v36 }
 0x3b7   : > { %v5116_v13 = vpop.f32.mrf.mxu1  ;;  %v13466_v51 = vadd.f32 %v13353_v24, %v4804_v10  ;;  %v13472_v56 = vadd.f32 %v4991_v63, %v4808_v8 }
 0x3b8   : > { %5367 = vst.msk [vmem:[#allocation2 + $0x21] sm:$0xff] %vm2766_vm4, %v5335_v47  ;;  %v5340_v40 = vmax.f32 %v5308_v57, 0.0  ;;  %v5306_v11 = vadd.f32 %v13339_v19, %v5267_v48  ;;  %v5270_v36 = vmul.f32 %v13324_v54, %v5231_v29  ;;  %v5229_v60 = vadd.f32 %v5116_v13, %v13334_v58  ;;  %v15632_v13 = vld [vmem:[#allocation6_spill] sm:$0xff] }
 0x3b9   : > { %v9660_v38 = vpop.f32.mrf.mxu1  ;;  %v13454_v4 = vld [vmem:[#allocation2 + $0x30] sm:$0xff] }
 0x3ba   : > { %5372 = vst.msk [vmem:[#allocation2 + $0x61] sm:$0xff] %vm2766_vm4, %v5340_v40  ;;  %v5338_v18 = vmax.f32 %v5306_v11, 0.0  ;;  %v5309_v28 = vadd.f32 %v13339_v19, %v5270_v36  ;;  %v5268_v58 = vmul.f32 %v13324_v54, %v5229_v60  ;;  %v5234_v46 = vadd.f32 %v9660_v38, %v13342_v22 }
 0x3bb   : > { %v5129_v5 = vpop.f32.mrf.mxu1  ;;  %v13463_v6 = vld [vmem:[#allocation2 + $0x18] sm:$0xff]  ;;  %v5530_v20 = vrot.slane %v13454_v4, 1 }
 0x3bc   : > { %5370 = vst.msk [vmem:[#allocation2 + $0x49] sm:$0xff] %vm2766_vm4, %v5338_v18  ;;  %v5341_v35 = vmax.f32 %v5309_v28, 0.0  ;;  %v5307_v22 = vadd.f32 %v13339_v19, %v5268_v58  ;;  %v5273_v44 = vmul.f32 %v13324_v54, %v5234_v46  ;;  %v5232_v7 = vadd.f32 %v5129_v5, %v13345_v43 }
 0x3bd   : > { %v9661_v52 = vpop.f32.mrf.mxu1  ;;  %v5525_v33 = vrot.slane %v13463_v6, 1  ;;  %v13475_v1 = vld [vmem:[#allocation2 + $0x38] sm:$0xff]  ;;  %v13479_v34 = vld [vmem:[#allocation2 + $0x40] sm:$0x3] }
 0x3be   : > { %5373 = vst.msk [vmem:[#allocation2 + $0x69] sm:$0xff] %vm2766_vm4, %v5341_v35  ;;  %v5339_v0 = vmax.f32 %v5307_v22, 0.0  ;;  %v5312_v16 = vadd.f32 %v13339_v19, %v5273_v44  ;;  %v5271_v43 = vmul.f32 %v13324_v54, %v5232_v7  ;;  %v5235_v50 = vadd.f32 %v9661_v52, %v15631_v26 }
 0x3bf   : > { %v5132_v53 = vpop.f32.mrf.mxu1  ;;  %v13485_v17 = vld [vmem:[#allocation2 + $0x20] sm:$0xff]  ;;  %v13490_v57 = vpack.c.bf16 %v13475_v1, %v13454_v4  ;;  %v5531_v48 = vrot.slane %v13475_v1, 1  ;;  %v13493_v29 = vld [vmem:[#allocation2 + $0x28] sm:$0x3]  ;;  %v5533_v10 = vrot.slane %v13479_v34, 1 }
 0x3c0   : > { %5371 = vst.msk [vmem:[#allocation2 + $0x51] sm:$0xff] %vm2766_vm4, %v5339_v0  ;;  %v5344_v12 = vmax.f32 %v5312_v16, 0.0  ;;  %v5310_v3 = vadd.f32 %v13339_v19, %v5271_v43  ;;  %v5274_v42 = vmul.f32 %v13324_v54, %v5235_v50  ;;  %v5233_v40 = vadd.f32 %v5132_v53, %v15632_v13  ;;  %v15633_v16 = vld [vmem:[#allocation68_spill] sm:$0xff]  ;;  %v13549_v13 = vld [vmem:[%s15131_s7 + $0x58] sm:$0xff]  }
 0x3c1   : > { %v9664_v11 = vpop.f32.mrf.mxu1  ;;  %v13502_v36 = vpack.c.bf16 %v13485_v17, %v13463_v6  ;;  %v5526_v60 = vrot.slane %v13485_v17, 1  ;;  %v5528_v38 = vrot.slane %v13493_v29, 1  ;;  %v5532_v35 = vsel %vm478_vm1, %v5530_v20, %v5531_v48 }
 0x3c2   : > { %5376 = vst.msk [vmem:[#allocation2 + $0x91] sm:$0xff] %vm2766_vm4, %v5344_v12  ;;  %v5342_v14 = vmax.f32 %v5310_v3, 0.0  ;;  %v5313_v63 = vadd.f32 %v13339_v19, %v5274_v42  ;;  %v5272_v18 = vmul.f32 %v13324_v54, %v5233_v40  ;;  %v5238_v28 = vadd.f32 %v9664_v11, %v13357_v2 }
 0x3c3   : > { %9723 = vmatmul.mubr.msk.bf16.vlgmr.msra.gmra.mxu1 %vm2766_vm4, %v13502_v36  ;;  %v5145_v58 = vpop.f32.mrf.mxu1  ;;  %v5527_v46 = vsel %vm478_vm1, %v5525_v33, %v5526_v60  ;;  %v5529_v5 = vsel %vm478_vm1, %v5526_v60, %v5528_v38  ;;  %v5534_v22 = vsel %vm478_vm1, %v5531_v48, %v5533_v10  ;;  %v13520_v44 = vld [vmem:[#allocation2 + $0x48] sm:$0xff]  ;;  %v13528_v33 = vld [vmem:[#allocation2 + $0x60] sm:$0xff] }
 0x3c4   : > { %5374 = vst.msk [vmem:[#allocation2 + $0x79] sm:$0xff] %vm2766_vm4, %v5342_v14  ;;  %v5345_v7 = vmax.f32 %v5313_v63, 0.0  ;;  %v5311_v52 = vadd.f32 %v13339_v19, %v5272_v18  ;;  %v5277_v2 = vmul.f32 %v13324_v54, %v5238_v28  ;;  %v5236_v0 = vadd.f32 %v5145_v58, %v13360_v31  ;;  %9726 = vmatprep.mubr.msk.bf16.mxu1 %vm2766_vm4, %v13490_v57  ;;  %v10084_v31 = vld [vmem:[%s15131_s7 + $0x20] sm:$0xff]   ;;  %v15637_v58 = vld [vmem:[#allocation22_spill] sm:$0xff] }
 0x3c5   : > { %9791 = vmatpush3.bf16.msra.mxu1 %v15633_v16  ;;  %v9665_v43 = vpop.f32.mrf.mxu1  ;;  %v13532_v26 = vpack.c.bf16 %v5529_v5, %v5527_v46  ;;  %v13534_v50 = vpack.c.bf16 %v5534_v22, %v5532_v35  ;;  %v5535_v53 = vrot.slane %v13520_v44, 1  ;;  %v13537_v48 = vld [vmem:[#allocation2 + $0x68] sm:$0xff]  ;;  %v5540_v14 = vrot.slane %v13528_v33, 1  ;;  %v13571_v35 = vld [vmem:[#allocation2 + $0x70] sm:$0x3] }
 0x3c6   : > { %9792 = vmatprep.subr.bf16.mxu1 %v10086_v41  ;;  %5377 = vst.msk [vmem:[#allocation2 + $0x99] sm:$0xff] %vm2766_vm4, %v5345_v7  ;;  %v5343_v10 = vmax.f32 %v5311_v52, 0.0  ;;  %v5316_v12 = vadd.f32 %v13339_v19, %v5277_v2  ;;  %v5275_v3 = vmul.f32 %v13324_v54, %v5236_v0  ;;  %v5239_v42 = vadd.f32 %v9665_v43, %v13366_v49 }
 0x3c7   : > { %15634 = vst [vmem:[#allocation52_spill] sm:$0xff] %v13532_v26  ;;  %15635 = vst [vmem:[#allocation35_spill] sm:$0xff] %v13534_v50  ;;  %9687 = vmatmul.mubr.msk.bf16.vlgmr.msra.gmra.mxu0 %vm2766_vm4, %v13532_v26  ;;  %v5148_v40 = vpop.f32.mrf.mxu1  ;;  %v13553_v11 = vld [vmem:[#allocation2 + $0x50] sm:$0xff]  ;;  %v13558_v38 = vpack.c.bf16 %v13537_v48, %v13528_v33  ;;  %v5541_v49 = vrot.slane %v13537_v48, 1  ;;  %v13569_v5 = vld [vmem:[#allocation2 + $0x58] sm:$0x3] }
 0x3c8   : > { %5375 = vst.msk [vmem:[#allocation2 + $0x81] sm:$0xff] %vm2766_vm4, %v5343_v10  ;;  %v5348_v63 = vmax.f32 %v5316_v12, 0.0  ;;  %v5314_v18 = vadd.f32 %v13339_v19, %v5275_v3  ;;  %v5278_v28 = vmul.f32 %v13324_v54, %v5239_v42  ;;  %9755 = vmatpush3.bf16.msra.mxu0 %v15637_v58  ;;  %9690 = vmatprep.mubr.msk.bf16.mxu0 %vm2766_vm4, %v13534_v50  ;;  %v5536_v52 = vrot.slane %v13553_v11, 1 }
 0x3c9   : > { %15636 = vst [vmem:[#allocation37_spill] sm:$0xff] %v13558_v38  ;;  %v5237_v46 = vadd.f32 %v5148_v40, %v13373_v59  ;;  %v9668_v22 = vpop.f32.mrf.mxu1  ;;  %v13575_v7 = vpack.c.bf16 %v13553_v11, %v13520_v44  ;;  %9756 = vmatprep.subr.bf16.mxu0 %v10084_v31  ;;  %9793 = vmatpush3.bf16.msra.mxu1 %v10086_v41  ;;  %v13583_v59 = vld [vmem:[%s15131_s7 + $0x48] sm:$0xff]   ;;  %v5538_v42 = vrot.slane %v13569_v5, 1 }
 0x3ca   : > { %15638 = vst [vmem:[#allocation46_spill] sm:$0xff] %v13583_v59  ;;  %5380 = vst.msk [vmem:[#allocation2 + $0xc1] sm:$0xff] %vm2766_vm4, %v5348_v63  ;;  %v5346_v16 = vmax.f32 %v5314_v18, 0.0  ;;  %v5317_v43 = vadd.f32 %v13339_v19, %v5278_v28  ;;  %v5242_v12 = vadd.f32 %v9668_v22, %v13388_v23  ;;  %9862 = vmatprep.subr.bf16.mxu1 %v13549_v13  ;;  %v5543_v63 = vrot.slane %v13571_v35, 1 }
 0x3cb   : > { %v5276_v10 = vmul.f32 %v13324_v54, %v5237_v46  ;;  %9727 = vmatmul.mubr.msk.bf16.gmra.mxu1 %vm2766_vm4, %v13575_v7  ;;  %v5161_v41 = vpop.f32.mrf.mxu1  ;;  %v5537_v3 = vsel %vm478_vm1, %v5535_v53, %v5536_v52  ;;  %v5542_v40 = vsel %vm478_vm1, %v5540_v14, %v5541_v49  ;;  %v13596_v18 = vld [vmem:[#allocation2 + $0x78] sm:$0xff]  ;;  %v5539_v22 = vsel %vm478_vm1, %v5536_v52, %v5538_v42 }
 0x3cc   : > { %5378 = vst.msk [vmem:[#allocation2 + $0xa9] sm:$0xff] %vm2766_vm4, %v5346_v16  ;;  %v5349_v28 = vmax.f32 %v5317_v43, 0.0  ;;  %v5281_v58 = vmul.f32 %v13324_v54, %v5242_v12  ;;  %v5240_v46 = vadd.f32 %v5161_v41, %v13391_v21  ;;  %9730 = vmatprep.mubr.msk.bf16.mxu1 %vm2766_vm4, %v13558_v38  ;;  %9757 = vmatpush3.bf16.msra.mxu0 %v10084_v31  ;;  %v5545_v16 = vrot.slane %v13596_v18, 1  ;;  %v13615_v41 = vld [vmem:[#allocation2 + $0x90] sm:$0xff] }
 0x3cd   : > { %v5315_v23 = vadd.f32 %v13339_v19, %v5276_v10  ;;  %v9669_v14 = vpop.f32.mrf.mxu1  ;;  %v5544_v0 = vsel %vm478_vm1, %v5541_v49, %v5543_v63  ;;  %v13608_v43 = vld [vmem:[#allocation2 + $0x98] sm:$0xff]  ;;  %9826 = vmatprep.subr.bf16.mxu0 %v13583_v59  ;;  %v13617_v52 = vpack.c.bf16 %v5539_v22, %v5537_v3  ;;  %v5550_v22 = vrot.slane %v13615_v41, 1 }
 0x3ce   : > { %5381 = vst.msk [vmem:[#allocation2 + $0xc9] sm:$0xff] %vm2766_vm4, %v5349_v28  ;;  %v5320_v10 = vadd.f32 %v13339_v19, %v5281_v58  ;;  %v5279_v31 = vmul.f32 %v13324_v54, %v5240_v46  ;;  %v5243_v12 = vadd.f32 %v9669_v14, %v13394_v61  ;;  %v13619_v49 = vpack.c.bf16 %v5544_v0, %v5542_v40 }
 0x3cf   : > { %v5347_v21 = vmax.f32 %v5315_v23, 0.0  ;;  %15639 = vst [vmem:[#allocation39_spill] sm:$0xff] %v13617_v52  ;;  %v5164_v42 = vpop.f32.mrf.mxu1  ;;  %v13621_v63 = vld [vmem:[#allocation2 + $0x80] sm:$0xff]  ;;  %v13626_v28 = vpack.c.bf16 %v13608_v43, %v13615_v41  ;;  %v13632_v0 = vld [vmem:[#allocation2 + $0x88] sm:$0x3]  ;;  %9691 = vmatmul.mubr.msk.bf16.gmra.mxu0 %vm2766_vm4, %v13617_v52  ;;  %v15662_v38 = vrot.slane %v13454_v4, 2 }
 0x3d0   : > { %15640 = vst [vmem:[#allocation51_spill] sm:$0xff] %v13619_v49  ;;  %v5352_v23 = vmax.f32 %v5320_v10, 0.0  ;;  %v5318_v61 = vadd.f32 %v13339_v19, %v5279_v31  ;;  %v5282_v58 = vmul.f32 %v13324_v54, %v5243_v12  ;;  %v5241_v3 = vadd.f32 %v5164_v42, %v13400_v37  ;;  %9694 = vmatprep.mubr.msk.bf16.mxu0 %vm2766_vm4, %v13619_v49  ;;  %v13649_v42 = vld [vmem:[#allocation2 + $0xa0] sm:$0x3] }
 0x3d1   : > { %15641 = vst [vmem:[#allocation41_spill] sm:$0xff] %v13626_v28  ;;  %5379 = vst.msk [vmem:[#allocation2 + $0xb1] sm:$0xff] %vm2766_vm4, %v5347_v21  ;;  %v9672_v40 = vpop.f32.mrf.mxu1  ;;  %v13638_v46 = vpack.c.bf16 %v13621_v63, %v13596_v18  ;;  %v5546_v14 = vrot.slane %v13621_v63, 1  ;;  %v5551_v21 = vrot.slane %v13608_v43, 1  ;;  %v15663_v4 = vrot.slane %v13485_v17, 2 }
 0x3d2   : > { %5384 = vst.msk [vmem:[#allocation2 + $0xf1] sm:$0xff] %vm2766_vm4, %v5352_v23  ;;  %v5350_v10 = vmax.f32 %v5318_v61, 0.0  ;;  %v5321_v37 = vadd.f32 %v13339_v19, %v5282_v58  ;;  %v5280_v31 = vmul.f32 %v13324_v54, %v5241_v3  ;;  %v5246_v12 = vadd.f32 %v9672_v40, %v13403_v55 }
 0x3d3   : > { %15642 = vst [vmem:[#allocation43_spill] sm:$0xff] %v13638_v46  ;;  %9731 = vmatmul.mubr.msk.bf16.gmra.mxu1 %vm2766_vm4, %v13638_v46  ;;  %v5177_v60 = vpop.f32.mrf.mxu1  ;;  %v5547_v61 = vsel %vm478_vm1, %v5545_v16, %v5546_v14  ;;  %v5548_v58 = vrot.slane %v13632_v0, 1  ;;  %v13663_v53 = vld [vmem:[#allocation2 + $0xa8] sm:$0xff]  ;;  %v5552_v8 = vsel %vm478_vm1, %v5550_v22, %v5551_v21 }
 0x3d4   : > { %5382 = vst.msk [vmem:[#allocation2 + $0xd9] sm:$0xff] %vm2766_vm4, %v5350_v10  ;;  %v5353_v2 = vmax.f32 %v5321_v37, 0.0  ;;  %v5319_v3 = vadd.f32 %v13339_v19, %v5280_v31  ;;  %v5285_v55 = vmul.f32 %v13324_v54, %v5246_v12  ;;  %v5244_v40 = vadd.f32 %v5177_v60, %v13406_v32  ;;  %9734 = vmatprep.mubr.msk.bf16.mxu1 %vm2766_vm4, %v13626_v28 }
 0x3d5   : > { %v9673_v24 = vpop.f32.mrf.mxu1  ;;  %v5549_v16 = vsel %vm478_vm1, %v5546_v14, %v5548_v58  ;;  %v5553_v10 = vrot.slane %v13649_v42, 1  ;;  %v13673_v12 = vld [vmem:[#allocation2 + $0xc8] sm:$0xff]  ;;  %v5555_v22 = vrot.slane %v13663_v53, 1 }
 0x3d6   : > { %5385 = vst.msk [vmem:[#allocation2 + $0xf9] sm:$0xff] %vm2766_vm4, %v5353_v2  ;;  %v5351_v37 = vmax.f32 %v5319_v3, 0.0  ;;  %v5324_v31 = vadd.f32 %v13339_v19, %v5285_v55  ;;  %v5283_v32 = vmul.f32 %v13324_v54, %v5244_v40  ;;  %v5247_v60 = vadd.f32 %v9673_v24, %v13409_v62 }
 0x3d7   : > { %v13675_v47 = vpack.c.bf16 %v5549_v16, %v5547_v61  ;;  %v5554_v23 = vsel %vm478_vm1, %v5551_v21, %v5553_v10  ;;  %v5180_v14 = vpop.f32.mrf.mxu1  ;;  %v13687_v61 = vld [vmem:[#allocation2 + $0xc0] sm:$0xff] }
 0x3d8   : > { %v13678_v58 = vld [vmem:[#allocation2 + $0xb0] sm:$0xff]  ;;  %5383 = vst.msk [vmem:[#allocation2 + $0xe1] sm:$0xff] %vm2766_vm4, %v5351_v37  ;;  %v5356_v3 = vmax.f32 %v5324_v31, 0.0  ;;  %v5322_v55 = vadd.f32 %v13339_v19, %v5283_v32  ;;  %v5286_v62 = vmul.f32 %v13324_v54, %v5247_v60  ;;  %v13685_v24 = vpack.c.bf16 %v5554_v23, %v5552_v8  ;;  %v13707_v32 = vld [vmem:[#allocation2 + $0xb8] sm:$0x3] }
 0x3d9   : > { %15643 = vst [vmem:[#allocation9_spill] sm:$0xff] %v13675_v47  ;;  %9695 = vmatmul.mubr.msk.bf16.gmra.mxu0 %vm2766_vm4, %v13675_v47  ;;  %v5245_v21 = vadd.f32 %v5180_v14, %v13421_v25  ;;  %v9676_v40 = vpop.f32.mrf.mxu1  ;;  %v13694_v16 = vpack.c.bf16 %v13678_v58, %v13663_v53  ;;  %v5556_v10 = vrot.slane %v13678_v58, 1  ;;  %v13699_v37 = vpack.c.bf16 %v13673_v12, %v13687_v61  ;;  %v13709_v60 = vld [vmem:[#allocation2 + $0xd0] sm:$0x3] }
 0x3da   : > { %15644 = vst [vmem:[#allocation54_spill] sm:$0xff] %v13685_v24  ;;  %5388 = vst.msk [vmem:[#allocation2 + $0x121] sm:$0xff] %vm2766_vm4, %v5356_v3  ;;  %v5354_v8 = vmax.f32 %v5322_v55, 0.0  ;;  %v5325_v23 = vadd.f32 %v13339_v19, %v5286_v62  ;;  %9698 = vmatprep.mubr.msk.bf16.mxu0 %vm2766_vm4, %v13685_v24  ;;  %v5250_v25 = vadd.f32 %v9676_v40, %v13442_v30  ;;  %v5560_v55 = vrot.slane %v13687_v61, 1 }
 0x3db   : > { %15645 = vst [vmem:[#allocation53_spill] sm:$0xff] %v13694_v16  ;;  %15646 = vst [vmem:[#allocation49_spill] sm:$0xff] %v13699_v37  ;;  %v5284_v14 = vmul.f32 %v13324_v54, %v5245_v21  ;;  %9735 = vmatmul.mubr.msk.bf16.gmra.mxu1 %vm2766_vm4, %v13694_v16  ;;  %v5193_v3 = vpop.f32.mrf.mxu1  ;;  %v5561_v62 = vrot.slane %v13673_v12, 1  ;;  %v13723_v20 = vld [vmem:[#allocation2 + $0xd8] sm:$0xff]  ;;  %v5557_v49 = vsel %vm478_vm1, %v5555_v22, %v5556_v10  ;;  %v5558_v2 = vrot.slane %v13707_v32, 1 }
 0x3dc   : > { %5386 = vst.msk [vmem:[#allocation2 + $0x109] sm:$0xff] %vm2766_vm4, %v5354_v8  ;;  %v5357_v30 = vmax.f32 %v5325_v23, 0.0  ;;  %v5289_v40 = vmul.f32 %v13324_v54, %v5250_v25  ;;  %v5248_v31 = vadd.f32 %v5193_v3, %v13445_v9  ;;  %9738 = vmatprep.mubr.msk.bf16.mxu1 %vm2766_vm4, %v13699_v37  ;;  %v5563_v8 = vrot.slane %v13709_v60, 1 }
 0x3dd   : > { %v5323_v24 = vadd.f32 %v13339_v19, %v5284_v14  ;;  %v9677_v47 = vpop.f32.mrf.mxu1  ;;  %v5562_v3 = vsel %vm478_vm1, %v5560_v55, %v5561_v62  ;;  %v5559_v14 = vsel %vm478_vm1, %v5556_v10, %v5558_v2  ;;  %v5565_v26 = vrot.slane %v13723_v20, 1 }
 0x3de   : > { %5389 = vst.msk [vmem:[#allocation2 + $0x129] sm:$0xff] %vm2766_vm4, %v5357_v30  ;;  %v5328_v9 = vadd.f32 %v13339_v19, %v5289_v40  ;;  %v5287_v23 = vmul.f32 %v13324_v54, %v5248_v31  ;;  %v5251_v25 = vadd.f32 %v9677_v47, %v13448_v39  ;;  %v5564_v52 = vsel %vm478_vm1, %v5561_v62, %v5563_v8  ;;  %v13743_v39 = vld [vmem:[#allocation2 + $0xf8] sm:$0xff]  ;;  %v13754_v62 = vld [vmem:[#allocation2 + $0xf0] sm:$0xff] }
 0x3df   : > { %v5355_v21 = vmax.f32 %v5323_v24, 0.0  ;;  %v5196_v22 = vpop.f32.mrf.mxu1  ;;  %v13736_v50 = vld [vmem:[#allocation2 + $0xe0] sm:$0xff]  ;;  %v13741_v31 = vpack.c.bf16 %v5559_v14, %v5557_v49  ;;  %v13746_v47 = vpack.c.bf16 %v5564_v52, %v5562_v3 }
 0x3e0   : > { %v5360_v37 = vmax.f32 %v5328_v9, 0.0  ;;  %v5326_v30 = vadd.f32 %v13339_v19, %v5287_v23  ;;  %v5290_v40 = vmul.f32 %v13324_v54, %v5251_v25  ;;  %v5249_v2 = vadd.f32 %v5196_v22, %v13466_v51 }
 0x3e1   : > { %15647 = vst [vmem:[#allocation60_spill] sm:$0xff] %v13741_v31  ;;  %5387 = vst.msk [vmem:[#allocation2 + $0x111] sm:$0xff] %vm2766_vm4, %v5355_v21  ;;  %v9680_v24 = vpop.f32.mrf.mxu1  ;;  %v13751_v10 = vpack.c.bf16 %v13736_v50, %v13723_v20  ;;  %v5566_v55 = vrot.slane %v13736_v50, 1  ;;  %9699 = vmatmul.mubr.msk.bf16.gmra.mxu0 %vm2766_vm4, %v13741_v31  ;;  %v13762_v21 = vld [vmem:[#allocation2 + $0xe8] sm:$0x3]  ;;  %v13772_v25 = vpack.c.bf16 %v13743_v39, %v13754_v62 }
 0x3e2   : > { %15648 = vst [vmem:[#allocation16_spill] sm:$0xff] %v13746_v47  ;;  %5392 = vst.msk [vmem:[#allocation2 + $0x151] sm:$0xff] %vm2766_vm4, %v5360_v37  ;;  %v5358_v49 = vmax.f32 %v5326_v30, 0.0  ;;  %v5329_v8 = vadd.f32 %v13339_v19, %v5290_v40  ;;  %v5254_v52 = vadd.f32 %v9680_v24, %v13457_v45  ;;  %9702 = vmatprep.mubr.msk.bf16.mxu0 %vm2766_vm4, %v13746_v47  ;;  %v5571_v45 = vrot.slane %v13743_v39, 1  ;;  %v13779_v40 = vld [vmem:[#allocation2 + $0x100] sm:$0x3] }
 0x3e3   : > { %15649 = vst [vmem:[#allocation56_spill] sm:$0xff] %v13751_v10  ;;  %v5288_v9 = vmul.f32 %v13324_v54, %v5249_v2  ;;  %9739 = vmatmul.mubr.msk.bf16.gmra.mxu1 %vm2766_vm4, %v13751_v10  ;;  %v5209_v23 = vpop.f32.mrf.mxu1  ;;  %15650 = vst [vmem:[#allocation64_spill] sm:$0xff] %v13772_v25  ;;  %v5570_v30 = vrot.slane %v13754_v62, 1  ;;  %v5567_v37 = vsel %vm478_vm1, %v5565_v26, %v5566_v55  ;;  %v5573_v31 = vrot.slane %v13779_v40, 1 }
 0x3e4   : > { %5390 = vst.msk [vmem:[#allocation2 + $0x139] sm:$0xff] %vm2766_vm4, %v5358_v49  ;;  %v5361_v3 = vmax.f32 %v5329_v8, 0.0  ;;  %v5293_v14 = vmul.f32 %v13324_v54, %v5254_v52  ;;  %v5252_v22 = vadd.f32 %v5209_v23, %v13459_v15  ;;  %9742 = vmatprep.mubr.msk.bf16.mxu1 %vm2766_vm4, %v13772_v25  ;;  %v5568_v49 = vrot.slane %v13762_v21, 1  ;;  %v13795_v25 = vld [vmem:[#allocation2 + $0x108] sm:$0xff] }
 0x3e5   : > { %v5327_v2 = vadd.f32 %v13339_v19, %v5288_v9  ;;  %v9681_v51 = vpop.f32.mrf.mxu1  ;;  %v5572_v24 = vsel %vm478_vm1, %v5570_v30, %v5571_v45 }
 0x3e6   : > { %5393 = vst.msk [vmem:[#allocation2 + $0x159] sm:$0xff] %vm2766_vm4, %v5361_v3  ;;  %v5332_v15 = vadd.f32 %v13339_v19, %v5293_v14  ;;  %v5291_v8 = vmul.f32 %v13324_v54, %v5252_v22  ;;  %v5255_v9 = vadd.f32 %v9681_v51, %v13461_v27  ;;  %v5569_v47 = vsel %vm478_vm1, %v5566_v55, %v5568_v49  ;;  %v13803_v27 = vld [vmem:[#allocation2 + $0x128] sm:$0xff]  ;;  %v13813_v49 = vld [vmem:[#allocation2 + $0x120] sm:$0xff] }
 0x3e7   : > { %v5359_v23 = vmax.f32 %v5327_v2, 0.0  ;;  %v5212_v26 = vpop.f32.mrf.mxu1  ;;  %v13799_v22 = vpack.c.bf16 %v5569_v47, %v5567_v37  ;;  %v5574_v55 = vsel %vm478_vm1, %v5571_v45, %v5573_v31  ;;  %v13824_v45 = vld [vmem:[#allocation2 + $0x130] sm:$0x3] }
 0x3e8   : > { %v5364_v10 = vmax.f32 %v5332_v15, 0.0  ;;  %v5330_v3 = vadd.f32 %v13339_v19, %v5291_v8  ;;  %v5294_v14 = vmul.f32 %v13324_v54, %v5255_v9  ;;  %v13801_v52 = vld [vmem:[#allocation2 + $0x110] sm:$0xff]  ;;  %v5253_v51 = vadd.f32 %v5212_v26, %v13472_v56  ;;  %v13822_v31 = vld [vmem:[#allocation2 + $0x118] sm:$0x3] }
 0x3e9   : > { %15651 = vst [vmem:[#allocation58_spill] sm:$0xff] %v13799_v22  ;;  %5391 = vst.msk [vmem:[#allocation2 + $0x141] sm:$0xff] %vm2766_vm4, %v5359_v23  ;;  %v13810_v30 = vpack.c.bf16 %v13801_v52, %v13795_v25  ;;  %v5576_v2 = vrot.slane %v13801_v52, 1  ;;  %9703 = vmatmul.mubr.msk.bf16.gmra.mxu0 %vm2766_vm4, %v13799_v22  ;;  %v13819_v15 = vpack.c.bf16 %v5574_v55, %v5572_v24  ;;  %v5575_v56 = vrot.slane %v13795_v25, 1 }
 0x3ea   : > { %5396 = vst.msk [vmem:[#allocation2 + $0x181] sm:$0xff] %vm2766_vm4, %v5364_v10  ;;  %v5362_v47 = vmax.f32 %v5330_v3, 0.0  ;;  %v5333_v37 = vadd.f32 %v13339_v19, %v5294_v14  ;;  %v5292_v8 = vmul.f32 %v13324_v54, %v5253_v51  ;;  %v13833_v23 = vpack.c.bf16 %v13803_v27, %v13813_v49 }
 0x3eb   : > { %15652 = vst [vmem:[#allocation57_spill] sm:$0xff] %v13810_v30  ;;  %15653 = vst [vmem:[#allocation12_spill] sm:$0xff] %v13819_v15  ;;  %9743 = vmatmul.mubr.msk.bf16.gmra.mxu1 %vm2766_vm4, %v13810_v30  ;;  %v13835_v24 = vld [vmem:[#allocation2 + $0x138] sm:$0xff]  ;;  %9706 = vmatprep.mubr.msk.bf16.mxu0 %vm2766_vm4, %v13819_v15  ;;  %v5580_v54 = vrot.slane %v13813_v49, 1  ;;  %v5581_v3 = vrot.slane %v13803_v27, 1  ;;  %v5577_v51 = vsel %vm478_vm1, %v5575_v56, %v5576_v2  ;;  %v5578_v10 = vrot.slane %v13822_v31, 1 }
 0x3ec   : > { %15654 = vst [vmem:[#allocation61_spill] sm:$0xff] %v13833_v23  ;;  %5394 = vst.msk [vmem:[#allocation2 + $0x169] sm:$0xff] %vm2766_vm4, %v5362_v47  ;;  %v5365_v26 = vmax.f32 %v5333_v37, 0.0  ;;  %v5331_v55 = vadd.f32 %v13339_v19, %v5292_v8  ;;  %9746 = vmatprep.mubr.msk.bf16.mxu1 %vm2766_vm4, %v13833_v23  ;;  %v5583_v47 = vrot.slane %v13824_v45, 1  ;;  %v13849_v37 = vld [vmem:[#allocation2 + $0x150] sm:$0xff]  ;;  %v5585_v19 = vrot.slane %v13835_v24, 1 }
 0x3ed   : > { %v13851_v9 = vld [vmem:[#allocation2 + $0x158] sm:$0xff]  ;;  %v5582_v14 = vsel %vm478_vm1, %v5580_v54, %v5581_v3  ;;  %v5579_v56 = vsel %vm478_vm1, %v5576_v2, %v5578_v10  ;;  %v13864_v16 = vld [vmem:[#allocation2 + $0x160] sm:$0x3]  ;;  %v5590_v28 = vrot.slane %v13849_v37, 1 }
 0x3ee   : > { %5397 = vst.msk [vmem:[#allocation2 + $0x189] sm:$0xff] %vm2766_vm4, %v5365_v26  ;;  %v5363_v22 = vmax.f32 %v5331_v55, 0.0  ;;  %v5584_v23 = vsel %vm478_vm1, %v5581_v3, %v5583_v47  ;;  %v13862_v30 = vpack.c.bf16 %v13851_v9, %v13849_v37  ;;  %v13866_v26 = vpack.c.bf16 %v5579_v56, %v5577_v51 }
 0x3ef   : > { %v13868_v15 = vpack.c.bf16 %v5584_v23, %v5582_v14  ;;  %v5591_v55 = vrot.slane %v13851_v9, 1  ;;  %v5593_v47 = vrot.slane %v13864_v16, 1  ;;  %v15660_v56 = vrot.slane %v13463_v6, 2 }
 0x3f0   : > { %15655 = vst [vmem:[#allocation62_spill] sm:$0xff] %v13862_v30  ;;  %15656 = vst [vmem:[#allocation15_spill] sm:$0xff] %v13866_v26  ;;  %v13870_v54 = vld [vmem:[#allocation2 + $0x140] sm:$0xff]  ;;  %v13874_v8 = vld [vmem:[#allocation2 + $0x148] sm:$0x3] }
 0x3f1   : > { %15657 = vst [vmem:[#allocation55_spill] sm:$0xff] %v13868_v15  ;;  %5395 = vst.msk [vmem:[#allocation2 + $0x171] sm:$0xff] %vm2766_vm4, %v5363_v22  ;;  %v13879_v2 = vpack.c.bf16 %v13870_v54, %v13835_v24  ;;  %v5586_v10 = vrot.slane %v13870_v54, 1  ;;  %9707 = vmatmul.mubr.msk.bf16.gmra.mxu0 %vm2766_vm4, %v13866_v26  ;;  %v5588_v14 = vrot.slane %v13874_v8, 1  ;;  %v5592_v51 = vsel %vm478_vm1, %v5590_v28, %v5591_v55 }
 0x3f2   : > { %v15659_v22 = vrot.slane %v13485_v17, 2  ;;  %9710 = vmatprep.mubr.msk.bf16.mxu0 %vm2766_vm4, %v13868_v15  ;;  %v6103_v28 = vrot.slane %v13493_v29, 2  ;;  %v15661_v26 = vrot.slane %v13475_v1, 2  ;;  %v15667_v17 = vrot.slane %v13537_v48, 2 }
 0x3f3   : > { %15658 = vst [vmem:[#allocation59_spill] sm:$0xff] %v13879_v2  ;;  %9747 = vmatmul.mubr.msk.bf16.gmra.mxu1 %vm2766_vm4, %v13879_v2  ;;  %v5587_v23 = vsel %vm478_vm1, %v5585_v19, %v5586_v10  ;;  %v13899_v3 = vld [vmem:[#allocation2 + $0x168] sm:$0xff]  ;;  %v5589_v15 = vsel %vm478_vm1, %v5586_v10, %v5588_v14  ;;  %v5594_v19 = vsel %vm478_vm1, %v5591_v55, %v5593_v47  ;;  %v15665_v55 = vrot.slane %v13553_v11, 2 }
 0x3f4   : > { %v6102_v46 = vsel %vm1035_vm3, %v15660_v56, %v15659_v22  ;;  %v6107_v6 = vsel %vm1035_vm3, %v15662_v38, %v15661_v26  ;;  %v6108_v22 = vrot.slane %v13479_v34, 2  ;;  %9750 = vmatprep.mubr.msk.bf16.mxu1 %vm2766_vm4, %v13862_v30  ;;  %v5595_v2 = vrot.slane %v13899_v3, 1 }
 0x3f5   : > { %v13914_v29 = vpack.c.bf16 %v5589_v15, %v5587_v23  ;;  %v13916_v59 = vpack.c.bf16 %v5594_v19, %v5592_v51  ;;  %v6104_v38 = vsel %vm1035_vm3, %v15663_v4, %v6103_v28  ;;  %v15664_v34 = vmov %v15661_v26 }
 0x3f6   : > { %v6109_v26 = vsel %vm1035_vm3, %v15664_v34, %v6108_v22  ;;  %v13924_v30 = vpack.c.bf16 %v6104_v38, %v6102_v46  ;;  %v15666_v10 = vrot.slane %v13520_v44, 2  ;;  %v6113_v23 = vrot.slane %v13569_v5, 2 }
 0x3f7   : > { %v13926_v56 = vpack.c.bf16 %v6109_v26, %v6107_v6  ;;  %v15668_v14 = vrot.slane %v13528_v33, 2  ;;  %v6118_v51 = vrot.slane %v13571_v35, 2  ;;  %v15669_v46 = vrot.slane %v13621_v63, 2 }
 0x3f8   : > { %v6112_v15 = vsel %vm1035_vm3, %v15666_v10, %v15665_v55  ;;  %v15670_v47 = vrot.slane %v13596_v18, 2  ;;  %v6123_v44 = vrot.slane %v13632_v0, 2  ;;  %v13946_v6 = vld [vmem:[#allocation2 + $0x170] sm:$0xff]  ;;  %v13948_v22 = vld [vmem:[#allocation2 + $0x178] sm:$0x3]  ;;  %v15671_v5 = vmov %v15665_v55 }
 0x3f9   : > { %v6117_v1 = vsel %vm1035_vm3, %v15668_v14, %v15667_v17  ;;  %v6114_v33 = vsel %vm1035_vm3, %v15671_v5, %v6113_v23  ;;  %v15672_v19 = vrot.slane %v13608_v43, 2  ;;  %v15673_v35 = vrot.slane %v13615_v41, 2  ;;  %9711 = vmatmul.mubr.msk.bf16.gmra.mxu0 %vm2766_vm4, %v13914_v29 }
 0x3fa   : > { %v6122_v28 = vsel %vm1035_vm3, %v15670_v47, %v15669_v46  ;;  %v6128_v18 = vrot.slane %v13649_v42, 2  ;;  %v15674_v38 = vrot.slane %v13678_v58, 2  ;;  %v15675_v0 = vrot.slane %v13663_v53, 2  ;;  %9714 = vmatprep.mubr.msk.bf16.mxu0 %vm2766_vm4, %v13916_v59 }
 0x3fb   : > { %v6127_v4 = vsel %vm1035_vm3, %v15673_v35, %v15672_v19  ;;  %v13966_v26 = vpack.c.bf16 %v13946_v6, %v13899_v3  ;;  %v5596_v11 = vrot.slane %v13946_v6, 1  ;;  %v6171_v55 = vrot.slane %v13946_v6, 2  ;;  %v15705_v6 = vld [vmem:[#allocation37_spill] sm:$0xff] }
 0x3fc   : > { %v6132_v34 = vsel %vm1035_vm3, %v15675_v0, %v15674_v38  ;;  %v5598_v41 = vrot.slane %v13948_v22, 1  ;;  %v13973_v42 = vpack.c.bf16 %v6114_v33, %v6112_v15  ;;  %v15676_v10 = vmov %v15667_v17 }
 0x3fd   : > { %v6119_v53 = vsel %vm1035_vm3, %v15676_v10, %v6118_v51  ;;  %v15677_v23 = vmov %v15669_v46  ;;  %v15678_v14 = vmov %v15672_v19  ;;  %9751 = vmatmul.mubr.msk.bf16.gmra.mxu1 %vm2766_vm4, %v13966_v26  ;;  %v5597_v15 = vsel %vm478_vm1, %v5595_v2, %v5596_v11 }
 0x3fe   : > { %v6124_v17 = vsel %vm1035_vm3, %v15677_v23, %v6123_v44  ;;  %v6129_v46 = vsel %vm1035_vm3, %v15678_v14, %v6128_v18  ;;  %v5599_v48 = vsel %vm478_vm1, %v5596_v11, %v5598_v41  ;;  %v13990_v47 = vpack.c.bf16 %v6119_v53, %v6117_v1  ;;  %9794 = vmatprep.mubr.msk.bf16.mxu1 %vm2766_vm4, %v13502_v36 }
 0x3ff   : > { %v6133_v63 = vrot.slane %v13707_v32, 2  ;;  %v13995_v43 = vpack.c.bf16 %v5599_v48, %v5597_v15  ;;  %v13997_v51 = vpack.c.bf16 %v6124_v17, %v6122_v28  ;;  %v13999_v44 = vpack.c.bf16 %v6129_v46, %v6127_v4 }
 0x400   : > { %v15679_v5 = vrot.slane %v13673_v12, 2  ;;  %v15680_v33 = vrot.slane %v13687_v61, 2  ;;  %v15681_v1 = vmov %v15674_v38  ;;  %v6138_v32 = vrot.slane %v13709_v60, 2 }
 0x401   : > { %v6134_v19 = vsel %vm1035_vm3, %v15681_v1, %v6133_v63  ;;  %v15682_v36 = vrot.slane %v13736_v50, 2  ;;  %v15683_v35 = vrot.slane %v13723_v20, 2  ;;  %v6143_v4 = vrot.slane %v13762_v21, 2  ;;  %9715 = vmatmul.mubr.msk.bf16.gmra.mxu0 %vm2766_vm4, %v13995_v43 }
 0x402   : > { %v6137_v2 = vsel %vm1035_vm3, %v15680_v33, %v15679_v5  ;;  %v14016_v18 = vpack.c.bf16 %v6134_v19, %v6132_v34  ;;  %v15684_v61 = vrot.slane %v13743_v39, 2  ;;  %v15685_v38 = vrot.slane %v13754_v62, 2  ;;  %v14060_v33 = vld [vmem:[#allocation2 + $0x180] sm:$0xff]  ;;  %v14062_v39 = vld [vmem:[#allocation2 + $0x188] sm:$0xff] }
 0x403   : > { %v6142_v28 = vsel %vm1035_vm3, %v15683_v35, %v15682_v36  ;;  %v6148_v0 = vrot.slane %v13779_v40, 2  ;;  %v15686_v60 = vrot.slane %v13801_v52, 2  ;;  %v15687_v11 = vrot.slane %v13795_v25, 2  ;;  %v15699_v35 = vld [vmem:[#allocation79_spill] sm:$0xff] }
 0x404   : > { %v6147_v58 = vsel %vm1035_vm3, %v15685_v38, %v15684_v61  ;;  %v15688_v41 = vmov %v15679_v5  ;;  %v15689_v34 = vmov %v15682_v36  ;;  %v6153_v62 = vrot.slane %v13822_v31, 2  ;;  %v14092_v38 = vld [vmem:[#allocation2 + $0x190] sm:$0x3] }
 0x405   : > { %v6152_v20 = vsel %vm1035_vm3, %v15687_v11, %v15686_v60  ;;  %v6139_v21 = vsel %vm1035_vm3, %v15688_v41, %v6138_v32  ;;  %v6144_v10 = vsel %vm1035_vm3, %v15689_v34, %v6143_v4  ;;  %v15690_v53 = vrot.slane %v13803_v27, 2  ;;  %9795 = vmatmul.mubr.msk.bf16.vlgmr.msra.gmra.mxu1 %vm2766_vm4, %v13490_v57  ;;  %v10088_v34 = vld [vmem:[%s15131_s7 + $0x40] sm:$0xff]  }
 0x406   : > { %v15691_v40 = vrot.slane %v13813_v49, 2  ;;  %v14041_v17 = vpack.c.bf16 %v6139_v21, %v6137_v2  ;;  %v14043_v25 = vpack.c.bf16 %v6144_v10, %v6142_v28  ;;  %v15692_v12 = vmov %v15684_v61  ;;  %v15700_v28 = vld [vmem:[#allocation76_spill] sm:$0xff]  ;;  %9798 = vmatprep.mubr.msk.bf16.mxu1 %vm2766_vm4, %v13575_v7  ;;  %9863 = vmatpush3.bf16.msra.mxu1 %v13549_v13 }
 0x407   : > { %v6149_v14 = vsel %vm1035_vm3, %v15692_v12, %v6148_v0  ;;  %v6158_v50 = vrot.slane %v13824_v45, 2  ;;  %v15693_v31 = vmov %v15686_v60  ;;  %v15694_v49 = vrot.slane %v13870_v54, 2  ;;  %v10090_v45 = vld [vmem:[%s15131_s7 + $0x50] sm:$0xff]   ;;  %v15708_v12 = vld [vmem:[#allocation53_spill] sm:$0xff] }
 0x408   : > { %v6157_v23 = vsel %vm1035_vm3, %v15691_v40, %v15690_v53  ;;  %v14049_v46 = vpack.c.bf16 %v6149_v14, %v6147_v58  ;;  %v6154_v15 = vsel %vm1035_vm3, %v15693_v31, %v6153_v62  ;;  %v15695_v48 = vrot.slane %v13835_v24, 2  ;;  %9864 = vmatprep.subr.bf16.mxu1 %v10090_v45  ;;  %v15706_v40 = vld [vmem:[#allocation43_spill] sm:$0xff]  ;;  %v15709_v14 = vld [vmem:[#allocation49_spill] sm:$0xff]  ;;  %v15711_v31 = vld [vmem:[#allocation64_spill] sm:$0xff] }
 0x409   : > { %v6163_v5 = vrot.slane %v13874_v8, 2  ;;  %v14069_v52 = vpack.c.bf16 %v6154_v15, %v6152_v20  ;;  %v15696_v2 = vmov %v15690_v53  ;;  %v15697_v1 = vrot.slane %v13851_v9, 2  ;;  %v10093_v9 = vld [vmem:[%s15131_s7 + $0x78] sm:$0xff]   ;;  %v15704_v53 = vld [vmem:[#allocation46_spill] sm:$0xff]  ;;  %v15712_v15 = vld [vmem:[#allocation57_spill] sm:$0xff] }
 0x40a   : > { %v6162_v63 = vsel %vm1035_vm3, %v15695_v48, %v15694_v49  ;;  %v6159_v24 = vsel %vm1035_vm3, %v15696_v2, %v6158_v50  ;;  %v15698_v8 = vrot.slane %v13849_v37, 2  ;;  %v6168_v32 = vrot.slane %v13864_v16, 2  ;;  %9865 = vmatpush3.bf16.msra.mxu1 %v10090_v45  ;;  %v15710_v50 = vld [vmem:[#allocation56_spill] sm:$0xff]  ;;  %v15714_v48 = vld [vmem:[#allocation59_spill] sm:$0xff]  ;;  %v10094_v45 = vld [vmem:[%s15131_s7 + $0x70] sm:$0xff]  }
 0x40b   : > { %v6170_v36 = vrot.slane %v13899_v3, 2  ;;  %v15701_v4 = vpack.c.bf16 %v15699_v35, %v15700_v28  ;;  %v14087_v27 = vpack.c.bf16 %v6159_v24, %v6157_v23  ;;  %v15702_v61 = vmov %v15694_v49  ;;  %9934 = vmatprep.subr.bf16.mxu1 %v10093_v9  ;;  %v15707_v23 = vld [vmem:[#allocation41_spill] sm:$0xff]  ;;  %v15716_v2 = vld [vmem:[#allocation52_spill] sm:$0xff]  ;;  %v15717_v24 = vld [vmem:[#allocation35_spill] sm:$0xff] }
 0x40c   : > { %v6167_v19 = vsel %vm1035_vm3, %v15698_v8, %v15697_v1  ;;  %v6164_v37 = vsel %vm1035_vm3, %v15702_v61, %v6163_v5  ;;  %v15703_v3 = vmov %v15697_v1  ;;  %v6698_v0 = vrot.slane %v14060_v33, 1  ;;  %v15713_v49 = vld [vmem:[#allocation61_spill] sm:$0xff]  ;;  %v15718_v1 = vld [vmem:[#allocation39_spill] sm:$0xff]  ;;  %v15722_v35 = vld [vmem:[#allocation60_spill] sm:$0xff] }
 0x40d   : > { %9758 = vmatprep.mubr.msk.bf16.mxu0 %vm2766_vm4, %v15701_v4  ;;  %v14096_v16 = vpack.c.bf16 %v6164_v37, %v6162_v63  ;;  %v6169_v58 = vsel %vm1035_vm3, %v15703_v3, %v6168_v32  ;;  %v6699_v60 = vrot.slane %v14062_v39, 1  ;;  %v6172_v11 = vsel %vm1035_vm3, %v6170_v36, %v6171_v55  ;;  %9799 = vmatmul.mubr.msk.bf16.gmra.mxu1 %vm2766_vm4, %v15705_v6  ;;  %v15715_v63 = vld [vmem:[#allocation62_spill] sm:$0xff]  ;;  %v10095_v8 = vld [vmem:[%s15131_s7 + $0x88] sm:$0xff]   ;;  %v15723_v28 = vld [vmem:[#allocation16_spill] sm:$0xff] }
 0x40e   : > { %v14104_v54 = vpack.c.bf16 %v6169_v58, %v6167_v19  ;;  %v6173_v20 = vrot.slane %v13948_v22, 2  ;;  %v6701_v21 = vrot.slane %v14092_v38, 1  ;;  %9759 = vmatmul.mubr.msk.bf16.vlgmr.msra.gmra.mxu0 %vm2766_vm4, %v13924_v30  ;;  %9802 = vmatprep.mubr.msk.bf16.mxu1 %vm2766_vm4, %v15706_v40  ;;  %v14182_v5 = vpack.c.bf16 %v14062_v39, %v14060_v33  ;;  %v15719_v19 = vld [vmem:[#allocation51_spill] sm:$0xff]  ;;  %v15720_v32 = vld [vmem:[#allocation9_spill] sm:$0xff]  ;;  %v15721_v36 = vld [vmem:[#allocation54_spill] sm:$0xff] }
 0x40f   : > { %v6700_v41 = vsel %vm478_vm1, %v6698_v0, %v6699_v60  ;;  %9827 = vmatpush3.bf16.msra.mxu0 %v15704_v53  ;;  %9762 = vmatprep.mubr.msk.bf16.mxu0 %vm2766_vm4, %v13926_v56  ;;  %v15724_v4 = vld [vmem:[#allocation58_spill] sm:$0xff]  ;;  %v15725_v61 = vld [vmem:[#allocation12_spill] sm:$0xff]  ;;  %v15726_v37 = vld [vmem:[#allocation15_spill] sm:$0xff]  ;;  %v6920_v58 = vrot.slane %v14062_v39, 2  ;;  %v6922_v0 = vrot.slane %v14092_v38, 2 }
 0x410   : > { %v6174_v13 = vsel %vm1035_vm3, %v6171_v55, %v6173_v20  ;;  %v6702_v22 = vsel %vm478_vm1, %v6699_v60, %v6701_v21  ;;  %9828 = vmatprep.subr.bf16.mxu0 %v10088_v34  ;;  %v10091_v55 = vld [vmem:[%s15131_s7 + $0x68] sm:$0xff]   ;;  %v15727_v3 = vld [vmem:[#allocation55_spill] sm:$0xff]  ;;  %v6919_v60 = vrot.slane %v14060_v33, 2  ;;  %v14272_v38 = vld [vmem:[#allocation2 + $0x1a0] sm:$0xff] }
 0x411   : > { %v14121_v10 = vpack.c.bf16 %v6174_v13, %v6172_v11  ;;  %v14124_v62 = vpack.c.bf16 %v6702_v22, %v6700_v41  ;;  %v6923_v20 = vsel %vm1035_vm3, %v6920_v58, %v6922_v0  ;;  %v14270_v33 = vld [vmem:[#allocation2 + $0x198] sm:$0xff]  ;;  %v7579_v41 = vrot.slane %v14272_v38, 2  ;;  %v14278_v21 = vld [vmem:[#allocation2 + $0x1a8] sm:$0x3] }
 0x412   : > { %v6921_v11 = vsel %vm1035_vm3, %v6919_v60, %v6920_v58  ;;  %v7581_v22 = vrot.slane %v14278_v21, 2 }
 0x413   : > { %9829 = vmatpush3.bf16.msra.mxu0 %v10088_v34  ;;  %v14262_v39 = vpack.c.bf16 %v6923_v20, %v6921_v11 }
 0x414   : > { %9898 = vmatprep.subr.bf16.mxu0 %v10091_v55 }
 0x415   : > { %9803 = vmatmul.mubr.msk.bf16.gmra.mxu1 %vm2766_vm4, %v15707_v23 }
 0x416   : > { %9763 = vmatmul.mubr.msk.bf16.gmra.mxu0 %vm2766_vm4, %v13973_v42  ;;  %9806 = vmatprep.mubr.msk.bf16.mxu1 %vm2766_vm4, %v15708_v12 }
 0x417   : > { %9766 = vmatprep.mubr.msk.bf16.mxu0 %vm2766_vm4, %v13990_v47 }
 0x41d   : > { %9807 = vmatmul.mubr.msk.bf16.gmra.mxu1 %vm2766_vm4, %v15709_v14 }
 0x41e   : > { %9767 = vmatmul.mubr.msk.bf16.gmra.mxu0 %vm2766_vm4, %v13997_v51  ;;  %9810 = vmatprep.mubr.msk.bf16.mxu1 %vm2766_vm4, %v15710_v50 }
 0x41f   : > { %9770 = vmatprep.mubr.msk.bf16.mxu0 %vm2766_vm4, %v13999_v44 }
 0x425   : > { %9811 = vmatmul.mubr.msk.bf16.gmra.mxu1 %vm2766_vm4, %v15711_v31 }
 0x426   : > { %9771 = vmatmul.mubr.msk.bf16.gmra.mxu0 %vm2766_vm4, %v14016_v18  ;;  %9814 = vmatprep.mubr.msk.bf16.mxu1 %vm2766_vm4, %v15712_v15 }
 0x427   : > { %9774 = vmatprep.mubr.msk.bf16.mxu0 %vm2766_vm4, %v14041_v17 }
 0x42d   : > { %9815 = vmatmul.mubr.msk.bf16.gmra.mxu1 %vm2766_vm4, %v15713_v49 }
 0x42e   : > { %9775 = vmatmul.mubr.msk.bf16.gmra.mxu0 %vm2766_vm4, %v14043_v25  ;;  %9818 = vmatprep.mubr.msk.bf16.mxu1 %vm2766_vm4, %v15714_v48 }
 0x42f   : > { %9778 = vmatprep.mubr.msk.bf16.mxu0 %vm2766_vm4, %v14049_v46 }
 0x435   : > { %9819 = vmatmul.mubr.msk.bf16.gmra.mxu1 %vm2766_vm4, %v15715_v63 }
 0x436   : > { %9779 = vmatmul.mubr.msk.bf16.gmra.mxu0 %vm2766_vm4, %v14069_v52  ;;  %9822 = vmatprep.mubr.msk.bf16.mxu1 %vm2766_vm4, %v13966_v26 }
 0x437   : > { %9782 = vmatprep.mubr.msk.bf16.mxu0 %vm2766_vm4, %v14087_v27 }
 0x43d   : > { %9823 = vmatmul.mubr.msk.bf16.gmra.mxu1 %vm2766_vm4, %v14182_v5 }
 0x43e   : > { %9783 = vmatmul.mubr.msk.bf16.gmra.mxu0 %vm2766_vm4, %v14096_v16  ;;  %9866 = vmatprep.mubr.msk.bf16.mxu1 %vm2766_vm4, %v13924_v30  ;;  %v10092_v30 = vld [vmem:[%s15131_s7 + $0x60] sm:$0xff]  }
 0x43f   : > { %9786 = vmatprep.mubr.msk.bf16.mxu0 %vm2766_vm4, %v14104_v54 }
 0x445   : > { %9867 = vmatmul.mubr.msk.bf16.vlgmr.msra.gmra.mxu1 %vm2766_vm4, %v13926_v56 }
 0x446   : > { %9787 = vmatmul.mubr.msk.bf16.gmra.mxu0 %vm2766_vm4, %v14121_v10  ;;  %9870 = vmatprep.mubr.msk.bf16.mxu1 %vm2766_vm4, %v13973_v42 }
 0x447   : > { %9830 = vmatprep.mubr.msk.bf16.mxu0 %vm2766_vm4, %v15716_v2  ;;  %9935 = vmatpush3.bf16.msra.mxu1 %v10093_v9  ;;  %v7578_v9 = vrot.slane %v14270_v33, 2 }
 0x448   : > { %9936 = vmatprep.subr.bf16.mxu1 %v10094_v45 }
 0x449   : > { %v14283_v34 = vsel %vm1035_vm3, %v7578_v9, %v7579_v41 }
 0x44b   : > { %9937 = vmatpush3.bf16.msra.mxu1 %v10094_v45 }
 0x44d   : > { %9871 = vmatmul.mubr.msk.bf16.gmra.mxu1 %vm2766_vm4, %v13990_v47 }
 0x44e   : > { %9831 = vmatmul.mubr.msk.bf16.vlgmr.msra.gmra.mxu0 %vm2766_vm4, %v15717_v24  ;;  %9874 = vmatprep.mubr.msk.bf16.mxu1 %vm2766_vm4, %v13997_v51 }
 0x44f   : > { %9899 = vmatpush3.bf16.msra.mxu0 %v10091_v55  ;;  %9834 = vmatprep.mubr.msk.bf16.mxu0 %vm2766_vm4, %v15718_v1  ;;  %v14291_v55 = vsel %vm1035_vm3, %v7579_v41, %v7581_v22 }
 0x450   : > { %9900 = vmatprep.subr.bf16.mxu0 %v10092_v30 }
 0x453   : > { %9901 = vmatpush3.bf16.msra.mxu0 %v10092_v30 }
 0x454   : > { %9970 = vmatprep.subr.bf16.mxu0 %v10095_v8 }
 0x455   : > { %9875 = vmatmul.mubr.msk.bf16.gmra.mxu1 %vm2766_vm4, %v13999_v44 }
 0x456   : > { %9835 = vmatmul.mubr.msk.bf16.gmra.mxu0 %vm2766_vm4, %v15719_v19  ;;  %9878 = vmatprep.mubr.msk.bf16.mxu1 %vm2766_vm4, %v14016_v18 }
 0x457   : > { %9838 = vmatprep.mubr.msk.bf16.mxu0 %vm2766_vm4, %v15720_v32 }
 0x45d   : > { %9879 = vmatmul.mubr.msk.bf16.gmra.mxu1 %vm2766_vm4, %v14041_v17 }
 0x45e   : > { %9839 = vmatmul.mubr.msk.bf16.gmra.mxu0 %vm2766_vm4, %v15721_v36  ;;  %9882 = vmatprep.mubr.msk.bf16.mxu1 %vm2766_vm4, %v14043_v25 }
 0x45f   : > { %9842 = vmatprep.mubr.msk.bf16.mxu0 %vm2766_vm4, %v15722_v35 }
 0x465   : > { %9883 = vmatmul.mubr.msk.bf16.gmra.mxu1 %vm2766_vm4, %v14049_v46 }
 0x466   : > { %9843 = vmatmul.mubr.msk.bf16.gmra.mxu0 %vm2766_vm4, %v15723_v28  ;;  %9886 = vmatprep.mubr.msk.bf16.mxu1 %vm2766_vm4, %v14069_v52 }
 0x467   : > { %9846 = vmatprep.mubr.msk.bf16.mxu0 %vm2766_vm4, %v15724_v4 }
 0x46d   : > { %9887 = vmatmul.mubr.msk.bf16.gmra.mxu1 %vm2766_vm4, %v14087_v27 }
 0x46e   : > { %9847 = vmatmul.mubr.msk.bf16.gmra.mxu0 %vm2766_vm4, %v15725_v61  ;;  %9890 = vmatprep.mubr.msk.bf16.mxu1 %vm2766_vm4, %v14096_v16 }
 0x46f   : > { %9850 = vmatprep.mubr.msk.bf16.mxu0 %vm2766_vm4, %v15726_v37 }
 0x475   : > { %9891 = vmatmul.mubr.msk.bf16.gmra.mxu1 %vm2766_vm4, %v14104_v54 }
 0x476   : > { %9851 = vmatmul.mubr.msk.bf16.gmra.mxu0 %vm2766_vm4, %v15727_v3  ;;  %9894 = vmatprep.mubr.msk.bf16.mxu1 %vm2766_vm4, %v14121_v10 }
 0x477   : > { %9854 = vmatprep.mubr.msk.bf16.mxu0 %vm2766_vm4, %v13914_v29 }
 0x47d   : > { %9895 = vmatmul.mubr.msk.bf16.gmra.mxu1 %vm2766_vm4, %v14262_v39 }
 0x47e   : > { %9855 = vmatmul.mubr.msk.bf16.gmra.mxu0 %vm2766_vm4, %v13916_v59  ;;  %9938 = vmatprep.mubr.msk.bf16.mxu1 %vm2766_vm4, %v15717_v24  ;;  %v10096_v24 = vld [vmem:[%s15131_s7 + $0x80] sm:$0xff]  }
 0x47f   : > { %9858 = vmatprep.mubr.msk.bf16.mxu0 %vm2766_vm4, %v13995_v43 }
 0x483   : > { %v9724_v13 = vpop.f32.mrf.mxu1 }
 0x485   : > { %9939 = vmatmul.mubr.msk.bf16.vlgmr.msra.gmra.mxu1 %vm2766_vm4, %v15718_v1  ;;  %v5968_v53 = vpop.f32.mrf.mxu1 }
 0x486   : > { %9859 = vmatmul.mubr.msk.bf16.gmra.mxu0 %vm2766_vm4, %v14124_v62  ;;  %9942 = vmatprep.mubr.msk.bf16.mxu1 %vm2766_vm4, %v15719_v19 }
 0x487   : > { %9902 = vmatprep.mubr.msk.bf16.mxu0 %vm2766_vm4, %v13490_v57  ;;  %v9688_v57 = vpop.f32.mrf.mxu0  ;;  %v9725_v2 = vpop.f32.mrf.mxu1 }
 0x488   : > { %v14295_v30 = vadd.f32 %v9724_v13, %v9688_v57 }
 0x489   : > { %v5747_v58 = vpop.f32.mrf.mxu0  ;;  %v5971_v1 = vpop.f32.mrf.mxu1 }
 0x48a   : > { %v14302_v19 = vadd.f32 %v5968_v53, %v5747_v58 }
 0x48b   : > { %v9689_v0 = vpop.f32.mrf.mxu0  ;;  %v9728_v60 = vpop.f32.mrf.mxu1 }
 0x48c   : > { %v14306_v11 = vadd.f32 %v9725_v2, %v9689_v0 }
 0x48d   : > { %9943 = vmatmul.mubr.msk.bf16.gmra.mxu1 %vm2766_vm4, %v15720_v32  ;;  %v5750_v20 = vpop.f32.mrf.mxu0  ;;  %v5984_v9 = vpop.f32.mrf.mxu1 }
 0x48e   : > { %9903 = vmatmul.mubr.msk.bf16.vlgmr.msra.gmra.mxu0 %vm2766_vm4, %v13575_v7  ;;  %9946 = vmatprep.mubr.msk.bf16.mxu1 %vm2766_vm4, %v15721_v36  ;;  %v14312_v7 = vadd.f32 %v5971_v1, %v5750_v20 }
 0x48f   : > { %9971 = vmatpush3.bf16.msra.mxu0 %v10095_v8  ;;  %9906 = vmatprep.mubr.msk.bf16.mxu0 %vm2766_vm4, %v15705_v6  ;;  %v9729_v41 = vpop.f32.mrf.mxu1  ;;  %v9692_v8 = vpop.f32.mrf.mxu0 }
 0x490   : > { %9972 = vmatprep.subr.bf16.mxu0 %v10096_v24  ;;  %v14314_v6 = vadd.f32 %v9728_v60, %v9692_v8 }
 0x491   : > { %v5987_v13 = vpop.f32.mrf.mxu1  ;;  %v5763_v32 = vpop.f32.mrf.mxu0 }
 0x492   : > { %v14320_v53 = vadd.f32 %v5984_v9, %v5763_v32 }
 0x493   : > { %9973 = vmatpush3.bf16.msra.mxu0 %v10096_v24  ;;  %v9732_v22 = vpop.f32.mrf.mxu1  ;;  %v9693_v36 = vpop.f32.mrf.mxu0 }
 0x494   : > { %v14326_v2 = vadd.f32 %v9729_v41, %v9693_v36 }
 0x495   : > { %9947 = vmatmul.mubr.msk.bf16.gmra.mxu1 %vm2766_vm4, %v15722_v35  ;;  %v6000_v57 = vpop.f32.mrf.mxu1  ;;  %v5766_v24 = vpop.f32.mrf.mxu0 }
 0x496   : > { %9907 = vmatmul.mubr.msk.bf16.gmra.mxu0 %vm2766_vm4, %v15706_v40  ;;  %9950 = vmatprep.mubr.msk.bf16.mxu1 %vm2766_vm4, %v15723_v28  ;;  %v14328_v40 = vadd.f32 %v5987_v13, %v5766_v24 }
 0x497   : > { %9910 = vmatprep.mubr.msk.bf16.mxu0 %vm2766_vm4, %v15707_v23  ;;  %v9733_v58 = vpop.f32.mrf.mxu1 }
 0x499   : > { %v9696_v1 = vpop.f32.mrf.mxu0  ;;  %v6003_v23 = vpop.f32.mrf.mxu1 }
 0x49a   : > { %v14330_v0 = vadd.f32 %v9732_v22, %v9696_v1 }
 0x49b   : > { %v5779_v35 = vpop.f32.mrf.mxu0  ;;  %v9736_v60 = vpop.f32.mrf.mxu1 }
 0x49c   : > { %v14336_v28 = vadd.f32 %v6000_v57, %v5779_v35 }
 0x49d   : > { %9951 = vmatmul.mubr.msk.bf16.gmra.mxu1 %vm2766_vm4, %v15724_v4  ;;  %v9697_v20 = vpop.f32.mrf.mxu0  ;;  %v6016_v9 = vpop.f32.mrf.mxu1 }
 0x49e   : > { %9911 = vmatmul.mubr.msk.bf16.gmra.mxu0 %vm2766_vm4, %v15708_v12  ;;  %9954 = vmatprep.mubr.msk.bf16.mxu1 %vm2766_vm4, %v15725_v61  ;;  %v14342_v41 = vadd.f32 %v9733_v58, %v9697_v20 }
 0x49f   : > { %9914 = vmatprep.mubr.msk.bf16.mxu0 %vm2766_vm4, %v15709_v14  ;;  %v5782_v8 = vpop.f32.mrf.mxu0  ;;  %v9737_v13 = vpop.f32.mrf.mxu1 }
 0x4a0   : > { %v14344_v12 = vadd.f32 %v6003_v23, %v5782_v8 }
 0x4a1   : > { %v6019_v32 = vpop.f32.mrf.mxu1  ;;  %v9700_v14 = vpop.f32.mrf.mxu0 }
 0x4a2   : > { %v14348_v22 = vadd.f32 %v9736_v60, %v9700_v14 }
 0x4a3   : > { %v9740_v4 = vpop.f32.mrf.mxu1  ;;  %v5795_v36 = vpop.f32.mrf.mxu0 }
 0x4a4   : > { %v14354_v61 = vadd.f32 %v6016_v9, %v5795_v36  ;;  %v7358_v36 = vrot.slane %v14272_v38, 1 }
 0x4a5   : > { %9955 = vmatmul.mubr.msk.bf16.gmra.mxu1 %vm2766_vm4, %v15726_v37  ;;  %v6032_v57 = vpop.f32.mrf.mxu1  ;;  %v9701_v24 = vpop.f32.mrf.mxu0 }
 0x4a6   : > { %9915 = vmatmul.mubr.msk.bf16.gmra.mxu0 %vm2766_vm4, %v15710_v50  ;;  %9958 = vmatprep.mubr.msk.bf16.mxu1 %vm2766_vm4, %v15727_v3  ;;  %v14358_v58 = vadd.f32 %v9737_v13, %v9701_v24 }
 0x4a7   : > { %9918 = vmatprep.mubr.msk.bf16.mxu0 %vm2766_vm4, %v15711_v31  ;;  %v9741_v50 = vpop.f32.mrf.mxu1  ;;  %v5798_v1 = vpop.f32.mrf.mxu0 }
 0x4a8   : > { %v14360_v23 = vadd.f32 %v6019_v32, %v5798_v1 }
 0x4a9   : > { %v6035_v35 = vpop.f32.mrf.mxu1  ;;  %v9704_v31 = vpop.f32.mrf.mxu0 }
 0x4aa   : > { %v14364_v60 = vadd.f32 %v9740_v4, %v9704_v31 }
 0x4ab   : > { %v9744_v37 = vpop.f32.mrf.mxu1  ;;  %v5811_v3 = vpop.f32.mrf.mxu0 }
 0x4ac   : > { %v14370_v20 = vadd.f32 %v6032_v57, %v5811_v3 }
 0x4ad   : > { %9959 = vmatmul.mubr.msk.bf16.gmra.mxu1 %vm2766_vm4, %v13914_v29  ;;  %v6048_v9 = vpop.f32.mrf.mxu1  ;;  %v9705_v8 = vpop.f32.mrf.mxu0  ;;  %v7360_v29 = vrot.slane %v14278_v21, 1 }
 0x4ae   : > { %9919 = vmatmul.mubr.msk.bf16.gmra.mxu0 %vm2766_vm4, %v15712_v15  ;;  %9962 = vmatprep.mubr.msk.bf16.mxu1 %vm2766_vm4, %v13916_v59  ;;  %v14374_v13 = vadd.f32 %v9741_v50, %v9705_v8 }
 0x4af   : > { %9922 = vmatprep.mubr.msk.bf16.mxu0 %vm2766_vm4, %v15713_v49  ;;  %v9745_v15 = vpop.f32.mrf.mxu1  ;;  %v5814_v32 = vpop.f32.mrf.mxu0  ;;  %v7357_v49 = vrot.slane %v14270_v33, 1 }
 0x4b0   : > { %v14376_v14 = vadd.f32 %v6035_v35, %v5814_v32 }
 0x4b1   : > { %v6051_v4 = vpop.f32.mrf.mxu1  ;;  %v9708_v57 = vpop.f32.mrf.mxu0  ;;  %v7359_v35 = vsel %vm478_vm1, %v7357_v49, %v7358_v36 }
 0x4b2   : > { %v14383_v59 = vadd.f32 %v9744_v37, %v9708_v57 }
 0x4b3   : > { %v9748_v24 = vpop.f32.mrf.mxu1  ;;  %v5827_v50 = vpop.f32.mrf.mxu0 }
 0x4b4   : > { %v14389_v1 = vadd.f32 %v6048_v9, %v5827_v50 }
 0x4b5   : > { %9963 = vmatmul.mubr.msk.bf16.gmra.mxu1 %vm2766_vm4, %v13995_v43  ;;  %v6064_v21 = vpop.f32.mrf.mxu1  ;;  %v9709_v31 = vpop.f32.mrf.mxu0 }
 0x4b6   : > { %9923 = vmatmul.mubr.msk.bf16.gmra.mxu0 %vm2766_vm4, %v15714_v48  ;;  %9966 = vmatprep.mubr.msk.bf16.mxu1 %vm2766_vm4, %v14124_v62  ;;  %v7361_v48 = vsel %vm478_vm1, %v7358_v36, %v7360_v29  ;;  %v14395_v37 = vadd.f32 %v9745_v15, %v9709_v31 }
 0x4b7   : > { %9926 = vmatprep.mubr.msk.bf16.mxu0 %vm2766_vm4, %v15715_v63  ;;  %v9749_v3 = vpop.f32.mrf.mxu1  ;;  %v5830_v63 = vpop.f32.mrf.mxu0  ;;  %v7364_v8 = vpack.c.bf16 %v7361_v48, %v7359_v35 }
 0x4b8   : > { %v14397_v32 = vadd.f32 %v6051_v4, %v5830_v63  ;;  %v7140_v4 = vpack.c.bf16 %v14272_v38, %v14270_v33 }
 0x4b9   : > { %v6067_v57 = vpop.f32.mrf.mxu1  ;;  %v9712_v43 = vpop.f32.mrf.mxu0 }
 0x4ba   : > { %v14401_v9 = vadd.f32 %v9748_v24, %v9712_v43 }
 0x4bb   : > { %v5843_v49 = vpop.f32.mrf.mxu0 }
 0x4bc   : > { %v14406_v15 = vadd.f32 %v6064_v21, %v5843_v49 }
 0x4bd   : > { %v9752_v62 = vpop.f32.mrf.mxu1  ;;  %9967 = vmatmul.mubr.msk.bf16.gmra.mxu1 %vm2766_vm4, %v7364_v8  ;;  %v9713_v29 = vpop.f32.mrf.mxu0 }
 0x4be   : > { %9927 = vmatmul.mubr.msk.bf16.gmra.mxu0 %vm2766_vm4, %v13966_v26  ;;  %v14410_v50 = vadd.f32 %v9749_v3, %v9713_v29 }
 0x4bf   : > { %9930 = vmatprep.mubr.msk.bf16.mxu0 %vm2766_vm4, %v14182_v5  ;;  %v6080_v36 = vpop.f32.mrf.mxu1  ;;  %v5846_v26 = vpop.f32.mrf.mxu0 }
 0x4c0   : > { %v14412_v24 = vadd.f32 %v6067_v57, %v5846_v26 }
 0x4c1   : > { %v9753_v35 = vpop.f32.mrf.mxu1  ;;  %v9716_v31 = vpop.f32.mrf.mxu0 }
 0x4c2   : > { %v14415_v5 = vadd.f32 %v9752_v62, %v9716_v31 }
 0x4c3   : > { %v6083_v48 = vpop.f32.mrf.mxu1  ;;  %v5859_v63 = vpop.f32.mrf.mxu0 }
 0x4c4   : > { %v14419_v8 = vadd.f32 %v6080_v36, %v5859_v63 }
 0x4c5   : > { %v9796_v21 = vpop.f32.mrf.mxu1  ;;  %v9717_v38 = vpop.f32.mrf.mxu0 }
 0x4c6   : > { %9931 = vmatmul.mubr.msk.bf16.gmra.mxu0 %vm2766_vm4, %v7140_v4  ;;  %v14421_v3 = vadd.f32 %v9753_v35, %v9717_v38 }
 0x4c7   : > { %9974 = vmatprep.mubr.msk.bf16.mxu0 %vm2766_vm4, %v13926_v56  ;;  %v6536_v33 = vpop.f32.mrf.mxu1  ;;  %v5862_v57 = vpop.f32.mrf.mxu0 }
 0x4c8   : > { %v14423_v49 = vadd.f32 %v6083_v48, %v5862_v57 }
 0x4c9   : > { %v9797_v43 = vpop.f32.mrf.mxu1 }
 0x4cb   : > { %v6539_v29 = vpop.f32.mrf.mxu1 }
 0x4cd   : > { %v9800_v36 = vpop.f32.mrf.mxu1 }
 0x4ce   : > { %v9760_v26 = vpop.f32.mrf.mxu0  ;;  %9975 = vmatmul.mubr.msk.bf16.vlgmr.msra.gmra.mxu0 %vm2766_vm4, %v13973_v42 }
 0x4cf   : > { %v6451_v62 = vadd.f32 %v9760_v26, %v14295_v30  ;;  %9978 = vmatprep.mubr.msk.bf16.mxu0 %vm2766_vm4, %v13990_v47  ;;  %v6552_v63 = vpop.f32.mrf.mxu1 }
 0x4d0   : > { %v6322_v56 = vpop.f32.mrf.mxu0 }
 0x4d1   : > { %v6449_v4 = vadd.f32 %v6322_v56, %v14302_v19  ;;  %v14431_v35 = vadd.f32 %v9796_v21, %v6451_v62  ;;  %v9801_v45 = vpop.f32.mrf.mxu1 }
 0x4d2   : > { %v9761_v31 = vpop.f32.mrf.mxu0 }
 0x4d3   : > { %v6452_v48 = vadd.f32 %v9761_v31, %v14306_v11  ;;  %v14434_v38 = vadd.f32 %v6536_v33, %v6449_v4  ;;  %v6555_v47 = vpop.f32.mrf.mxu1 }
 0x4d4   : > { %v6325_v57 = vpop.f32.mrf.mxu0 }
 0x4d5   : > { %v6450_v42 = vadd.f32 %v6325_v57, %v14312_v7  ;;  %v14437_v30 = vadd.f32 %v9797_v43, %v6452_v48  ;;  %v9804_v33 = vpop.f32.mrf.mxu1 }
 0x4d6   : > { %v9764_v26 = vpop.f32.mrf.mxu0  ;;  %9979 = vmatmul.mubr.msk.bf16.gmra.mxu0 %vm2766_vm4, %v13997_v51 }
 0x4d7   : > { %v6455_v19 = vadd.f32 %v9764_v26, %v14314_v6  ;;  %9982 = vmatprep.mubr.msk.bf16.mxu0 %vm2766_vm4, %v13999_v44  ;;  %v14444_v21 = vadd.f32 %v6539_v29, %v6450_v42  ;;  %v6568_v43 = vpop.f32.mrf.mxu1 }
 0x4d8   : > { %v6338_v11 = vpop.f32.mrf.mxu0 }
 0x4d9   : > { %v6453_v62 = vadd.f32 %v6338_v11, %v14320_v53  ;;  %v14447_v56 = vadd.f32 %v9800_v36, %v6455_v19  ;;  %v9805_v48 = vpop.f32.mrf.mxu1 }
 0x4da   : > { %v9765_v7 = vpop.f32.mrf.mxu0 }
 0x4db   : > { %v6456_v4 = vadd.f32 %v9765_v7, %v14326_v2  ;;  %v14450_v31 = vadd.f32 %v6552_v63, %v6453_v62  ;;  %v6571_v29 = vpop.f32.mrf.mxu1 }
 0x4dc   : > { %v6341_v51 = vpop.f32.mrf.mxu0 }
 0x4dd   : > { %v6454_v6 = vadd.f32 %v6341_v51, %v14328_v40  ;;  %v14453_v57 = vadd.f32 %v9801_v45, %v6456_v4  ;;  %v9808_v63 = vpop.f32.mrf.mxu1 }
 0x4de   : > { %v9768_v44 = vpop.f32.mrf.mxu0  ;;  %9983 = vmatmul.mubr.msk.bf16.gmra.mxu0 %vm2766_vm4, %v14016_v18 }
 0x4df   : > { %v6459_v53 = vadd.f32 %v9768_v44, %v14330_v0  ;;  %9986 = vmatprep.mubr.msk.bf16.mxu0 %vm2766_vm4, %v14041_v17  ;;  %v14460_v36 = vadd.f32 %v6555_v47, %v6454_v6  ;;  %v6584_v40 = vpop.f32.mrf.mxu1 }
 0x4e0   : > { %v6354_v2 = vpop.f32.mrf.mxu0 }
 0x4e1   : > { %v6457_v42 = vadd.f32 %v6354_v2, %v14336_v28  ;;  %v14463_v26 = vadd.f32 %v9804_v33, %v6459_v53  ;;  %v9809_v62 = vpop.f32.mrf.mxu1 }
 0x4e2   : > { %v9769_v45 = vpop.f32.mrf.mxu0 }
 0x4e3   : > { %v6460_v19 = vadd.f32 %v9769_v45, %v14342_v41  ;;  %v14466_v11 = vadd.f32 %v6568_v43, %v6457_v42  ;;  %v6587_v47 = vpop.f32.mrf.mxu1 }
 0x4e4   : > { %v6357_v18 = vpop.f32.mrf.mxu0 }
 0x4e5   : > { %v6458_v0 = vadd.f32 %v6357_v18, %v14344_v12  ;;  %v14469_v7 = vadd.f32 %v9805_v48, %v6460_v19  ;;  %v9812_v43 = vpop.f32.mrf.mxu1 }
 0x4e6   : > { %v9772_v17 = vpop.f32.mrf.mxu0  ;;  %9987 = vmatmul.mubr.msk.bf16.gmra.mxu0 %vm2766_vm4, %v14043_v25 }
 0x4e7   : > { %v6463_v28 = vadd.f32 %v9772_v17, %v14348_v22  ;;  %9990 = vmatprep.mubr.msk.bf16.mxu0 %vm2766_vm4, %v14049_v46  ;;  %v14476_v33 = vadd.f32 %v6571_v29, %v6458_v0  ;;  %v6600_v48 = vpop.f32.mrf.mxu1 }
 0x4e8   : > { %v6370_v41 = vpop.f32.mrf.mxu0 }
 0x4e9   : > { %v6461_v4 = vadd.f32 %v6370_v41, %v14354_v61  ;;  %v14479_v51 = vadd.f32 %v9808_v63, %v6463_v28  ;;  %v9813_v53 = vpop.f32.mrf.mxu1 }
 0x4ea   : > { %v9773_v12 = vpop.f32.mrf.mxu0 }
 0x4eb   : > { %v6464_v6 = vadd.f32 %v9773_v12, %v14358_v58  ;;  %v14482_v44 = vadd.f32 %v6584_v40, %v6461_v4  ;;  %v6603_v29 = vpop.f32.mrf.mxu1 }
 0x4ec   : > { %v6373_v25 = vpop.f32.mrf.mxu0 }
 0x4ed   : > { %v6462_v22 = vadd.f32 %v6373_v25, %v14360_v23  ;;  %v14485_v2 = vadd.f32 %v9809_v62, %v6464_v6  ;;  %v9816_v42 = vpop.f32.mrf.mxu1 }
 0x4ee   : > { %v9776_v46 = vpop.f32.mrf.mxu0  ;;  %9991 = vmatmul.mubr.msk.bf16.gmra.mxu0 %vm2766_vm4, %v14069_v52 }
 0x4ef   : > { %v6467_v61 = vadd.f32 %v9776_v46, %v14364_v60  ;;  %9994 = vmatprep.mubr.msk.bf16.mxu0 %vm2766_vm4, %v14087_v27  ;;  %v14492_v63 = vadd.f32 %v6587_v47, %v6462_v22  ;;  %v6616_v19 = vpop.f32.mrf.mxu1 }
 0x4f0   : > { %v6386_v58 = vpop.f32.mrf.mxu0 }
 0x4f1   : > { %v6465_v45 = vadd.f32 %v6386_v58, %v14370_v20  ;;  %v14495_v40 = vadd.f32 %v9812_v43, %v6467_v61  ;;  %v9817_v0 = vpop.f32.mrf.mxu1 }
 0x4f2   : > { %v9777_v23 = vpop.f32.mrf.mxu0 }
 0x4f3   : > { %v6468_v18 = vadd.f32 %v9777_v23, %v14374_v13  ;;  %v14498_v62 = vadd.f32 %v6600_v48, %v6465_v45  ;;  %v6619_v47 = vpop.f32.mrf.mxu1 }
 0x4f4   : > { %v6389_v52 = vpop.f32.mrf.mxu0 }
 0x4f5   : > { %v6466_v60 = vadd.f32 %v6389_v52, %v14376_v14  ;;  %v14501_v17 = vadd.f32 %v9813_v53, %v6468_v18  ;;  %v9820_v41 = vpop.f32.mrf.mxu1  ;;  %v15728_v52 = vpack.c.bf16 %v14291_v55, %v14283_v34 }
 0x4f6   : > { %v9780_v27 = vpop.f32.mrf.mxu0  ;;  %9995 = vmatmul.mubr.msk.bf16.gmra.mxu0 %vm2766_vm4, %v14096_v16 }
 0x4f7   : > { %v6471_v20 = vadd.f32 %v9780_v27, %v14383_v59  ;;  %9998 = vmatprep.mubr.msk.bf16.mxu0 %vm2766_vm4, %v14104_v54  ;;  %v14508_v28 = vadd.f32 %v6603_v29, %v6466_v60  ;;  %v6632_v12 = vpop.f32.mrf.mxu1 }
 0x4f8   : > { %v6402_v13 = vpop.f32.mrf.mxu0 }
 0x4f9   : > { %v6469_v43 = vadd.f32 %v6402_v13, %v14389_v1  ;;  %v14511_v4 = vadd.f32 %v9816_v42, %v6471_v20  ;;  %v9821_v25 = vpop.f32.mrf.mxu1 }
 0x4fa   : > { %v9781_v14 = vpop.f32.mrf.mxu0 }
 0x4fb   : > { %v6472_v48 = vadd.f32 %v9781_v14, %v14395_v37  ;;  %v14514_v6 = vadd.f32 %v6616_v19, %v6469_v43  ;;  %v6635_v22 = vpop.f32.mrf.mxu1 }
 0x4fc   : > { %v6405_v16 = vpop.f32.mrf.mxu0 }
 0x4fd   : > { %v6470_v59 = vadd.f32 %v6405_v16, %v14397_v32  ;;  %v14517_v53 = vadd.f32 %v9817_v0, %v6472_v48  ;;  %v9824_v29 = vpop.f32.mrf.mxu1 }
 0x4fe   : > { %v9784_v54 = vpop.f32.mrf.mxu0  ;;  %9999 = vmatmul.mubr.msk.bf16.gmra.mxu0 %vm2766_vm4, %v14121_v10 }
 0x4ff   : > { %v6475_v1 = vadd.f32 %v9784_v54, %v14401_v9  ;;  %10002 = vmatprep.mubr.msk.bf16.mxu0 %vm2766_vm4, %v14262_v39  ;;  %v14524_v46 = vadd.f32 %v6619_v47, %v6470_v59  ;;  %v6648_v42 = vpop.f32.mrf.mxu1 }
 0x500   : > { %v6418_v37 = vpop.f32.mrf.mxu0 }
 0x501   : > { %v6473_v61 = vadd.f32 %v6418_v37, %v14406_v15  ;;  %v14527_v58 = vadd.f32 %v9820_v41, %v6475_v1  ;;  %v9825_v19 = vpop.f32.mrf.mxu1 }
 0x502   : > { %v9785_v32 = vpop.f32.mrf.mxu0 }
 0x503   : > { %v6476_v45 = vadd.f32 %v9785_v32, %v14410_v50  ;;  %v14530_v23 = vadd.f32 %v6632_v12, %v6473_v61  ;;  %v6651_v15 = vpop.f32.mrf.mxu1 }
 0x504   : > { %v6421_v10 = vpop.f32.mrf.mxu0 }
 0x505   : > { %v6474_v9 = vadd.f32 %v6421_v10, %v14412_v24  ;;  %v14533_v18 = vadd.f32 %v9821_v25, %v6476_v45  ;;  %v14542_v27 = vpop.f32.mrf.mxu1 }
 0x506   : > { %v9788_v39 = vpop.f32.mrf.mxu0  ;;  %10003 = vmatmul.mubr.msk.bf16.gmra.mxu0 %vm2766_vm4, %v15728_v52 }
 0x507   : > { %v6479_v0 = vadd.f32 %v9788_v39, %v14415_v5  ;;  %v14540_v60 = vadd.f32 %v6635_v22, %v6474_v9  ;;  %v14547_v13 = vpop.f32.mrf.mxu1 }
 0x508   : > { %v6434_v50 = vpop.f32.mrf.mxu0 }
 0x509   : > { %v6477_v47 = vadd.f32 %v6434_v50, %v14419_v8  ;;  %v14545_v20 = vadd.f32 %v9824_v29, %v6479_v0  ;;  %v14552_v43 = vpop.f32.mrf.mxu1 }
 0x50a   : > { %v9789_v24 = vpop.f32.mrf.mxu0 }
 0x50b   : > { %v6480_v41 = vadd.f32 %v9789_v24, %v14421_v3  ;;  %v14550_v34 = vadd.f32 %v6648_v42, %v6477_v47  ;;  %v14557_v48 = vpop.f32.mrf.mxu1 }
 0x50c   : > { %v6437_v55 = vpop.f32.mrf.mxu0 }
 0x50d   : > { %v6478_v5 = vadd.f32 %v6437_v55, %v14423_v49  ;;  %v14555_v14 = vadd.f32 %v9825_v19, %v6480_v41  ;;  %v14564_v59 = vpop.f32.mrf.mxu1 }
 0x50e   : > { %v9832_v12 = vpop.f32.mrf.mxu0 }
 0x50f   : > { %v14560_v8 = vadd.f32 %v9832_v12, %v14431_v35  ;;  %v14562_v16 = vadd.f32 %v6651_v15, %v6478_v5  ;;  %v14569_v22 = vpop.f32.mrf.mxu1 }
 0x510   : > { %v6760_v25 = vpop.f32.mrf.mxu0 }
 0x511   : > { %v14567_v3 = vadd.f32 %v6760_v25, %v14434_v38  ;;  %v14574_v37 = vpop.f32.mrf.mxu1 }
 0x512   : > { %v9833_v54 = vpop.f32.mrf.mxu0 }
 0x513   : > { %v14572_v49 = vadd.f32 %v9833_v54, %v14437_v30  ;;  %v14579_v61 = vpop.f32.mrf.mxu1 }
 0x514   : > { %v6763_v1 = vpop.f32.mrf.mxu0 }
 0x515   : > { %v14577_v35 = vadd.f32 %v6763_v1, %v14444_v21  ;;  %v14584_v42 = vpop.f32.mrf.mxu1 }
 0x516   : > { %v9836_v29 = vpop.f32.mrf.mxu0 }
 0x517   : > { %v14582_v32 = vadd.f32 %v9836_v29, %v14447_v56  ;;  %v14589_v10 = vpop.f32.mrf.mxu1 }
 0x518   : > { %v6776_v38 = vpop.f32.mrf.mxu0 }
 0x519   : > { %v14587_v45 = vadd.f32 %v6776_v38, %v14450_v31  ;;  %v14594_v9 = vpop.f32.mrf.mxu1 }
 0x51a   : > { %v9837_v30 = vpop.f32.mrf.mxu0 }
 0x51b   : > { %v14592_v19 = vadd.f32 %v9837_v30, %v14453_v57  ;;  %v14599_v52 = vpop.f32.mrf.mxu1 }
 0x51c   : > { %v6779_v21 = vpop.f32.mrf.mxu0 }
 0x51d   : > { %v14597_v39 = vadd.f32 %v6779_v21, %v14460_v36  ;;  %v14604_v0 = vpop.f32.mrf.mxu1 }
 0x51e   : > { %v9840_v56 = vpop.f32.mrf.mxu0 }
 0x51f   : > { %v14602_v15 = vadd.f32 %v9840_v56, %v14463_v26  ;;  %v14609_v47 = vpop.f32.mrf.mxu1 }
 0x520   : > { %v6792_v31 = vpop.f32.mrf.mxu0 }
 0x521   : > { %v14607_v50 = vadd.f32 %v6792_v31, %v14466_v11  ;;  %v14614_v41 = vpop.f32.mrf.mxu1 }
 0x522   : > { %v9841_v57 = vpop.f32.mrf.mxu0  ;;  %15729 = vst [vmem:[#allocation63_spill] sm:$0xff] %v14614_v41 }
 0x523   : > { %v14612_v24 = vadd.f32 %v9841_v57, %v14469_v7  ;;  %v14619_v5 = vpop.f32.mrf.mxu1 }
 0x524   : > { %v6795_v36 = vpop.f32.mrf.mxu0  ;;  %15730 = vst [vmem:[#allocation65_spill] sm:$0xff] %v14619_v5 }
 0x525   : > { %v14617_v55 = vadd.f32 %v6795_v36, %v14476_v33  ;;  %v14624_v25 = vpop.f32.mrf.mxu1 }
 0x526   : > { %v9844_v26 = vpop.f32.mrf.mxu0  ;;  %15731 = vst [vmem:[#allocation23_spill] sm:$0xff] %v14624_v25 }
 0x527   : > { %v14622_v12 = vadd.f32 %v9844_v26, %v14479_v51  ;;  %v14629_v1 = vpop.f32.mrf.mxu1 }
 0x528   : > { %v6808_v11 = vpop.f32.mrf.mxu0  ;;  %15732 = vst [vmem:[#allocation24_spill] sm:$0xff] %v14629_v1 }
 0x529   : > { %v14627_v54 = vadd.f32 %v6808_v11, %v14482_v44  ;;  %v14634_v38 = vpop.f32.mrf.mxu1 }
 0x52a   : > { %v9845_v7 = vpop.f32.mrf.mxu0  ;;  %15734 = vst [vmem:[#allocation42_spill] sm:$0xff] %v14634_v38 }
 0x52b   : > { %v14632_v29 = vadd.f32 %v9845_v7, %v14485_v2  ;;  %v14639_v21 = vpop.f32.mrf.mxu1 }
 0x52c   : > { %v6811_v33 = vpop.f32.mrf.mxu0  ;;  %15736 = vst [vmem:[#allocation26_spill] sm:$0xff] %v14639_v21 }
 0x52d   : > { %15733 = vst [vmem:[#allocation25_spill] sm:$0xff] %v14632_v29  ;;  %v14637_v30 = vadd.f32 %v6811_v33, %v14492_v63  ;;  %v14644_v31 = vpop.f32.mrf.mxu1 }
 0x52e   : > { %v9848_v51 = vpop.f32.mrf.mxu0  ;;  %15738 = vst [vmem:[#allocation36_spill] sm:$0xff] %v14644_v31 }
 0x52f   : > { %15735 = vst [vmem:[#allocation44_spill] sm:$0xff] %v14637_v30  ;;  %v14642_v56 = vadd.f32 %v9848_v51, %v14495_v40  ;;  %v14649_v36 = vpop.f32.mrf.mxu1 }
 0x530   : > { %v6824_v44 = vpop.f32.mrf.mxu0  ;;  %15740 = vst [vmem:[#allocation18_spill] sm:$0xff] %v14649_v36 }
 0x531   : > { %15737 = vst [vmem:[#allocation29_spill] sm:$0xff] %v14642_v56  ;;  %v14647_v57 = vadd.f32 %v6824_v44, %v14498_v62  ;;  %v14654_v11 = vpop.f32.mrf.mxu1 }
 0x532   : > { %v9849_v2 = vpop.f32.mrf.mxu0  ;;  %15742 = vst [vmem:[#allocation40_spill] sm:$0xff] %v14654_v11 }
 0x533   : > { %15739 = vst [vmem:[#allocation11_spill] sm:$0xff] %v14647_v57  ;;  %v14652_v26 = vadd.f32 %v9849_v2, %v14501_v17  ;;  %v14659_v33 = vpop.f32.mrf.mxu1 }
 0x534   : > { %v6827_v63 = vpop.f32.mrf.mxu0  ;;  %15744 = vst [vmem:[#allocation10_spill] sm:$0xff] %v14659_v33 }
 0x535   : > { %15741 = vst [vmem:[#allocation34_spill] sm:$0xff] %v14652_v26  ;;  %v14657_v7 = vadd.f32 %v6827_v63, %v14508_v28  ;;  %v14664_v44 = vpop.f32.mrf.mxu1 }
 0x536   : > { %v9852_v40 = vpop.f32.mrf.mxu0  ;;  %15746 = vst [vmem:[#allocation47_spill] sm:$0xff] %v14664_v44 }
 0x537   : > { %15743 = vst [vmem:[#allocation14_spill] sm:$0xff] %v14657_v7  ;;  %v14662_v51 = vadd.f32 %v9852_v40, %v14511_v4  ;;  %v14669_v2 = vpop.f32.mrf.mxu1 }
 0x538   : > { %v6840_v62 = vpop.f32.mrf.mxu0  ;;  %15748 = vst [vmem:[#allocation48_spill] sm:$0xff] %v14669_v2 }
 0x539   : > { %15745 = vst [vmem:[#allocation17_spill] sm:$0xff] %v14662_v51  ;;  %v14667_v36 = vadd.f32 %v6840_v62, %v14514_v6  ;;  %v14674_v63 = vpop.f32.mrf.mxu1 }
 0x53a   : > { %v9853_v17 = vpop.f32.mrf.mxu0  ;;  %15750 = vst [vmem:[#allocation70_spill] sm:$0xff] %v14674_v63 }
 0x53b   : > { %15747 = vst [vmem:[#allocation28_spill] sm:$0xff] %v14667_v36  ;;  %v14672_v11 = vadd.f32 %v9853_v17, %v14517_v53  ;;  %v14679_v40 = vpop.f32.mrf.mxu1 }
 0x53c   : > { %v6843_v28 = vpop.f32.mrf.mxu0  ;;  %15752 = vst [vmem:[#allocation74_spill] sm:$0xff] %v14679_v40 }
 0x53d   : > { %15749 = vst [vmem:[#allocation66_spill] sm:$0xff] %v14672_v11  ;;  %v14677_v33 = vadd.f32 %v6843_v28, %v14524_v46  ;;  %v14684_v62 = vpop.f32.mrf.mxu1 }
 0x53e   : > { %v9856_v4 = vpop.f32.mrf.mxu0  ;;  %15754 = vst [vmem:[#allocation31_spill] sm:$0xff] %v14684_v62 }
 0x53f   : > { %15751 = vst [vmem:[#allocation72_spill] sm:$0xff] %v14677_v33  ;;  %v14682_v44 = vadd.f32 %v9856_v4, %v14527_v58  ;;  %v14689_v17 = vpop.f32.mrf.mxu1 }
 0x540   : > { %v6856_v6 = vpop.f32.mrf.mxu0  ;;  %15756 = vst [vmem:[#allocation45_spill] sm:$0xff] %v14689_v17 }
 0x541   : > { %15753 = vst [vmem:[#allocation38_spill] sm:$0xff] %v14682_v44  ;;  %v14687_v2 = vadd.f32 %v6856_v6, %v14530_v23  ;;  %v14697_v40 = vpop.f32.mrf.mxu1 }
 0x542   : > { %v9857_v53 = vpop.f32.mrf.mxu0  ;;  %15759 = vst [vmem:[#allocation19_spill] sm:$0xff] %v14697_v40 }
 0x543   : > { %15755 = vst [vmem:[#allocation77_spill] sm:$0xff] %v14687_v2  ;;  %v14692_v63 = vadd.f32 %v9857_v53, %v14533_v18  ;;  %v14705_v6 = vpop.f32.mrf.mxu1 }
 0x544   : > { %v6859_v46 = vpop.f32.mrf.mxu0  ;;  %15762 = vst [vmem:[#allocation13_spill] sm:$0xff] %v14705_v6 }
 0x545   : > { %15757 = vst [vmem:[#allocation20_spill] sm:$0xff] %v14692_v63  ;;  %v14695_v28 = vadd.f32 %v6859_v46, %v14540_v60  ;;  %v9940_v63 = vpop.f32.mrf.mxu1 }
 0x546   : > { %v9860_v58 = vpop.f32.mrf.mxu0 }
 0x547   : > { %15758 = vst [vmem:[#allocation8_spill] sm:$0xff] %v14695_v28  ;;  %v14700_v4 = vadd.f32 %v9860_v58, %v14545_v20  ;;  %v7419_v28 = vpop.f32.mrf.mxu1 }
 0x548   : > { %v6872_v62 = vpop.f32.mrf.mxu0 }
 0x549   : > { %15760 = vst [vmem:[#allocation7_spill] sm:$0xff] %v14700_v4  ;;  %v14703_v23 = vadd.f32 %v6872_v62, %v14550_v34  ;;  %v14713_v4 = vpop.f32.mrf.mxu1 }
 0x54a   : > { %v9861_v17 = vpop.f32.mrf.mxu0 }
 0x54b   : > { %15761 = vst [vmem:[#allocation27_spill] sm:$0xff] %v14703_v23  ;;  %v14708_v18 = vadd.f32 %v9861_v17, %v14555_v14  ;;  %v14717_v6 = vpop.f32.mrf.mxu1 }
 0x54c   : > { %v6875_v53 = vpop.f32.mrf.mxu0 }
 0x54d   : > { %15763 = vst [vmem:[#allocation30_spill] sm:$0xff] %v14708_v18  ;;  %v14711_v60 = vadd.f32 %v6875_v53, %v14562_v16  ;;  %v14723_v17 = vpop.f32.mrf.mxu1 }
 0x54e   : > { %v9904_v46 = vpop.f32.mrf.mxu0 }
 0x54f   : > { %15764 = vst [vmem:[#allocation32_spill] sm:$0xff] %v14711_v60  ;;  %v14729_v60 = vpop.f32.mrf.mxu1 }
 0x550   : > { %v7195_v40 = vpop.f32.mrf.mxu0 }
 0x551   : > { %v14735_v44 = vpop.f32.mrf.mxu1 }
 0x552   : > { %v9905_v20 = vpop.f32.mrf.mxu0 }
 0x553   : > { %v14741_v36 = vpop.f32.mrf.mxu1 }
 0x554   : > { %v7198_v58 = vpop.f32.mrf.mxu0 }
 0x555   : > { %v14747_v21 = vpop.f32.mrf.mxu1 }
 0x556   : > { %v9908_v34 = vpop.f32.mrf.mxu0 }
 0x557   : > { %v14753_v26 = vpop.f32.mrf.mxu1 }
 0x558   : > { %v14715_v62 = vpop.f32.mrf.mxu0 }
 0x559   : > { %v14759_v25 = vpop.f32.mrf.mxu1 }
 0x55a   : > { %v14719_v23 = vpop.f32.mrf.mxu0 }
 0x55b   : > { %v14765_v30 = vpop.f32.mrf.mxu1 }
 0x55c   : > { %v14721_v14 = vpop.f32.mrf.mxu0 }
 0x55e   : > { %v14725_v16 = vpop.f32.mrf.mxu0 }
 0x560   : > { %v14727_v53 = vpop.f32.mrf.mxu0 }
 0x562   : > { %v14731_v18 = vpop.f32.mrf.mxu0 }
 0x564   : > { %v14733_v2 = vpop.f32.mrf.mxu0 }
 0x566   : > { %v14737_v33 = vpop.f32.mrf.mxu0 }
 0x568   : > { %v14739_v11 = vpop.f32.mrf.mxu0 }
 0x56a   : > { %v14743_v31 = vpop.f32.mrf.mxu0 }
 0x56b   : > { %15765 = vst [vmem:[#allocation67_spill] sm:$0xff] %v14743_v31 }
 0x56c   : > { %v14745_v51 = vpop.f32.mrf.mxu0 }
 0x56d   : > { %15766 = vst [vmem:[#allocation69_spill] sm:$0xff] %v14745_v51 }
 0x56e   : > { %v14749_v7 = vpop.f32.mrf.mxu0 }
 0x56f   : > { %15767 = vst [vmem:[#allocation81_spill] sm:$0xff] %v14749_v7  ;;  %v14771_v7 = vpop.f32.mrf.mxu1 }
 0x570   : > { %v14751_v38 = vpop.f32.mrf.mxu0  ;;  %15775 = vst [vmem:[#allocation75_spill] sm:$0xff] %v14771_v7 }
 0x571   : > { %15768 = vst [vmem:[#allocation82_spill] sm:$0xff] %v14751_v38 }
 0x572   : > { %v14755_v1 = vpop.f32.mrf.mxu0 }
 0x573   : > { %15769 = vst [vmem:[#allocation84_spill] sm:$0xff] %v14755_v1  ;;  %v14777_v1 = vpop.f32.mrf.mxu1 }
 0x574   : > { %v14757_v57 = vpop.f32.mrf.mxu0  ;;  %15778 = vst [vmem:[#allocation83_spill] sm:$0xff] %v14777_v1 }
 0x575   : > { %15770 = vst [vmem:[#allocation71_spill] sm:$0xff] %v14757_v57 }
 0x576   : > { %v14761_v56 = vpop.f32.mrf.mxu0 }
 0x577   : > { %15771 = vst [vmem:[#allocation73_spill] sm:$0xff] %v14761_v56  ;;  %v14783_v56 = vpop.f32.mrf.mxu1 }
 0x578   : > { %v14763_v5 = vpop.f32.mrf.mxu0  ;;  %15781 = vst [vmem:[#allocation50_spill] sm:$0xff] %v14783_v56 }
 0x579   : > { %15772 = vst [vmem:[#allocation85_spill] sm:$0xff] %v14763_v5 }
 0x57a   : > { %v14767_v51 = vpop.f32.mrf.mxu0 }
 0x57b   : > { %15773 = vst [vmem:[#allocation87_spill] sm:$0xff] %v14767_v51 }
 0x57c   : > { %v14769_v31 = vpop.f32.mrf.mxu0 }
 0x57d   : > { %15774 = vst [vmem:[#allocation88_spill] sm:$0xff] %v14769_v31  ;;  %v7110_v31 = vadd.f32 %v14542_v27, %v14560_v8  ;;  %v7109_v27 = vadd.f32 %v14557_v48, %v14577_v35  ;;  %v7112_v48 = vadd.f32 %v14569_v22, %v14587_v45  ;;  %v14818_v35 = vld [vmem:[%s15133_s9] ss:$0 sm:$0xff]  ;;  %v7115_v22 = vadd.f32 %v14574_v37, %v14592_v19 }
 0x57e   : > { %v14773_v38 = vpop.f32.mrf.mxu0 }
 0x57f   : > { %15776 = vst [vmem:[#allocation78_spill] sm:$0xff] %v14773_v38  ;;  %v7324_v7 = vadd.f32 %v9904_v46, %v7110_v31  ;;  %v14793_v38 = vpop.f32.mrf.mxu1 }
 0x580   : > { %v14775_v41 = vpop.f32.mrf.mxu0 }
 0x581   : > { %15777 = vst [vmem:[#allocation80_spill] sm:$0xff] %v14775_v41  ;;  %v7108_v41 = vadd.f32 %v14547_v13, %v14567_v3  ;;  %v14803_v8 = vpop.f32.mrf.mxu1  ;;  %v7548_v31 = vadd.f32 %v9940_v63, %v7324_v7  ;;  %v7114_v13 = vadd.f32 %v14564_v59, %v14582_v32 }
 0x582   : > { %v14779_v57 = vpop.f32.mrf.mxu0 }
 0x583   : > { %15779 = vst [vmem:[#allocation86_spill] sm:$0xff] %v14779_v57  ;;  %v7322_v57 = vadd.f32 %v7195_v40, %v7108_v41  ;;  %v14811_v41 = vld [vmem:[%s15132_s8] ss:$0 sm:$0xff]  ;;  %v7328_v40 = vadd.f32 %v9908_v34, %v7114_v13  ;;  %v14820_v32 = vpop.f32.mrf.mxu1 }
 0x584   : > { %v14781_v29 = vpop.f32.mrf.mxu0 }
 0x585   : > { %15780 = vst [vmem:[#allocation33_spill] sm:$0xff] %v14781_v29  ;;  %v7111_v29 = vadd.f32 %v14552_v43, %v14572_v49  ;;  %v7323_v43 = vadd.f32 %v7198_v58, %v7109_v27  ;;  %v7329_v27 = vadd.f32 %v14719_v23, %v7115_v22 }
 0x586   : > { %v14785_v5 = vpop.f32.mrf.mxu0 }
 0x587   : > { %15782 = vst [vmem:[#allocation21_spill] sm:$0xff] %v14785_v5  ;;  %v7325_v5 = vadd.f32 %v9905_v20, %v7111_v29  ;;  %v7546_v29 = vadd.f32 %v7419_v28, %v7322_v57  ;;  %v7326_v57 = vadd.f32 %v14715_v62, %v7112_v48  ;;  %v7547_v34 = vadd.f32 %v14717_v6, %v7323_v43 }
 0x588   : > { %v14789_v51 = vpop.f32.mrf.mxu0  ;;  %v7118_v6 = vadd.f32 %v14584_v42, %v14602_v15  ;;  %v7116_v42 = vadd.f32 %v14589_v10, %v14607_v50 }
 0x589   : > { %v7549_v46 = vadd.f32 %v14713_v4, %v7325_v5  ;;  %v7552_v5 = vadd.f32 %v14723_v17, %v7328_v40  ;;  %v14836_v4 = vpop.f32.mrf.mxu1  ;;  %v7550_v43 = vadd.f32 %v14729_v60, %v7326_v57  ;;  %v7553_v60 = vadd.f32 %v14735_v44, %v7329_v27 }
 0x58a   : > { %v14795_v1 = vpop.f32.mrf.mxu0 }
 0x58b   : > { %v14854_v40 = vpop.f32.mrf.mxu1 }
 0x58c   : > { %v14799_v56 = vpop.f32.mrf.mxu0 }
 0x58e   : > { %v9976_v3 = vpop.f32.mrf.mxu0 }
 0x58f   : > { %v7769_v49 = vadd.f32 %v9976_v3, %v7548_v31  ;;  %v7113_v31 = vadd.f32 %v14579_v61, %v14597_v39 }
 0x590   : > { %v7640_v59 = vpop.f32.mrf.mxu0 }
 0x591   : > { %v7808_v7 = vmul.f32 %v14811_v41, %v7769_v49  ;;  %v7767_v63 = vadd.f32 %v7640_v59, %v7546_v29  ;;  %v7327_v49 = vadd.f32 %v14721_v14, %v7113_v31  ;;  %v7332_v14 = vadd.f32 %v14725_v16, %v7118_v6 }
 0x592   : > { %v9977_v45 = vpop.f32.mrf.mxu0  ;;  %v7119_v16 = vadd.f32 %v14594_v9, %v14612_v24  ;;  %v14872_v24 = vpop.f32.mrf.mxu1 }
 0x593   : > { %v7847_v28 = vadd.f32 %v14818_v35, %v7808_v7  ;;  %v7806_v20 = vmul.f32 %v14811_v41, %v7767_v63  ;;  %v7770_v58 = vadd.f32 %v9977_v45, %v7549_v46  ;;  %v7330_v46 = vadd.f32 %v14727_v53, %v7116_v42 }
 0x594   : > { %v7643_v13 = vpop.f32.mrf.mxu0  ;;  %v7551_v50 = vadd.f32 %v14741_v36, %v7327_v49  ;;  %v7117_v53 = vadd.f32 %v14599_v52, %v14617_v55  ;;  %v7556_v9 = vadd.f32 %v14747_v21, %v7332_v14  ;;  %v15785_v14 = vld [vmem:[#allocation67_spill] sm:$0xff] }
 0x595   : > { %v7879_v62 = vmax.f32 %v7847_v28, 0.0  ;;  %v7845_v37 = vadd.f32 %v14818_v35, %v7806_v20  ;;  %v7809_v19 = vmul.f32 %v14811_v41, %v7770_v58  ;;  %v7768_v3 = vadd.f32 %v7643_v13, %v7547_v34 }
 0x596   : > { %v9980_v23 = vpop.f32.mrf.mxu0  ;;  %v7333_v28 = vadd.f32 %v14731_v18, %v7119_v16  ;;  %v7331_v31 = vadd.f32 %v14733_v2, %v7117_v53  ;;  %v7122_v18 = vadd.f32 %v14604_v0, %v14622_v12  ;;  %v7554_v55 = vadd.f32 %v14753_v26, %v7330_v46  ;;  %v14890_v12 = vpop.f32.mrf.mxu1  ;;  %v15792_v53 = vld [vmem:[#allocation83_spill] sm:$0xff] }
 0x597   : > { %7911 = vst.msk [vmem:[%s14844_s25 + $0x10] sm:$0xff] %vm2766_vm4, %v7879_v62  ;;  %v7877_v61 = vmax.f32 %v7845_v37, 0.0  ;;  %v7848_v39 = vadd.f32 %v14818_v35, %v7809_v19  ;;  %v7807_v17 = vmul.f32 %v14811_v41, %v7768_v3  ;;  %v7773_v29 = vadd.f32 %v9980_v23, %v7552_v5 }
 0x598   : > { %v7656_v15 = vpop.f32.mrf.mxu0  ;;  %v7336_v37 = vadd.f32 %v14737_v33, %v7122_v18  ;;  %v7120_v2 = vadd.f32 %v14609_v47, %v14627_v54  ;;  %v7557_v0 = vadd.f32 %v14759_v25, %v7333_v28  ;;  %v15783_v33 = vld [vmem:[#allocation25_spill] sm:$0xff]  ;;  %v7555_v54 = vadd.f32 %v14765_v30, %v7331_v31  ;;  %v15794_v18 = vld [vmem:[#allocation11_spill] sm:$0xff] }
 0x599   : > { %7909 = vst.msk [vmem:[%s14844_s25] sm:$0xff] %vm2766_vm4, %v7877_v61  ;;  %v7880_v48 = vmax.f32 %v7848_v39, 0.0  ;;  %v7846_v59 = vadd.f32 %v14818_v35, %v7807_v17  ;;  %v7812_v7 = vmul.f32 %v14811_v41, %v7773_v29  ;;  %v7771_v63 = vadd.f32 %v7656_v15, %v7550_v43  ;;  %v15784_v43 = vld [vmem:[#allocation63_spill] sm:$0xff]  ;;  %v15786_v15 = vld [vmem:[#allocation44_spill] sm:$0xff] }
 0x59a   : > { %v9981_v10 = vpop.f32.mrf.mxu0  ;;  %v7334_v23 = vadd.f32 %v14739_v11, %v7120_v2  ;;  %v7123_v61 = vadd.f32 %v15784_v43, %v15783_v33 }
 0x59b   : > { %7912 = vst.msk [vmem:[%s14844_s25 + $0x18] sm:$0xff] %vm2766_vm4, %v7880_v48  ;;  %v7878_v44 = vmax.f32 %v7846_v59, 0.0  ;;  %v7851_v57 = vadd.f32 %v14818_v35, %v7812_v7  ;;  %v7810_v22 = vmul.f32 %v14811_v41, %v7771_v63  ;;  %v7774_v45 = vadd.f32 %v9981_v10, %v7553_v60  ;;  %v15787_v60 = vld [vmem:[#allocation65_spill] sm:$0xff]  ;;  %v15788_v59 = vld [vmem:[#allocation75_spill] sm:$0xff]  ;;  %v14908_v63 = vpop.f32.mrf.mxu1 }
 0x59c   : > { %v7659_v20 = vpop.f32.mrf.mxu0  ;;  %v7337_v42 = vadd.f32 %v15785_v14, %v7123_v61  ;;  %v7121_v11 = vadd.f32 %v15787_v60, %v15786_v15  ;;  %v7560_v7 = vadd.f32 %v15788_v59, %v7336_v37  ;;  %v15802_v14 = vld [vmem:[#allocation26_spill] sm:$0xff] }
 0x59d   : > { %7910 = vst.msk [vmem:[%s14844_s25 + $0x8] sm:$0xff] %vm2766_vm4, %v7878_v44  ;;  %v7883_v36 = vmax.f32 %v7851_v57, 0.0  ;;  %v7849_v58 = vadd.f32 %v14818_v35, %v7810_v22  ;;  %v7813_v34 = vmul.f32 %v14811_v41, %v7774_v45  ;;  %v7772_v27 = vadd.f32 %v7659_v20, %v7551_v50  ;;  %v15789_v50 = vld [vmem:[#allocation69_spill] sm:$0xff]  ;;  %v15791_v22 = vld [vmem:[#allocation23_spill] sm:$0xff] }
 0x59e   : > { %v9984_v52 = vpop.f32.mrf.mxu0  ;;  %v7335_v44 = vadd.f32 %v15789_v50, %v7121_v11  ;;  %v15790_v57 = vld [vmem:[#allocation29_spill] sm:$0xff]  ;;  %v7558_v20 = vadd.f32 %v15792_v53, %v7334_v23 }
 0x59f   : > { %7915 = vst.msk [vmem:[%s14844_s25 + $0x30] sm:$0xff] %vm2766_vm4, %v7883_v36  ;;  %v7881_v21 = vmax.f32 %v7849_v58, 0.0  ;;  %v7852_v13 = vadd.f32 %v14818_v35, %v7813_v34  ;;  %v7811_v5 = vmul.f32 %v14811_v41, %v7772_v27  ;;  %v7777_v62 = vadd.f32 %v9984_v52, %v7556_v9  ;;  %v15793_v27 = vld [vmem:[#allocation81_spill] sm:$0xff]  ;;  %v15795_v52 = vld [vmem:[#allocation24_spill] sm:$0xff] }
 0x5a0   : > { %v7672_v19 = vpop.f32.mrf.mxu0  ;;  %v7126_v45 = vadd.f32 %v15791_v22, %v15790_v57  ;;  %v7559_v43 = vadd.f32 %v14793_v38, %v7335_v44  ;;  %v15806_v53 = vld [vmem:[#allocation73_spill] sm:$0xff] }
 0x5a1   : > { %7913 = vst.msk [vmem:[%s14844_s25 + $0x20] sm:$0xff] %vm2766_vm4, %v7881_v21  ;;  %v7884_v26 = vmax.f32 %v7852_v13, 0.0  ;;  %v7850_v3 = vadd.f32 %v14818_v35, %v7811_v5  ;;  %v7816_v49 = vmul.f32 %v14811_v41, %v7777_v62  ;;  %v7775_v6 = vadd.f32 %v7672_v19, %v7554_v55  ;;  %v15796_v13 = vld [vmem:[#allocation50_spill] sm:$0xff]  ;;  %v14926_v62 = vpop.f32.mrf.mxu1 }
 0x5a2   : > { %v9985_v47 = vpop.f32.mrf.mxu0  ;;  %v7340_v31 = vadd.f32 %v15793_v27, %v7126_v45  ;;  %v7124_v55 = vadd.f32 %v15795_v52, %v15794_v18  ;;  %v7561_v5 = vadd.f32 %v15796_v13, %v7337_v42 }
 0x5a3   : > { %7916 = vst.msk [vmem:[%s14844_s25 + $0x38] sm:$0xff] %vm2766_vm4, %v7884_v26  ;;  %v7882_v25 = vmax.f32 %v7850_v3, 0.0  ;;  %v7855_v39 = vadd.f32 %v14818_v35, %v7816_v49  ;;  %v7814_v17 = vmul.f32 %v14811_v41, %v7775_v6  ;;  %v7778_v29 = vadd.f32 %v9985_v47, %v7557_v0  ;;  %v15797_v26 = vld [vmem:[#allocation82_spill] sm:$0xff]  ;;  %v14944_v11 = vpop.f32.mrf.mxu1 }
 0x5a4   : > { %v7675_v48 = vpop.f32.mrf.mxu0  ;;  %v7338_v3 = vadd.f32 %v15797_v26, %v7124_v55  ;;  %v15798_v49 = vld [vmem:[#allocation34_spill] sm:$0xff]  ;;  %v7564_v60 = vadd.f32 %v14803_v8, %v7340_v31 }
 0x5a5   : > { %7914 = vst.msk [vmem:[%s14844_s25 + $0x28] sm:$0xff] %vm2766_vm4, %v7882_v25  ;;  %v7887_v30 = vmax.f32 %v7855_v39, 0.0  ;;  %v7853_v46 = vadd.f32 %v14818_v35, %v7814_v17  ;;  %v7817_v16 = vmul.f32 %v14811_v41, %v7778_v29  ;;  %v7776_v10 = vadd.f32 %v7675_v48, %v7555_v54  ;;  %v15799_v6 = vld [vmem:[#allocation42_spill] sm:$0xff]  ;;  %v15800_v39 = vld [vmem:[#allocation84_spill] sm:$0xff]  ;;  %v14962_v31 = vpop.f32.mrf.mxu1 }
 0x5a6   : > { %v9988_v28 = vpop.f32.mrf.mxu0  ;;  %v7127_v23 = vadd.f32 %v15799_v6, %v15798_v49  ;;  %v15801_v29 = vld [vmem:[#allocation14_spill] sm:$0xff]  ;;  %v7562_v57 = vadd.f32 %v14820_v32, %v7338_v3  ;;  %v15812_v6 = vld [vmem:[#allocation87_spill] sm:$0xff] }
 0x5a7   : > { %7919 = vst.msk [vmem:[%s14844_s25 + $0x50] sm:$0xff] %vm2766_vm4, %v7887_v30  ;;  %v7885_v9 = vmax.f32 %v7853_v46, 0.0  ;;  %v7856_v36 = vadd.f32 %v14818_v35, %v7817_v16  ;;  %v7815_v58 = vmul.f32 %v14811_v41, %v7776_v10  ;;  %v7781_v34 = vadd.f32 %v9988_v28, %v7560_v7  ;;  %v15803_v30 = vld [vmem:[#allocation71_spill] sm:$0xff]  ;;  %v15804_v16 = vld [vmem:[#allocation17_spill] sm:$0xff]  ;;  %v15805_v10 = vld [vmem:[#allocation36_spill] sm:$0xff] }
 0x5a8   : > { %v7688_v21 = vpop.f32.mrf.mxu0  ;;  %v7341_v17 = vadd.f32 %v15800_v39, %v7127_v23  ;;  %v7125_v42 = vadd.f32 %v15802_v14, %v15801_v29  ;;  %v7130_v50 = vadd.f32 %v15805_v10, %v15804_v16  ;;  %v15815_v14 = vld [vmem:[#allocation88_spill] sm:$0xff]  ;;  %v15818_v16 = vld [vmem:[#allocation78_spill] sm:$0xff] }
 0x5a9   : > { %7917 = vst.msk [vmem:[%s14844_s25 + $0x40] sm:$0xff] %vm2766_vm4, %v7885_v9  ;;  %v7888_v37 = vmax.f32 %v7856_v36, 0.0  ;;  %v7854_v2 = vadd.f32 %v14818_v35, %v7815_v58  ;;  %v7820_v19 = vmul.f32 %v14811_v41, %v7781_v34  ;;  %v7779_v0 = vadd.f32 %v7688_v21, %v7558_v20  ;;  %v15807_v9 = vld [vmem:[#allocation28_spill] sm:$0xff]  ;;  %v15808_v36 = vld [vmem:[#allocation18_spill] sm:$0xff]  ;;  %v15809_v21 = vld [vmem:[#allocation85_spill] sm:$0xff] }
 0x5aa   : > { %v9989_v33 = vpop.f32.mrf.mxu0  ;;  %v7339_v46 = vadd.f32 %v15803_v30, %v7125_v42  ;;  %v7344_v20 = vadd.f32 %v15806_v53, %v7130_v50  ;;  %v7128_v58 = vadd.f32 %v15808_v36, %v15807_v9  ;;  %v7565_v27 = vadd.f32 %v14836_v4, %v7341_v17  ;;  %v15819_v50 = vld [vmem:[#allocation77_spill] sm:$0xff]  ;;  %v15821_v9 = vld [vmem:[#allocation80_spill] sm:$0xff] }
 0x5ab   : > { %7920 = vst.msk [vmem:[%s14844_s25 + $0x58] sm:$0xff] %vm2766_vm4, %v7888_v37  ;;  %v7886_v61 = vmax.f32 %v7854_v2, 0.0  ;;  %v7859_v47 = vadd.f32 %v14818_v35, %v7820_v19  ;;  %v7818_v54 = vmul.f32 %v14811_v41, %v7779_v0  ;;  %v7782_v25 = vadd.f32 %v9989_v33, %v7561_v5  ;;  %v15810_v5 = vld [vmem:[#allocation66_spill] sm:$0xff]  ;;  %v15811_v37 = vld [vmem:[#allocation40_spill] sm:$0xff] }
 0x5ac   : > { %v7691_v15 = vpop.f32.mrf.mxu0  ;;  %v7342_v13 = vadd.f32 %v15809_v21, %v7128_v58  ;;  %v7131_v2 = vadd.f32 %v15811_v37, %v15810_v5  ;;  %v7563_v0 = vadd.f32 %v14854_v40, %v7339_v46  ;;  %v15813_v33 = vld [vmem:[#allocation72_spill] sm:$0xff]  ;;  %v15824_v5 = vld [vmem:[#allocation86_spill] sm:$0xff] }
 0x5ad   : > { %7918 = vst.msk [vmem:[%s14844_s25 + $0x48] sm:$0xff] %vm2766_vm4, %v7886_v61  ;;  %v7891_v38 = vmax.f32 %v7859_v47, 0.0  ;;  %v7857_v48 = vadd.f32 %v14818_v35, %v7818_v54  ;;  %v7821_v59 = vmul.f32 %v14811_v41, %v7782_v25  ;;  %v7780_v7 = vadd.f32 %v7691_v15, %v7559_v43  ;;  %v15814_v43 = vld [vmem:[#allocation10_spill] sm:$0xff]  ;;  %v9965_v25 = vpop.f32.mrf.mxu1  ;;  %v15822_v58 = vld [vmem:[#allocation20_spill] sm:$0xff] }
 0x5ae   : > { %v9992_v44 = vpop.f32.mrf.mxu0  ;;  %v7345_v23 = vadd.f32 %v15812_v6, %v7131_v2  ;;  %v7129_v61 = vadd.f32 %v15814_v43, %v15813_v33  ;;  %v7568_v54 = vadd.f32 %v14872_v24, %v7344_v20  ;;  %v15816_v15 = vld [vmem:[#allocation38_spill] sm:$0xff]  ;;  %v15825_v2 = vld [vmem:[#allocation8_spill] sm:$0xff]  ;;  %v15828_v43 = vld [vmem:[#allocation7_spill] sm:$0xff] }
 0x5af   : > { %7923 = vst.msk [vmem:[%s14844_s25 + $0x70] sm:$0xff] %vm2766_vm4, %v7891_v38  ;;  %v7889_v8 = vmax.f32 %v7857_v48, 0.0  ;;  %v7860_v22 = vadd.f32 %v14818_v35, %v7821_v59  ;;  %v7819_v45 = vmul.f32 %v14811_v41, %v7780_v7  ;;  %v7785_v28 = vadd.f32 %v9992_v44, %v7564_v60  ;;  %v15817_v60 = vld [vmem:[#allocation47_spill] sm:$0xff]  ;;  %v15820_v44 = vld [vmem:[#allocation48_spill] sm:$0xff] }
 0x5b0   : > { %v7704_v34 = vpop.f32.mrf.mxu0  ;;  %v7343_v42 = vadd.f32 %v15815_v14, %v7129_v61  ;;  %v7134_v38 = vadd.f32 %v15817_v60, %v15816_v15  ;;  %v7566_v59 = vadd.f32 %v14890_v12, %v7342_v13  ;;  %v15829_v61 = vld [vmem:[#allocation31_spill] sm:$0xff] }
 0x5b1   : > { %7921 = vst.msk [vmem:[%s14844_s25 + $0x60] sm:$0xff] %vm2766_vm4, %v7889_v8  ;;  %v7892_v32 = vmax.f32 %v7860_v22, 0.0  ;;  %v7858_v18 = vadd.f32 %v14818_v35, %v7819_v45  ;;  %v7824_v52 = vmul.f32 %v14811_v41, %v7785_v28  ;;  %v7783_v55 = vadd.f32 %v7704_v34, %v7562_v57  ;;  %v7518_v45 = vpop.f32.mrf.mxu1  ;;  %v15823_v34 = vld [vmem:[#allocation70_spill] sm:$0xff]  ;;  %v15831_v60 = vld [vmem:[#allocation27_spill] sm:$0xff] }
 0x5b2   : > { %v9993_v19 = vpop.f32.mrf.mxu0  ;;  %v7348_v10 = vadd.f32 %v15818_v16, %v7134_v38  ;;  %v7132_v57 = vadd.f32 %v15820_v44, %v15819_v50  ;;  %v7569_v22 = vadd.f32 %v14908_v63, %v7345_v23  ;;  %v15827_v23 = vld [vmem:[#allocation33_spill] sm:$0xff]  ;;  %v15834_v50 = vld [vmem:[#allocation19_spill] sm:$0xff] }
 0x5b3   : > { %7924 = vst.msk [vmem:[%s14844_s25 + $0x78] sm:$0xff] %vm2766_vm4, %v7892_v32  ;;  %v7890_v4 = vmax.f32 %v7858_v18, 0.0  ;;  %v7863_v26 = vadd.f32 %v14818_v35, %v7824_v52  ;;  %v7822_v3 = vmul.f32 %v14811_v41, %v7783_v55  ;;  %v7786_v49 = vadd.f32 %v9993_v19, %v7565_v27  ;;  %v9968_v52 = vpop.f32.mrf.mxu1  ;;  %v15826_v19 = vld [vmem:[#allocation74_spill] sm:$0xff]  ;;  %v15832_v38 = vld [vmem:[#allocation45_spill] sm:$0xff] }
 0x5b4   : > { %v7707_v47 = vpop.f32.mrf.mxu0  ;;  %v7346_v36 = vadd.f32 %v15821_v9, %v7132_v57  ;;  %v7135_v27 = vadd.f32 %v15823_v34, %v15822_v58  ;;  %v7567_v18 = vadd.f32 %v14926_v62, %v7343_v42  ;;  %v15830_v42 = vld [vmem:[#allocation21_spill] sm:$0xff] }
 0x5b5   : > { %7922 = vst.msk [vmem:[%s14844_s25 + $0x68] sm:$0xff] %vm2766_vm4, %v7890_v4  ;;  %v7895_v40 = vmax.f32 %v7863_v26, 0.0  ;;  %v7861_v39 = vadd.f32 %v14818_v35, %v7822_v3  ;;  %v7825_v17 = vmul.f32 %v14811_v41, %v7786_v49  ;;  %v7784_v29 = vadd.f32 %v7707_v47, %v7563_v0 }
 0x5b6   : > { %v9996_v48 = vpop.f32.mrf.mxu0  ;;  %v7349_v37 = vadd.f32 %v15824_v5, %v7135_v27  ;;  %v7133_v0 = vadd.f32 %v15826_v19, %v15825_v2  ;;  %v7572_v26 = vadd.f32 %v14944_v11, %v7348_v10  ;;  %v7138_v47 = vadd.f32 %v15829_v61, %v15828_v43  ;;  %v15833_v10 = vld [vmem:[#allocation30_spill] sm:$0xff] }
 0x5b7   : > { %7927 = vst.msk [vmem:[%s14844_s25 + $0x90] sm:$0xff] %vm2766_vm4, %v7895_v40  ;;  %v7893_v24 = vmax.f32 %v7861_v39, 0.0  ;;  %v7864_v7 = vadd.f32 %v14818_v35, %v7825_v17  ;;  %v7823_v30 = vmul.f32 %v14811_v41, %v7784_v29  ;;  %v7789_v46 = vadd.f32 %v9996_v48, %v7568_v54  ;;  %v7531_v39 = vpop.f32.mrf.mxu1 }
 0x5b8   : > { %v7720_v8 = vpop.f32.mrf.mxu0  ;;  %v7347_v33 = vadd.f32 %v15827_v23, %v7133_v0  ;;  %v7570_v40 = vadd.f32 %v14962_v31, %v7346_v36  ;;  %v7352_v15 = vadd.f32 %v15830_v42, %v7138_v47  ;;  %v7136_v48 = vadd.f32 %v15832_v38, %v15831_v60  ;;  %v15835_v36 = vld [vmem:[#allocation32_spill] sm:$0xff] }
 0x5b9   : > { %7925 = vst.msk [vmem:[%s14844_s25 + $0x80] sm:$0xff] %vm2766_vm4, %v7893_v24  ;;  %v7896_v12 = vmax.f32 %v7864_v7, 0.0  ;;  %v7862_v28 = vadd.f32 %v14818_v35, %v7823_v30  ;;  %v7828_v53 = vmul.f32 %v14811_v41, %v7789_v46  ;;  %v7787_v20 = vadd.f32 %v7720_v8, %v7566_v59 }
 0x5ba   : > { %v9997_v32 = vpop.f32.mrf.mxu0  ;;  %v7573_v24 = vadd.f32 %v9965_v25, %v7349_v37  ;;  %v7350_v16 = vadd.f32 %v14789_v51, %v7136_v48  ;;  %v7139_v44 = vadd.f32 %v15834_v50, %v15833_v10  ;;  %v7571_v8 = vadd.f32 %v7518_v45, %v7347_v33  ;;  %v15836_v51 = vld [vmem:[#allocation13_spill] sm:$0xff] }
 0x5bb   : > { %7928 = vst.msk [vmem:[%s14844_s25 + $0x98] sm:$0xff] %vm2766_vm4, %v7896_v12  ;;  %v7894_v63 = vmax.f32 %v7862_v28, 0.0  ;;  %v7867_v55 = vadd.f32 %v14818_v35, %v7828_v53  ;;  %v7826_v21 = vmul.f32 %v14811_v41, %v7787_v20  ;;  %v7790_v13 = vadd.f32 %v9997_v32, %v7569_v22  ;;  %v9969_v22 = vpop.f32.mrf.mxu1 }
 0x5bc   : > { %v7723_v4 = vpop.f32.mrf.mxu0  ;;  %v7576_v20 = vadd.f32 %v9968_v52, %v7352_v15  ;;  %v7353_v9 = vadd.f32 %v14795_v1, %v7139_v44  ;;  %v7137_v58 = vadd.f32 %v15836_v51, %v15835_v36 }
 0x5bd   : > { %7926 = vst.msk [vmem:[%s14844_s25 + $0x88] sm:$0xff] %vm2766_vm4, %v7894_v63  ;;  %v7899_v62 = vmax.f32 %v7867_v55, 0.0  ;;  %v7865_v3 = vadd.f32 %v14818_v35, %v7826_v21  ;;  %v7829_v49 = vmul.f32 %v14811_v41, %v7790_v13  ;;  %v7788_v6 = vadd.f32 %v7723_v4, %v7567_v18  ;;  %v7534_v52 = vpop.f32.mrf.mxu1 }
 0x5be   : > { %v10000_v54 = vpop.f32.mrf.mxu0  ;;  %v7574_v63 = vadd.f32 %v7531_v39, %v7350_v16  ;;  %v7351_v55 = vadd.f32 %v14799_v56, %v7137_v58  ;;  %v7577_v2 = vadd.f32 %v9969_v22, %v7353_v9 }
 0x5bf   : > { %7931 = vst.msk [vmem:[%s14844_s25 + $0xb0] sm:$0xff] %vm2766_vm4, %v7899_v62  ;;  %v7897_v11 = vmax.f32 %v7865_v3, 0.0  ;;  %v7868_v17 = vadd.f32 %v14818_v35, %v7829_v49  ;;  %v7827_v29 = vmul.f32 %v14811_v41, %v7788_v6  ;;  %v7793_v14 = vadd.f32 %v10000_v54, %v7572_v26 }
 0x5c0   : > { %v7736_v59 = vpop.f32.mrf.mxu0  ;;  %v7575_v62 = vadd.f32 %v7534_v52, %v7351_v55 }
 0x5c1   : > { %7929 = vst.msk [vmem:[%s14844_s25 + $0xa0] sm:$0xff] %vm2766_vm4, %v7897_v11  ;;  %v7900_v31 = vmax.f32 %v7868_v17, 0.0  ;;  %v7866_v7 = vadd.f32 %v14818_v35, %v7827_v29  ;;  %v7832_v30 = vmul.f32 %v14811_v41, %v7793_v14  ;;  %v7791_v46 = vadd.f32 %v7736_v59, %v7570_v40 }
 0x5c2   : > { %v10001_v57 = vpop.f32.mrf.mxu0 }
 0x5c3   : > { %7932 = vst.msk [vmem:[%s14844_s25 + $0xb8] sm:$0xff] %vm2766_vm4, %v7900_v31  ;;  %v7898_v25 = vmax.f32 %v7866_v7, 0.0  ;;  %v7871_v12 = vadd.f32 %v14818_v35, %v7832_v30  ;;  %v7830_v28 = vmul.f32 %v14811_v41, %v7791_v46  ;;  %v7794_v53 = vadd.f32 %v10001_v57, %v7573_v24 }
 0x5c4   : > { %v7739_v34 = vpop.f32.mrf.mxu0 }
 0x5c5   : > { %7930 = vst.msk [vmem:[%s14844_s25 + $0xa8] sm:$0xff] %vm2766_vm4, %v7898_v25  ;;  %v7903_v45 = vmax.f32 %v7871_v12, 0.0  ;;  %v7869_v27 = vadd.f32 %v14818_v35, %v7830_v28  ;;  %v7833_v32 = vmul.f32 %v14811_v41, %v7794_v53  ;;  %v7792_v18 = vadd.f32 %v7739_v34, %v7571_v8 }
 0x5c6   : > { %v10004_v21 = vpop.f32.mrf.mxu0 }
 0x5c7   : > { %7935 = vst.msk [vmem:[%s14844_s25 + $0xd0] sm:$0xff] %vm2766_vm4, %v7903_v45  ;;  %v7901_v1 = vmax.f32 %v7869_v27, 0.0  ;;  %v7872_v13 = vadd.f32 %v14818_v35, %v7833_v32  ;;  %v7831_v5 = vmul.f32 %v14811_v41, %v7792_v18  ;;  %v7797_v37 = vadd.f32 %v10004_v21, %v7576_v20 }
 0x5c8   : > { %v7752_v19 = vpop.f32.mrf.mxu0 }
 0x5c9   : > { %7933 = vst.msk [vmem:[%s14844_s25 + $0xc0] sm:$0xff] %vm2766_vm4, %v7901_v1  ;;  %v7904_v0 = vmax.f32 %v7872_v13, 0.0  ;;  %v7870_v4 = vadd.f32 %v14818_v35, %v7831_v5  ;;  %v7836_v56 = vmul.f32 %v14811_v41, %v7797_v37  ;;  %v7795_v26 = vadd.f32 %v7752_v19, %v7574_v63 }
 0x5ca   : > { %v10005_v3 = vpop.f32.mrf.mxu0 }
 0x5cb   : > { %7936 = vst.msk [vmem:[%s14844_s25 + $0xd8] sm:$0xff] %vm2766_vm4, %v7904_v0  ;;  %v7902_v49 = vmax.f32 %v7870_v4, 0.0  ;;  %v7875_v6 = vadd.f32 %v14818_v35, %v7836_v56  ;;  %v7834_v23 = vmul.f32 %v14811_v41, %v7795_v26  ;;  %v7798_v33 = vadd.f32 %v10005_v3, %v7577_v2 }
 0x5cc   : > { %v7755_v43 = vpop.f32.mrf.mxu0 }
 0x5cd   : > { %7934 = vst.msk [vmem:[%s14844_s25 + $0xc8] sm:$0xff] %vm2766_vm4, %v7902_v49  ;;  %v7907_v61 = vmax.f32 %v7875_v6, 0.0  ;;  %v7873_v47 = vadd.f32 %v14818_v35, %v7834_v23  ;;  %v7837_v54 = vmul.f32 %v14811_v41, %v7798_v33  ;;  %v7796_v40 = vadd.f32 %v7755_v43, %v7575_v62 }
 0x5cf   : > { %7939 = vst.msk [vmem:[%s14844_s25 + $0xf0] sm:$0xff] %vm2766_vm4, %v7907_v61  ;;  %v7905_v39 = vmax.f32 %v7873_v47, 0.0  ;;  %v7876_v11 = vadd.f32 %v14818_v35, %v7837_v54  ;;  %v7835_v17 = vmul.f32 %v14811_v41, %v7796_v40 }
 0x5d1   : > { %7937 = vst.msk [vmem:[%s14844_s25 + $0xe0] sm:$0xff] %vm2766_vm4, %v7905_v39  ;;  %v7908_v29 = vmax.f32 %v7876_v11, 0.0  ;;  %v7874_v14 = vadd.f32 %v14818_v35, %v7835_v17 }
 0x5d3   : > { %7940 = vst.msk [vmem:[%s14844_s25 + $0xf8] sm:$0xff] %vm2766_vm4, %v7908_v29  ;;  %v7906_v41 = vmax.f32 %v7874_v14, 0.0 }
 0x5d5   : > { %7938 = vst.msk [vmem:[%s14844_s25 + $0xe8] sm:$0xff] %vm2766_vm4, %v7906_v41 }
 0x5d6   : > { %10110 = shalt.err (!%p10107_p3)
}
 0x5d7   : > { %s10111_s29 = scalar_lea.hbm %s15074_s30, 4096  ;;  %s10115_s28 = scalar_lea.hbm %s15134_s10, 8192 }
 0x5d8   : > { %p10112_p4 = scmp.ne.s32.totalorder %s15074_s30, %s10111_s29  ;;  %p10116_p9 = scmp.lt.s32.totalorder %s15074_s30, %s15134_s10 }
 0x5d9   : > { %p10117_p10 = scmp.lt.s32.totalorder %s10115_s28, %s10111_s29 }
 0x5da   : > { %p10113_p7 = pnand %p10112_p4, %p10256_p5 }
 0x5db   : > { %p10118_p11 = por %p10117_p10, %p10116_p9 }
 0x5dc   : > { %p10114_p8 = pneg %p10113_p7 }
 0x5de   : > { %p10119_p12 = pnand %p10118_p11, %p10114_p8 }
 0x5e0   : > { %10122 = shalt.err (!%p10119_p12)
}
 0x5e1   : > { %s10161_s11 = smov 128   ;;  %s10162_s18 = smov 8  }
 0x5e2   : > { %10019 = dma.vmem_to_hbm [thread:$0]  (%p10256_p5), %s15076_s27, 4096, %s15074_s30, %s15084_s17, %s10161_s11, %s10161_s11, %s10162_s18  }
 0x5e3 PF: > { %p10025_p13 = scmp.ge.s32.totalorder %s10157_s16, 2  ;;  %s7970_s20 = sand.u32 1, %s10145_s13  }
 0x5e4   : > { %s7971_s29 = scalar_lea.sflag [#allocation4], %s7970_s20 }
 0x5e5   : > { %p10022_p0 = pnand %p10025_p13, %p10260_p6 }
 0x5e7   : > { %p10023_p1 = pneg %p10022_p0 }
 0x5e9   : > { %10140 = dma.done.wait (%p10023_p1), %s7971_s29, 4096  }
 0x5ea   : > { %10142 = vsyncadd (%p10023_p1), %s7971_s29, 4294963200  ;;  %p20_p2 = scmp.ge.s32.totalorder %s10243_s19, 4   ;;  %s15837_s13 = smov %s10149_s14 }
 0x5eb   : > { %s15838_s14 = smov %s10153_s15  ;;  %s15839_s15 = smov %s10254_s22 }
 0x5ec   : > { %s15840_s16 = smov %s10243_s19  ;;  %22 = sbr.rel (!%p20_p2) target bundleno = 3 (0x3), region = 120 }
 0x5f1   :  { %7976 = vsyncpa [#allocation4], 1 }
 0x5f2   :  { %7978 = vsyncpa [#allocation4 + $0x1], 1 }

</bundles_post_ra>
